<compile_context>
chip_gen: v7x
topology: tpu7x:2x2x1
jax: 0.10.0
libtpu: 0.0.40
codegen_flags: <defaults>
</compile_context>

<pallas_src>
import functools

import jax
import jax.numpy as jnp
from jax.experimental import pallas as pl
from jax.experimental.pallas import tpu as pltpu


CPAD = 128          # output-channel padding -> lane-dense (128) stores everywhere
_BM_MAX = 512       # max rows (output pixels) per grid step

_VMEM_SPEC = pl.BlockSpec(memory_space=pltpu.MemorySpace.VMEM)


def _round_up(x, m):
    return (x + m - 1) // m * m


# ----------------------------------------------------------------------------
# Pallas kernels
# ----------------------------------------------------------------------------
def conv_dual_kernel(taps_ref, w_ref, b_ref, scale_ref, shift_ref, raw_ref, act_ref):
    """conv (single K-packed matmul, shortcut already folded into K) + bias -> raw;
    relu(raw*scale+shift) -> act (fused BN+ReLU epilogue for the consumer)."""
    acc = jnp.dot(taps_ref[...], w_ref[...],
                  preferred_element_type=jnp.float32) + b_ref[...]
    raw_ref[...] = acc.astype(raw_ref.dtype)
    act_ref[...] = jnp.maximum(acc * scale_ref[...] + shift_ref[...], 0.0).astype(act_ref.dtype)


def conv_res_dual_kernel(taps_ref, res_ref, w_ref, b_ref, scale_ref, shift_ref,
                         raw_ref, act_ref):
    """conv + bias + identity residual -> raw ; bn+relu epilogue -> act."""
    acc = (jnp.dot(taps_ref[...], w_ref[...], preferred_element_type=jnp.float32)
           + b_ref[...] + res_ref[...].astype(jnp.float32))
    raw_ref[...] = acc.astype(raw_ref.dtype)
    act_ref[...] = jnp.maximum(acc * scale_ref[...] + shift_ref[...], 0.0).astype(act_ref.dtype)


def conv_act_kernel(taps_ref, w_ref, scale_ref, shift_ref, act_ref):
    """conv with bias pre-folded into the BN shift; only the activation is needed."""
    acc = jnp.dot(taps_ref[...], w_ref[...], preferred_element_type=jnp.float32)
    act_ref[...] = jnp.maximum(acc * scale_ref[...] + shift_ref[...], 0.0).astype(act_ref.dtype)


def head_kernel(pm_ref, x_ref, w_ref, b_ref, o_ref):
    """Global average pool as an f32 matmul (rides the MXU) fused with the final linear."""
    x32 = x_ref[...].astype(jnp.float32)
    pooled = jnp.dot(pm_ref[...], x32, preferred_element_type=jnp.float32)
    o_ref[...] = jnp.dot(pooled, w_ref[...], preferred_element_type=jnp.float32) + b_ref[...]


# ----------------------------------------------------------------------------
# pallas_call wrapper: 1-D grid over output rows (pixels)
# ----------------------------------------------------------------------------
def _conv_call(kernel, blocked, broadcast, num_out):
    """'blocked' args are tiled along rows; 'broadcast' args are passed whole.

    bm is a multiple of 8 sublanes, the grid has >= 2 steps (DMA/compute overlap +
    v7x megacore sharding) and rows are zero-padded to a multiple of bm so the
    block constraint holds for any M.
    """
    M = blocked[0].shape[0]
    bm = min(_BM_MAX, _round_up(-(-M // 2), 8))
    m_pad = _round_up(M, bm)
    if m_pad != M:
        blocked = [jnp.pad(a, ((0, m_pad - M), (0, 0))) for a in blocked]
    grid = (m_pad // bm,)

    def row_spec(a):
        return pl.BlockSpec((bm, a.shape[1]), lambda i: (i, 0))

    def full_spec(a):
        zeros = (0,) * a.ndim
        return pl.BlockSpec(a.shape, lambda i: zeros)

    in_specs = [row_spec(a) for a in blocked] + [full_spec(a) for a in broadcast]
    out_spec = pl.BlockSpec((bm, CPAD), lambda i: (i, 0))
    out_shape = jax.ShapeDtypeStruct((m_pad, CPAD), jnp.bfloat16)
    if num_out == 1:
        outs_shape, outs_spec = out_shape, out_spec
    else:
        outs_shape = tuple(out_shape for _ in range(num_out))
        outs_spec = tuple(out_spec for _ in range(num_out))

    res = pl.pallas_call(
        kernel,
        grid=grid,
        in_specs=in_specs,
        out_specs=outs_spec,
        out_shape=outs_shape,
        compiler_params=pltpu.CompilerParams(dimension_semantics=("parallel",)),
    )(*blocked, *broadcast)

    if num_out == 1:
        return res[:M] if m_pad != M else res
    return tuple(r[:M] for r in res) if m_pad != M else res


def _build_taps(x, cin, stride, extra=None, extra_cin=None):
    """im2col with REAL channels only: pack the 9 taps (and optionally the 1x1
    shortcut input) into the K dim, then pad K to a multiple of 128 lanes."""
    N, H, W, _ = x.shape
    Ho = (H - 1) // stride + 1
    Wo = (W - 1) // stride + 1
    M = N * Ho * Wo

    xr = x[..., :cin]
    xp = jnp.pad(xr, ((0, 0), (1, 1), (1, 1), (0, 0)))
    slabs = [xp[:, dy::stride, dx::stride, :][:, :Ho, :Wo, :]
             for dy in range(3) for dx in range(3)]
    if extra is not None:                              # fused 1x1 shortcut input
        slabs.append(extra[:, ::stride, ::stride, :extra_cin])
    taps = jnp.concatenate(slabs, axis=-1).reshape(M, -1)

    k_real = taps.shape[1]
    k_pad = _round_up(k_real, 128)
    if k_pad != k_real:
        taps = jnp.pad(taps, ((0, 0), (0, k_pad - k_real)))
    return taps, (N, Ho, Wo)


def _head(x_act, p, num_classes):
    """avg_pool2d over the full (8x8) spatial extent + Linear, fused, all in f32."""
    N, H, W, C = x_act.shape
    HW = H * W
    pool_mat = jnp.kron(jnp.eye(N, dtype=jnp.float32),
                        jnp.ones((1, HW), jnp.float32)) / HW
    out = pl.pallas_call(
        head_kernel,
        out_shape=jax.ShapeDtypeStruct((N, CPAD), jnp.float32),
        in_specs=[_VMEM_SPEC, _VMEM_SPEC, _VMEM_SPEC, _VMEM_SPEC],
        out_specs=_VMEM_SPEC,
    )(pool_mat, x_act.reshape(N * HW, C), p["w"], p["b"])
    return out[:, :num_classes]


# ----------------------------------------------------------------------------
# Parameters (K packed to real channels, N padded to CPAD, BN folded, bf16 weights)
# ----------------------------------------------------------------------------
def _pad_row(v):
    return jnp.zeros((1, CPAD), jnp.float32).at[0, :v.shape[0]].set(v)


def _pack_conv_w(w9, extra_w=None):
    """w9: (9, cin, cout) f32 taps-major weights; extra_w: (cin_sc, cout) shortcut
    weights stacked under them.  Returns bf16 (Kpad, CPAD), K padded to mult of 128."""
    _, cin, cout = w9.shape
    w = w9.reshape(9 * cin, cout)
    if extra_w is not None:
        w = jnp.concatenate([w, extra_w], axis=0)
    k_real = w.shape[0]
    k_pad = _round_up(k_real, 128)
    wp = jnp.zeros((k_pad, CPAD), jnp.float32).at[:k_real, :cout].set(w)
    return wp.astype(jnp.bfloat16)


def _rand_conv3x3(key, cin, cout):
    kw, kb = jax.random.split(key)
    w = jax.random.normal(kw, (9, cin, cout), jnp.float32) / jnp.sqrt(9.0 * cin)
    b = 0.01 * jax.random.normal(kb, (cout,), jnp.float32)
    return w, b


def _rand_conv1x1(key, cin, cout):
    kw, kb = jax.random.split(key)
    w = jax.random.normal(kw, (cin, cout), jnp.float32) / jnp.sqrt(float(cin))
    b = 0.01 * jax.random.normal(kb, (cout,), jnp.float32)
    return w, b


def _bn_scale_shift(key, c, eps=1e-5):
    """Eval-mode BatchNorm folded to per-channel scale/shift."""
    k1, k2, k3, k4 = jax.random.split(key, 4)
    gamma = 1.0 + 0.1 * jax.random.normal(k1, (c,), jnp.float32)
    beta = 0.1 * jax.random.normal(k2, (c,), jnp.float32)
    mean = 0.1 * jax.random.normal(k3, (c,), jnp.float32)
    var = 1.0 + 0.1 * jax.random.uniform(k4, (c,), jnp.float32)
    scale = gamma * jax.lax.rsqrt(var + eps)
    shift = beta - mean * scale
    return scale, shift


def _wide_basic_params(key, in_planes, planes, stride):
    ks = jax.random.split(key, 5)
    s1, t1 = _bn_scale_shift(ks[0], in_planes)
    w1, b1 = _rand_conv3x3(ks[1], in_planes, planes)
    s2, t2 = _bn_scale_shift(ks[2], planes)
    w2, b2 = _rand_conv3x3(ks[3], planes, planes)

    p = {
        "bn1": {"scale": _pad_row(s1), "shift": _pad_row(t1)},
        "conv1": {"w": _pack_conv_w(w1)},
        # conv1 bias folded into bn2: relu(s2*(conv+b1)+t2) = relu(s2*conv + (t2+s2*b1))
        "bn2f": {"scale": _pad_row(s2), "shift": _pad_row(t2 + s2 * b1)},
    }
    if stride != 1 or in_planes != planes:
        wsc, bsc = _rand_conv1x1(ks[4], in_planes, planes)
        # 1x1 shortcut fused into conv2's K dim; biases combined.
        p["conv2"] = {"w": _pack_conv_w(w2, extra_w=wsc), "b": _pad_row(b2 + bsc)}
    else:
        p["conv2"] = {"w": _pack_conv_w(w2), "b": _pad_row(b2)}
    return p


def init_wide_resnet(key, depth=10, widen_factor=1, num_classes=10):
    assert (depth - 4) % 6 == 0, "Wide-resnet depth should be 6n+4"
    n = (depth - 4) // 6
    k = widen_factor
    stages = [16, 16 * k, 32 * k, 64 * k]

    keys = jax.random.split(key, 6)
    w0, b0 = _rand_conv3x3(keys[0], 3, stages[0])
    params = {"conv1": {"w": _pack_conv_w(w0), "b": _pad_row(b0)}}

    blocks, cfg = [], []
    in_planes = stages[0]
    for li, (planes, stride) in enumerate(zip(stages[1:], (1, 2, 2)), start=1):
        bkeys = jax.random.split(keys[li], n)
        ss = [stride] + [1] * (n - 1)
        for bk, s in zip(bkeys, ss):
            blocks.append(_wide_basic_params(bk, in_planes, planes, s))
            cfg.append((in_planes, planes, s))
            in_planes = planes
    params["blocks"] = blocks

    sF, tF = _bn_scale_shift(keys[4], stages[3])
    params["bn_final"] = {"scale": _pad_row(sF), "shift": _pad_row(tF)}

    klw, klb = jax.random.split(keys[5])
    w = (jax.random.normal(klw, (stages[3], num_classes), jnp.float32)
         / jnp.sqrt(float(stages[3])))
    wp = jnp.zeros((CPAD, CPAD), jnp.float32).at[:stages[3], :num_classes].set(w)
    b = 0.01 * jax.random.normal(klb, (num_classes,), jnp.float32)
    params["linear"] = {"w": wp, "b": _pad_row(b)}     # kept f32 for the f32 head
    return params, tuple(cfg), num_classes


# ----------------------------------------------------------------------------
# Forward
# ----------------------------------------------------------------------------
def _wide_basic(x_raw, x_act, bp, c, out_bn):
    """wide_basic block.  x_act = relu(bn1(x_raw)) was produced by the previous
    kernel's epilogue.  out_bn = the BN applied to this block's residual sum
    (bn1 of the next block, or bn_final)."""
    in_planes, planes, stride = c
    # TODO(synk): nn.Dropout omitted (inference/eval semantics -> identity).

    # conv1 (3x3, stride 1): act-only, conv bias pre-folded into bn2 shift.
    taps, shp = _build_taps(x_act, in_planes, 1)
    h = _conv_call(conv_act_kernel, [taps],
                   [bp["conv1"]["w"], bp["bn2f"]["scale"], bp["bn2f"]["shift"]], 1)
    h = h.reshape(*shp, CPAD)

    # conv2 (3x3, stride s) + residual, BN+ReLU epilogue for the next consumer.
    if stride != 1 or in_planes != planes:
        # 1x1 shortcut conv fused into the same matmul (extra K columns).
        taps2, shp2 = _build_taps(h, planes, stride, extra=x_raw, extra_cin=in_planes)
        raw, act = _conv_call(conv_dual_kernel, [taps2],
                              [bp["conv2"]["w"], bp["conv2"]["b"],
                               out_bn["scale"], out_bn["shift"]], 2)
    else:
        taps2, shp2 = _build_taps(h, planes, stride)
        res = x_raw.reshape(-1, CPAD)
        raw, act = _conv_call(conv_res_dual_kernel, [taps2, res],
                              [bp["conv2"]["w"], bp["conv2"]["b"],
                               out_bn["scale"], out_bn["shift"]], 2)
    return raw.reshape(*shp2, CPAD), act.reshape(*shp2, CPAD)


def wide_resnet_forward(params, x_nchw, cfg, num_classes):
    """x_nchw: (N, 3, H, W) float32, PyTorch layout.  Returns (N, num_classes) float32."""
    # TODO(synk): do_noisy_mixup / mixup branches are not implemented (standard mode only).
    x = jnp.transpose(x_nchw, (0, 2, 3, 1)).astype(jnp.bfloat16)      # NCHW -> NHWC (3 real ch)

    blocks = params["blocks"]
    # BN applied to each produced residual-sum: bn1 of the consuming block, bn_final at the end.
    post_bn = [bp["bn1"] for bp in blocks] + [params["bn_final"]]

    taps, shp = _build_taps(x, 3, 1)
    raw, act = _conv_call(conv_dual_kernel, [taps],
                          [params["conv1"]["w"], params["conv1"]["b"],
                           post_bn[0]["scale"], post_bn[0]["shift"]], 2)
    raw = raw.reshape(*shp, CPAD)
    act = act.reshape(*shp, CPAD)

    for i, (bp, c) in enumerate(zip(blocks, cfg)):
        raw, act = _wide_basic(raw, act, bp, c, post_bn[i + 1])

    # act == relu(bn_final(raw)) at 8x8 spatial -> avg_pool2d(8) + flatten + linear
    return _head(act, params["linear"], num_classes)


# ----------------------------------------------------------------------------
if __name__ == "__main__":
    key = jax.random.PRNGKey(0)
    kx, kp = jax.random.split(key)

    # Wide-ResNet-10x1 on CIFAR-sized input (32x32 so avg_pool2d(8) matches).
    params, cfg, num_classes = init_wide_resnet(kp, depth=10, widen_factor=1,
                                                num_classes=10)
    x = jax.random.normal(kx, (2, 3, 32, 32), jnp.float32)  # NCHW, like PyTorch

    fwd = jax.jit(functools.partial(wide_resnet_forward, cfg=cfg,
                                    num_classes=num_classes))
    logits = fwd(params, x)
    jax.block_until_ready(logits)

    assert logits.shape == (2, 10), logits.shape
    assert bool(jnp.all(jnp.isfinite(logits)))
    print("KERNEL_OK")
</pallas_src>

<mosaic_0001>
module attributes {stable_mosaic.version = 11 : i64} {
  func.func @conv_dual_kernel(%arg0: i32, %arg1: memref<512x128xbf16, #tpu.memory_space<vmem>>, %arg2: memref<128x128xbf16, #tpu.memory_space<vmem>>, %arg3: memref<1x128xf32, #tpu.memory_space<vmem>>, %arg4: memref<1x128xf32, #tpu.memory_space<vmem>>, %arg5: memref<1x128xf32, #tpu.memory_space<vmem>>, %arg6: memref<512x128xbf16, #tpu.memory_space<vmem>>, %arg7: memref<512x128xbf16, #tpu.memory_space<vmem>>) attributes {dimension_semantics = [#tpu.dimension_semantics<parallel>], iteration_bounds = array<i64: 4>, scalar_prefetch = 0 : i64, scratch_operands = 0 : i64, tpu.core_type = #tpu.core_type<tc>, window_params = [{transform_indices = @transform_0, window_bounds = array<i64: 512, 128>}, {pipeline_mode = #tpu.pipeline_mode<synchronous>, transform_indices = @transform_1, window_bounds = array<i64: 128, 128>}, {pipeline_mode = #tpu.pipeline_mode<synchronous>, transform_indices = @transform_2, window_bounds = array<i64: 1, 128>}, {pipeline_mode = #tpu.pipeline_mode<synchronous>, transform_indices = @transform_3, window_bounds = array<i64: 1, 128>}, {pipeline_mode = #tpu.pipeline_mode<synchronous>, transform_indices = @transform_4, window_bounds = array<i64: 1, 128>}, {transform_indices = @transform_5, window_bounds = array<i64: 512, 128>}, {transform_indices = @transform_6, window_bounds = array<i64: 512, 128>}]} {
    %c0 = arith.constant 0 : index
    %c0_0 = arith.constant 0 : index
    %0 = vector.load %arg1[%c0, %c0_0] : memref<512x128xbf16, #tpu.memory_space<vmem>>, vector<512x128xbf16>
    %c0_1 = arith.constant 0 : index
    %c0_2 = arith.constant 0 : index
    %1 = vector.load %arg2[%c0_1, %c0_2] : memref<128x128xbf16, #tpu.memory_space<vmem>>, vector<128x128xbf16>
    %cst = arith.constant dense<0.000000e+00> : vector<512x128xf32>
    %2 = tpu.matmul %0, %1, %cst {dimension_numbers = #tpu.dot_dimension_numbers<[1], [0], [0], [1], [0, 0, 1, 1], [], []>} : vector<512x128xbf16>, vector<128x128xbf16>, vector<512x128xf32> -> vector<512x128xf32>
    %c0_3 = arith.constant 0 : index
    %c0_4 = arith.constant 0 : index
    %3 = vector.load %arg3[%c0_3, %c0_4] : memref<1x128xf32, #tpu.memory_space<vmem>>, vector<1x128xf32>
    %4 = vector.broadcast %3 : vector<1x128xf32> to vector<512x128xf32>
    %5 = arith.addf %2, %4 : vector<512x128xf32>
    %6 = arith.truncf %5 : vector<512x128xf32> to vector<512x128xbf16>
    %c0_5 = arith.constant 0 : index
    %c0_6 = arith.constant 0 : index
    %7 = vector.load %arg6[%c0_5, %c0_6] : memref<512x128xbf16, #tpu.memory_space<vmem>>, vector<512x128xbf16>
    tpu.vector_store %arg6[%c0_5, %c0_6], %6 {strides = array<i32>} : memref<512x128xbf16, #tpu.memory_space<vmem>>, vector<512x128xbf16>,
    %c0_7 = arith.constant 0 : index
    %c0_8 = arith.constant 0 : index
    %8 = vector.load %arg4[%c0_7, %c0_8] : memref<1x128xf32, #tpu.memory_space<vmem>>, vector<1x128xf32>
    %9 = vector.broadcast %8 : vector<1x128xf32> to vector<512x128xf32>
    %10 = arith.mulf %5, %9 : vector<512x128xf32>
    %c0_9 = arith.constant 0 : index
    %c0_10 = arith.constant 0 : index
    %11 = vector.load %arg5[%c0_9, %c0_10] : memref<1x128xf32, #tpu.memory_space<vmem>>, vector<1x128xf32>
    %12 = vector.broadcast %11 : vector<1x128xf32> to vector<512x128xf32>
    %13 = arith.addf %10, %12 : vector<512x128xf32>
    %cst_11 = arith.constant 0.000000e+00 : f32
    %14 = vector.broadcast %cst_11 : f32 to vector<512x128xf32>
    %15 = arith.maximumf %13, %14 : vector<512x128xf32>
    %16 = arith.truncf %15 : vector<512x128xf32> to vector<512x128xbf16>
    %c0_12 = arith.constant 0 : index
    %c0_13 = arith.constant 0 : index
    %17 = vector.load %arg7[%c0_12, %c0_13] : memref<512x128xbf16, #tpu.memory_space<vmem>>, vector<512x128xbf16>
    tpu.vector_store %arg7[%c0_12, %c0_13], %16 {strides = array<i32>} : memref<512x128xbf16, #tpu.memory_space<vmem>>, vector<512x128xbf16>,
    return
  }
  func.func @transform_0(%arg0: i32) -> (i32, i32) {
    %c0_i32 = arith.constant 0 : i32
    %c0_i32_0 = arith.constant 0 : i32
    return %arg0, %c0_i32 : i32, i32
  }
  func.func @transform_1(%arg0: i32) -> (i32, i32) {
    %c0_i32 = arith.constant 0 : i32
    %c0_i32_0 = arith.constant 0 : i32
    %c0_i32_1 = arith.constant 0 : i32
    return %c0_i32, %c0_i32_0 : i32, i32
  }
  func.func @transform_2(%arg0: i32) -> (i32, i32) {
    %c0_i32 = arith.constant 0 : i32
    %c0_i32_0 = arith.constant 0 : i32
    %c0_i32_1 = arith.constant 0 : i32
    return %c0_i32, %c0_i32_0 : i32, i32
  }
  func.func @transform_3(%arg0: i32) -> (i32, i32) {
    %c0_i32 = arith.constant 0 : i32
    %c0_i32_0 = arith.constant 0 : i32
    %c0_i32_1 = arith.constant 0 : i32
    return %c0_i32, %c0_i32_0 : i32, i32
  }
  func.func @transform_4(%arg0: i32) -> (i32, i32) {
    %c0_i32 = arith.constant 0 : i32
    %c0_i32_0 = arith.constant 0 : i32
    %c0_i32_1 = arith.constant 0 : i32
    return %c0_i32, %c0_i32_0 : i32, i32
  }
  func.func @transform_5(%arg0: i32) -> (i32, i32) {
    %c0_i32 = arith.constant 0 : i32
    %c0_i32_0 = arith.constant 0 : i32
    return %arg0, %c0_i32 : i32, i32
  }
  func.func @transform_6(%arg0: i32) -> (i32, i32) {
    %c0_i32 = arith.constant 0 : i32
    %c0_i32_0 = arith.constant 0 : i32
    return %arg0, %c0_i32 : i32, i32
  }
}

module attributes {stable_mosaic.version = 11 : i64} {
  func.func @conv_act_kernel(%arg0: i32, %arg1: memref<512x256xbf16, #tpu.memory_space<vmem>>, %arg2: memref<256x128xbf16, #tpu.memory_space<vmem>>, %arg3: memref<1x128xf32, #tpu.memory_space<vmem>>, %arg4: memref<1x128xf32, #tpu.memory_space<vmem>>, %arg5: memref<512x128xbf16, #tpu.memory_space<vmem>>) attributes {dimension_semantics = [#tpu.dimension_semantics<parallel>], iteration_bounds = array<i64: 4>, scalar_prefetch = 0 : i64, scratch_operands = 0 : i64, tpu.core_type = #tpu.core_type<tc>, window_params = [{transform_indices = @transform_0, window_bounds = array<i64: 512, 256>}, {pipeline_mode = #tpu.pipeline_mode<synchronous>, transform_indices = @transform_1, window_bounds = array<i64: 256, 128>}, {pipeline_mode = #tpu.pipeline_mode<synchronous>, transform_indices = @transform_2, window_bounds = array<i64: 1, 128>}, {pipeline_mode = #tpu.pipeline_mode<synchronous>, transform_indices = @transform_3, window_bounds = array<i64: 1, 128>}, {transform_indices = @transform_4, window_bounds = array<i64: 512, 128>}]} {
    %c0 = arith.constant 0 : index
    %c0_0 = arith.constant 0 : index
    %0 = vector.load %arg1[%c0, %c0_0] : memref<512x256xbf16, #tpu.memory_space<vmem>>, vector<512x256xbf16>
    %c0_1 = arith.constant 0 : index
    %c0_2 = arith.constant 0 : index
    %1 = vector.load %arg2[%c0_1, %c0_2] : memref<256x128xbf16, #tpu.memory_space<vmem>>, vector<256x128xbf16>
    %cst = arith.constant dense<0.000000e+00> : vector<512x128xf32>
    %2 = tpu.matmul %0, %1, %cst {dimension_numbers = #tpu.dot_dimension_numbers<[1], [0], [0], [1], [0, 0, 1, 1], [], []>} : vector<512x256xbf16>, vector<256x128xbf16>, vector<512x128xf32> -> vector<512x128xf32>
    %c0_3 = arith.constant 0 : index
    %c0_4 = arith.constant 0 : index
    %3 = vector.load %arg3[%c0_3, %c0_4] : memref<1x128xf32, #tpu.memory_space<vmem>>, vector<1x128xf32>
    %4 = vector.broadcast %3 : vector<1x128xf32> to vector<512x128xf32>
    %5 = arith.mulf %2, %4 : vector<512x128xf32>
    %c0_5 = arith.constant 0 : index
    %c0_6 = arith.constant 0 : index
    %6 = vector.load %arg4[%c0_5, %c0_6] : memref<1x128xf32, #tpu.memory_space<vmem>>, vector<1x128xf32>
    %7 = vector.broadcast %6 : vector<1x128xf32> to vector<512x128xf32>
    %8 = arith.addf %5, %7 : vector<512x128xf32>
    %cst_7 = arith.constant 0.000000e+00 : f32
    %9 = vector.broadcast %cst_7 : f32 to vector<512x128xf32>
    %10 = arith.maximumf %8, %9 : vector<512x128xf32>
    %11 = arith.truncf %10 : vector<512x128xf32> to vector<512x128xbf16>
    %c0_8 = arith.constant 0 : index
    %c0_9 = arith.constant 0 : index
    %12 = vector.load %arg5[%c0_8, %c0_9] : memref<512x128xbf16, #tpu.memory_space<vmem>>, vector<512x128xbf16>
    tpu.vector_store %arg5[%c0_8, %c0_9], %11 {strides = array<i32>} : memref<512x128xbf16, #tpu.memory_space<vmem>>, vector<512x128xbf16>,
    return
  }
  func.func @transform_0(%arg0: i32) -> (i32, i32) {
    %c0_i32 = arith.constant 0 : i32
    %c0_i32_0 = arith.constant 0 : i32
    return %arg0, %c0_i32 : i32, i32
  }
  func.func @transform_1(%arg0: i32) -> (i32, i32) {
    %c0_i32 = arith.constant 0 : i32
    %c0_i32_0 = arith.constant 0 : i32
    %c0_i32_1 = arith.constant 0 : i32
    return %c0_i32, %c0_i32_0 : i32, i32
  }
  func.func @transform_2(%arg0: i32) -> (i32, i32) {
    %c0_i32 = arith.constant 0 : i32
    %c0_i32_0 = arith.constant 0 : i32
    %c0_i32_1 = arith.constant 0 : i32
    return %c0_i32, %c0_i32_0 : i32, i32
  }
  func.func @transform_3(%arg0: i32) -> (i32, i32) {
    %c0_i32 = arith.constant 0 : i32
    %c0_i32_0 = arith.constant 0 : i32
    %c0_i32_1 = arith.constant 0 : i32
    return %c0_i32, %c0_i32_0 : i32, i32
  }
  func.func @transform_4(%arg0: i32) -> (i32, i32) {
    %c0_i32 = arith.constant 0 : i32
    %c0_i32_0 = arith.constant 0 : i32
    return %arg0, %c0_i32 : i32, i32
  }
}

module attributes {stable_mosaic.version = 11 : i64} {
  func.func @conv_res_dual_kernel(%arg0: i32, %arg1: memref<512x256xbf16, #tpu.memory_space<vmem>>, %arg2: memref<512x128xbf16, #tpu.memory_space<vmem>>, %arg3: memref<256x128xbf16, #tpu.memory_space<vmem>>, %arg4: memref<1x128xf32, #tpu.memory_space<vmem>>, %arg5: memref<1x128xf32, #tpu.memory_space<vmem>>, %arg6: memref<1x128xf32, #tpu.memory_space<vmem>>, %arg7: memref<512x128xbf16, #tpu.memory_space<vmem>>, %arg8: memref<512x128xbf16, #tpu.memory_space<vmem>>) attributes {dimension_semantics = [#tpu.dimension_semantics<parallel>], iteration_bounds = array<i64: 4>, scalar_prefetch = 0 : i64, scratch_operands = 0 : i64, tpu.core_type = #tpu.core_type<tc>, window_params = [{transform_indices = @transform_0, window_bounds = array<i64: 512, 256>}, {transform_indices = @transform_1, window_bounds = array<i64: 512, 128>}, {pipeline_mode = #tpu.pipeline_mode<synchronous>, transform_indices = @transform_2, window_bounds = array<i64: 256, 128>}, {pipeline_mode = #tpu.pipeline_mode<synchronous>, transform_indices = @transform_3, window_bounds = array<i64: 1, 128>}, {pipeline_mode = #tpu.pipeline_mode<synchronous>, transform_indices = @transform_4, window_bounds = array<i64: 1, 128>}, {pipeline_mode = #tpu.pipeline_mode<synchronous>, transform_indices = @transform_5, window_bounds = array<i64: 1, 128>}, {transform_indices = @transform_6, window_bounds = array<i64: 512, 128>}, {transform_indices = @transform_7, window_bounds = array<i64: 512, 128>}]} {
    %c0 = arith.constant 0 : index
    %c0_0 = arith.constant 0 : index
    %0 = vector.load %arg1[%c0, %c0_0] : memref<512x256xbf16, #tpu.memory_space<vmem>>, vector<512x256xbf16>
    %c0_1 = arith.constant 0 : index
    %c0_2 = arith.constant 0 : index
    %1 = vector.load %arg3[%c0_1, %c0_2] : memref<256x128xbf16, #tpu.memory_space<vmem>>, vector<256x128xbf16>
    %cst = arith.constant dense<0.000000e+00> : vector<512x128xf32>
    %2 = tpu.matmul %0, %1, %cst {dimension_numbers = #tpu.dot_dimension_numbers<[1], [0], [0], [1], [0, 0, 1, 1], [], []>} : vector<512x256xbf16>, vector<256x128xbf16>, vector<512x128xf32> -> vector<512x128xf32>
    %c0_3 = arith.constant 0 : index
    %c0_4 = arith.constant 0 : index
    %3 = vector.load %arg4[%c0_3, %c0_4] : memref<1x128xf32, #tpu.memory_space<vmem>>, vector<1x128xf32>
    %4 = vector.broadcast %3 : vector<1x128xf32> to vector<512x128xf32>
    %5 = arith.addf %2, %4 : vector<512x128xf32>
    %c0_5 = arith.constant 0 : index
    %c0_6 = arith.constant 0 : index
    %6 = vector.load %arg2[%c0_5, %c0_6] : memref<512x128xbf16, #tpu.memory_space<vmem>>, vector<512x128xbf16>
    %7 = arith.extf %6 : vector<512x128xbf16> to vector<512x128xf32>
    %8 = arith.addf %5, %7 : vector<512x128xf32>
    %9 = arith.truncf %8 : vector<512x128xf32> to vector<512x128xbf16>
    %c0_7 = arith.constant 0 : index
    %c0_8 = arith.constant 0 : index
    %10 = vector.load %arg7[%c0_7, %c0_8] : memref<512x128xbf16, #tpu.memory_space<vmem>>, vector<512x128xbf16>
    tpu.vector_store %arg7[%c0_7, %c0_8], %9 {strides = array<i32>} : memref<512x128xbf16, #tpu.memory_space<vmem>>, vector<512x128xbf16>,
    %c0_9 = arith.constant 0 : index
    %c0_10 = arith.constant 0 : index
    %11 = vector.load %arg5[%c0_9, %c0_10] : memref<1x128xf32, #tpu.memory_space<vmem>>, vector<1x128xf32>
    %12 = vector.broadcast %11 : vector<1x128xf32> to vector<512x128xf32>
    %13 = arith.mulf %8, %12 : vector<512x128xf32>
    %c0_11 = arith.constant 0 : index
    %c0_12 = arith.constant 0 : index
    %14 = vector.load %arg6[%c0_11, %c0_12] : memref<1x128xf32, #tpu.memory_space<vmem>>, vector<1x128xf32>
    %15 = vector.broadcast %14 : vector<1x128xf32> to vector<512x128xf32>
    %16 = arith.addf %13, %15 : vector<512x128xf32>
    %cst_13 = arith.constant 0.000000e+00 : f32
    %17 = vector.broadcast %cst_13 : f32 to vector<512x128xf32>
    %18 = arith.maximumf %16, %17 : vector<512x128xf32>
    %19 = arith.truncf %18 : vector<512x128xf32> to vector<512x128xbf16>
    %c0_14 = arith.constant 0 : index
    %c0_15 = arith.constant 0 : index
    %20 = vector.load %arg8[%c0_14, %c0_15] : memref<512x128xbf16, #tpu.memory_space<vmem>>, vector<512x128xbf16>
    tpu.vector_store %arg8[%c0_14, %c0_15], %19 {strides = array<i32>} : memref<512x128xbf16, #tpu.memory_space<vmem>>, vector<512x128xbf16>,
    return
  }
  func.func @transform_0(%arg0: i32) -> (i32, i32) {
    %c0_i32 = arith.constant 0 : i32
    %c0_i32_0 = arith.constant 0 : i32
    return %arg0, %c0_i32 : i32, i32
  }
  func.func @transform_1(%arg0: i32) -> (i32, i32) {
    %c0_i32 = arith.constant 0 : i32
    %c0_i32_0 = arith.constant 0 : i32
    return %arg0, %c0_i32 : i32, i32
  }
  func.func @transform_2(%arg0: i32) -> (i32, i32) {
    %c0_i32 = arith.constant 0 : i32
    %c0_i32_0 = arith.constant 0 : i32
    %c0_i32_1 = arith.constant 0 : i32
    return %c0_i32, %c0_i32_0 : i32, i32
  }
  func.func @transform_3(%arg0: i32) -> (i32, i32) {
    %c0_i32 = arith.constant 0 : i32
    %c0_i32_0 = arith.constant 0 : i32
    %c0_i32_1 = arith.constant 0 : i32
    return %c0_i32, %c0_i32_0 : i32, i32
  }
  func.func @transform_4(%arg0: i32) -> (i32, i32) {
    %c0_i32 = arith.constant 0 : i32
    %c0_i32_0 = arith.constant 0 : i32
    %c0_i32_1 = arith.constant 0 : i32
    return %c0_i32, %c0_i32_0 : i32, i32
  }
  func.func @transform_5(%arg0: i32) -> (i32, i32) {
    %c0_i32 = arith.constant 0 : i32
    %c0_i32_0 = arith.constant 0 : i32
    %c0_i32_1 = arith.constant 0 : i32
    return %c0_i32, %c0_i32_0 : i32, i32
  }
  func.func @transform_6(%arg0: i32) -> (i32, i32) {
    %c0_i32 = arith.constant 0 : i32
    %c0_i32_0 = arith.constant 0 : i32
    return %arg0, %c0_i32 : i32, i32
  }
  func.func @transform_7(%arg0: i32) -> (i32, i32) {
    %c0_i32 = arith.constant 0 : i32
    %c0_i32_0 = arith.constant 0 : i32
    return %arg0, %c0_i32 : i32, i32
  }
}

module attributes {stable_mosaic.version = 11 : i64} {
  func.func @conv_dual_kernel(%arg0: i32, %arg1: memref<256x384xbf16, #tpu.memory_space<vmem>>, %arg2: memref<384x128xbf16, #tpu.memory_space<vmem>>, %arg3: memref<1x128xf32, #tpu.memory_space<vmem>>, %arg4: memref<1x128xf32, #tpu.memory_space<vmem>>, %arg5: memref<1x128xf32, #tpu.memory_space<vmem>>, %arg6: memref<256x128xbf16, #tpu.memory_space<vmem>>, %arg7: memref<256x128xbf16, #tpu.memory_space<vmem>>) attributes {dimension_semantics = [#tpu.dimension_semantics<parallel>], iteration_bounds = array<i64: 2>, scalar_prefetch = 0 : i64, scratch_operands = 0 : i64, tpu.core_type = #tpu.core_type<tc>, window_params = [{transform_indices = @transform_0, window_bounds = array<i64: 256, 384>}, {pipeline_mode = #tpu.pipeline_mode<synchronous>, transform_indices = @transform_1, window_bounds = array<i64: 384, 128>}, {pipeline_mode = #tpu.pipeline_mode<synchronous>, transform_indices = @transform_2, window_bounds = array<i64: 1, 128>}, {pipeline_mode = #tpu.pipeline_mode<synchronous>, transform_indices = @transform_3, window_bounds = array<i64: 1, 128>}, {pipeline_mode = #tpu.pipeline_mode<synchronous>, transform_indices = @transform_4, window_bounds = array<i64: 1, 128>}, {transform_indices = @transform_5, window_bounds = array<i64: 256, 128>}, {transform_indices = @transform_6, window_bounds = array<i64: 256, 128>}]} {
    %c0 = arith.constant 0 : index
    %c0_0 = arith.constant 0 : index
    %0 = vector.load %arg1[%c0, %c0_0] : memref<256x384xbf16, #tpu.memory_space<vmem>>, vector<256x384xbf16>
    %c0_1 = arith.constant 0 : index
    %c0_2 = arith.constant 0 : index
    %1 = vector.load %arg2[%c0_1, %c0_2] : memref<384x128xbf16, #tpu.memory_space<vmem>>, vector<384x128xbf16>
    %cst = arith.constant dense<0.000000e+00> : vector<256x128xf32>
    %2 = tpu.matmul %0, %1, %cst {dimension_numbers = #tpu.dot_dimension_numbers<[1], [0], [0], [1], [0, 0, 1, 1], [], []>} : vector<256x384xbf16>, vector<384x128xbf16>, vector<256x128xf32> -> vector<256x128xf32>
    %c0_3 = arith.constant 0 : index
    %c0_4 = arith.constant 0 : index
    %3 = vector.load %arg3[%c0_3, %c0_4] : memref<1x128xf32, #tpu.memory_space<vmem>>, vector<1x128xf32>
    %4 = vector.broadcast %3 : vector<1x128xf32> to vector<256x128xf32>
    %5 = arith.addf %2, %4 : vector<256x128xf32>
    %6 = arith.truncf %5 : vector<256x128xf32> to vector<256x128xbf16>
    %c0_5 = arith.constant 0 : index
    %c0_6 = arith.constant 0 : index
    %7 = vector.load %arg6[%c0_5, %c0_6] : memref<256x128xbf16, #tpu.memory_space<vmem>>, vector<256x128xbf16>
    tpu.vector_store %arg6[%c0_5, %c0_6], %6 {strides = array<i32>} : memref<256x128xbf16, #tpu.memory_space<vmem>>, vector<256x128xbf16>,
    %c0_7 = arith.constant 0 : index
    %c0_8 = arith.constant 0 : index
    %8 = vector.load %arg4[%c0_7, %c0_8] : memref<1x128xf32, #tpu.memory_space<vmem>>, vector<1x128xf32>
    %9 = vector.broadcast %8 : vector<1x128xf32> to vector<256x128xf32>
    %10 = arith.mulf %5, %9 : vector<256x128xf32>
    %c0_9 = arith.constant 0 : index
    %c0_10 = arith.constant 0 : index
    %11 = vector.load %arg5[%c0_9, %c0_10] : memref<1x128xf32, #tpu.memory_space<vmem>>, vector<1x128xf32>
    %12 = vector.broadcast %11 : vector<1x128xf32> to vector<256x128xf32>
    %13 = arith.addf %10, %12 : vector<256x128xf32>
    %cst_11 = arith.constant 0.000000e+00 : f32
    %14 = vector.broadcast %cst_11 : f32 to vector<256x128xf32>
    %15 = arith.maximumf %13, %14 : vector<256x128xf32>
    %16 = arith.truncf %15 : vector<256x128xf32> to vector<256x128xbf16>
    %c0_12 = arith.constant 0 : index
    %c0_13 = arith.constant 0 : index
    %17 = vector.load %arg7[%c0_12, %c0_13] : memref<256x128xbf16, #tpu.memory_space<vmem>>, vector<256x128xbf16>
    tpu.vector_store %arg7[%c0_12, %c0_13], %16 {strides = array<i32>} : memref<256x128xbf16, #tpu.memory_space<vmem>>, vector<256x128xbf16>,
    return
  }
  func.func @transform_0(%arg0: i32) -> (i32, i32) {
    %c0_i32 = arith.constant 0 : i32
    %c0_i32_0 = arith.constant 0 : i32
    return %arg0, %c0_i32 : i32, i32
  }
  func.func @transform_1(%arg0: i32) -> (i32, i32) {
    %c0_i32 = arith.constant 0 : i32
    %c0_i32_0 = arith.constant 0 : i32
    %c0_i32_1 = arith.constant 0 : i32
    return %c0_i32, %c0_i32_0 : i32, i32
  }
  func.func @transform_2(%arg0: i32) -> (i32, i32) {
    %c0_i32 = arith.constant 0 : i32
    %c0_i32_0 = arith.constant 0 : i32
    %c0_i32_1 = arith.constant 0 : i32
    return %c0_i32, %c0_i32_0 : i32, i32
  }
  func.func @transform_3(%arg0: i32) -> (i32, i32) {
    %c0_i32 = arith.constant 0 : i32
    %c0_i32_0 = arith.constant 0 : i32
    %c0_i32_1 = arith.constant 0 : i32
    return %c0_i32, %c0_i32_0 : i32, i32
  }
  func.func @transform_4(%arg0: i32) -> (i32, i32) {
    %c0_i32 = arith.constant 0 : i32
    %c0_i32_0 = arith.constant 0 : i32
    %c0_i32_1 = arith.constant 0 : i32
    return %c0_i32, %c0_i32_0 : i32, i32
  }
  func.func @transform_5(%arg0: i32) -> (i32, i32) {
    %c0_i32 = arith.constant 0 : i32
    %c0_i32_0 = arith.constant 0 : i32
    return %arg0, %c0_i32 : i32, i32
  }
  func.func @transform_6(%arg0: i32) -> (i32, i32) {
    %c0_i32 = arith.constant 0 : i32
    %c0_i32_0 = arith.constant 0 : i32
    return %arg0, %c0_i32 : i32, i32
  }
}

module attributes {stable_mosaic.version = 11 : i64} {
  func.func @conv_act_kernel(%arg0: i32, %arg1: memref<256x384xbf16, #tpu.memory_space<vmem>>, %arg2: memref<384x128xbf16, #tpu.memory_space<vmem>>, %arg3: memref<1x128xf32, #tpu.memory_space<vmem>>, %arg4: memref<1x128xf32, #tpu.memory_space<vmem>>, %arg5: memref<256x128xbf16, #tpu.memory_space<vmem>>) attributes {dimension_semantics = [#tpu.dimension_semantics<parallel>], iteration_bounds = array<i64: 2>, scalar_prefetch = 0 : i64, scratch_operands = 0 : i64, tpu.core_type = #tpu.core_type<tc>, window_params = [{transform_indices = @transform_0, window_bounds = array<i64: 256, 384>}, {pipeline_mode = #tpu.pipeline_mode<synchronous>, transform_indices = @transform_1, window_bounds = array<i64: 384, 128>}, {pipeline_mode = #tpu.pipeline_mode<synchronous>, transform_indices = @transform_2, window_bounds = array<i64: 1, 128>}, {pipeline_mode = #tpu.pipeline_mode<synchronous>, transform_indices = @transform_3, window_bounds = array<i64: 1, 128>}, {transform_indices = @transform_4, window_bounds = array<i64: 256, 128>}]} {
    %c0 = arith.constant 0 : index
    %c0_0 = arith.constant 0 : index
    %0 = vector.load %arg1[%c0, %c0_0] : memref<256x384xbf16, #tpu.memory_space<vmem>>, vector<256x384xbf16>
    %c0_1 = arith.constant 0 : index
    %c0_2 = arith.constant 0 : index
    %1 = vector.load %arg2[%c0_1, %c0_2] : memref<384x128xbf16, #tpu.memory_space<vmem>>, vector<384x128xbf16>
    %cst = arith.constant dense<0.000000e+00> : vector<256x128xf32>
    %2 = tpu.matmul %0, %1, %cst {dimension_numbers = #tpu.dot_dimension_numbers<[1], [0], [0], [1], [0, 0, 1, 1], [], []>} : vector<256x384xbf16>, vector<384x128xbf16>, vector<256x128xf32> -> vector<256x128xf32>
    %c0_3 = arith.constant 0 : index
    %c0_4 = arith.constant 0 : index
    %3 = vector.load %arg3[%c0_3, %c0_4] : memref<1x128xf32, #tpu.memory_space<vmem>>, vector<1x128xf32>
    %4 = vector.broadcast %3 : vector<1x128xf32> to vector<256x128xf32>
    %5 = arith.mulf %2, %4 : vector<256x128xf32>
    %c0_5 = arith.constant 0 : index
    %c0_6 = arith.constant 0 : index
    %6 = vector.load %arg4[%c0_5, %c0_6] : memref<1x128xf32, #tpu.memory_space<vmem>>, vector<1x128xf32>
    %7 = vector.broadcast %6 : vector<1x128xf32> to vector<256x128xf32>
    %8 = arith.addf %5, %7 : vector<256x128xf32>
    %cst_7 = arith.constant 0.000000e+00 : f32
    %9 = vector.broadcast %cst_7 : f32 to vector<256x128xf32>
    %10 = arith.maximumf %8, %9 : vector<256x128xf32>
    %11 = arith.truncf %10 : vector<256x128xf32> to vector<256x128xbf16>
    %c0_8 = arith.constant 0 : index
    %c0_9 = arith.constant 0 : index
    %12 = vector.load %arg5[%c0_8, %c0_9] : memref<256x128xbf16, #tpu.memory_space<vmem>>, vector<256x128xbf16>
    tpu.vector_store %arg5[%c0_8, %c0_9], %11 {strides = array<i32>} : memref<256x128xbf16, #tpu.memory_space<vmem>>, vector<256x128xbf16>,
    return
  }
  func.func @transform_0(%arg0: i32) -> (i32, i32) {
    %c0_i32 = arith.constant 0 : i32
    %c0_i32_0 = arith.constant 0 : i32
    return %arg0, %c0_i32 : i32, i32
  }
  func.func @transform_1(%arg0: i32) -> (i32, i32) {
    %c0_i32 = arith.constant 0 : i32
    %c0_i32_0 = arith.constant 0 : i32
    %c0_i32_1 = arith.constant 0 : i32
    return %c0_i32, %c0_i32_0 : i32, i32
  }
  func.func @transform_2(%arg0: i32) -> (i32, i32) {
    %c0_i32 = arith.constant 0 : i32
    %c0_i32_0 = arith.constant 0 : i32
    %c0_i32_1 = arith.constant 0 : i32
    return %c0_i32, %c0_i32_0 : i32, i32
  }
  func.func @transform_3(%arg0: i32) -> (i32, i32) {
    %c0_i32 = arith.constant 0 : i32
    %c0_i32_0 = arith.constant 0 : i32
    %c0_i32_1 = arith.constant 0 : i32
    return %c0_i32, %c0_i32_0 : i32, i32
  }
  func.func @transform_4(%arg0: i32) -> (i32, i32) {
    %c0_i32 = arith.constant 0 : i32
    %c0_i32_0 = arith.constant 0 : i32
    return %arg0, %c0_i32 : i32, i32
  }
}

module attributes {stable_mosaic.version = 11 : i64} {
  func.func @conv_dual_kernel(%arg0: i32, %arg1: memref<64x640xbf16, #tpu.memory_space<vmem>>, %arg2: memref<640x128xbf16, #tpu.memory_space<vmem>>, %arg3: memref<1x128xf32, #tpu.memory_space<vmem>>, %arg4: memref<1x128xf32, #tpu.memory_space<vmem>>, %arg5: memref<1x128xf32, #tpu.memory_space<vmem>>, %arg6: memref<64x128xbf16, #tpu.memory_space<vmem>>, %arg7: memref<64x128xbf16, #tpu.memory_space<vmem>>) attributes {dimension_semantics = [#tpu.dimension_semantics<parallel>], iteration_bounds = array<i64: 2>, scalar_prefetch = 0 : i64, scratch_operands = 0 : i64, tpu.core_type = #tpu.core_type<tc>, window_params = [{transform_indices = @transform_0, window_bounds = array<i64: 64, 640>}, {pipeline_mode = #tpu.pipeline_mode<synchronous>, transform_indices = @transform_1, window_bounds = array<i64: 640, 128>}, {pipeline_mode = #tpu.pipeline_mode<synchronous>, transform_indices = @transform_2, window_bounds = array<i64: 1, 128>}, {pipeline_mode = #tpu.pipeline_mode<synchronous>, transform_indices = @transform_3, window_bounds = array<i64: 1, 128>}, {pipeline_mode = #tpu.pipeline_mode<synchronous>, transform_indices = @transform_4, window_bounds = array<i64: 1, 128>}, {transform_indices = @transform_5, window_bounds = array<i64: 64, 128>}, {transform_indices = @transform_6, window_bounds = array<i64: 64, 128>}]} {
    %c0 = arith.constant 0 : index
    %c0_0 = arith.constant 0 : index
    %0 = vector.load %arg1[%c0, %c0_0] : memref<64x640xbf16, #tpu.memory_space<vmem>>, vector<64x640xbf16>
    %c0_1 = arith.constant 0 : index
    %c0_2 = arith.constant 0 : index
    %1 = vector.load %arg2[%c0_1, %c0_2] : memref<640x128xbf16, #tpu.memory_space<vmem>>, vector<640x128xbf16>
    %cst = arith.constant dense<0.000000e+00> : vector<64x128xf32>
    %2 = tpu.matmul %0, %1, %cst {dimension_numbers = #tpu.dot_dimension_numbers<[1], [0], [0], [1], [0, 0, 1, 1], [], []>} : vector<64x640xbf16>, vector<640x128xbf16>, vector<64x128xf32> -> vector<64x128xf32>
    %c0_3 = arith.constant 0 : index
    %c0_4 = arith.constant 0 : index
    %3 = vector.load %arg3[%c0_3, %c0_4] : memref<1x128xf32, #tpu.memory_space<vmem>>, vector<1x128xf32>
    %4 = vector.broadcast %3 : vector<1x128xf32> to vector<64x128xf32>
    %5 = arith.addf %2, %4 : vector<64x128xf32>
    %6 = arith.truncf %5 : vector<64x128xf32> to vector<64x128xbf16>
    %c0_5 = arith.constant 0 : index
    %c0_6 = arith.constant 0 : index
    %7 = vector.load %arg6[%c0_5, %c0_6] : memref<64x128xbf16, #tpu.memory_space<vmem>>, vector<64x128xbf16>
    tpu.vector_store %arg6[%c0_5, %c0_6], %6 {strides = array<i32>} : memref<64x128xbf16, #tpu.memory_space<vmem>>, vector<64x128xbf16>,
    %c0_7 = arith.constant 0 : index
    %c0_8 = arith.constant 0 : index
    %8 = vector.load %arg4[%c0_7, %c0_8] : memref<1x128xf32, #tpu.memory_space<vmem>>, vector<1x128xf32>
    %9 = vector.broadcast %8 : vector<1x128xf32> to vector<64x128xf32>
    %10 = arith.mulf %5, %9 : vector<64x128xf32>
    %c0_9 = arith.constant 0 : index
    %c0_10 = arith.constant 0 : index
    %11 = vector.load %arg5[%c0_9, %c0_10] : memref<1x128xf32, #tpu.memory_space<vmem>>, vector<1x128xf32>
    %12 = vector.broadcast %11 : vector<1x128xf32> to vector<64x128xf32>
    %13 = arith.addf %10, %12 : vector<64x128xf32>
    %cst_11 = arith.constant 0.000000e+00 : f32
    %14 = vector.broadcast %cst_11 : f32 to vector<64x128xf32>
    %15 = arith.maximumf %13, %14 : vector<64x128xf32>
    %16 = arith.truncf %15 : vector<64x128xf32> to vector<64x128xbf16>
    %c0_12 = arith.constant 0 : index
    %c0_13 = arith.constant 0 : index
    %17 = vector.load %arg7[%c0_12, %c0_13] : memref<64x128xbf16, #tpu.memory_space<vmem>>, vector<64x128xbf16>
    tpu.vector_store %arg7[%c0_12, %c0_13], %16 {strides = array<i32>} : memref<64x128xbf16, #tpu.memory_space<vmem>>, vector<64x128xbf16>,
    return
  }
  func.func @transform_0(%arg0: i32) -> (i32, i32) {
    %c0_i32 = arith.constant 0 : i32
    %c0_i32_0 = arith.constant 0 : i32
    return %arg0, %c0_i32 : i32, i32
  }
  func.func @transform_1(%arg0: i32) -> (i32, i32) {
    %c0_i32 = arith.constant 0 : i32
    %c0_i32_0 = arith.constant 0 : i32
    %c0_i32_1 = arith.constant 0 : i32
    return %c0_i32, %c0_i32_0 : i32, i32
  }
  func.func @transform_2(%arg0: i32) -> (i32, i32) {
    %c0_i32 = arith.constant 0 : i32
    %c0_i32_0 = arith.constant 0 : i32
    %c0_i32_1 = arith.constant 0 : i32
    return %c0_i32, %c0_i32_0 : i32, i32
  }
  func.func @transform_3(%arg0: i32) -> (i32, i32) {
    %c0_i32 = arith.constant 0 : i32
    %c0_i32_0 = arith.constant 0 : i32
    %c0_i32_1 = arith.constant 0 : i32
    return %c0_i32, %c0_i32_0 : i32, i32
  }
  func.func @transform_4(%arg0: i32) -> (i32, i32) {
    %c0_i32 = arith.constant 0 : i32
    %c0_i32_0 = arith.constant 0 : i32
    %c0_i32_1 = arith.constant 0 : i32
    return %c0_i32, %c0_i32_0 : i32, i32
  }
  func.func @transform_5(%arg0: i32) -> (i32, i32) {
    %c0_i32 = arith.constant 0 : i32
    %c0_i32_0 = arith.constant 0 : i32
    return %arg0, %c0_i32 : i32, i32
  }
  func.func @transform_6(%arg0: i32) -> (i32, i32) {
    %c0_i32 = arith.constant 0 : i32
    %c0_i32_0 = arith.constant 0 : i32
    return %arg0, %c0_i32 : i32, i32
  }
}

module attributes {stable_mosaic.version = 11 : i64} {
  func.func @head_kernel(%arg0: memref<2x128xf32, #tpu.memory_space<vmem>>, %arg1: memref<128x128xbf16, #tpu.memory_space<vmem>>, %arg2: memref<128x128xf32, #tpu.memory_space<vmem>>, %arg3: memref<1x128xf32, #tpu.memory_space<vmem>>, %arg4: memref<2x128xf32, #tpu.memory_space<vmem>>) attributes {dimension_semantics = [], scalar_prefetch = 0 : i64, scratch_operands = 0 : i64, tpu.core_type = #tpu.core_type<tc>} {
    %c0 = arith.constant 0 : index
    %c0_0 = arith.constant 0 : index
    %0 = vector.load %arg1[%c0, %c0_0] : memref<128x128xbf16, #tpu.memory_space<vmem>>, vector<128x128xbf16>
    %1 = arith.extf %0 : vector<128x128xbf16> to vector<128x128xf32>
    %c0_1 = arith.constant 0 : index
    %c0_2 = arith.constant 0 : index
    %2 = vector.load %arg0[%c0_1, %c0_2] : memref<2x128xf32, #tpu.memory_space<vmem>>, vector<2x128xf32>
    %cst = arith.constant dense<0.000000e+00> : vector<2x128xf32>
    %3 = tpu.matmul %2, %1, %cst {dimension_numbers = #tpu.dot_dimension_numbers<[1], [0], [0], [1], [0, 0, 1, 1], [], []>} : vector<2x128xf32>, vector<128x128xf32>, vector<2x128xf32> -> vector<2x128xf32>
    %c0_3 = arith.constant 0 : index
    %c0_4 = arith.constant 0 : index
    %4 = vector.load %arg2[%c0_3, %c0_4] : memref<128x128xf32, #tpu.memory_space<vmem>>, vector<128x128xf32>
    %cst_5 = arith.constant dense<0.000000e+00> : vector<2x128xf32>
    %5 = tpu.matmul %3, %4, %cst_5 {dimension_numbers = #tpu.dot_dimension_numbers<[1], [0], [0], [1], [0, 0, 1, 1], [], []>} : vector<2x128xf32>, vector<128x128xf32>, vector<2x128xf32> -> vector<2x128xf32>
    %c0_6 = arith.constant 0 : index
    %c0_7 = arith.constant 0 : index
    %6 = vector.load %arg3[%c0_6, %c0_7] : memref<1x128xf32, #tpu.memory_space<vmem>>, vector<1x128xf32>
    %7 = vector.broadcast %6 : vector<1x128xf32> to vector<2x128xf32>
    %8 = arith.addf %5, %7 : vector<2x128xf32>
    %c0_8 = arith.constant 0 : index
    %c0_9 = arith.constant 0 : index
    %9 = vector.load %arg4[%c0_8, %c0_9] : memref<2x128xf32, #tpu.memory_space<vmem>>, vector<2x128xf32>
    tpu.vector_store %arg4[%c0_8, %c0_9], %8 {strides = array<i32>} : memref<2x128xf32, #tpu.memory_space<vmem>>, vector<2x128xf32>,
    return
  }
}

</mosaic_0001>

<bundles_post_ra>
// kernel: wide_resnet_forward.8
= control target key start
LH: loop header
LB: loop body
LE: loop exit
PB: predicated region body
PF: predicated region fallthrough
CT: control target
= control target key end

     0   :  { %s2743_s21 = smov 0   ;;  %s3174_s0 = inlined_call_operand.vmem [shape: bf16[2048,128], index: 0, kind: input, shape index: {}]   ;;  %s3175_s1 = inlined_call_operand.vmem [shape: bf16[128,128], index: 1, kind: input, shape index: {}]   ;;  %s3176_s2 = inlined_call_operand.vmem [shape: f32[1,128], index: 2, kind: input, shape index: {}]   ;;  %s3177_s3 = inlined_call_operand.vmem [shape: f32[1,128], index: 3, kind: input, shape index: {}]   ;;  %s3178_s4 = inlined_call_operand.vmem [shape: f32[1,128], index: 4, kind: input, shape index: {}]   ;;  %s3179_s5 = inlined_call_operand.vmem [shape: bf16[2048,128], index: 5, kind: output, shape index: {0}]   ;;  %s3180_s6 = inlined_call_operand.vmem [shape: bf16[2048,128], index: 6, kind: output, shape index: {1}]  }
   0x1 LB: > { %s1822_s22 = sadd.s32 4294967295, %s2706_s21   ;;  %p1826_p0 = scmp.ge.s32.totalorder %s2706_s21, 1  ;;  %s2706_s21 = sphi %s2743_s21, %s17_s21  }
   0x2   : > { %p216_p1 = scmp.lt.s32.totalorder %s2706_s21, 5 }
   0x4   : > { %p217_p2 = pnand %p1826_p0, %p216_p1 }
   0x5   : > { %v2660_v0 = vld [vmem:[%s3175_s1] sm:$0xff] (!%p217_p2)   ;;  %s1827_s25 = sshll.u32 (!%p217_p2), %s1822_s22, 6  ;;  %v2661_v1 = vld [vmem:[%s3175_s1 + $0x8] sm:$0xff] (!%p217_p2)   ;;  %v2662_v2 = vld [vmem:[%s3175_s1 + $0x10] sm:$0xff] (!%p217_p2)  }
   0x6   : > { %220 = sbr.rel (%p217_p2) target bundleno = 337 (0x151), region = 40  ;;  %p252_p3 = scmp.lt.s32.totalorder (!%p217_p2), %s1827_s25, 255  ;;  %2556 = vmatprep.subr.bf16.mxu0 (!%p217_p2), %v2660_v0  ;;  %2636 = vmatprep.subr.bf16.mxu1 (!%p217_p2), %v2660_v0  ;;  %v2663_v3 = vld [vmem:[%s3175_s1 + $0x18] sm:$0xff] (!%p217_p2)   ;;  %v2664_v6 = vld [vmem:[%s3175_s1 + $0x20] sm:$0xff] (!%p217_p2)   ;;  %v2665_v7 = vld [vmem:[%s3175_s1 + $0x28] sm:$0xff] (!%p217_p2)  }
   0x7   : > { %2557 = vmatpush3.bf16.msra.mxu0 (!%p217_p2), %v2660_v0  ;;  %2644 = vmatpush3.bf16.msra.mxu1 (!%p217_p2), %v2660_v0  ;;  %v2666_v8 = vld [vmem:[%s3175_s1 + $0x30] sm:$0xff] (!%p217_p2)   ;;  %v2667_v9 = vld [vmem:[%s3175_s1 + $0x38] sm:$0xff] (!%p217_p2)   ;;  %v2818_v40 = vld [vmem:[%s3176_s2] ss:$0 sm:$0xff] (!%p217_p2) }
   0x8   : > { %2558 = vmatprep.subr.bf16.mxu0 (!%p217_p2), %v2661_v1  ;;  %2637 = vmatprep.subr.bf16.mxu1 (!%p217_p2), %v2661_v1  ;;  %v2823_v42 = vld [vmem:[%s3177_s3] ss:$0 sm:$0xff] (!%p217_p2) }
   0x9   : > { %v2830_v48 = vld [vmem:[%s3178_s4] ss:$0 sm:$0xff] (!%p217_p2) }
   0xb   : > { %2559 = vmatpush3.bf16.msra.mxu0 (!%p217_p2), %v2661_v1  ;;  %2645 = vmatpush3.bf16.msra.mxu1 (!%p217_p2), %v2661_v1 }
   0xc   : > { %2560 = vmatprep.subr.bf16.mxu0 (!%p217_p2), %v2662_v2  ;;  %2638 = vmatprep.subr.bf16.mxu1 (!%p217_p2), %v2662_v2 }
   0xd   : > { %s3182_s25 = smov (!%p252_p3, %s1827_s25), 255 }
   0xe   : > { %s2760_s30 = sshll.u32 %s3182_s25, 2 }
   0xf   : > { %s2766_s9 = scalar_lea.vmem %s3174_s0, %s2760_s30  ;;  %2561 = vmatpush3.bf16.msra.mxu0 %v2662_v2  ;;  %2646 = vmatpush3.bf16.msra.mxu1 %v2662_v2  ;;  %s2844_s29 = scalar_lea.vmem %s3179_s5, %s2760_s30 }
  0x10   : > { %v2668_v4 = vld [vmem:[%s2766_s9] sm:$0xff]   ;;  %2562 = vmatprep.subr.bf16.mxu0 %v2663_v3  ;;  %2639 = vmatprep.subr.bf16.mxu1 %v2663_v3  ;;  %v2670_v10 = vld [vmem:[%s2766_s9 + $0x8] sm:$0xff]   ;;  %v2672_v12 = vld [vmem:[%s2766_s9 + $0x10] sm:$0xff]  }
  0x11   : > { %v2669_v5 = vld [vmem:[%s2766_s9 + $0x80] sm:$0xff]   ;;  %2572 = vmatprep.mubr.bf16.mxu0 %v2668_v4  ;;  %v2671_v11 = vld [vmem:[%s2766_s9 + $0x88] sm:$0xff]   ;;  %v2673_v13 = vld [vmem:[%s2766_s9 + $0x90] sm:$0xff]  }
  0x12   : > { %2604 = vmatprep.mubr.bf16.mxu1 %v2669_v5  ;;  %v2674_v14 = vld [vmem:[%s2766_s9 + $0x18] sm:$0xff]   ;;  %v2676_v16 = vld [vmem:[%s2766_s9 + $0x20] sm:$0xff]   ;;  %v2678_v18 = vld [vmem:[%s2766_s9 + $0x28] sm:$0xff]  }
  0x13   : > { %2563 = vmatpush3.bf16.msra.mxu0 %v2663_v3  ;;  %2647 = vmatpush3.bf16.msra.mxu1 %v2663_v3  ;;  %v2675_v15 = vld [vmem:[%s2766_s9 + $0x98] sm:$0xff]   ;;  %v2677_v17 = vld [vmem:[%s2766_s9 + $0xa0] sm:$0xff]   ;;  %v2679_v19 = vld [vmem:[%s2766_s9 + $0xa8] sm:$0xff]  }
  0x14   : > { %2564 = vmatprep.subr.bf16.mxu0 %v2664_v6  ;;  %2640 = vmatprep.subr.bf16.mxu1 %v2664_v6  ;;  %v2680_v20 = vld [vmem:[%s2766_s9 + $0x30] sm:$0xff]   ;;  %v2682_v22 = vld [vmem:[%s2766_s9 + $0x38] sm:$0xff]   ;;  %v2684_v24 = vld [vmem:[%s2766_s9 + $0x40] sm:$0xff]  }
  0x15   : > { %v2681_v21 = vld [vmem:[%s2766_s9 + $0xb0] sm:$0xff]   ;;  %v2683_v23 = vld [vmem:[%s2766_s9 + $0xb8] sm:$0xff]   ;;  %v2685_v25 = vld [vmem:[%s2766_s9 + $0xc0] sm:$0xff]  }
  0x16   : > { %v2686_v26 = vld [vmem:[%s2766_s9 + $0x48] sm:$0xff]   ;;  %v2688_v28 = vld [vmem:[%s2766_s9 + $0x50] sm:$0xff]   ;;  %v2690_v30 = vld [vmem:[%s2766_s9 + $0x58] sm:$0xff]  }
  0x17   : > { %2565 = vmatpush3.bf16.msra.mxu0 %v2664_v6  ;;  %2648 = vmatpush3.bf16.msra.mxu1 %v2664_v6  ;;  %v2687_v27 = vld [vmem:[%s2766_s9 + $0xc8] sm:$0xff]   ;;  %v2689_v29 = vld [vmem:[%s2766_s9 + $0xd0] sm:$0xff]   ;;  %v2691_v31 = vld [vmem:[%s2766_s9 + $0xd8] sm:$0xff]  }
  0x18   : > { %2566 = vmatprep.subr.bf16.mxu0 %v2665_v7  ;;  %2641 = vmatprep.subr.bf16.mxu1 %v2665_v7  ;;  %v2692_v32 = vld [vmem:[%s2766_s9 + $0x60] sm:$0xff]   ;;  %v2694_v34 = vld [vmem:[%s2766_s9 + $0x68] sm:$0xff]   ;;  %v2696_v36 = vld [vmem:[%s2766_s9 + $0x70] sm:$0xff]  }
  0x19   : > { %v2693_v33 = vld [vmem:[%s2766_s9 + $0xe0] sm:$0xff]   ;;  %v2695_v35 = vld [vmem:[%s2766_s9 + $0xe8] sm:$0xff]   ;;  %v2697_v37 = vld [vmem:[%s2766_s9 + $0xf0] sm:$0xff]  }
  0x1a   : > { %v2698_v38 = vld [vmem:[%s2766_s9 + $0x78] sm:$0xff]  }
  0x1b   : > { %2567 = vmatpush3.bf16.msra.mxu0 %v2665_v7  ;;  %2649 = vmatpush3.bf16.msra.mxu1 %v2665_v7  ;;  %v2699_v39 = vld [vmem:[%s2766_s9 + $0xf8] sm:$0xff]   ;;  %s2866_s9 = scalar_lea.vmem %s3180_s6, %s2760_s30 }
  0x1c   : > { %2568 = vmatprep.subr.bf16.mxu0 %v2666_v8  ;;  %2642 = vmatprep.subr.bf16.mxu1 %v2666_v8 }
  0x1f   : > { %2569 = vmatpush3.bf16.msra.mxu0 %v2666_v8  ;;  %2650 = vmatpush3.bf16.msra.mxu1 %v2666_v8 }
  0x20   : > { %2570 = vmatprep.subr.bf16.mxu0 %v2667_v9  ;;  %2643 = vmatprep.subr.bf16.mxu1 %v2667_v9 }
  0x23   : > { %2571 = vmatpush3.bf16.msra.mxu0 %v2667_v9  ;;  %2651 = vmatpush3.bf16.msra.mxu1 %v2667_v9 }
  0x26   : > { %2573 = vmatmul.mubr.bf16.vlgmr.msra.gmra.mrb[0].mxu0 %v2670_v10  ;;  %2605 = vmatmul.mubr.bf16.vlgmr.msra.gmra.mrb[0].mxu1 %v2671_v11 }
  0x27   : > { %2576 = vmatprep.mubr.bf16.mxu0 %v2672_v12  ;;  %2608 = vmatprep.mubr.bf16.mxu1 %v2673_v13 }
  0x2e   : > { %2577 = vmatmul.mubr.bf16.gmra.mrb[4].mxu0 %v2674_v14  ;;  %2609 = vmatmul.mubr.bf16.gmra.mrb[4].mxu1 %v2675_v15 }
  0x2f   : > { %2580 = vmatprep.mubr.bf16.mxu0 %v2676_v16  ;;  %2612 = vmatprep.mubr.bf16.mxu1 %v2677_v17 }
  0x36   : > { %2581 = vmatmul.mubr.bf16.gmra.mrb[8].mxu0 %v2678_v18  ;;  %2613 = vmatmul.mubr.bf16.gmra.mrb[8].mxu1 %v2679_v19 }
  0x37   : > { %2584 = vmatprep.mubr.bf16.mxu0 %v2680_v20  ;;  %2616 = vmatprep.mubr.bf16.mxu1 %v2681_v21 }
  0x3e   : > { %2585 = vmatmul.mubr.bf16.gmra.mrb[12].mxu0 %v2682_v22  ;;  %2617 = vmatmul.mubr.bf16.gmra.mrb[12].mxu1 %v2683_v23 }
  0x3f   : > { %2588 = vmatprep.mubr.bf16.mxu0 %v2684_v24  ;;  %2620 = vmatprep.mubr.bf16.mxu1 %v2685_v25 }
  0x46   : > { %2589 = vmatmul.mubr.bf16.gmra.mrb[16].mxu0 %v2686_v26  ;;  %2621 = vmatmul.mubr.bf16.gmra.mrb[16].mxu1 %v2687_v27 }
  0x47   : > { %2592 = vmatprep.mubr.bf16.mxu0 %v2688_v28  ;;  %2624 = vmatprep.mubr.bf16.mxu1 %v2689_v29 }
  0x4e   : > { %2593 = vmatmul.mubr.bf16.gmra.mrb[20].mxu0 %v2690_v30  ;;  %2625 = vmatmul.mubr.bf16.gmra.mrb[20].mxu1 %v2691_v31 }
  0x4f   : > { %2596 = vmatprep.mubr.bf16.mxu0 %v2692_v32  ;;  %2628 = vmatprep.mubr.bf16.mxu1 %v2693_v33 }
  0x56   : > { %2597 = vmatmul.mubr.bf16.gmra.mrb[24].mxu0 %v2694_v34  ;;  %2629 = vmatmul.mubr.bf16.gmra.mrb[24].mxu1 %v2695_v35 }
  0x57   : > { %2600 = vmatprep.mubr.bf16.mxu0 %v2696_v36  ;;  %2632 = vmatprep.mubr.bf16.mxu1 %v2697_v37 }
  0x5e   : > { %2601 = vmatmul.mubr.bf16.gmra.mrb[28].mxu0 %v2698_v38  ;;  %2633 = vmatmul.mubr.bf16.gmra.mrb[28].mxu1 %v2699_v39 }
  0xf9   : > { %v2574_v41 = vpop.f32.mrb[0].mxu0  ;;  %v2606_v43 = vpop.f32.mrb[0].mxu1 }
  0xfa   : > { %v640_v44 = vadd.f32 %v2574_v41, %v2818_v40  ;;  %v768_v45 = vadd.f32 %v2606_v43, %v2818_v40  ;;  %v631_v46 = vpop.f32.mrb[1].mxu0  ;;  %v759_v47 = vpop.f32.mrb[1].mxu1 }
  0xfb   : > { %v632_v49 = vadd.f32 %v2818_v40, %v631_v46  ;;  %v760_v50 = vadd.f32 %v2818_v40, %v759_v47  ;;  %v2575_v51 = vpop.f32.mrb[2].mxu0  ;;  %v2607_v52 = vpop.f32.mrb[2].mxu1 }
  0xfc   : > { %v1215_v53 = vmul.f32 %v2823_v42, %v640_v44  ;;  %v1247_v54 = vmul.f32 %v2823_v42, %v768_v45  ;;  %v643_v55 = vadd.f32 %v2575_v51, %v2818_v40  ;;  %v771_v56 = vadd.f32 %v2607_v52, %v2818_v40  ;;  %v634_v57 = vpop.f32.mrb[3].mxu0  ;;  %v762_v58 = vpop.f32.mrb[3].mxu1 }
  0xfd   : > { %v1213_v59 = vmul.f32 %v2823_v42, %v632_v49  ;;  %v1245_v60 = vmul.f32 %v2823_v42, %v760_v50  ;;  %v635_v61 = vadd.f32 %v2818_v40, %v634_v57  ;;  %v763_v62 = vadd.f32 %v2818_v40, %v762_v58 }
  0xfe   : > { %v1286_v63 = vadd.f32 %v2830_v48, %v1215_v53  ;;  %v1318_v0 = vadd.f32 %v2830_v48, %v1247_v54  ;;  %v2142_v1 = vpack.c.bf16 %v643_v55, %v640_v44  ;;  %v1216_v2 = vmul.f32 %v2823_v42, %v643_v55 }
  0xff   : > { %v1284_v3 = vadd.f32 %v2830_v48, %v1213_v59  ;;  %v1316_v4 = vadd.f32 %v2830_v48, %v1245_v60  ;;  %v2222_v5 = vpack.c.bf16 %v771_v56, %v768_v45  ;;  %v1248_v6 = vmul.f32 %v2823_v42, %v771_v56 }
 0x100   : > { %v1350_v7 = vmax.f32 %v1286_v63, 0.0  ;;  %v1382_v8 = vmax.f32 %v1318_v0, 0.0  ;;  %2454 = vst [vmem:[%s2844_s29 + $0x8] sm:$0xff] %v2142_v1   ;;  %v1287_v9 = vadd.f32 %v2830_v48, %v1216_v2  ;;  %v2137_v10 = vpack.c.bf16 %v635_v61, %v632_v49 }
 0x101   : > { %v1348_v11 = vmax.f32 %v1284_v3, 0.0  ;;  %v1380_v12 = vmax.f32 %v1316_v4, 0.0  ;;  %2470 = vst [vmem:[%s2844_s29 + $0x88] sm:$0xff] %v2222_v5   ;;  %v1319_v13 = vadd.f32 %v2830_v48, %v1248_v6  ;;  %v1214_v14 = vmul.f32 %v2823_v42, %v635_v61  ;;  %v2578_v15 = vpop.f32.mrb[4].mxu0  ;;  %v2610_v16 = vpop.f32.mrb[4].mxu1 }
 0x102   : > { %v1351_v17 = vmax.f32 %v1287_v9, 0.0  ;;  %2138 = vst [vmem:[%s2844_s29] sm:$0xff] %v2137_v10   ;;  %v2217_v18 = vpack.c.bf16 %v763_v62, %v760_v50  ;;  %v1246_v19 = vmul.f32 %v2823_v42, %v763_v62  ;;  %v656_v20 = vadd.f32 %v2578_v15, %v2818_v40  ;;  %v647_v21 = vpop.f32.mrb[5].mxu0  ;;  %v775_v22 = vpop.f32.mrb[5].mxu1 }
 0x103   : > { %v1383_v23 = vmax.f32 %v1319_v13, 0.0  ;;  %v1285_v24 = vadd.f32 %v2830_v48, %v1214_v14  ;;  %v784_v25 = vadd.f32 %v2610_v16, %v2818_v40  ;;  %v648_v26 = vadd.f32 %v2818_v40, %v647_v21  ;;  %v2579_v27 = vpop.f32.mrb[6].mxu0  ;;  %v2611_v28 = vpop.f32.mrb[6].mxu1 }
 0x104   : > { %v2302_v29 = vpack.c.bf16 %v1351_v17, %v1350_v7  ;;  %2469 = vst [vmem:[%s2844_s29 + $0x80] sm:$0xff] %v2217_v18   ;;  %v1317_v30 = vadd.f32 %v2830_v48, %v1246_v19  ;;  %v1219_v31 = vmul.f32 %v2823_v42, %v656_v20  ;;  %v776_v32 = vadd.f32 %v2818_v40, %v775_v22  ;;  %v650_v33 = vpop.f32.mrb[7].mxu0  ;;  %v778_v34 = vpop.f32.mrb[7].mxu1 }
 0x105   : > { %v2382_v35 = vpack.c.bf16 %v1383_v23, %v1382_v8  ;;  %v1349_v36 = vmax.f32 %v1285_v24, 0.0  ;;  %v1251_v37 = vmul.f32 %v2823_v42, %v784_v25  ;;  %v1217_v38 = vmul.f32 %v2823_v42, %v648_v26 }
 0x106   : > { %2485 = vst [vmem:[%s2866_s9 + $0x8] sm:$0xff] %v2302_v29   ;;  %v1381_v39 = vmax.f32 %v1317_v30, 0.0  ;;  %v1290_v41 = vadd.f32 %v2830_v48, %v1219_v31  ;;  %v1249_v43 = vmul.f32 %v2823_v42, %v776_v32  ;;  %v659_v44 = vadd.f32 %v2579_v27, %v2818_v40 }
 0x107   : > { %2501 = vst [vmem:[%s2866_s9 + $0x88] sm:$0xff] %v2382_v35   ;;  %v2297_v45 = vpack.c.bf16 %v1349_v36, %v1348_v11  ;;  %v1322_v46 = vadd.f32 %v2830_v48, %v1251_v37  ;;  %v1288_v47 = vadd.f32 %v2830_v48, %v1217_v38  ;;  %v787_v49 = vadd.f32 %v2611_v28, %v2818_v40 }
 0x108   : > { %v2377_v50 = vpack.c.bf16 %v1381_v39, %v1380_v12  ;;  %v1354_v51 = vmax.f32 %v1290_v41, 0.0  ;;  %v2886_v52 = vadd.f32 %v2830_v48, %v1249_v43  ;;  %v2152_v53 = vpack.c.bf16 %v659_v44, %v656_v20 }
 0x109   : > { %2298 = vst [vmem:[%s2866_s9] sm:$0xff] %v2297_v45   ;;  %v1386_v54 = vmax.f32 %v1322_v46, 0.0  ;;  %v1352_v55 = vmax.f32 %v1288_v47, 0.0  ;;  %v1220_v56 = vmul.f32 %v2823_v42, %v659_v44  ;;  %v2232_v57 = vpack.c.bf16 %v787_v49, %v784_v25  ;;  %v2582_v58 = vpop.f32.mrb[8].mxu0  ;;  %v2614_v59 = vpop.f32.mrb[8].mxu1 }
 0x10a   : > { %2500 = vst [vmem:[%s2866_s9 + $0x80] sm:$0xff] %v2377_v50   ;;  %v1384_v60 = vmax.f32 %v2886_v52, 0.0  ;;  %2456 = vst [vmem:[%s2844_s29 + $0x18] sm:$0xff] %v2152_v53   ;;  %v1252_v61 = vmul.f32 %v2823_v42, %v787_v49  ;;  %v651_v62 = vadd.f32 %v2818_v40, %v650_v33  ;;  %v779_v63 = vadd.f32 %v2818_v40, %v778_v34  ;;  %v663_v0 = vpop.f32.mrb[9].mxu0  ;;  %v791_v1 = vpop.f32.mrb[9].mxu1 }
 0x10b   : > { %v1291_v2 = vadd.f32 %v2830_v48, %v1220_v56  ;;  %2472 = vst [vmem:[%s2844_s29 + $0x98] sm:$0xff] %v2232_v57   ;;  %v672_v3 = vadd.f32 %v2582_v58, %v2818_v40  ;;  %v800_v4 = vadd.f32 %v2614_v59, %v2818_v40  ;;  %v2901_v5 = vadd.f32 %v2818_v40, %v663_v0  ;;  %v2583_v6 = vpop.f32.mrb[10].mxu0  ;;  %v2615_v7 = vpop.f32.mrb[10].mxu1 }
 0x10c   : > { %v1323_v8 = vadd.f32 %v2830_v48, %v1252_v61  ;;  %v2147_v9 = vpack.c.bf16 %v651_v62, %v648_v26  ;;  %v1218_v10 = vmul.f32 %v2823_v42, %v651_v62  ;;  %v2227_v11 = vpack.c.bf16 %v779_v63, %v776_v32  ;;  %v666_v12 = vpop.f32.mrb[11].mxu0  ;;  %v794_v13 = vpop.f32.mrb[11].mxu1 }
 0x10d   : > { %v1355_v14 = vmax.f32 %v1291_v2, 0.0  ;;  %v1250_v15 = vmul.f32 %v2823_v42, %v779_v63  ;;  %v1223_v16 = vmul.f32 %v2823_v42, %v672_v3  ;;  %v1255_v17 = vmul.f32 %v2823_v42, %v800_v4 }
 0x10e   : > { %v1387_v18 = vmax.f32 %v1323_v8, 0.0  ;;  %2455 = vst [vmem:[%s2844_s29 + $0x10] sm:$0xff] %v2147_v9   ;;  %v1289_v19 = vadd.f32 %v2830_v48, %v1218_v10  ;;  %2471 = vst [vmem:[%s2844_s29 + $0x90] sm:$0xff] %v2227_v11   ;;  %v1221_v20 = vmul.f32 %v2823_v42, %v2901_v5  ;;  %v792_v21 = vadd.f32 %v2818_v40, %v791_v1 }
 0x10f   : > { %v2312_v22 = vpack.c.bf16 %v1355_v14, %v1354_v51  ;;  %v1321_v23 = vadd.f32 %v2830_v48, %v1250_v15  ;;  %v1294_v24 = vadd.f32 %v2830_v48, %v1223_v16  ;;  %v1326_v25 = vadd.f32 %v2830_v48, %v1255_v17 }
 0x110   : > { %v2392_v26 = vpack.c.bf16 %v1387_v18, %v1386_v54  ;;  %v1353_v27 = vmax.f32 %v1289_v19, 0.0  ;;  %v2918_v28 = vadd.f32 %v2830_v48, %v1221_v20  ;;  %v1253_v29 = vmul.f32 %v2823_v42, %v792_v21 }
 0x111   : > { %2487 = vst [vmem:[%s2866_s9 + $0x18] sm:$0xff] %v2312_v22   ;;  %v1385_v30 = vmax.f32 %v1321_v23, 0.0  ;;  %v1358_v31 = vmax.f32 %v1294_v24, 0.0  ;;  %v1390_v32 = vmax.f32 %v1326_v25, 0.0  ;;  %v675_v33 = vadd.f32 %v2583_v6, %v2818_v40  ;;  %v2586_v34 = vpop.f32.mrb[12].mxu0  ;;  %v2618_v35 = vpop.f32.mrb[12].mxu1 }
 0x112   : > { %2503 = vst [vmem:[%s2866_s9 + $0x98] sm:$0xff] %v2392_v26   ;;  %v2307_v36 = vpack.c.bf16 %v1353_v27, %v1352_v55  ;;  %v1356_v37 = vmax.f32 %v2918_v28, 0.0  ;;  %v1324_v38 = vadd.f32 %v2830_v48, %v1253_v29  ;;  %v803_v39 = vadd.f32 %v2615_v7, %v2818_v40  ;;  %v679_v41 = vpop.f32.mrb[13].mxu0  ;;  %v807_v43 = vpop.f32.mrb[13].mxu1 }
 0x113   : > { %v2387_v44 = vpack.c.bf16 %v1385_v30, %v1384_v60  ;;  %v2162_v45 = vpack.c.bf16 %v675_v33, %v672_v3  ;;  %v1224_v46 = vmul.f32 %v2823_v42, %v675_v33  ;;  %v667_v47 = vadd.f32 %v2818_v40, %v666_v12  ;;  %v2587_v49 = vpop.f32.mrb[14].mxu0  ;;  %v2619_v50 = vpop.f32.mrb[14].mxu1 }
 0x114   : > { %2486 = vst [vmem:[%s2866_s9 + $0x10] sm:$0xff] %v2307_v36   ;;  %v1388_v51 = vmax.f32 %v1324_v38, 0.0  ;;  %v2242_v52 = vpack.c.bf16 %v803_v39, %v800_v4  ;;  %v1256_v53 = vmul.f32 %v2823_v42, %v803_v39  ;;  %v795_v54 = vadd.f32 %v2818_v40, %v794_v13  ;;  %v682_v55 = vpop.f32.mrb[15].mxu0  ;;  %v810_v56 = vpop.f32.mrb[15].mxu1 }
 0x115   : > { %2502 = vst [vmem:[%s2866_s9 + $0x90] sm:$0xff] %v2387_v44   ;;  %2458 = vst [vmem:[%s2844_s29 + $0x28] sm:$0xff] %v2162_v45   ;;  %v1295_v57 = vadd.f32 %v2830_v48, %v1224_v46  ;;  %v2157_v58 = vpack.c.bf16 %v667_v47, %v2901_v5  ;;  %v1222_v59 = vmul.f32 %v2823_v42, %v667_v47 }
 0x116   : > { %v688_v60 = vadd.f32 %v2586_v34, %v2818_v40  ;;  %2474 = vst [vmem:[%s2844_s29 + $0xa8] sm:$0xff] %v2242_v52   ;;  %v1327_v61 = vadd.f32 %v2830_v48, %v1256_v53  ;;  %v2237_v62 = vpack.c.bf16 %v795_v54, %v792_v21  ;;  %v1254_v63 = vmul.f32 %v2823_v42, %v795_v54 }
 0x117   : > { %v816_v0 = vadd.f32 %v2618_v35, %v2818_v40  ;;  %v1359_v1 = vmax.f32 %v1295_v57, 0.0  ;;  %2457 = vst [vmem:[%s2844_s29 + $0x20] sm:$0xff] %v2157_v58   ;;  %v1293_v2 = vadd.f32 %v2830_v48, %v1222_v59  ;;  %v680_v4 = vadd.f32 %v2818_v40, %v679_v41 }
 0x118   : > { %v1227_v3 = vmul.f32 %v2823_v42, %v688_v60  ;;  %v1391_v5 = vmax.f32 %v1327_v61, 0.0  ;;  %2473 = vst [vmem:[%s2844_s29 + $0xa0] sm:$0xff] %v2237_v62   ;;  %v1325_v6 = vadd.f32 %v2830_v48, %v1254_v63  ;;  %v808_v8 = vadd.f32 %v2818_v40, %v807_v43 }
 0x119   : > { %v1259_v7 = vmul.f32 %v2823_v42, %v816_v0  ;;  %v2322_v9 = vpack.c.bf16 %v1359_v1, %v1358_v31  ;;  %v1357_v10 = vmax.f32 %v1293_v2, 0.0  ;;  %v1225_v12 = vmul.f32 %v2823_v42, %v680_v4  ;;  %v2590_v13 = vpop.f32.mrb[16].mxu0  ;;  %v2622_v14 = vpop.f32.mrb[16].mxu1 }
 0x11a   : > { %v1298_v11 = vadd.f32 %v2830_v48, %v1227_v3  ;;  %v2402_v15 = vpack.c.bf16 %v1391_v5, %v1390_v32  ;;  %v1389_v16 = vmax.f32 %v1325_v6, 0.0  ;;  %v1257_v18 = vmul.f32 %v2823_v42, %v808_v8  ;;  %v695_v19 = vpop.f32.mrb[17].mxu0  ;;  %v823_v20 = vpop.f32.mrb[17].mxu1 }
 0x11b   : > { %v1330_v17 = vadd.f32 %v2830_v48, %v1259_v7  ;;  %2489 = vst [vmem:[%s2866_s9 + $0x28] sm:$0xff] %v2322_v9   ;;  %v2317_v21 = vpack.c.bf16 %v1357_v10, %v1356_v37  ;;  %v1296_v23 = vadd.f32 %v2830_v48, %v1225_v12  ;;  %v691_v24 = vadd.f32 %v2587_v49, %v2818_v40  ;;  %v2591_v25 = vpop.f32.mrb[18].mxu0  ;;  %v2957_v26 = vpop.f32.mrb[18].mxu1 }
 0x11c   : > { %v1362_v22 = vmax.f32 %v1298_v11, 0.0  ;;  %2505 = vst [vmem:[%s2866_s9 + $0xa8] sm:$0xff] %v2402_v15   ;;  %v2397_v27 = vpack.c.bf16 %v1389_v16, %v1388_v51  ;;  %v1328_v29 = vadd.f32 %v2830_v48, %v1257_v18  ;;  %v819_v30 = vadd.f32 %v2619_v50, %v2818_v40  ;;  %v698_v31 = vpop.f32.mrb[19].mxu0  ;;  %v2962_v32 = vpop.f32.mrb[19].mxu1 }
 0x11d   : > { %v1394_v28 = vmax.f32 %v1330_v17, 0.0  ;;  %2488 = vst [vmem:[%s2866_s9 + $0x20] sm:$0xff] %v2317_v21   ;;  %v1360_v33 = vmax.f32 %v1296_v23, 0.0  ;;  %v2172_v34 = vpack.c.bf16 %v691_v24, %v688_v60  ;;  %v1228_v35 = vmul.f32 %v2823_v42, %v691_v24 }
 0x11e   : > { %v683_v36 = vadd.f32 %v2818_v40, %v682_v55  ;;  %2504 = vst [vmem:[%s2866_s9 + $0xa0] sm:$0xff] %v2397_v27   ;;  %v1392_v37 = vmax.f32 %v1328_v29, 0.0  ;;  %v2252_v38 = vpack.c.bf16 %v819_v30, %v816_v0  ;;  %v1260_v39 = vmul.f32 %v2823_v42, %v819_v30 }
 0x11f   : > { %v811_v41 = vadd.f32 %v2818_v40, %v810_v56  ;;  %2460 = vst [vmem:[%s2844_s29 + $0x38] sm:$0xff] %v2172_v34   ;;  %v1299_v43 = vadd.f32 %v2830_v48, %v1228_v35  ;;  %v704_v46 = vadd.f32 %v2590_v13, %v2818_v40  ;;  %v832_v51 = vadd.f32 %v2622_v14, %v2818_v40 }
 0x120   : > { %v2167_v44 = vpack.c.bf16 %v683_v36, %v680_v4  ;;  %v1226_v45 = vmul.f32 %v2823_v42, %v683_v36  ;;  %2476 = vst [vmem:[%s2844_s29 + $0xb8] sm:$0xff] %v2252_v38   ;;  %v1331_v47 = vadd.f32 %v2830_v48, %v1260_v39  ;;  %v696_v55 = vadd.f32 %v2818_v40, %v695_v19 }
 0x121   : > { %v2247_v49 = vpack.c.bf16 %v811_v41, %v808_v8  ;;  %v1258_v50 = vmul.f32 %v2823_v42, %v811_v41  ;;  %v1363_v52 = vmax.f32 %v1299_v43, 0.0  ;;  %v1231_v54 = vmul.f32 %v2823_v42, %v704_v46  ;;  %v2594_v56 = vpop.f32.mrb[20].mxu0  ;;  %v2626_v57 = vpop.f32.mrb[20].mxu1 }
 0x122   : > { %2459 = vst [vmem:[%s2844_s29 + $0x30] sm:$0xff] %v2167_v44   ;;  %v1297_v53 = vadd.f32 %v2830_v48, %v1226_v45  ;;  %v1395_v58 = vmax.f32 %v1331_v47, 0.0  ;;  %v1263_v60 = vmul.f32 %v2823_v42, %v832_v51  ;;  %v824_v61 = vadd.f32 %v2818_v40, %v823_v20  ;;  %v711_v62 = vpop.f32.mrb[21].mxu0  ;;  %v839_v63 = vpop.f32.mrb[21].mxu1 }
 0x123   : > { %2475 = vst [vmem:[%s2844_s29 + $0xb0] sm:$0xff] %v2247_v49   ;;  %v1329_v59 = vadd.f32 %v2830_v48, %v1258_v50  ;;  %v2332_v0 = vpack.c.bf16 %v1363_v52, %v1362_v22  ;;  %v1302_v2 = vadd.f32 %v2830_v48, %v1231_v54  ;;  %v1229_v3 = vmul.f32 %v2823_v42, %v696_v55  ;;  %v2988_v4 = vpop.f32.mrb[22].mxu0  ;;  %v2990_v5 = vpop.f32.mrb[22].mxu1 }
 0x124   : > { %v1361_v1 = vmax.f32 %v1297_v53, 0.0  ;;  %v2412_v6 = vpack.c.bf16 %v1395_v58, %v1394_v28  ;;  %v1334_v8 = vadd.f32 %v2830_v48, %v1263_v60  ;;  %v1261_v9 = vmul.f32 %v2823_v42, %v824_v61  ;;  %v2994_v10 = vpop.f32.mrb[23].mxu0  ;;  %v2996_v11 = vpop.f32.mrb[23].mxu1 }
 0x125   : > { %v1393_v7 = vmax.f32 %v1329_v59, 0.0  ;;  %2491 = vst [vmem:[%s2866_s9 + $0x38] sm:$0xff] %v2332_v0   ;;  %v1366_v13 = vmax.f32 %v1302_v2, 0.0  ;;  %v1300_v14 = vadd.f32 %v2830_v48, %v1229_v3  ;;  %v707_v15 = vadd.f32 %v2591_v25, %v2818_v40 }
 0x126   : > { %v2327_v12 = vpack.c.bf16 %v1361_v1, %v1360_v33  ;;  %2507 = vst [vmem:[%s2866_s9 + $0xb8] sm:$0xff] %v2412_v6   ;;  %v1398_v17 = vmax.f32 %v1334_v8, 0.0  ;;  %v1332_v18 = vadd.f32 %v2830_v48, %v1261_v9  ;;  %v835_v19 = vadd.f32 %v2957_v26, %v2818_v40 }
 0x127   : > { %v2407_v16 = vpack.c.bf16 %v1393_v7, %v1392_v37  ;;  %v1364_v20 = vmax.f32 %v1300_v14, 0.0  ;;  %v2182_v21 = vpack.c.bf16 %v707_v15, %v704_v46  ;;  %v1232_v22 = vmul.f32 %v2823_v42, %v707_v15 }
 0x128   : > { %2490 = vst [vmem:[%s2866_s9 + $0x30] sm:$0xff] %v2327_v12   ;;  %v699_v23 = vadd.f32 %v2818_v40, %v698_v31  ;;  %v1396_v24 = vmax.f32 %v1332_v18, 0.0  ;;  %v2262_v25 = vpack.c.bf16 %v835_v19, %v832_v51  ;;  %v1264_v27 = vmul.f32 %v2823_v42, %v835_v19 }
 0x129   : > { %2506 = vst [vmem:[%s2866_s9 + $0xb0] sm:$0xff] %v2407_v16   ;;  %v827_v28 = vadd.f32 %v2818_v40, %v2962_v32  ;;  %2462 = vst [vmem:[%s2844_s29 + $0x48] sm:$0xff] %v2182_v21   ;;  %v1303_v26 = vadd.f32 %v2830_v48, %v1232_v22  ;;  %v720_v33 = vadd.f32 %v2594_v56, %v2818_v40  ;;  %v2598_v34 = vpop.f32.mrb[24].mxu0  ;;  %v3016_v35 = vpop.f32.mrb[24].mxu1 }
 0x12a   : > { %v2177_v29 = vpack.c.bf16 %v699_v23, %v696_v55  ;;  %v1230_v30 = vmul.f32 %v2823_v42, %v699_v23  ;;  %2478 = vst [vmem:[%s2844_s29 + $0xc8] sm:$0xff] %v2262_v25   ;;  %v1335_v31 = vadd.f32 %v2830_v48, %v1264_v27  ;;  %v848_v32 = vadd.f32 %v2626_v57, %v2818_v40  ;;  %v3022_v38 = vpop.f32.mrb[25].mxu0  ;;  %v3024_v39 = vpop.f32.mrb[25].mxu1 }
 0x12b   : > { %v2257_v36 = vpack.c.bf16 %v827_v28, %v824_v61  ;;  %v1262_v37 = vmul.f32 %v2823_v42, %v827_v28  ;;  %v1367_v41 = vmax.f32 %v1303_v26, 0.0  ;;  %v1235_v44 = vmul.f32 %v2823_v42, %v720_v33  ;;  %v3030_v46 = vpop.f32.mrb[26].mxu0  ;;  %v3032_v47 = vpop.f32.mrb[26].mxu1 }
 0x12c   : > { %2461 = vst [vmem:[%s2844_s29 + $0x40] sm:$0xff] %v2177_v29   ;;  %v1301_v43 = vadd.f32 %v2830_v48, %v1230_v30  ;;  %v712_v45 = vadd.f32 %v2818_v40, %v711_v62  ;;  %v1399_v49 = vmax.f32 %v1335_v31, 0.0  ;;  %v1267_v51 = vmul.f32 %v2823_v42, %v848_v32  ;;  %v3038_v53 = vpop.f32.mrb[27].mxu0  ;;  %v3040_v54 = vpop.f32.mrb[27].mxu1 }
 0x12d   : > { %2477 = vst [vmem:[%s2844_s29 + $0xc0] sm:$0xff] %v2257_v36   ;;  %v1333_v50 = vadd.f32 %v2830_v48, %v1262_v37  ;;  %v840_v52 = vadd.f32 %v2818_v40, %v839_v63  ;;  %v2342_v55 = vpack.c.bf16 %v1367_v41, %v1366_v13  ;;  %v1306_v57 = vadd.f32 %v2830_v48, %v1235_v44 }
 0x12e   : > { %v1365_v56 = vmax.f32 %v1301_v43, 0.0  ;;  %v1233_v58 = vmul.f32 %v2823_v42, %v712_v45  ;;  %v2422_v59 = vpack.c.bf16 %v1399_v49, %v1398_v17  ;;  %v1338_v61 = vadd.f32 %v2830_v48, %v1267_v51 }
 0x12f   : > { %v1397_v60 = vmax.f32 %v1333_v50, 0.0  ;;  %v1265_v62 = vmul.f32 %v2823_v42, %v840_v52  ;;  %2493 = vst [vmem:[%s2866_s9 + $0x48] sm:$0xff] %v2342_v55   ;;  %v723_v0 = vadd.f32 %v2988_v4, %v2818_v40  ;;  %v1370_v2 = vmax.f32 %v1306_v57, 0.0 }
 0x130   : > { %v2337_v63 = vpack.c.bf16 %v1365_v56, %v1364_v20  ;;  %2509 = vst [vmem:[%s2866_s9 + $0xc8] sm:$0xff] %v2422_v59   ;;  %v1304_v3 = vadd.f32 %v2830_v48, %v1233_v58  ;;  %v851_v6 = vadd.f32 %v2990_v5, %v2818_v40  ;;  %v1402_v7 = vmax.f32 %v1338_v61, 0.0 }
 0x131   : > { %v2417_v1 = vpack.c.bf16 %v1397_v60, %v1396_v24  ;;  %v2192_v8 = vpack.c.bf16 %v723_v0, %v720_v33  ;;  %v1236_v9 = vmul.f32 %v2823_v42, %v723_v0  ;;  %v715_v12 = vadd.f32 %v2818_v40, %v2994_v10  ;;  %v3057_v13 = vpop.f32.mrb[28].mxu0  ;;  %v3059_v4 = vpop.f32.mrb[28].mxu1 }
 0x132   : > { %2492 = vst [vmem:[%s2866_s9 + $0x40] sm:$0xff] %v2337_v63   ;;  %v1336_v14 = vadd.f32 %v2830_v48, %v1265_v62  ;;  %v2272_v15 = vpack.c.bf16 %v851_v6, %v848_v32  ;;  %v1268_v16 = vmul.f32 %v2823_v42, %v851_v6  ;;  %v843_v5 = vadd.f32 %v2818_v40, %v2996_v11  ;;  %v3066_v17 = vpop.f32.mrb[29].mxu0  ;;  %v3068_v18 = vpop.f32.mrb[29].mxu1 }
 0x133   : > { %2508 = vst [vmem:[%s2866_s9 + $0xc0] sm:$0xff] %v2417_v1   ;;  %2464 = vst [vmem:[%s2844_s29 + $0x58] sm:$0xff] %v2192_v8   ;;  %v1307_v10 = vadd.f32 %v2830_v48, %v1236_v9  ;;  %v2187_v19 = vpack.c.bf16 %v715_v12, %v712_v45  ;;  %v1234_v20 = vmul.f32 %v2823_v42, %v715_v12  ;;  %v3074_v22 = vpop.f32.mrb[30].mxu0  ;;  %v3076_v23 = vpop.f32.mrb[30].mxu1  ;;  %v1368_v32 = vmax.f32 %v1304_v3, 0.0 }
 0x134   : > { %v736_v21 = vadd.f32 %v2598_v34, %v2818_v40  ;;  %2480 = vst [vmem:[%s2844_s29 + $0xd8] sm:$0xff] %v2272_v15   ;;  %v1339_v11 = vadd.f32 %v2830_v48, %v1268_v16  ;;  %v2267_v24 = vpack.c.bf16 %v843_v5, %v840_v52  ;;  %v1266_v25 = vmul.f32 %v2823_v42, %v843_v5  ;;  %v3083_v28 = vpop.f32.mrb[31].mxu0  ;;  %v3085_v26 = vpop.f32.mrb[31].mxu1 }
 0x135   : > { %v864_v27 = vadd.f32 %v3016_v35, %v2818_v40  ;;  %v1371_v29 = vmax.f32 %v1307_v10, 0.0  ;;  %2463 = vst [vmem:[%s2844_s29 + $0x50] sm:$0xff] %v2187_v19   ;;  %v1305_v30 = vadd.f32 %v2830_v48, %v1234_v20  ;;  %v728_v34 = vadd.f32 %v2818_v40, %v3022_v38 }
 0x136   : > { %v1239_v33 = vmul.f32 %v2823_v42, %v736_v21  ;;  %v1403_v31 = vmax.f32 %v1339_v11, 0.0  ;;  %2479 = vst [vmem:[%s2844_s29 + $0xd0] sm:$0xff] %v2267_v24   ;;  %v1337_v36 = vadd.f32 %v2830_v48, %v1266_v25  ;;  %v856_v37 = vadd.f32 %v2818_v40, %v3024_v39 }
 0x137   : > { %v1271_v35 = vmul.f32 %v2823_v42, %v864_v27  ;;  %v2352_v41 = vpack.c.bf16 %v1371_v29, %v1370_v2  ;;  %v1369_v43 = vmax.f32 %v1305_v30, 0.0  ;;  %v1237_v44 = vmul.f32 %v2823_v42, %v728_v34 }
 0x138   : > { %v1400_v45 = vmax.f32 %v1336_v14, 0.0  ;;  %v2432_v49 = vpack.c.bf16 %v1403_v31, %v1402_v7  ;;  %v1401_v38 = vmax.f32 %v1337_v36, 0.0  ;;  %v1269_v50 = vmul.f32 %v2823_v42, %v856_v37 }
 0x139   : > { %2495 = vst [vmem:[%s2866_s9 + $0x58] sm:$0xff] %v2352_v41   ;;  %v2347_v51 = vpack.c.bf16 %v1369_v43, %v1368_v32  ;;  %v739_v52 = vadd.f32 %v3030_v46, %v2818_v40  ;;  %v1310_v55 = vadd.f32 %v2830_v48, %v1239_v33  ;;  %v1342_v56 = vadd.f32 %v2830_v48, %v1271_v35 }
 0x13a   : > { %2511 = vst [vmem:[%s2866_s9 + $0xd8] sm:$0xff] %v2432_v49   ;;  %v2427_v39 = vpack.c.bf16 %v1401_v38, %v1400_v45  ;;  %v867_v57 = vadd.f32 %v3032_v47, %v2818_v40  ;;  %v1308_v58 = vadd.f32 %v2830_v48, %v1237_v44  ;;  %v731_v46 = vadd.f32 %v2818_v40, %v3038_v53 }
 0x13b   : > { %2494 = vst [vmem:[%s2866_s9 + $0x50] sm:$0xff] %v2347_v51   ;;  %v2202_v59 = vpack.c.bf16 %v739_v52, %v736_v21  ;;  %v1240_v60 = vmul.f32 %v2823_v42, %v739_v52  ;;  %v1340_v61 = vadd.f32 %v2830_v48, %v1269_v50  ;;  %v859_v47 = vadd.f32 %v2818_v40, %v3040_v54 }
 0x13c   : > { %2510 = vst [vmem:[%s2866_s9 + $0xd0] sm:$0xff] %v2427_v39   ;;  %v2282_v62 = vpack.c.bf16 %v867_v57, %v864_v27  ;;  %v1272_v63 = vmul.f32 %v2823_v42, %v867_v57  ;;  %v2197_v1 = vpack.c.bf16 %v731_v46, %v728_v34  ;;  %v1238_v2 = vmul.f32 %v2823_v42, %v731_v46 }
 0x13d   : > { %2466 = vst [vmem:[%s2844_s29 + $0x68] sm:$0xff] %v2202_v59   ;;  %v1311_v0 = vadd.f32 %v2830_v48, %v1240_v60  ;;  %v752_v53 = vadd.f32 %v3057_v13, %v2818_v40  ;;  %v2277_v6 = vpack.c.bf16 %v859_v47, %v856_v37  ;;  %v1270_v7 = vmul.f32 %v2823_v42, %v859_v47 }
 0x13e   : > { %2482 = vst [vmem:[%s2844_s29 + $0xe8] sm:$0xff] %v2282_v62   ;;  %v1343_v3 = vadd.f32 %v2830_v48, %v1272_v63  ;;  %v880_v8 = vadd.f32 %v3059_v4, %v2818_v40  ;;  %v1374_v54 = vmax.f32 %v1310_v55, 0.0  ;;  %2465 = vst [vmem:[%s2844_s29 + $0x60] sm:$0xff] %v2197_v1   ;;  %v1309_v12 = vadd.f32 %v2830_v48, %v1238_v2 }
 0x13f   : > { %v1375_v9 = vmax.f32 %v1311_v0, 0.0  ;;  %v744_v14 = vadd.f32 %v2818_v40, %v3066_v17  ;;  %v1406_v15 = vmax.f32 %v1342_v56, 0.0  ;;  %2481 = vst [vmem:[%s2844_s29 + $0xe0] sm:$0xff] %v2277_v6   ;;  %v1341_v16 = vadd.f32 %v2830_v48, %v1270_v7 }
 0x140   : > { %v1407_v13 = vmax.f32 %v1343_v3, 0.0  ;;  %v872_v5 = vadd.f32 %v2818_v40, %v3068_v18  ;;  %v1372_v10 = vmax.f32 %v1308_v58, 0.0  ;;  %v1373_v19 = vmax.f32 %v1309_v12, 0.0 }
 0x141   : > { %v2362_v4 = vpack.c.bf16 %v1375_v9, %v1374_v54  ;;  %v1243_v20 = vmul.f32 %v2823_v42, %v752_v53  ;;  %v1404_v21 = vmax.f32 %v1340_v61, 0.0  ;;  %v1405_v24 = vmax.f32 %v1341_v16, 0.0 }
 0x142   : > { %v2442_v11 = vpack.c.bf16 %v1407_v13, %v1406_v15  ;;  %v1275_v17 = vmul.f32 %v2823_v42, %v880_v8  ;;  %v2357_v25 = vpack.c.bf16 %v1373_v19, %v1372_v10  ;;  %v1241_v27 = vmul.f32 %v2823_v42, %v744_v14 }
 0x143   : > { %2497 = vst [vmem:[%s2866_s9 + $0x68] sm:$0xff] %v2362_v4   ;;  %v755_v29 = vadd.f32 %v3074_v22, %v2818_v40  ;;  %v2437_v18 = vpack.c.bf16 %v1405_v24, %v1404_v21  ;;  %v1273_v30 = vmul.f32 %v2823_v42, %v872_v5  ;;  %v883_v33 = vadd.f32 %v3076_v23, %v2818_v40 }
 0x144   : > { %2513 = vst [vmem:[%s2866_s9 + $0xe8] sm:$0xff] %v2442_v11   ;;  %2496 = vst [vmem:[%s2866_s9 + $0x60] sm:$0xff] %v2357_v25   ;;  %v1314_v34 = vadd.f32 %v2830_v48, %v1243_v20  ;;  %v747_v35 = vadd.f32 %v2818_v40, %v3083_v28  ;;  %v1346_v22 = vadd.f32 %v2830_v48, %v1275_v17 }
 0x145   : > { %v2212_v31 = vpack.c.bf16 %v755_v29, %v752_v53  ;;  %v1244_v36 = vmul.f32 %v2823_v42, %v755_v29  ;;  %2512 = vst [vmem:[%s2866_s9 + $0xe0] sm:$0xff] %v2437_v18   ;;  %v2292_v37 = vpack.c.bf16 %v883_v33, %v880_v8  ;;  %v1276_v32 = vmul.f32 %v2823_v42, %v883_v33 }
 0x146   : > { %v875_v23 = vadd.f32 %v2818_v40, %v3085_v26  ;;  %v1312_v41 = vadd.f32 %v2830_v48, %v1241_v27  ;;  %v2207_v44 = vpack.c.bf16 %v747_v35, %v744_v14  ;;  %v1242_v45 = vmul.f32 %v2823_v42, %v747_v35 }
 0x147   : > { %2468 = vst [vmem:[%s2844_s29 + $0x78] sm:$0xff] %v2212_v31   ;;  %v1315_v43 = vadd.f32 %v2830_v48, %v1244_v36  ;;  %v1344_v28 = vadd.f32 %v2830_v48, %v1273_v30  ;;  %2484 = vst [vmem:[%s2844_s29 + $0xf8] sm:$0xff] %v2292_v37   ;;  %v1347_v49 = vadd.f32 %v2830_v48, %v1276_v32  ;;  %v1378_v51 = vmax.f32 %v1314_v34, 0.0 }
 0x148   : > { %v2287_v38 = vpack.c.bf16 %v875_v23, %v872_v5  ;;  %v1274_v50 = vmul.f32 %v2823_v42, %v875_v23  ;;  %2467 = vst [vmem:[%s2844_s29 + $0x70] sm:$0xff] %v2207_v44   ;;  %v1313_v26 = vadd.f32 %v2830_v48, %v1242_v45  ;;  %v1410_v52 = vmax.f32 %v1346_v22, 0.0 }
 0x149   : > { %v1379_v40 = vmax.f32 %v1315_v43, 0.0  ;;  %v1411_v39 = vmax.f32 %v1347_v49, 0.0  ;;  %v1376_v56 = vmax.f32 %v1312_v41, 0.0  ;;  %v1408_v59 = vmax.f32 %v1344_v28, 0.0 }
 0x14a   : > { %2483 = vst [vmem:[%s2844_s29 + $0xf0] sm:$0xff] %v2287_v38   ;;  %v1345_v55 = vadd.f32 %v2830_v48, %v1274_v50  ;;  %v1377_v58 = vmax.f32 %v1313_v26, 0.0 }
 0x14b   : > { %v2372_v57 = vpack.c.bf16 %v1379_v40, %v1378_v51  ;;  %v2452_v60 = vpack.c.bf16 %v1411_v39, %v1410_v52 }
 0x14c   : > { %v1409_v46 = vmax.f32 %v1345_v55, 0.0  ;;  %v2367_v42 = vpack.c.bf16 %v1377_v58, %v1376_v56 }
 0x14d   : > { %2499 = vst [vmem:[%s2866_s9 + $0x78] sm:$0xff] %v2372_v57   ;;  %2515 = vst [vmem:[%s2866_s9 + $0xf8] sm:$0xff] %v2452_v60  }
 0x14e   : > { %v2447_v61 = vpack.c.bf16 %v1409_v46, %v1408_v59  ;;  %2498 = vst [vmem:[%s2866_s9 + $0x70] sm:$0xff] %v2367_v42  }
 0x150   : > { %2514 = vst [vmem:[%s2866_s9 + $0xf0] sm:$0xff] %v2447_v61  }
 0x151 PF: > { %s17_s21 = sadd.s32 1, %s2706_s21  }
 0x152   : > { %p14_p4 = scmp.ge.s32.totalorder %s17_s21, 6  }
 0x154   :  { %16 = sbr.rel (!%p14_p4) target bundleno = 1 (0x1), region = 82 }

// kernel: wide_resnet_forward.9
= control target key start
LH: loop header
LB: loop body
LE: loop exit
PB: predicated region body
PF: predicated region fallthrough
CT: control target
= control target key end

     0   :  { %s2189_s15 = smov 0   ;;  %s2528_s0 = inlined_call_operand.vmem [shape: bf16[2048,256], index: 0, kind: input, shape index: {}]   ;;  %s2529_s1 = inlined_call_operand.vmem [shape: bf16[256,128], index: 1, kind: input, shape index: {}]   ;;  %s2530_s2 = inlined_call_operand.vmem [shape: f32[1,128], index: 2, kind: input, shape index: {}]   ;;  %s2531_s3 = inlined_call_operand.vmem [shape: f32[1,128], index: 3, kind: input, shape index: {}]   ;;  %s2532_s4 = inlined_call_operand.vmem [shape: bf16[2048,128], index: 4, kind: output, shape index: {}]  }
   0x1 LB: > { %s1588_s16 = sadd.s32 4294967295, %s2161_s15   ;;  %p1592_p0 = scmp.ge.s32.totalorder %s2161_s15, 1  ;;  %s2161_s15 = sphi %s2189_s15, %s14_s15  }
   0x2   : > { %p164_p1 = scmp.lt.s32.totalorder %s2161_s15, 5 }
   0x4   : > { %p165_p2 = pnand %p1592_p0, %p164_p1 }
   0x5   : > { %v2043_v0 = vld [vmem:[%s2529_s1] sm:$0xff] (!%p165_p2)   ;;  %v2163_v1 = vmov (!%p165_p2), 0   ;;  %s1593_s19 = sshll.u32 (!%p165_p2), %s1588_s16, 6  ;;  %v2044_v2 = vld [vmem:[%s2529_s1 + $0x8] sm:$0xff] (!%p165_p2)   ;;  %v2045_v3 = vld [vmem:[%s2529_s1 + $0x10] sm:$0xff] (!%p165_p2)  }
   0x6   : > { %168 = sbr.rel (%p165_p2) target bundleno = 414 (0x19e), region = 36  ;;  %717 = vmatprep.subr.bf16.mxu0 (!%p165_p2), %v2163_v1  ;;  %2002 = vmatprep.subr.bf16.mxu1 (!%p165_p2), %v2163_v1  ;;  %p192_p3 = scmp.lt.s32.totalorder (!%p165_p2), %s1593_s19, 255  ;;  %v2046_v4 = vld [vmem:[%s2529_s1 + $0x18] sm:$0xff] (!%p165_p2)   ;;  %v2047_v5 = vld [vmem:[%s2529_s1 + $0x20] sm:$0xff] (!%p165_p2)   ;;  %v2048_v7 = vld [vmem:[%s2529_s1 + $0x28] sm:$0xff] (!%p165_p2)  }
   0x7   : > { %718 = vmatpush1.bf16.msra.mxu0 (!%p165_p2), %v2043_v0  ;;  %2018 = vmatpush1.bf16.msra.mxu1 (!%p165_p2), %v2043_v0  ;;  %v2049_v9 = vld [vmem:[%s2529_s1 + $0x30] sm:$0xff] (!%p165_p2)   ;;  %v2050_v10 = vld [vmem:[%s2529_s1 + $0x38] sm:$0xff] (!%p165_p2)   ;;  %v2051_v11 = vld [vmem:[%s2529_s1 + $0x40] sm:$0xff] (!%p165_p2)  }
   0x8   : > { %719 = vmatprep.subr.bf16.mxu0 (!%p165_p2), %v2163_v1  ;;  %2003 = vmatprep.subr.bf16.mxu1 (!%p165_p2), %v2163_v1  ;;  %v2052_v12 = vld [vmem:[%s2529_s1 + $0x48] sm:$0xff] (!%p165_p2)   ;;  %v2053_v13 = vld [vmem:[%s2529_s1 + $0x50] sm:$0xff] (!%p165_p2)   ;;  %v2054_v14 = vld [vmem:[%s2529_s1 + $0x58] sm:$0xff] (!%p165_p2)  }
   0x9   : > { %v2055_v15 = vld [vmem:[%s2529_s1 + $0x60] sm:$0xff] (!%p165_p2)   ;;  %v2056_v16 = vld [vmem:[%s2529_s1 + $0x68] sm:$0xff] (!%p165_p2)   ;;  %v2057_v17 = vld [vmem:[%s2529_s1 + $0x70] sm:$0xff] (!%p165_p2)  }
   0xa   : > { %v2058_v18 = vld [vmem:[%s2529_s1 + $0x78] sm:$0xff] (!%p165_p2)  }
   0xb   : > { %720 = vmatpush1.bf16.msra.mxu0 (!%p165_p2), %v2044_v2  ;;  %2019 = vmatpush1.bf16.msra.mxu1 (!%p165_p2), %v2044_v2 }
   0xc   : > { %721 = vmatprep.subr.bf16.mxu0 (!%p165_p2), %v2163_v1  ;;  %2004 = vmatprep.subr.bf16.mxu1 (!%p165_p2), %v2163_v1 }
   0xd   : > { %s2534_s19 = smov (!%p192_p3, %s1593_s19), 255 }
   0xe   : > { %s1746_s26 = sshll.u32 %s2534_s19, 3 }
   0xf   : > { %722 = vmatpush1.bf16.msra.mxu0 %v2045_v3  ;;  %2020 = vmatpush1.bf16.msra.mxu1 %v2045_v3  ;;  %s2226_s5 = scalar_lea.vmem %s2528_s0, %s1746_s26 }
  0x10   : > { %723 = vmatprep.subr.bf16.mxu0 %v2163_v1  ;;  %2005 = vmatprep.subr.bf16.mxu1 %v2163_v1  ;;  %v2061_v6 = vld [vmem:[%s2226_s5 + $0x4] ss:$8 sps:$4 sm:$0xff]   ;;  %v2059_v19 = vld [vmem:[%s2226_s5] ss:$8 sps:$4 sm:$0xff]   ;;  %v2065_v21 = vld [vmem:[%s2226_s5 + $0x14] ss:$8 sps:$4 sm:$0xff]  }
  0x11   : > { %v2064_v8 = vld [vmem:[%s2226_s5 + $0x104] ss:$8 sps:$4 sm:$0xff]   ;;  %749 = vmatprep.mubr.bf16.mxu0 %v2061_v6  ;;  %v2062_v20 = vld [vmem:[%s2226_s5 + $0x100] ss:$8 sps:$4 sm:$0xff]   ;;  %v2067_v22 = vld [vmem:[%s2226_s5 + $0x114] ss:$8 sps:$4 sm:$0xff]  }
  0x12   : > { %877 = vmatprep.mubr.bf16.mxu1 %v2064_v8  ;;  %v2069_v23 = vld [vmem:[%s2226_s5 + $0x10] ss:$8 sps:$4 sm:$0xff]   ;;  %v2071_v25 = vld [vmem:[%s2226_s5 + $0x24] ss:$8 sps:$4 sm:$0xff]   ;;  %v2075_v27 = vld [vmem:[%s2226_s5 + $0x20] ss:$8 sps:$4 sm:$0xff]  }
  0x13   : > { %724 = vmatpush1.bf16.msra.mxu0 %v2046_v4  ;;  %2021 = vmatpush1.bf16.msra.mxu1 %v2046_v4  ;;  %v2070_v24 = vld [vmem:[%s2226_s5 + $0x110] ss:$8 sps:$4 sm:$0xff]   ;;  %v2073_v26 = vld [vmem:[%s2226_s5 + $0x124] ss:$8 sps:$4 sm:$0xff]   ;;  %v2076_v28 = vld [vmem:[%s2226_s5 + $0x120] ss:$8 sps:$4 sm:$0xff]  }
  0x14   : > { %725 = vmatprep.subr.bf16.mxu0 %v2163_v1  ;;  %2006 = vmatprep.subr.bf16.mxu1 %v2163_v1  ;;  %v2077_v29 = vld [vmem:[%s2226_s5 + $0x34] ss:$8 sps:$4 sm:$0xff]   ;;  %v2081_v31 = vld [vmem:[%s2226_s5 + $0x30] ss:$8 sps:$4 sm:$0xff]   ;;  %v2083_v33 = vld [vmem:[%s2226_s5 + $0x44] ss:$8 sps:$4 sm:$0xff]  }
  0x15   : > { %v2079_v30 = vld [vmem:[%s2226_s5 + $0x134] ss:$8 sps:$4 sm:$0xff]   ;;  %v2082_v32 = vld [vmem:[%s2226_s5 + $0x130] ss:$8 sps:$4 sm:$0xff]   ;;  %v2085_v34 = vld [vmem:[%s2226_s5 + $0x144] ss:$8 sps:$4 sm:$0xff]  }
  0x16   : > { %v2087_v35 = vld [vmem:[%s2226_s5 + $0x40] ss:$8 sps:$4 sm:$0xff]   ;;  %v2089_v37 = vld [vmem:[%s2226_s5 + $0x54] ss:$8 sps:$4 sm:$0xff]   ;;  %v2093_v39 = vld [vmem:[%s2226_s5 + $0x50] ss:$8 sps:$4 sm:$0xff]  }
  0x17   : > { %726 = vmatpush1.bf16.msra.mxu0 %v2047_v5  ;;  %2022 = vmatpush1.bf16.msra.mxu1 %v2047_v5  ;;  %v2088_v36 = vld [vmem:[%s2226_s5 + $0x140] ss:$8 sps:$4 sm:$0xff]   ;;  %v2091_v38 = vld [vmem:[%s2226_s5 + $0x154] ss:$8 sps:$4 sm:$0xff]   ;;  %v2094_v40 = vld [vmem:[%s2226_s5 + $0x150] ss:$8 sps:$4 sm:$0xff]  }
  0x18   : > { %727 = vmatprep.subr.bf16.mxu0 %v2163_v1  ;;  %2007 = vmatprep.subr.bf16.mxu1 %v2163_v1  ;;  %v2095_v41 = vld [vmem:[%s2226_s5 + $0x64] ss:$8 sps:$4 sm:$0xff]   ;;  %v2099_v43 = vld [vmem:[%s2226_s5 + $0x60] ss:$8 sps:$4 sm:$0xff]   ;;  %v2101_v45 = vld [vmem:[%s2226_s5 + $0x74] ss:$8 sps:$4 sm:$0xff]  }
  0x19   : > { %v2097_v42 = vld [vmem:[%s2226_s5 + $0x164] ss:$8 sps:$4 sm:$0xff]   ;;  %v2100_v44 = vld [vmem:[%s2226_s5 + $0x160] ss:$8 sps:$4 sm:$0xff]   ;;  %v2103_v46 = vld [vmem:[%s2226_s5 + $0x174] ss:$8 sps:$4 sm:$0xff]  }
  0x1a   : > { %v2105_v47 = vld [vmem:[%s2226_s5 + $0x70] ss:$8 sps:$4 sm:$0xff]   ;;  %v2107_v49 = vld [vmem:[%s2226_s5 + $0x84] ss:$8 sps:$4 sm:$0xff]   ;;  %v2111_v51 = vld [vmem:[%s2226_s5 + $0x80] ss:$8 sps:$4 sm:$0xff]  }
  0x1b   : > { %728 = vmatpush1.bf16.msra.mxu0 %v2048_v7  ;;  %2023 = vmatpush1.bf16.msra.mxu1 %v2048_v7  ;;  %v2106_v48 = vld [vmem:[%s2226_s5 + $0x170] ss:$8 sps:$4 sm:$0xff]   ;;  %v2109_v50 = vld [vmem:[%s2226_s5 + $0x184] ss:$8 sps:$4 sm:$0xff]   ;;  %v2112_v52 = vld [vmem:[%s2226_s5 + $0x180] ss:$8 sps:$4 sm:$0xff]  }
  0x1c   : > { %729 = vmatprep.subr.bf16.mxu0 %v2163_v1  ;;  %2008 = vmatprep.subr.bf16.mxu1 %v2163_v1  ;;  %v2113_v53 = vld [vmem:[%s2226_s5 + $0x94] ss:$8 sps:$4 sm:$0xff]   ;;  %v2117_v55 = vld [vmem:[%s2226_s5 + $0x90] ss:$8 sps:$4 sm:$0xff]   ;;  %v2119_v57 = vld [vmem:[%s2226_s5 + $0xa4] ss:$8 sps:$4 sm:$0xff]  }
  0x1d   : > { %v2115_v54 = vld [vmem:[%s2226_s5 + $0x194] ss:$8 sps:$4 sm:$0xff]   ;;  %v2118_v56 = vld [vmem:[%s2226_s5 + $0x190] ss:$8 sps:$4 sm:$0xff]   ;;  %v2121_v58 = vld [vmem:[%s2226_s5 + $0x1a4] ss:$8 sps:$4 sm:$0xff]  }
  0x1e   : > { %v2123_v59 = vld [vmem:[%s2226_s5 + $0xa0] ss:$8 sps:$4 sm:$0xff]   ;;  %v2125_v61 = vld [vmem:[%s2226_s5 + $0xb4] ss:$8 sps:$4 sm:$0xff]   ;;  %v2129_v63 = vld [vmem:[%s2226_s5 + $0xb0] ss:$8 sps:$4 sm:$0xff]  }
  0x1f   : > { %730 = vmatpush1.bf16.msra.mxu0 %v2049_v9  ;;  %2024 = vmatpush1.bf16.msra.mxu1 %v2049_v9  ;;  %v2124_v60 = vld [vmem:[%s2226_s5 + $0x1a0] ss:$8 sps:$4 sm:$0xff]   ;;  %v2127_v62 = vld [vmem:[%s2226_s5 + $0x1b4] ss:$8 sps:$4 sm:$0xff]   ;;  %v2130_v0 = vld [vmem:[%s2226_s5 + $0x1b0] ss:$8 sps:$4 sm:$0xff]  }
  0x20   : > { %731 = vmatprep.subr.bf16.mxu0 %v2163_v1  ;;  %2009 = vmatprep.subr.bf16.mxu1 %v2163_v1  ;;  %v2133_v2 = vld [vmem:[%s2226_s5 + $0x1c4] ss:$8 sps:$4 sm:$0xff]   ;;  %v2135_v3 = vld [vmem:[%s2226_s5 + $0xc0] ss:$8 sps:$4 sm:$0xff]   ;;  %v2137_v5 = vld [vmem:[%s2226_s5 + $0xd4] ss:$8 sps:$4 sm:$0xff]  }
  0x21   : > { %v2136_v4 = vld [vmem:[%s2226_s5 + $0x1c0] ss:$8 sps:$4 sm:$0xff]   ;;  %v2139_v6 = vld [vmem:[%s2226_s5 + $0x1d4] ss:$8 sps:$4 sm:$0xff]   ;;  %v2141_v7 = vld [vmem:[%s2226_s5 + $0xd0] ss:$8 sps:$4 sm:$0xff]  }
  0x22   : > { %v2142_v8 = vld [vmem:[%s2226_s5 + $0x1d0] ss:$8 sps:$4 sm:$0xff]   ;;  %v2143_v9 = vld [vmem:[%s2226_s5 + $0xe4] ss:$8 sps:$4 sm:$0xff]  }
  0x23   : > { %732 = vmatpush1.bf16.msra.mxu0 %v2050_v10  ;;  %2025 = vmatpush1.bf16.msra.mxu1 %v2050_v10  ;;  %v2145_v10 = vld [vmem:[%s2226_s5 + $0x1e4] ss:$8 sps:$4 sm:$0xff]  }
  0x24   : > { %733 = vmatprep.subr.bf16.mxu0 %v2163_v1  ;;  %2010 = vmatprep.subr.bf16.mxu1 %v2163_v1 }
  0x27   : > { %734 = vmatpush1.bf16.msra.mxu0 %v2051_v11  ;;  %2026 = vmatpush1.bf16.msra.mxu1 %v2051_v11  ;;  %v2147_v11 = vld [vmem:[%s2226_s5 + $0xe0] ss:$8 sps:$4 sm:$0xff]  }
  0x28   : > { %735 = vmatprep.subr.bf16.mxu0 %v2163_v1  ;;  %2011 = vmatprep.subr.bf16.mxu1 %v2163_v1 }
  0x2b   : > { %736 = vmatpush1.bf16.msra.mxu0 %v2052_v12  ;;  %2027 = vmatpush1.bf16.msra.mxu1 %v2052_v12  ;;  %v2148_v12 = vld [vmem:[%s2226_s5 + $0x1e0] ss:$8 sps:$4 sm:$0xff]  }
  0x2c   : > { %737 = vmatprep.subr.bf16.mxu0 %v2163_v1  ;;  %2012 = vmatprep.subr.bf16.mxu1 %v2163_v1 }
  0x2f   : > { %738 = vmatpush1.bf16.msra.mxu0 %v2053_v13  ;;  %2028 = vmatpush1.bf16.msra.mxu1 %v2053_v13  ;;  %v2149_v13 = vld [vmem:[%s2226_s5 + $0xf4] ss:$8 sps:$4 sm:$0xff]  }
  0x30   : > { %739 = vmatprep.subr.bf16.mxu0 %v2163_v1  ;;  %2013 = vmatprep.subr.bf16.mxu1 %v2163_v1 }
  0x33   : > { %740 = vmatpush1.bf16.msra.mxu0 %v2054_v14  ;;  %2029 = vmatpush1.bf16.msra.mxu1 %v2054_v14  ;;  %v2151_v14 = vld [vmem:[%s2226_s5 + $0x1f4] ss:$8 sps:$4 sm:$0xff]  }
  0x34   : > { %741 = vmatprep.subr.bf16.mxu0 %v2163_v1  ;;  %2014 = vmatprep.subr.bf16.mxu1 %v2163_v1 }
  0x37   : > { %742 = vmatpush1.bf16.msra.mxu0 %v2055_v15  ;;  %2030 = vmatpush1.bf16.msra.mxu1 %v2055_v15  ;;  %v2153_v15 = vld [vmem:[%s2226_s5 + $0xf0] ss:$8 sps:$4 sm:$0xff]  }
  0x38   : > { %743 = vmatprep.subr.bf16.mxu0 %v2163_v1  ;;  %2015 = vmatprep.subr.bf16.mxu1 %v2163_v1 }
  0x3b   : > { %744 = vmatpush1.bf16.msra.mxu0 %v2056_v16  ;;  %2031 = vmatpush1.bf16.msra.mxu1 %v2056_v16  ;;  %v2154_v16 = vld [vmem:[%s2226_s5 + $0x1f0] ss:$8 sps:$4 sm:$0xff]  }
  0x3c   : > { %745 = vmatprep.subr.bf16.mxu0 %v2163_v1  ;;  %2016 = vmatprep.subr.bf16.mxu1 %v2163_v1 }
  0x3f   : > { %746 = vmatpush1.bf16.msra.mxu0 %v2057_v17  ;;  %2032 = vmatpush1.bf16.msra.mxu1 %v2057_v17  ;;  %v2352_v17 = vld [vmem:[%s2530_s2] ss:$0 sm:$0xff] }
  0x40   : > { %747 = vmatprep.subr.bf16.mxu0 %v2163_v1  ;;  %2017 = vmatprep.subr.bf16.mxu1 %v2163_v1  ;;  %v2131_v1 = vld [vmem:[%s2226_s5 + $0xc4] ss:$8 sps:$4 sm:$0xff]   ;;  %s1597_s5 = sshll.u32 %s2534_s19, 2 }
  0x41   : > { %s2371_s11 = scalar_lea.vmem %s2532_s4, %s1597_s5 }
  0x43   : > { %748 = vmatpush1.bf16.msra.mxu0 %v2058_v18  ;;  %2033 = vmatpush1.bf16.msra.mxu1 %v2058_v18 }
  0x46   : > { %750 = vmatmul.mubr.bf16.vlgmr.msra.gmra.mrb[0].mxu0 %v2059_v19  ;;  %878 = vmatmul.mubr.bf16.vlgmr.msra.gmra.mrb[0].mxu1 %v2062_v20  ;;  %v2357_v19 = vld [vmem:[%s2531_s3] ss:$0 sm:$0xff] }
  0x47   : > { %757 = vmatprep.mubr.bf16.mxu0 %v2065_v21  ;;  %885 = vmatprep.mubr.bf16.mxu1 %v2067_v22 }
  0x4e   : > { %758 = vmatmul.mubr.bf16.gmra.mrb[4].mxu0 %v2069_v23  ;;  %886 = vmatmul.mubr.bf16.gmra.mrb[4].mxu1 %v2070_v24 }
  0x4f   : > { %765 = vmatprep.mubr.bf16.mxu0 %v2071_v25  ;;  %893 = vmatprep.mubr.bf16.mxu1 %v2073_v26 }
  0x56   : > { %766 = vmatmul.mubr.bf16.gmra.mrb[8].mxu0 %v2075_v27  ;;  %894 = vmatmul.mubr.bf16.gmra.mrb[8].mxu1 %v2076_v28 }
  0x57   : > { %773 = vmatprep.mubr.bf16.mxu0 %v2077_v29  ;;  %901 = vmatprep.mubr.bf16.mxu1 %v2079_v30 }
  0x5e   : > { %774 = vmatmul.mubr.bf16.gmra.mrb[12].mxu0 %v2081_v31  ;;  %902 = vmatmul.mubr.bf16.gmra.mrb[12].mxu1 %v2082_v32 }
  0x5f   : > { %781 = vmatprep.mubr.bf16.mxu0 %v2083_v33  ;;  %909 = vmatprep.mubr.bf16.mxu1 %v2085_v34 }
  0x66   : > { %782 = vmatmul.mubr.bf16.gmra.mrb[16].mxu0 %v2087_v35  ;;  %910 = vmatmul.mubr.bf16.gmra.mrb[16].mxu1 %v2088_v36 }
  0x67   : > { %789 = vmatprep.mubr.bf16.mxu0 %v2089_v37  ;;  %917 = vmatprep.mubr.bf16.mxu1 %v2091_v38 }
  0x6e   : > { %790 = vmatmul.mubr.bf16.gmra.mrb[20].mxu0 %v2093_v39  ;;  %918 = vmatmul.mubr.bf16.gmra.mrb[20].mxu1 %v2094_v40 }
  0x6f   : > { %797 = vmatprep.mubr.bf16.mxu0 %v2095_v41  ;;  %925 = vmatprep.mubr.bf16.mxu1 %v2097_v42 }
  0x76   : > { %798 = vmatmul.mubr.bf16.gmra.mrb[24].mxu0 %v2099_v43  ;;  %926 = vmatmul.mubr.bf16.gmra.mrb[24].mxu1 %v2100_v44 }
  0x77   : > { %805 = vmatprep.mubr.bf16.mxu0 %v2101_v45  ;;  %933 = vmatprep.mubr.bf16.mxu1 %v2103_v46 }
  0x7e   : > { %806 = vmatmul.mubr.bf16.gmra.mrb[28].mxu0 %v2105_v47  ;;  %934 = vmatmul.mubr.bf16.gmra.mrb[28].mxu1 %v2106_v48 }
  0x7f   : > { %813 = vmatprep.mubr.bf16.mxu0 %v2107_v49  ;;  %941 = vmatprep.mubr.bf16.mxu1 %v2109_v50 }
  0x86   : > { %814 = vmatmul.mubr.bf16.gmra.mrb[32].mxu0 %v2111_v51  ;;  %942 = vmatmul.mubr.bf16.gmra.mrb[32].mxu1 %v2112_v52 }
  0x87   : > { %821 = vmatprep.mubr.bf16.mxu0 %v2113_v53  ;;  %949 = vmatprep.mubr.bf16.mxu1 %v2115_v54 }
  0x8e   : > { %822 = vmatmul.mubr.bf16.gmra.mrb[36].mxu0 %v2117_v55  ;;  %950 = vmatmul.mubr.bf16.gmra.mrb[36].mxu1 %v2118_v56 }
  0x8f   : > { %829 = vmatprep.mubr.bf16.mxu0 %v2119_v57  ;;  %957 = vmatprep.mubr.bf16.mxu1 %v2121_v58 }
  0x96   : > { %830 = vmatmul.mubr.bf16.gmra.mrb[40].mxu0 %v2123_v59  ;;  %958 = vmatmul.mubr.bf16.gmra.mrb[40].mxu1 %v2124_v60 }
  0x97   : > { %837 = vmatprep.mubr.bf16.mxu0 %v2125_v61  ;;  %965 = vmatprep.mubr.bf16.mxu1 %v2127_v62 }
  0x9e   : > { %838 = vmatmul.mubr.bf16.gmra.mrb[44].mxu0 %v2129_v63  ;;  %966 = vmatmul.mubr.bf16.gmra.mrb[44].mxu1 %v2130_v0 }
  0x9f   : > { %845 = vmatprep.mubr.bf16.mxu0 %v2131_v1  ;;  %973 = vmatprep.mubr.bf16.mxu1 %v2133_v2 }
  0xa6   : > { %846 = vmatmul.mubr.bf16.gmra.mrb[48].mxu0 %v2135_v3  ;;  %974 = vmatmul.mubr.bf16.gmra.mrb[48].mxu1 %v2136_v4 }
  0xa7   : > { %853 = vmatprep.mubr.bf16.mxu0 %v2137_v5  ;;  %981 = vmatprep.mubr.bf16.mxu1 %v2139_v6 }
  0xae   : > { %854 = vmatmul.mubr.bf16.gmra.mrb[52].mxu0 %v2141_v7  ;;  %982 = vmatmul.mubr.bf16.gmra.mrb[52].mxu1 %v2142_v8 }
  0xaf   : > { %861 = vmatprep.mubr.bf16.mxu0 %v2143_v9  ;;  %989 = vmatprep.mubr.bf16.mxu1 %v2145_v10 }
  0xb6   : > { %862 = vmatmul.mubr.bf16.gmra.mrb[56].mxu0 %v2147_v11  ;;  %990 = vmatmul.mubr.bf16.gmra.mrb[56].mxu1 %v2148_v12 }
  0xb7   : > { %869 = vmatprep.mubr.bf16.mxu0 %v2149_v13  ;;  %997 = vmatprep.mubr.bf16.mxu1 %v2151_v14 }
  0xbe   : > { %870 = vmatmul.mubr.bf16.gmra.mrb[60].mxu0 %v2153_v15  ;;  %998 = vmatmul.mubr.bf16.gmra.mrb[60].mxu1 %v2154_v16 }
 0x119   : > { %v751_v18 = vpop.f32.mrb[0].mxu0  ;;  %v879_v20 = vpop.f32.mrb[0].mxu1 }
 0x11a   : > { %v1013_v21 = vmul.f32 %v2352_v17, %v751_v18  ;;  %v1045_v22 = vmul.f32 %v2352_v17, %v879_v20  ;;  %v753_v23 = vpop.f32.mrb[1].mxu0  ;;  %v881_v24 = vpop.f32.mrb[1].mxu1 }
 0x11b   : > { %v754_v25 = vpop.f32.mrb[2].mxu0  ;;  %v882_v26 = vpop.f32.mrb[2].mxu1 }
 0x11c   : > { %v1084_v27 = vadd.f32 %v2357_v19, %v1013_v21  ;;  %v1116_v28 = vadd.f32 %v2357_v19, %v1045_v22  ;;  %v1014_v29 = vmul.f32 %v2352_v17, %v754_v25  ;;  %v1046_v30 = vmul.f32 %v2352_v17, %v882_v26  ;;  %v756_v31 = vpop.f32.mrb[3].mxu0  ;;  %v884_v32 = vpop.f32.mrb[3].mxu1 }
 0x11e   : > { %v1085_v33 = vadd.f32 %v2357_v19, %v1014_v29  ;;  %v1117_v34 = vadd.f32 %v2357_v19, %v1046_v30  ;;  %v1148_v35 = vmax.f32 %v1084_v27, 0.0  ;;  %v1180_v36 = vmax.f32 %v1116_v28, 0.0 }
 0x120   : > { %v1149_v37 = vmax.f32 %v1085_v33, 0.0  ;;  %v1181_v38 = vmax.f32 %v1117_v34, 0.0 }
 0x121   : > { %v759_v39 = vpop.f32.mrb[4].mxu0  ;;  %v887_v40 = vpop.f32.mrb[4].mxu1 }
 0x122   : > { %v1814_v41 = vpack.c.bf16 %v1149_v37, %v1148_v35  ;;  %v1894_v42 = vpack.c.bf16 %v1181_v38, %v1180_v36  ;;  %v1015_v43 = vmul.f32 %v2352_v17, %v759_v39  ;;  %v1047_v44 = vmul.f32 %v2352_v17, %v887_v40  ;;  %v761_v45 = vpop.f32.mrb[5].mxu0  ;;  %v889_v46 = vpop.f32.mrb[5].mxu1 }
 0x123   : > { %v762_v47 = vpop.f32.mrb[6].mxu0  ;;  %v890_v48 = vpop.f32.mrb[6].mxu1 }
 0x124   : > { %1815 = vst [vmem:[%s2371_s11] sm:$0xff] %v1814_v41   ;;  %1986 = vst [vmem:[%s2371_s11 + $0x80] sm:$0xff] %v1894_v42   ;;  %v1086_v49 = vadd.f32 %v2357_v19, %v1015_v43  ;;  %v1118_v50 = vadd.f32 %v2357_v19, %v1047_v44  ;;  %v1016_v51 = vmul.f32 %v2352_v17, %v762_v47  ;;  %v764_v53 = vpop.f32.mrb[7].mxu0  ;;  %v892_v54 = vpop.f32.mrb[7].mxu1 }
 0x125   : > { %v1048_v52 = vmul.f32 %v2352_v17, %v890_v48 }
 0x126   : > { %v1087_v55 = vadd.f32 %v2357_v19, %v1016_v51  ;;  %v1150_v57 = vmax.f32 %v1086_v49, 0.0  ;;  %v1182_v58 = vmax.f32 %v1118_v50, 0.0 }
 0x127   : > { %v1119_v56 = vadd.f32 %v2357_v19, %v1048_v52 }
 0x128   : > { %v1151_v59 = vmax.f32 %v1087_v55, 0.0 }
 0x129   : > { %v1183_v60 = vmax.f32 %v1119_v56, 0.0  ;;  %v767_v61 = vpop.f32.mrb[8].mxu0  ;;  %v895_v62 = vpop.f32.mrb[8].mxu1 }
 0x12a   : > { %v1819_v63 = vpack.c.bf16 %v1151_v59, %v1150_v57  ;;  %v1017_v1 = vmul.f32 %v2352_v17, %v767_v61  ;;  %v1049_v2 = vmul.f32 %v2352_v17, %v895_v62  ;;  %v769_v3 = vpop.f32.mrb[9].mxu0  ;;  %v897_v4 = vpop.f32.mrb[9].mxu1 }
 0x12b   : > { %v1899_v0 = vpack.c.bf16 %v1183_v60, %v1182_v58  ;;  %v770_v5 = vpop.f32.mrb[10].mxu0  ;;  %v898_v6 = vpop.f32.mrb[10].mxu1 }
 0x12c   : > { %1971 = vst [vmem:[%s2371_s11 + $0x8] sm:$0xff] %v1819_v63   ;;  %v1088_v7 = vadd.f32 %v2357_v19, %v1017_v1  ;;  %v1120_v8 = vadd.f32 %v2357_v19, %v1049_v2  ;;  %v1018_v9 = vmul.f32 %v2352_v17, %v770_v5  ;;  %v1050_v10 = vmul.f32 %v2352_v17, %v898_v6  ;;  %v772_v11 = vpop.f32.mrb[11].mxu0  ;;  %v900_v12 = vpop.f32.mrb[11].mxu1 }
 0x12d   : > { %1987 = vst [vmem:[%s2371_s11 + $0x88] sm:$0xff] %v1899_v0  }
 0x12e   : > { %v1089_v13 = vadd.f32 %v2357_v19, %v1018_v9  ;;  %v1121_v14 = vadd.f32 %v2357_v19, %v1050_v10  ;;  %v1152_v15 = vmax.f32 %v1088_v7, 0.0  ;;  %v1184_v16 = vmax.f32 %v1120_v8, 0.0 }
 0x130   : > { %v1153_v18 = vmax.f32 %v1089_v13, 0.0  ;;  %v1185_v20 = vmax.f32 %v1121_v14, 0.0 }
 0x131   : > { %v775_v21 = vpop.f32.mrb[12].mxu0  ;;  %v903_v22 = vpop.f32.mrb[12].mxu1 }
 0x132   : > { %v1824_v23 = vpack.c.bf16 %v1153_v18, %v1152_v15  ;;  %v1904_v24 = vpack.c.bf16 %v1185_v20, %v1184_v16  ;;  %v1019_v25 = vmul.f32 %v2352_v17, %v775_v21  ;;  %v1051_v26 = vmul.f32 %v2352_v17, %v903_v22  ;;  %v777_v27 = vpop.f32.mrb[13].mxu0  ;;  %v905_v28 = vpop.f32.mrb[13].mxu1 }
 0x133   : > { %v778_v29 = vpop.f32.mrb[14].mxu0  ;;  %v906_v30 = vpop.f32.mrb[14].mxu1 }
 0x134   : > { %1972 = vst [vmem:[%s2371_s11 + $0x10] sm:$0xff] %v1824_v23   ;;  %1988 = vst [vmem:[%s2371_s11 + $0x90] sm:$0xff] %v1904_v24   ;;  %v1090_v31 = vadd.f32 %v2357_v19, %v1019_v25  ;;  %v1122_v32 = vadd.f32 %v2357_v19, %v1051_v26  ;;  %v1020_v33 = vmul.f32 %v2352_v17, %v778_v29  ;;  %v780_v35 = vpop.f32.mrb[15].mxu0  ;;  %v908_v36 = vpop.f32.mrb[15].mxu1 }
 0x135   : > { %v1052_v34 = vmul.f32 %v2352_v17, %v906_v30 }
 0x136   : > { %v1091_v37 = vadd.f32 %v2357_v19, %v1020_v33  ;;  %v1154_v39 = vmax.f32 %v1090_v31, 0.0  ;;  %v1186_v40 = vmax.f32 %v1122_v32, 0.0 }
 0x137   : > { %v1123_v38 = vadd.f32 %v2357_v19, %v1052_v34 }
 0x138   : > { %v1155_v41 = vmax.f32 %v1091_v37, 0.0 }
 0x139   : > { %v1187_v42 = vmax.f32 %v1123_v38, 0.0  ;;  %v783_v43 = vpop.f32.mrb[16].mxu0  ;;  %v911_v44 = vpop.f32.mrb[16].mxu1 }
 0x13a   : > { %v1829_v45 = vpack.c.bf16 %v1155_v41, %v1154_v39  ;;  %v1021_v47 = vmul.f32 %v2352_v17, %v783_v43  ;;  %v1053_v48 = vmul.f32 %v2352_v17, %v911_v44  ;;  %v785_v49 = vpop.f32.mrb[17].mxu0  ;;  %v913_v50 = vpop.f32.mrb[17].mxu1 }
 0x13b   : > { %v1909_v46 = vpack.c.bf16 %v1187_v42, %v1186_v40  ;;  %v786_v51 = vpop.f32.mrb[18].mxu0  ;;  %v914_v52 = vpop.f32.mrb[18].mxu1 }
 0x13c   : > { %1973 = vst [vmem:[%s2371_s11 + $0x18] sm:$0xff] %v1829_v45   ;;  %v1092_v53 = vadd.f32 %v2357_v19, %v1021_v47  ;;  %v1124_v54 = vadd.f32 %v2357_v19, %v1053_v48  ;;  %v1022_v55 = vmul.f32 %v2352_v17, %v786_v51  ;;  %v1054_v56 = vmul.f32 %v2352_v17, %v914_v52  ;;  %v788_v57 = vpop.f32.mrb[19].mxu0  ;;  %v916_v58 = vpop.f32.mrb[19].mxu1 }
 0x13d   : > { %1989 = vst [vmem:[%s2371_s11 + $0x98] sm:$0xff] %v1909_v46  }
 0x13e   : > { %v1093_v59 = vadd.f32 %v2357_v19, %v1022_v55  ;;  %v1125_v60 = vadd.f32 %v2357_v19, %v1054_v56  ;;  %v1156_v61 = vmax.f32 %v1092_v53, 0.0  ;;  %v1188_v62 = vmax.f32 %v1124_v54, 0.0 }
 0x140   : > { %v1157_v63 = vmax.f32 %v1093_v59, 0.0  ;;  %v1189_v0 = vmax.f32 %v1125_v60, 0.0 }
 0x141   : > { %v791_v1 = vpop.f32.mrb[20].mxu0  ;;  %v919_v2 = vpop.f32.mrb[20].mxu1 }
 0x142   : > { %v1834_v3 = vpack.c.bf16 %v1157_v63, %v1156_v61  ;;  %v1914_v4 = vpack.c.bf16 %v1189_v0, %v1188_v62  ;;  %v1023_v5 = vmul.f32 %v2352_v17, %v791_v1  ;;  %v1055_v6 = vmul.f32 %v2352_v17, %v919_v2  ;;  %v793_v7 = vpop.f32.mrb[21].mxu0  ;;  %v921_v8 = vpop.f32.mrb[21].mxu1 }
 0x143   : > { %v794_v9 = vpop.f32.mrb[22].mxu0  ;;  %v922_v10 = vpop.f32.mrb[22].mxu1 }
 0x144   : > { %1974 = vst [vmem:[%s2371_s11 + $0x20] sm:$0xff] %v1834_v3   ;;  %1990 = vst [vmem:[%s2371_s11 + $0xa0] sm:$0xff] %v1914_v4   ;;  %v1094_v11 = vadd.f32 %v2357_v19, %v1023_v5  ;;  %v1126_v12 = vadd.f32 %v2357_v19, %v1055_v6  ;;  %v1024_v13 = vmul.f32 %v2352_v17, %v794_v9  ;;  %v796_v15 = vpop.f32.mrb[23].mxu0  ;;  %v924_v16 = vpop.f32.mrb[23].mxu1 }
 0x145   : > { %v1056_v14 = vmul.f32 %v2352_v17, %v922_v10 }
 0x146   : > { %v1095_v18 = vadd.f32 %v2357_v19, %v1024_v13  ;;  %v1158_v21 = vmax.f32 %v1094_v11, 0.0  ;;  %v1190_v22 = vmax.f32 %v1126_v12, 0.0 }
 0x147   : > { %v1127_v20 = vadd.f32 %v2357_v19, %v1056_v14 }
 0x148   : > { %v1159_v23 = vmax.f32 %v1095_v18, 0.0 }
 0x149   : > { %v1191_v24 = vmax.f32 %v1127_v20, 0.0  ;;  %v799_v25 = vpop.f32.mrb[24].mxu0  ;;  %v927_v26 = vpop.f32.mrb[24].mxu1 }
 0x14a   : > { %v1839_v27 = vpack.c.bf16 %v1159_v23, %v1158_v21  ;;  %v1025_v29 = vmul.f32 %v2352_v17, %v799_v25  ;;  %v1057_v30 = vmul.f32 %v2352_v17, %v927_v26  ;;  %v801_v31 = vpop.f32.mrb[25].mxu0  ;;  %v929_v32 = vpop.f32.mrb[25].mxu1 }
 0x14b   : > { %v1919_v28 = vpack.c.bf16 %v1191_v24, %v1190_v22  ;;  %v802_v33 = vpop.f32.mrb[26].mxu0  ;;  %v930_v34 = vpop.f32.mrb[26].mxu1 }
 0x14c   : > { %1975 = vst [vmem:[%s2371_s11 + $0x28] sm:$0xff] %v1839_v27   ;;  %v1096_v35 = vadd.f32 %v2357_v19, %v1025_v29  ;;  %v1128_v36 = vadd.f32 %v2357_v19, %v1057_v30  ;;  %v1026_v37 = vmul.f32 %v2352_v17, %v802_v33  ;;  %v1058_v38 = vmul.f32 %v2352_v17, %v930_v34  ;;  %v804_v39 = vpop.f32.mrb[27].mxu0  ;;  %v932_v40 = vpop.f32.mrb[27].mxu1 }
 0x14d   : > { %1991 = vst [vmem:[%s2371_s11 + $0xa8] sm:$0xff] %v1919_v28  }
 0x14e   : > { %v1097_v41 = vadd.f32 %v2357_v19, %v1026_v37  ;;  %v1129_v42 = vadd.f32 %v2357_v19, %v1058_v38  ;;  %v1160_v43 = vmax.f32 %v1096_v35, 0.0  ;;  %v1192_v44 = vmax.f32 %v1128_v36, 0.0 }
 0x150   : > { %v1161_v45 = vmax.f32 %v1097_v41, 0.0  ;;  %v1193_v46 = vmax.f32 %v1129_v42, 0.0 }
 0x151   : > { %v807_v47 = vpop.f32.mrb[28].mxu0  ;;  %v935_v48 = vpop.f32.mrb[28].mxu1 }
 0x152   : > { %v1844_v49 = vpack.c.bf16 %v1161_v45, %v1160_v43  ;;  %v1924_v50 = vpack.c.bf16 %v1193_v46, %v1192_v44  ;;  %v1027_v51 = vmul.f32 %v2352_v17, %v807_v47  ;;  %v1059_v52 = vmul.f32 %v2352_v17, %v935_v48  ;;  %v809_v53 = vpop.f32.mrb[29].mxu0  ;;  %v937_v54 = vpop.f32.mrb[29].mxu1 }
 0x153   : > { %v810_v55 = vpop.f32.mrb[30].mxu0  ;;  %v938_v56 = vpop.f32.mrb[30].mxu1 }
 0x154   : > { %1976 = vst [vmem:[%s2371_s11 + $0x30] sm:$0xff] %v1844_v49   ;;  %1992 = vst [vmem:[%s2371_s11 + $0xb0] sm:$0xff] %v1924_v50   ;;  %v1098_v57 = vadd.f32 %v2357_v19, %v1027_v51  ;;  %v1130_v58 = vadd.f32 %v2357_v19, %v1059_v52  ;;  %v1028_v59 = vmul.f32 %v2352_v17, %v810_v55  ;;  %v812_v61 = vpop.f32.mrb[31].mxu0  ;;  %v940_v62 = vpop.f32.mrb[31].mxu1 }
 0x155   : > { %v1060_v60 = vmul.f32 %v2352_v17, %v938_v56 }
 0x156   : > { %v1099_v63 = vadd.f32 %v2357_v19, %v1028_v59  ;;  %v1162_v1 = vmax.f32 %v1098_v57, 0.0  ;;  %v1194_v2 = vmax.f32 %v1130_v58, 0.0 }
 0x157   : > { %v1131_v0 = vadd.f32 %v2357_v19, %v1060_v60 }
 0x158   : > { %v1163_v3 = vmax.f32 %v1099_v63, 0.0 }
 0x159   : > { %v1195_v4 = vmax.f32 %v1131_v0, 0.0  ;;  %v815_v5 = vpop.f32.mrb[32].mxu0  ;;  %v943_v6 = vpop.f32.mrb[32].mxu1 }
 0x15a   : > { %v1849_v7 = vpack.c.bf16 %v1163_v3, %v1162_v1  ;;  %v1029_v9 = vmul.f32 %v2352_v17, %v815_v5  ;;  %v1061_v10 = vmul.f32 %v2352_v17, %v943_v6  ;;  %v817_v11 = vpop.f32.mrb[33].mxu0  ;;  %v945_v12 = vpop.f32.mrb[33].mxu1 }
 0x15b   : > { %v1929_v8 = vpack.c.bf16 %v1195_v4, %v1194_v2  ;;  %v818_v13 = vpop.f32.mrb[34].mxu0  ;;  %v946_v14 = vpop.f32.mrb[34].mxu1 }
 0x15c   : > { %1977 = vst [vmem:[%s2371_s11 + $0x38] sm:$0xff] %v1849_v7   ;;  %v1100_v15 = vadd.f32 %v2357_v19, %v1029_v9  ;;  %v1132_v16 = vadd.f32 %v2357_v19, %v1061_v10  ;;  %v1030_v18 = vmul.f32 %v2352_v17, %v818_v13  ;;  %v1062_v20 = vmul.f32 %v2352_v17, %v946_v14  ;;  %v820_v21 = vpop.f32.mrb[35].mxu0  ;;  %v948_v22 = vpop.f32.mrb[35].mxu1 }
 0x15d   : > { %1993 = vst [vmem:[%s2371_s11 + $0xb8] sm:$0xff] %v1929_v8  }
 0x15e   : > { %v1101_v23 = vadd.f32 %v2357_v19, %v1030_v18  ;;  %v1133_v24 = vadd.f32 %v2357_v19, %v1062_v20  ;;  %v1164_v25 = vmax.f32 %v1100_v15, 0.0  ;;  %v1196_v26 = vmax.f32 %v1132_v16, 0.0 }
 0x160   : > { %v1165_v27 = vmax.f32 %v1101_v23, 0.0  ;;  %v1197_v28 = vmax.f32 %v1133_v24, 0.0 }
 0x161   : > { %v823_v29 = vpop.f32.mrb[36].mxu0  ;;  %v951_v30 = vpop.f32.mrb[36].mxu1 }
 0x162   : > { %v1854_v31 = vpack.c.bf16 %v1165_v27, %v1164_v25  ;;  %v1934_v32 = vpack.c.bf16 %v1197_v28, %v1196_v26  ;;  %v1031_v33 = vmul.f32 %v2352_v17, %v823_v29  ;;  %v1063_v34 = vmul.f32 %v2352_v17, %v951_v30  ;;  %v825_v35 = vpop.f32.mrb[37].mxu0  ;;  %v953_v36 = vpop.f32.mrb[37].mxu1 }
 0x163   : > { %v826_v37 = vpop.f32.mrb[38].mxu0  ;;  %v954_v38 = vpop.f32.mrb[38].mxu1 }
 0x164   : > { %1978 = vst [vmem:[%s2371_s11 + $0x40] sm:$0xff] %v1854_v31   ;;  %1994 = vst [vmem:[%s2371_s11 + $0xc0] sm:$0xff] %v1934_v32   ;;  %v1102_v39 = vadd.f32 %v2357_v19, %v1031_v33  ;;  %v1134_v40 = vadd.f32 %v2357_v19, %v1063_v34  ;;  %v1032_v41 = vmul.f32 %v2352_v17, %v826_v37  ;;  %v828_v43 = vpop.f32.mrb[39].mxu0  ;;  %v956_v44 = vpop.f32.mrb[39].mxu1 }
 0x165   : > { %v1064_v42 = vmul.f32 %v2352_v17, %v954_v38 }
 0x166   : > { %v1103_v45 = vadd.f32 %v2357_v19, %v1032_v41  ;;  %v1166_v47 = vmax.f32 %v1102_v39, 0.0  ;;  %v1198_v48 = vmax.f32 %v1134_v40, 0.0 }
 0x167   : > { %v1135_v46 = vadd.f32 %v2357_v19, %v1064_v42 }
 0x168   : > { %v1167_v49 = vmax.f32 %v1103_v45, 0.0 }
 0x169   : > { %v1199_v50 = vmax.f32 %v1135_v46, 0.0  ;;  %v831_v51 = vpop.f32.mrb[40].mxu0  ;;  %v959_v52 = vpop.f32.mrb[40].mxu1 }
 0x16a   : > { %v1859_v53 = vpack.c.bf16 %v1167_v49, %v1166_v47  ;;  %v1033_v55 = vmul.f32 %v2352_v17, %v831_v51  ;;  %v1065_v56 = vmul.f32 %v2352_v17, %v959_v52  ;;  %v833_v57 = vpop.f32.mrb[41].mxu0  ;;  %v961_v58 = vpop.f32.mrb[41].mxu1 }
 0x16b   : > { %v1939_v54 = vpack.c.bf16 %v1199_v50, %v1198_v48  ;;  %v834_v59 = vpop.f32.mrb[42].mxu0  ;;  %v962_v60 = vpop.f32.mrb[42].mxu1 }
 0x16c   : > { %1979 = vst [vmem:[%s2371_s11 + $0x48] sm:$0xff] %v1859_v53   ;;  %v1104_v61 = vadd.f32 %v2357_v19, %v1033_v55  ;;  %v1136_v62 = vadd.f32 %v2357_v19, %v1065_v56  ;;  %v1034_v63 = vmul.f32 %v2352_v17, %v834_v59  ;;  %v1066_v0 = vmul.f32 %v2352_v17, %v962_v60  ;;  %v836_v1 = vpop.f32.mrb[43].mxu0  ;;  %v964_v2 = vpop.f32.mrb[43].mxu1 }
 0x16d   : > { %1995 = vst [vmem:[%s2371_s11 + $0xc8] sm:$0xff] %v1939_v54  }
 0x16e   : > { %v1105_v3 = vadd.f32 %v2357_v19, %v1034_v63  ;;  %v1137_v4 = vadd.f32 %v2357_v19, %v1066_v0  ;;  %v1168_v5 = vmax.f32 %v1104_v61, 0.0  ;;  %v1200_v6 = vmax.f32 %v1136_v62, 0.0 }
 0x170   : > { %v1169_v7 = vmax.f32 %v1105_v3, 0.0  ;;  %v1201_v8 = vmax.f32 %v1137_v4, 0.0 }
 0x171   : > { %v839_v9 = vpop.f32.mrb[44].mxu0  ;;  %v967_v10 = vpop.f32.mrb[44].mxu1 }
 0x172   : > { %v1864_v11 = vpack.c.bf16 %v1169_v7, %v1168_v5  ;;  %v1944_v12 = vpack.c.bf16 %v1201_v8, %v1200_v6  ;;  %v1035_v13 = vmul.f32 %v2352_v17, %v839_v9  ;;  %v1067_v14 = vmul.f32 %v2352_v17, %v967_v10  ;;  %v841_v15 = vpop.f32.mrb[45].mxu0  ;;  %v969_v16 = vpop.f32.mrb[45].mxu1 }
 0x173   : > { %v842_v18 = vpop.f32.mrb[46].mxu0  ;;  %v970_v20 = vpop.f32.mrb[46].mxu1 }
 0x174   : > { %1980 = vst [vmem:[%s2371_s11 + $0x50] sm:$0xff] %v1864_v11   ;;  %1996 = vst [vmem:[%s2371_s11 + $0xd0] sm:$0xff] %v1944_v12   ;;  %v1106_v21 = vadd.f32 %v2357_v19, %v1035_v13  ;;  %v1138_v22 = vadd.f32 %v2357_v19, %v1067_v14  ;;  %v1036_v23 = vmul.f32 %v2352_v17, %v842_v18  ;;  %v844_v25 = vpop.f32.mrb[47].mxu0  ;;  %v972_v26 = vpop.f32.mrb[47].mxu1 }
 0x175   : > { %v1068_v24 = vmul.f32 %v2352_v17, %v970_v20 }
 0x176   : > { %v1107_v27 = vadd.f32 %v2357_v19, %v1036_v23  ;;  %v1170_v29 = vmax.f32 %v1106_v21, 0.0  ;;  %v1202_v30 = vmax.f32 %v1138_v22, 0.0 }
 0x177   : > { %v1139_v28 = vadd.f32 %v2357_v19, %v1068_v24 }
 0x178   : > { %v1171_v31 = vmax.f32 %v1107_v27, 0.0 }
 0x179   : > { %v1203_v32 = vmax.f32 %v1139_v28, 0.0  ;;  %v847_v33 = vpop.f32.mrb[48].mxu0  ;;  %v975_v34 = vpop.f32.mrb[48].mxu1 }
 0x17a   : > { %v1869_v35 = vpack.c.bf16 %v1171_v31, %v1170_v29  ;;  %v1037_v37 = vmul.f32 %v2352_v17, %v847_v33  ;;  %v1069_v38 = vmul.f32 %v2352_v17, %v975_v34  ;;  %v849_v39 = vpop.f32.mrb[49].mxu0  ;;  %v977_v40 = vpop.f32.mrb[49].mxu1 }
 0x17b   : > { %v1949_v36 = vpack.c.bf16 %v1203_v32, %v1202_v30  ;;  %v850_v41 = vpop.f32.mrb[50].mxu0  ;;  %v978_v42 = vpop.f32.mrb[50].mxu1 }
 0x17c   : > { %1981 = vst [vmem:[%s2371_s11 + $0x58] sm:$0xff] %v1869_v35   ;;  %v1108_v43 = vadd.f32 %v2357_v19, %v1037_v37  ;;  %v1140_v44 = vadd.f32 %v2357_v19, %v1069_v38  ;;  %v1038_v45 = vmul.f32 %v2352_v17, %v850_v41  ;;  %v1070_v46 = vmul.f32 %v2352_v17, %v978_v42  ;;  %v852_v47 = vpop.f32.mrb[51].mxu0  ;;  %v980_v48 = vpop.f32.mrb[51].mxu1 }
 0x17d   : > { %1997 = vst [vmem:[%s2371_s11 + $0xd8] sm:$0xff] %v1949_v36  }
 0x17e   : > { %v1109_v49 = vadd.f32 %v2357_v19, %v1038_v45  ;;  %v1141_v50 = vadd.f32 %v2357_v19, %v1070_v46  ;;  %v1172_v51 = vmax.f32 %v1108_v43, 0.0  ;;  %v1204_v52 = vmax.f32 %v1140_v44, 0.0 }
 0x180   : > { %v1173_v53 = vmax.f32 %v1109_v49, 0.0  ;;  %v1205_v54 = vmax.f32 %v1141_v50, 0.0 }
 0x181   : > { %v855_v55 = vpop.f32.mrb[52].mxu0  ;;  %v983_v56 = vpop.f32.mrb[52].mxu1 }
 0x182   : > { %v1874_v57 = vpack.c.bf16 %v1173_v53, %v1172_v51  ;;  %v1954_v58 = vpack.c.bf16 %v1205_v54, %v1204_v52  ;;  %v1039_v59 = vmul.f32 %v2352_v17, %v855_v55  ;;  %v1071_v60 = vmul.f32 %v2352_v17, %v983_v56  ;;  %v857_v61 = vpop.f32.mrb[53].mxu0  ;;  %v985_v62 = vpop.f32.mrb[53].mxu1 }
 0x183   : > { %v858_v63 = vpop.f32.mrb[54].mxu0  ;;  %v986_v0 = vpop.f32.mrb[54].mxu1 }
 0x184   : > { %1982 = vst [vmem:[%s2371_s11 + $0x60] sm:$0xff] %v1874_v57   ;;  %1998 = vst [vmem:[%s2371_s11 + $0xe0] sm:$0xff] %v1954_v58   ;;  %v1110_v1 = vadd.f32 %v2357_v19, %v1039_v59  ;;  %v1142_v2 = vadd.f32 %v2357_v19, %v1071_v60  ;;  %v1040_v3 = vmul.f32 %v2352_v17, %v858_v63  ;;  %v860_v5 = vpop.f32.mrb[55].mxu0  ;;  %v988_v6 = vpop.f32.mrb[55].mxu1 }
 0x185   : > { %v1072_v4 = vmul.f32 %v2352_v17, %v986_v0 }
 0x186   : > { %v1111_v7 = vadd.f32 %v2357_v19, %v1040_v3  ;;  %v1174_v9 = vmax.f32 %v1110_v1, 0.0  ;;  %v1206_v10 = vmax.f32 %v1142_v2, 0.0 }
 0x187   : > { %v1143_v8 = vadd.f32 %v2357_v19, %v1072_v4 }
 0x188   : > { %v1175_v11 = vmax.f32 %v1111_v7, 0.0 }
 0x189   : > { %v1207_v12 = vmax.f32 %v1143_v8, 0.0  ;;  %v863_v13 = vpop.f32.mrb[56].mxu0  ;;  %v991_v14 = vpop.f32.mrb[56].mxu1 }
 0x18a   : > { %v1879_v15 = vpack.c.bf16 %v1175_v11, %v1174_v9  ;;  %v1041_v18 = vmul.f32 %v2352_v17, %v863_v13  ;;  %v1073_v20 = vmul.f32 %v2352_v17, %v991_v14  ;;  %v865_v21 = vpop.f32.mrb[57].mxu0  ;;  %v993_v22 = vpop.f32.mrb[57].mxu1 }
 0x18b   : > { %v1959_v16 = vpack.c.bf16 %v1207_v12, %v1206_v10  ;;  %v866_v23 = vpop.f32.mrb[58].mxu0  ;;  %v994_v24 = vpop.f32.mrb[58].mxu1 }
 0x18c   : > { %1983 = vst [vmem:[%s2371_s11 + $0x68] sm:$0xff] %v1879_v15   ;;  %v1112_v25 = vadd.f32 %v2357_v19, %v1041_v18  ;;  %v1144_v26 = vadd.f32 %v2357_v19, %v1073_v20  ;;  %v1042_v27 = vmul.f32 %v2352_v17, %v866_v23  ;;  %v1074_v28 = vmul.f32 %v2352_v17, %v994_v24  ;;  %v868_v29 = vpop.f32.mrb[59].mxu0  ;;  %v996_v30 = vpop.f32.mrb[59].mxu1 }
 0x18d   : > { %1999 = vst [vmem:[%s2371_s11 + $0xe8] sm:$0xff] %v1959_v16  }
 0x18e   : > { %v1113_v31 = vadd.f32 %v2357_v19, %v1042_v27  ;;  %v1145_v32 = vadd.f32 %v2357_v19, %v1074_v28  ;;  %v1176_v33 = vmax.f32 %v1112_v25, 0.0  ;;  %v1208_v34 = vmax.f32 %v1144_v26, 0.0 }
 0x190   : > { %v1177_v35 = vmax.f32 %v1113_v31, 0.0  ;;  %v1209_v36 = vmax.f32 %v1145_v32, 0.0 }
 0x191   : > { %v871_v37 = vpop.f32.mrb[60].mxu0  ;;  %v999_v38 = vpop.f32.mrb[60].mxu1 }
 0x192   : > { %v1884_v39 = vpack.c.bf16 %v1177_v35, %v1176_v33  ;;  %v1964_v40 = vpack.c.bf16 %v1209_v36, %v1208_v34  ;;  %v1043_v41 = vmul.f32 %v2352_v17, %v871_v37  ;;  %v1075_v42 = vmul.f32 %v2352_v17, %v999_v38  ;;  %v873_v43 = vpop.f32.mrb[61].mxu0  ;;  %v1001_v44 = vpop.f32.mrb[61].mxu1 }
 0x193   : > { %v874_v45 = vpop.f32.mrb[62].mxu0  ;;  %v1002_v46 = vpop.f32.mrb[62].mxu1 }
 0x194   : > { %1984 = vst [vmem:[%s2371_s11 + $0x70] sm:$0xff] %v1884_v39   ;;  %2000 = vst [vmem:[%s2371_s11 + $0xf0] sm:$0xff] %v1964_v40   ;;  %v1114_v47 = vadd.f32 %v2357_v19, %v1043_v41  ;;  %v1146_v48 = vadd.f32 %v2357_v19, %v1075_v42  ;;  %v1044_v49 = vmul.f32 %v2352_v17, %v874_v45  ;;  %v876_v51 = vpop.f32.mrb[63].mxu0  ;;  %v1004_v52 = vpop.f32.mrb[63].mxu1 }
 0x195   : > { %v1076_v50 = vmul.f32 %v2352_v17, %v1002_v46 }
 0x196   : > { %v1115_v53 = vadd.f32 %v2357_v19, %v1044_v49  ;;  %v1178_v55 = vmax.f32 %v1114_v47, 0.0  ;;  %v1210_v56 = vmax.f32 %v1146_v48, 0.0 }
 0x197   : > { %v1147_v54 = vadd.f32 %v2357_v19, %v1076_v50 }
 0x198   : > { %v1179_v57 = vmax.f32 %v1115_v53, 0.0 }
 0x199   : > { %v1211_v58 = vmax.f32 %v1147_v54, 0.0 }
 0x19a   : > { %v1889_v59 = vpack.c.bf16 %v1179_v57, %v1178_v55 }
 0x19b   : > { %v1969_v60 = vpack.c.bf16 %v1211_v58, %v1210_v56 }
 0x19c   : > { %1985 = vst [vmem:[%s2371_s11 + $0x78] sm:$0xff] %v1889_v59  }
 0x19d   : > { %2001 = vst [vmem:[%s2371_s11 + $0xf8] sm:$0xff] %v1969_v60  }
 0x19e PF: > { %s14_s15 = sadd.s32 1, %s2161_s15  }
 0x19f   : > { %p11_p4 = scmp.ge.s32.totalorder %s14_s15, 6  }
 0x1a1   :  { %13 = sbr.rel (!%p11_p4) target bundleno = 1 (0x1), region = 66 }

// kernel: wide_resnet_forward.10
= control target key start
LH: loop header
LB: loop body
LE: loop exit
PB: predicated region body
PF: predicated region fallthrough
CT: control target
= control target key end

     0   :  { %s3372_s24 = smov 0   ;;  %s3874_s0 = inlined_call_operand.vmem [shape: bf16[2048,256], index: 0, kind: input, shape index: {}]   ;;  %s3875_s1 = inlined_call_operand.vmem [shape: bf16[2048,128], index: 1, kind: input, shape index: {}]   ;;  %s3876_s2 = inlined_call_operand.vmem [shape: bf16[256,128], index: 2, kind: input, shape index: {}]   ;;  %s3877_s3 = inlined_call_operand.vmem [shape: f32[1,128], index: 3, kind: input, shape index: {}]   ;;  %s3878_s4 = inlined_call_operand.vmem [shape: f32[1,128], index: 4, kind: input, shape index: {}]   ;;  %s3879_s5 = inlined_call_operand.vmem [shape: f32[1,128], index: 5, kind: input, shape index: {}]   ;;  %s3880_s6 = inlined_call_operand.vmem [shape: bf16[2048,128], index: 6, kind: output, shape index: {0}]   ;;  %s3881_s7 = inlined_call_operand.vmem [shape: bf16[2048,128], index: 7, kind: output, shape index: {1}]  }
   0x1 LB: > { %s2270_s25 = sadd.s32 4294967295, %s3329_s24   ;;  %p2274_p0 = scmp.ge.s32.totalorder %s3329_s24, 1  ;;  %s3329_s24 = sphi %s3372_s24, %s18_s24  }
   0x2   : > { %p253_p1 = scmp.lt.s32.totalorder %s3329_s24, 5 }
   0x4   : > { %p254_p2 = pnand %p2274_p0, %p253_p1 }
   0x5   : > { %v3208_v0 = vld [vmem:[%s3876_s2] sm:$0xff] (!%p254_p2)   ;;  %v3331_v1 = vmov (!%p254_p2), 0   ;;  %s2275_s28 = sshll.u32 (!%p254_p2), %s2270_s25, 6  ;;  %v3209_v2 = vld [vmem:[%s3876_s2 + $0x8] sm:$0xff] (!%p254_p2)   ;;  %v3210_v3 = vld [vmem:[%s3876_s2 + $0x10] sm:$0xff] (!%p254_p2)  }
   0x6   : > { %257 = sbr.rel (%p254_p2) target bundleno = 418 (0x1a2), region = 44  ;;  %841 = vmatprep.subr.bf16.mxu0 (!%p254_p2), %v3331_v1  ;;  %3167 = vmatprep.subr.bf16.mxu1 (!%p254_p2), %v3331_v1  ;;  %p297_p3 = scmp.lt.s32.totalorder (!%p254_p2), %s2275_s28, 255  ;;  %v3211_v4 = vld [vmem:[%s3876_s2 + $0x18] sm:$0xff] (!%p254_p2)   ;;  %v3212_v5 = vld [vmem:[%s3876_s2 + $0x20] sm:$0xff] (!%p254_p2)   ;;  %v3213_v7 = vld [vmem:[%s3876_s2 + $0x28] sm:$0xff] (!%p254_p2)  }
   0x7   : > { %842 = vmatpush1.bf16.msra.mxu0 (!%p254_p2), %v3208_v0  ;;  %3183 = vmatpush1.bf16.msra.mxu1 (!%p254_p2), %v3208_v0  ;;  %v3214_v9 = vld [vmem:[%s3876_s2 + $0x30] sm:$0xff] (!%p254_p2)   ;;  %v3215_v10 = vld [vmem:[%s3876_s2 + $0x38] sm:$0xff] (!%p254_p2)   ;;  %v3216_v11 = vld [vmem:[%s3876_s2 + $0x40] sm:$0xff] (!%p254_p2)  }
   0x8   : > { %843 = vmatprep.subr.bf16.mxu0 (!%p254_p2), %v3331_v1  ;;  %3168 = vmatprep.subr.bf16.mxu1 (!%p254_p2), %v3331_v1  ;;  %v3217_v12 = vld [vmem:[%s3876_s2 + $0x48] sm:$0xff] (!%p254_p2)   ;;  %v3218_v13 = vld [vmem:[%s3876_s2 + $0x50] sm:$0xff] (!%p254_p2)   ;;  %v3219_v14 = vld [vmem:[%s3876_s2 + $0x58] sm:$0xff] (!%p254_p2)  }
   0x9   : > { %v3220_v15 = vld [vmem:[%s3876_s2 + $0x60] sm:$0xff] (!%p254_p2)   ;;  %v3221_v16 = vld [vmem:[%s3876_s2 + $0x68] sm:$0xff] (!%p254_p2)   ;;  %v3222_v17 = vld [vmem:[%s3876_s2 + $0x70] sm:$0xff] (!%p254_p2)  }
   0xa   : > { %v3223_v18 = vld [vmem:[%s3876_s2 + $0x78] sm:$0xff] (!%p254_p2)  }
   0xb   : > { %844 = vmatpush1.bf16.msra.mxu0 (!%p254_p2), %v3209_v2  ;;  %3184 = vmatpush1.bf16.msra.mxu1 (!%p254_p2), %v3209_v2 }
   0xc   : > { %845 = vmatprep.subr.bf16.mxu0 (!%p254_p2), %v3331_v1  ;;  %3169 = vmatprep.subr.bf16.mxu1 (!%p254_p2), %v3331_v1 }
   0xd   : > { %s3883_s28 = smov (!%p297_p3, %s2275_s28), 255 }
   0xe   : > { %s2497_s12 = sshll.u32 %s3883_s28, 3  ;;  %s3533_s20 = sshll.u32 %s3883_s28, 2 }
   0xf   : > { %846 = vmatpush1.bf16.msra.mxu0 %v3210_v3  ;;  %3185 = vmatpush1.bf16.msra.mxu1 %v3210_v3  ;;  %s3409_s17 = scalar_lea.vmem %s3874_s0, %s2497_s12  ;;  %s3539_s23 = scalar_lea.vmem %s3875_s1, %s3533_s20 }
  0x10   : > { %847 = vmatprep.subr.bf16.mxu0 %v3331_v1  ;;  %3170 = vmatprep.subr.bf16.mxu1 %v3331_v1  ;;  %v3226_v6 = vld [vmem:[%s3409_s17 + $0x4] ss:$8 sps:$4 sm:$0xff]   ;;  %v3224_v19 = vld [vmem:[%s3409_s17] ss:$8 sps:$4 sm:$0xff]   ;;  %v3230_v21 = vld [vmem:[%s3409_s17 + $0x14] ss:$8 sps:$4 sm:$0xff]   ;;  %s3570_s9 = scalar_lea.vmem %s3880_s6, %s3533_s20  ;;  %s3590_s12 = scalar_lea.vmem %s3881_s7, %s3533_s20 }
  0x11   : > { %v3229_v8 = vld [vmem:[%s3409_s17 + $0x104] ss:$8 sps:$4 sm:$0xff]   ;;  %873 = vmatprep.mubr.bf16.mxu0 %v3226_v6  ;;  %v3227_v20 = vld [vmem:[%s3409_s17 + $0x100] ss:$8 sps:$4 sm:$0xff]   ;;  %v3232_v22 = vld [vmem:[%s3409_s17 + $0x114] ss:$8 sps:$4 sm:$0xff]  }
  0x12   : > { %1001 = vmatprep.mubr.bf16.mxu1 %v3229_v8  ;;  %v3234_v23 = vld [vmem:[%s3409_s17 + $0x10] ss:$8 sps:$4 sm:$0xff]   ;;  %v3236_v25 = vld [vmem:[%s3409_s17 + $0x24] ss:$8 sps:$4 sm:$0xff]   ;;  %v3240_v27 = vld [vmem:[%s3409_s17 + $0x20] ss:$8 sps:$4 sm:$0xff]  }
  0x13   : > { %848 = vmatpush1.bf16.msra.mxu0 %v3211_v4  ;;  %3186 = vmatpush1.bf16.msra.mxu1 %v3211_v4  ;;  %v3235_v24 = vld [vmem:[%s3409_s17 + $0x110] ss:$8 sps:$4 sm:$0xff]   ;;  %v3238_v26 = vld [vmem:[%s3409_s17 + $0x124] ss:$8 sps:$4 sm:$0xff]   ;;  %v3241_v28 = vld [vmem:[%s3409_s17 + $0x120] ss:$8 sps:$4 sm:$0xff]  }
  0x14   : > { %849 = vmatprep.subr.bf16.mxu0 %v3331_v1  ;;  %3171 = vmatprep.subr.bf16.mxu1 %v3331_v1  ;;  %v3242_v29 = vld [vmem:[%s3409_s17 + $0x34] ss:$8 sps:$4 sm:$0xff]   ;;  %v3246_v31 = vld [vmem:[%s3409_s17 + $0x30] ss:$8 sps:$4 sm:$0xff]   ;;  %v3248_v33 = vld [vmem:[%s3409_s17 + $0x44] ss:$8 sps:$4 sm:$0xff]  }
  0x15   : > { %v3244_v30 = vld [vmem:[%s3409_s17 + $0x134] ss:$8 sps:$4 sm:$0xff]   ;;  %v3247_v32 = vld [vmem:[%s3409_s17 + $0x130] ss:$8 sps:$4 sm:$0xff]   ;;  %v3250_v34 = vld [vmem:[%s3409_s17 + $0x144] ss:$8 sps:$4 sm:$0xff]  }
  0x16   : > { %v3252_v35 = vld [vmem:[%s3409_s17 + $0x40] ss:$8 sps:$4 sm:$0xff]   ;;  %v3254_v37 = vld [vmem:[%s3409_s17 + $0x54] ss:$8 sps:$4 sm:$0xff]   ;;  %v3258_v39 = vld [vmem:[%s3409_s17 + $0x50] ss:$8 sps:$4 sm:$0xff]  }
  0x17   : > { %850 = vmatpush1.bf16.msra.mxu0 %v3212_v5  ;;  %3187 = vmatpush1.bf16.msra.mxu1 %v3212_v5  ;;  %v3253_v36 = vld [vmem:[%s3409_s17 + $0x140] ss:$8 sps:$4 sm:$0xff]   ;;  %v3256_v38 = vld [vmem:[%s3409_s17 + $0x154] ss:$8 sps:$4 sm:$0xff]   ;;  %v3259_v40 = vld [vmem:[%s3409_s17 + $0x150] ss:$8 sps:$4 sm:$0xff]  }
  0x18   : > { %851 = vmatprep.subr.bf16.mxu0 %v3331_v1  ;;  %3172 = vmatprep.subr.bf16.mxu1 %v3331_v1  ;;  %v3260_v41 = vld [vmem:[%s3409_s17 + $0x64] ss:$8 sps:$4 sm:$0xff]   ;;  %v3264_v43 = vld [vmem:[%s3409_s17 + $0x60] ss:$8 sps:$4 sm:$0xff]   ;;  %v3266_v45 = vld [vmem:[%s3409_s17 + $0x74] ss:$8 sps:$4 sm:$0xff]  }
  0x19   : > { %v3262_v42 = vld [vmem:[%s3409_s17 + $0x164] ss:$8 sps:$4 sm:$0xff]   ;;  %v3265_v44 = vld [vmem:[%s3409_s17 + $0x160] ss:$8 sps:$4 sm:$0xff]   ;;  %v3268_v46 = vld [vmem:[%s3409_s17 + $0x174] ss:$8 sps:$4 sm:$0xff]  }
  0x1a   : > { %v3270_v47 = vld [vmem:[%s3409_s17 + $0x70] ss:$8 sps:$4 sm:$0xff]   ;;  %v3272_v49 = vld [vmem:[%s3409_s17 + $0x84] ss:$8 sps:$4 sm:$0xff]   ;;  %v3276_v51 = vld [vmem:[%s3409_s17 + $0x80] ss:$8 sps:$4 sm:$0xff]  }
  0x1b   : > { %852 = vmatpush1.bf16.msra.mxu0 %v3213_v7  ;;  %3188 = vmatpush1.bf16.msra.mxu1 %v3213_v7  ;;  %v3271_v48 = vld [vmem:[%s3409_s17 + $0x170] ss:$8 sps:$4 sm:$0xff]   ;;  %v3274_v50 = vld [vmem:[%s3409_s17 + $0x184] ss:$8 sps:$4 sm:$0xff]   ;;  %v3277_v52 = vld [vmem:[%s3409_s17 + $0x180] ss:$8 sps:$4 sm:$0xff]  }
  0x1c   : > { %853 = vmatprep.subr.bf16.mxu0 %v3331_v1  ;;  %3173 = vmatprep.subr.bf16.mxu1 %v3331_v1  ;;  %v3278_v53 = vld [vmem:[%s3409_s17 + $0x94] ss:$8 sps:$4 sm:$0xff]   ;;  %v3282_v55 = vld [vmem:[%s3409_s17 + $0x90] ss:$8 sps:$4 sm:$0xff]   ;;  %v3284_v57 = vld [vmem:[%s3409_s17 + $0xa4] ss:$8 sps:$4 sm:$0xff]  }
  0x1d   : > { %v3280_v54 = vld [vmem:[%s3409_s17 + $0x194] ss:$8 sps:$4 sm:$0xff]   ;;  %v3283_v56 = vld [vmem:[%s3409_s17 + $0x190] ss:$8 sps:$4 sm:$0xff]   ;;  %v3286_v58 = vld [vmem:[%s3409_s17 + $0x1a4] ss:$8 sps:$4 sm:$0xff]  }
  0x1e   : > { %v3288_v59 = vld [vmem:[%s3409_s17 + $0xa0] ss:$8 sps:$4 sm:$0xff]   ;;  %v3290_v61 = vld [vmem:[%s3409_s17 + $0xb4] ss:$8 sps:$4 sm:$0xff]   ;;  %v3294_v63 = vld [vmem:[%s3409_s17 + $0xb0] ss:$8 sps:$4 sm:$0xff]  }
  0x1f   : > { %854 = vmatpush1.bf16.msra.mxu0 %v3214_v9  ;;  %3189 = vmatpush1.bf16.msra.mxu1 %v3214_v9  ;;  %v3289_v60 = vld [vmem:[%s3409_s17 + $0x1a0] ss:$8 sps:$4 sm:$0xff]   ;;  %v3292_v62 = vld [vmem:[%s3409_s17 + $0x1b4] ss:$8 sps:$4 sm:$0xff]   ;;  %v3295_v0 = vld [vmem:[%s3409_s17 + $0x1b0] ss:$8 sps:$4 sm:$0xff]  }
  0x20   : > { %855 = vmatprep.subr.bf16.mxu0 %v3331_v1  ;;  %3174 = vmatprep.subr.bf16.mxu1 %v3331_v1  ;;  %v3298_v2 = vld [vmem:[%s3409_s17 + $0x1c4] ss:$8 sps:$4 sm:$0xff]   ;;  %v3300_v3 = vld [vmem:[%s3409_s17 + $0xc0] ss:$8 sps:$4 sm:$0xff]   ;;  %v3302_v5 = vld [vmem:[%s3409_s17 + $0xd4] ss:$8 sps:$4 sm:$0xff]  }
  0x21   : > { %v3301_v4 = vld [vmem:[%s3409_s17 + $0x1c0] ss:$8 sps:$4 sm:$0xff]   ;;  %v3304_v6 = vld [vmem:[%s3409_s17 + $0x1d4] ss:$8 sps:$4 sm:$0xff]   ;;  %v3306_v7 = vld [vmem:[%s3409_s17 + $0xd0] ss:$8 sps:$4 sm:$0xff]  }
  0x22   : > { %v3307_v8 = vld [vmem:[%s3409_s17 + $0x1d0] ss:$8 sps:$4 sm:$0xff]   ;;  %v3308_v9 = vld [vmem:[%s3409_s17 + $0xe4] ss:$8 sps:$4 sm:$0xff]  }
  0x23   : > { %856 = vmatpush1.bf16.msra.mxu0 %v3215_v10  ;;  %3190 = vmatpush1.bf16.msra.mxu1 %v3215_v10  ;;  %v3310_v10 = vld [vmem:[%s3409_s17 + $0x1e4] ss:$8 sps:$4 sm:$0xff]  }
  0x24   : > { %857 = vmatprep.subr.bf16.mxu0 %v3331_v1  ;;  %3175 = vmatprep.subr.bf16.mxu1 %v3331_v1 }
  0x27   : > { %858 = vmatpush1.bf16.msra.mxu0 %v3216_v11  ;;  %3191 = vmatpush1.bf16.msra.mxu1 %v3216_v11  ;;  %v3312_v11 = vld [vmem:[%s3409_s17 + $0xe0] ss:$8 sps:$4 sm:$0xff]  }
  0x28   : > { %859 = vmatprep.subr.bf16.mxu0 %v3331_v1  ;;  %3176 = vmatprep.subr.bf16.mxu1 %v3331_v1 }
  0x2b   : > { %860 = vmatpush1.bf16.msra.mxu0 %v3217_v12  ;;  %3192 = vmatpush1.bf16.msra.mxu1 %v3217_v12  ;;  %v3313_v12 = vld [vmem:[%s3409_s17 + $0x1e0] ss:$8 sps:$4 sm:$0xff]  }
  0x2c   : > { %861 = vmatprep.subr.bf16.mxu0 %v3331_v1  ;;  %3177 = vmatprep.subr.bf16.mxu1 %v3331_v1 }
  0x2f   : > { %862 = vmatpush1.bf16.msra.mxu0 %v3218_v13  ;;  %3193 = vmatpush1.bf16.msra.mxu1 %v3218_v13  ;;  %v3314_v13 = vld [vmem:[%s3409_s17 + $0xf4] ss:$8 sps:$4 sm:$0xff]  }
  0x30   : > { %863 = vmatprep.subr.bf16.mxu0 %v3331_v1  ;;  %3178 = vmatprep.subr.bf16.mxu1 %v3331_v1 }
  0x33   : > { %864 = vmatpush1.bf16.msra.mxu0 %v3219_v14  ;;  %3194 = vmatpush1.bf16.msra.mxu1 %v3219_v14  ;;  %v3316_v14 = vld [vmem:[%s3409_s17 + $0x1f4] ss:$8 sps:$4 sm:$0xff]  }
  0x34   : > { %865 = vmatprep.subr.bf16.mxu0 %v3331_v1  ;;  %3179 = vmatprep.subr.bf16.mxu1 %v3331_v1 }
  0x37   : > { %866 = vmatpush1.bf16.msra.mxu0 %v3220_v15  ;;  %3195 = vmatpush1.bf16.msra.mxu1 %v3220_v15  ;;  %v3318_v15 = vld [vmem:[%s3409_s17 + $0xf0] ss:$8 sps:$4 sm:$0xff]  }
  0x38   : > { %867 = vmatprep.subr.bf16.mxu0 %v3331_v1  ;;  %3180 = vmatprep.subr.bf16.mxu1 %v3331_v1 }
  0x3b   : > { %868 = vmatpush1.bf16.msra.mxu0 %v3221_v16  ;;  %3196 = vmatpush1.bf16.msra.mxu1 %v3221_v16  ;;  %v3319_v16 = vld [vmem:[%s3409_s17 + $0x1f0] ss:$8 sps:$4 sm:$0xff]  }
  0x3c   : > { %869 = vmatprep.subr.bf16.mxu0 %v3331_v1  ;;  %3181 = vmatprep.subr.bf16.mxu1 %v3331_v1 }
  0x3f   : > { %870 = vmatpush1.bf16.msra.mxu0 %v3222_v17  ;;  %3197 = vmatpush1.bf16.msra.mxu1 %v3222_v17  ;;  %v2627_v17 = vld [vmem:[%s3539_s23] sm:$0xff]  }
  0x40   : > { %871 = vmatprep.subr.bf16.mxu0 %v3331_v1  ;;  %3182 = vmatprep.subr.bf16.mxu1 %v3331_v1  ;;  %v3296_v1 = vld [vmem:[%s3409_s17 + $0xc4] ss:$8 sps:$4 sm:$0xff]  }
  0x43   : > { %872 = vmatpush1.bf16.msra.mxu0 %v3223_v18  ;;  %3198 = vmatpush1.bf16.msra.mxu1 %v3223_v18  ;;  %v3089_v18 = vld [vmem:[%s3539_s23 + $0x80] sm:$0xff]  }
  0x46   : > { %874 = vmatmul.mubr.bf16.vlgmr.msra.gmra.mrb[0].mxu0 %v3224_v19  ;;  %1002 = vmatmul.mubr.bf16.vlgmr.msra.gmra.mrb[0].mxu1 %v3227_v20  ;;  %v3546_v19 = vld [vmem:[%s3877_s3] ss:$0 sm:$0xff]  ;;  %v2628_v20 = vunpack.c.l.bf16 %v2627_v17 }
  0x47   : > { %881 = vmatprep.mubr.bf16.mxu0 %v3230_v21  ;;  %1009 = vmatprep.mubr.bf16.mxu1 %v3232_v22  ;;  %v2692_v21 = vunpack.c.l.bf16 %v3089_v18 }
  0x4e   : > { %882 = vmatmul.mubr.bf16.gmra.mrb[4].mxu0 %v3234_v23  ;;  %1010 = vmatmul.mubr.bf16.gmra.mrb[4].mxu1 %v3235_v24 }
  0x4f   : > { %889 = vmatprep.mubr.bf16.mxu0 %v3236_v25  ;;  %1017 = vmatprep.mubr.bf16.mxu1 %v3238_v26 }
  0x56   : > { %890 = vmatmul.mubr.bf16.gmra.mrb[8].mxu0 %v3240_v27  ;;  %1018 = vmatmul.mubr.bf16.gmra.mrb[8].mxu1 %v3241_v28  ;;  %v2629_v28 = vunpack.c.h.bf16 %v2627_v17 }
  0x57   : > { %897 = vmatprep.mubr.bf16.mxu0 %v3242_v29  ;;  %1025 = vmatprep.mubr.bf16.mxu1 %v3244_v30  ;;  %v2693_v29 = vunpack.c.h.bf16 %v3089_v18  ;;  %v3553_v30 = vld [vmem:[%s3878_s4] ss:$0 sm:$0xff] }
  0x5e   : > { %898 = vmatmul.mubr.bf16.gmra.mrb[12].mxu0 %v3246_v31  ;;  %1026 = vmatmul.mubr.bf16.gmra.mrb[12].mxu1 %v3247_v32 }
  0x5f   : > { %905 = vmatprep.mubr.bf16.mxu0 %v3248_v33  ;;  %1033 = vmatprep.mubr.bf16.mxu1 %v3250_v34 }
  0x66   : > { %906 = vmatmul.mubr.bf16.gmra.mrb[16].mxu0 %v3252_v35  ;;  %1034 = vmatmul.mubr.bf16.gmra.mrb[16].mxu1 %v3253_v36 }
  0x67   : > { %913 = vmatprep.mubr.bf16.mxu0 %v3254_v37  ;;  %1041 = vmatprep.mubr.bf16.mxu1 %v3256_v38 }
  0x6e   : > { %914 = vmatmul.mubr.bf16.gmra.mrb[20].mxu0 %v3258_v39  ;;  %1042 = vmatmul.mubr.bf16.gmra.mrb[20].mxu1 %v3259_v40  ;;  %v3560_v39 = vld [vmem:[%s3879_s5] ss:$0 sm:$0xff]  ;;  %v3074_v40 = vld [vmem:[%s3539_s23 + $0x8] sm:$0xff]  }
  0x6f   : > { %921 = vmatprep.mubr.bf16.mxu0 %v3260_v41  ;;  %1049 = vmatprep.mubr.bf16.mxu1 %v3262_v42 }
  0x76   : > { %922 = vmatmul.mubr.bf16.gmra.mrb[24].mxu0 %v3264_v43  ;;  %1050 = vmatmul.mubr.bf16.gmra.mrb[24].mxu1 %v3265_v44 }
  0x77   : > { %929 = vmatprep.mubr.bf16.mxu0 %v3266_v45  ;;  %1057 = vmatprep.mubr.bf16.mxu1 %v3268_v46  ;;  %v3090_v45 = vld [vmem:[%s3539_s23 + $0x88] sm:$0xff]  }
  0x7e   : > { %930 = vmatmul.mubr.bf16.gmra.mrb[28].mxu0 %v3270_v47  ;;  %1058 = vmatmul.mubr.bf16.gmra.mrb[28].mxu1 %v3271_v48 }
  0x7f   : > { %937 = vmatprep.mubr.bf16.mxu0 %v3272_v49  ;;  %1065 = vmatprep.mubr.bf16.mxu1 %v3274_v50  ;;  %v2632_v49 = vunpack.c.l.bf16 %v3074_v40 }
  0x86   : > { %938 = vmatmul.mubr.bf16.gmra.mrb[32].mxu0 %v3276_v51  ;;  %1066 = vmatmul.mubr.bf16.gmra.mrb[32].mxu1 %v3277_v52 }
  0x87   : > { %945 = vmatprep.mubr.bf16.mxu0 %v3278_v53  ;;  %1073 = vmatprep.mubr.bf16.mxu1 %v3280_v54 }
  0x8e   : > { %946 = vmatmul.mubr.bf16.gmra.mrb[36].mxu0 %v3282_v55  ;;  %1074 = vmatmul.mubr.bf16.gmra.mrb[36].mxu1 %v3283_v56  ;;  %v2696_v55 = vunpack.c.l.bf16 %v3090_v45 }
  0x8f   : > { %953 = vmatprep.mubr.bf16.mxu0 %v3284_v57  ;;  %1081 = vmatprep.mubr.bf16.mxu1 %v3286_v58 }
  0x96   : > { %954 = vmatmul.mubr.bf16.gmra.mrb[40].mxu0 %v3288_v59  ;;  %1082 = vmatmul.mubr.bf16.gmra.mrb[40].mxu1 %v3289_v60  ;;  %v2633_v60 = vunpack.c.h.bf16 %v3074_v40 }
  0x97   : > { %961 = vmatprep.mubr.bf16.mxu0 %v3290_v61  ;;  %1089 = vmatprep.mubr.bf16.mxu1 %v3292_v62  ;;  %v2697_v61 = vunpack.c.h.bf16 %v3090_v45 }
  0x9e   : > { %962 = vmatmul.mubr.bf16.gmra.mrb[44].mxu0 %v3294_v63  ;;  %1090 = vmatmul.mubr.bf16.gmra.mrb[44].mxu1 %v3295_v0 }
  0x9f   : > { %969 = vmatprep.mubr.bf16.mxu0 %v3296_v1  ;;  %1097 = vmatprep.mubr.bf16.mxu1 %v3298_v2 }
  0xa6   : > { %970 = vmatmul.mubr.bf16.gmra.mrb[48].mxu0 %v3300_v3  ;;  %1098 = vmatmul.mubr.bf16.gmra.mrb[48].mxu1 %v3301_v4 }
  0xa7   : > { %977 = vmatprep.mubr.bf16.mxu0 %v3302_v5  ;;  %1105 = vmatprep.mubr.bf16.mxu1 %v3304_v6 }
  0xae   : > { %978 = vmatmul.mubr.bf16.gmra.mrb[52].mxu0 %v3306_v7  ;;  %1106 = vmatmul.mubr.bf16.gmra.mrb[52].mxu1 %v3307_v8 }
  0xaf   : > { %985 = vmatprep.mubr.bf16.mxu0 %v3308_v9  ;;  %1113 = vmatprep.mubr.bf16.mxu1 %v3310_v10  ;;  %v3075_v9 = vld [vmem:[%s3539_s23 + $0x10] sm:$0xff]  }
  0xb0   : > { %v3091_v10 = vld [vmem:[%s3539_s23 + $0x90] sm:$0xff]  }
  0xb6   : > { %986 = vmatmul.mubr.bf16.gmra.mrb[56].mxu0 %v3312_v11  ;;  %1114 = vmatmul.mubr.bf16.gmra.mrb[56].mxu1 %v3313_v12 }
  0xb7   : > { %993 = vmatprep.mubr.bf16.mxu0 %v3314_v13  ;;  %1121 = vmatprep.mubr.bf16.mxu1 %v3316_v14 }
  0xbe   : > { %994 = vmatmul.mubr.bf16.gmra.mrb[60].mxu0 %v3318_v15  ;;  %1122 = vmatmul.mubr.bf16.gmra.mrb[60].mxu1 %v3319_v16 }
 0x119   : > { %v875_v22 = vpop.f32.mrb[0].mxu0  ;;  %v1003_v23 = vpop.f32.mrb[0].mxu1 }
 0x11a   : > { %v876_v24 = vadd.f32 %v3546_v19, %v875_v22  ;;  %v1004_v25 = vadd.f32 %v3546_v19, %v1003_v23  ;;  %v877_v26 = vpop.f32.mrb[1].mxu0  ;;  %v1005_v27 = vpop.f32.mrb[1].mxu1  ;;  %v2700_v22 = vunpack.c.l.bf16 %v3091_v10 }
 0x11b   : > { %v878_v31 = vpop.f32.mrb[2].mxu0  ;;  %v1006_v32 = vpop.f32.mrb[2].mxu1 }
 0x11c   : > { %v1258_v33 = vadd.f32 %v2628_v20, %v876_v24  ;;  %v1290_v34 = vadd.f32 %v2692_v21, %v1004_v25  ;;  %v879_v35 = vadd.f32 %v3546_v19, %v878_v31  ;;  %v1007_v36 = vadd.f32 %v3546_v19, %v1006_v32  ;;  %v880_v37 = vpop.f32.mrb[3].mxu0  ;;  %v1008_v38 = vpop.f32.mrb[3].mxu1 }
 0x11d   : > { %v2636_v21 = vunpack.c.l.bf16 %v3075_v9  ;;  %v2637_v37 = vunpack.c.h.bf16 %v3075_v9 }
 0x11e   : > { %v1649_v41 = vmul.f32 %v3553_v30, %v1258_v33  ;;  %v1681_v42 = vmul.f32 %v3553_v30, %v1290_v34  ;;  %v1259_v43 = vadd.f32 %v2629_v28, %v879_v35  ;;  %v1291_v44 = vadd.f32 %v2693_v29, %v1007_v36 }
 0x120   : > { %v1720_v46 = vadd.f32 %v3560_v39, %v1649_v41  ;;  %v2757_v47 = vpack.c.bf16 %v1259_v43, %v1258_v33  ;;  %v1650_v48 = vmul.f32 %v3553_v30, %v1259_v43  ;;  %v1752_v50 = vadd.f32 %v3560_v39, %v1681_v42 }
 0x121   : > { %v2837_v51 = vpack.c.bf16 %v1291_v44, %v1290_v34  ;;  %v1682_v52 = vmul.f32 %v3553_v30, %v1291_v44  ;;  %v883_v53 = vpop.f32.mrb[4].mxu0  ;;  %v1011_v54 = vpop.f32.mrb[4].mxu1  ;;  %v2701_v43 = vunpack.c.h.bf16 %v3091_v10 }
 0x122   : > { %2758 = vst [vmem:[%s3570_s9] sm:$0xff] %v2757_v47   ;;  %v1721_v56 = vadd.f32 %v3560_v39, %v1650_v48  ;;  %v884_v57 = vadd.f32 %v3546_v19, %v883_v53  ;;  %v885_v58 = vpop.f32.mrb[5].mxu0  ;;  %v1013_v59 = vpop.f32.mrb[5].mxu1  ;;  %v1784_v62 = vmax.f32 %v1720_v46, 0.0  ;;  %v1012_v0 = vadd.f32 %v3546_v19, %v1011_v54  ;;  %v3076_v53 = vld [vmem:[%s3539_s23 + $0x18] sm:$0xff]  }
 0x123   : > { %3120 = vst [vmem:[%s3570_s9 + $0x80] sm:$0xff] %v2837_v51   ;;  %v1753_v63 = vadd.f32 %v3560_v39, %v1682_v52  ;;  %v886_v1 = vpop.f32.mrb[6].mxu0  ;;  %v1014_v2 = vpop.f32.mrb[6].mxu1  ;;  %v1816_v11 = vmax.f32 %v1752_v50, 0.0  ;;  %v3092_v58 = vld [vmem:[%s3539_s23 + $0x98] sm:$0xff]  }
 0x124   : > { %v1785_v3 = vmax.f32 %v1721_v56, 0.0  ;;  %v1260_v4 = vadd.f32 %v2632_v49, %v884_v57  ;;  %v887_v5 = vadd.f32 %v3546_v19, %v886_v1  ;;  %v1015_v6 = vadd.f32 %v3546_v19, %v1014_v2  ;;  %v888_v7 = vpop.f32.mrb[7].mxu0  ;;  %v1016_v8 = vpop.f32.mrb[7].mxu1 }
 0x125   : > { %v1817_v12 = vmax.f32 %v1753_v63, 0.0  ;;  %v1292_v13 = vadd.f32 %v2696_v55, %v1012_v0  ;;  %v2640_v0 = vunpack.c.l.bf16 %v3076_v53 }
 0x126   : > { %v2917_v14 = vpack.c.bf16 %v1785_v3, %v1784_v62  ;;  %v1651_v15 = vmul.f32 %v3553_v30, %v1260_v4  ;;  %v1261_v16 = vadd.f32 %v2633_v60, %v887_v5  ;;  %v1293_v17 = vadd.f32 %v2697_v61, %v1015_v6 }
 0x127   : > { %v2997_v18 = vpack.c.bf16 %v1817_v12, %v1816_v11  ;;  %v1683_v20 = vmul.f32 %v3553_v30, %v1292_v13  ;;  %v2704_v6 = vunpack.c.l.bf16 %v3092_v58  ;;  %v2641_v11 = vunpack.c.h.bf16 %v3076_v53 }
 0x128   : > { %2918 = vst [vmem:[%s3590_s12] sm:$0xff] %v2917_v14   ;;  %v1722_v23 = vadd.f32 %v3560_v39, %v1651_v15  ;;  %v2762_v24 = vpack.c.bf16 %v1261_v16, %v1260_v4  ;;  %v1652_v25 = vmul.f32 %v3553_v30, %v1261_v16  ;;  %v2842_v26 = vpack.c.bf16 %v1293_v17, %v1292_v13 }
 0x129   : > { %3151 = vst [vmem:[%s3590_s12 + $0x80] sm:$0xff] %v2997_v18   ;;  %v1754_v27 = vadd.f32 %v3560_v39, %v1683_v20  ;;  %v1684_v28 = vmul.f32 %v3553_v30, %v1293_v17  ;;  %v891_v29 = vpop.f32.mrb[8].mxu0  ;;  %v1019_v31 = vpop.f32.mrb[8].mxu1  ;;  %v2705_v12 = vunpack.c.h.bf16 %v3092_v58 }
 0x12a   : > { %3105 = vst [vmem:[%s3570_s9 + $0x8] sm:$0xff] %v2762_v24   ;;  %v1723_v32 = vadd.f32 %v3560_v39, %v1652_v25  ;;  %3121 = vst [vmem:[%s3570_s9 + $0x88] sm:$0xff] %v2842_v26   ;;  %v892_v33 = vadd.f32 %v3546_v19, %v891_v29  ;;  %v1020_v34 = vadd.f32 %v3546_v19, %v1019_v31  ;;  %v893_v35 = vpop.f32.mrb[9].mxu0  ;;  %v1021_v36 = vpop.f32.mrb[9].mxu1  ;;  %v1786_v38 = vmax.f32 %v1722_v23, 0.0  ;;  %v3077_v25 = vld [vmem:[%s3539_s23 + $0x20] sm:$0xff]  }
 0x12b   : > { %v1755_v40 = vadd.f32 %v3560_v39, %v1684_v28  ;;  %v894_v41 = vpop.f32.mrb[10].mxu0  ;;  %v1022_v42 = vpop.f32.mrb[10].mxu1  ;;  %v1818_v50 = vmax.f32 %v1754_v27, 0.0  ;;  %v3093_v26 = vld [vmem:[%s3539_s23 + $0xa0] sm:$0xff]   ;;  %v2645_v53 = vunpack.c.h.bf16 %v3077_v25 }
 0x12c   : > { %v1787_v44 = vmax.f32 %v1723_v32, 0.0  ;;  %v1262_v45 = vadd.f32 %v2636_v21, %v892_v33  ;;  %v1294_v46 = vadd.f32 %v2700_v22, %v1020_v34  ;;  %v895_v47 = vadd.f32 %v3546_v19, %v894_v41  ;;  %v896_v48 = vpop.f32.mrb[11].mxu0  ;;  %v1024_v49 = vpop.f32.mrb[11].mxu1 }
 0x12d   : > { %v1819_v51 = vmax.f32 %v1755_v40, 0.0  ;;  %v1023_v52 = vadd.f32 %v3546_v19, %v1022_v42  ;;  %v2709_v58 = vunpack.c.h.bf16 %v3093_v26 }
 0x12e   : > { %v2922_v54 = vpack.c.bf16 %v1787_v44, %v1786_v38  ;;  %v1653_v55 = vmul.f32 %v3553_v30, %v1262_v45  ;;  %v1685_v56 = vmul.f32 %v3553_v30, %v1294_v46  ;;  %v1263_v57 = vadd.f32 %v2637_v37, %v895_v47 }
 0x12f   : > { %v3002_v59 = vpack.c.bf16 %v1819_v51, %v1818_v50  ;;  %v1295_v60 = vadd.f32 %v2701_v43, %v1023_v52  ;;  %v2644_v37 = vunpack.c.l.bf16 %v3077_v25  ;;  %v2708_v38 = vunpack.c.l.bf16 %v3093_v26 }
 0x130   : > { %3136 = vst [vmem:[%s3590_s12 + $0x8] sm:$0xff] %v2922_v54   ;;  %v1724_v61 = vadd.f32 %v3560_v39, %v1653_v55  ;;  %v2767_v62 = vpack.c.bf16 %v1263_v57, %v1262_v45  ;;  %v1654_v63 = vmul.f32 %v3553_v30, %v1263_v57  ;;  %v1756_v1 = vadd.f32 %v3560_v39, %v1685_v56 }
 0x131   : > { %3152 = vst [vmem:[%s3590_s12 + $0x88] sm:$0xff] %v3002_v59   ;;  %v2847_v2 = vpack.c.bf16 %v1295_v60, %v1294_v46  ;;  %v1686_v3 = vmul.f32 %v3553_v30, %v1295_v60  ;;  %v899_v4 = vpop.f32.mrb[12].mxu0  ;;  %v1027_v5 = vpop.f32.mrb[12].mxu1 }
 0x132   : > { %3106 = vst [vmem:[%s3570_s9 + $0x10] sm:$0xff] %v2767_v62   ;;  %v1725_v7 = vadd.f32 %v3560_v39, %v1654_v63  ;;  %v900_v8 = vadd.f32 %v3546_v19, %v899_v4  ;;  %v901_v9 = vpop.f32.mrb[13].mxu0  ;;  %v1029_v10 = vpop.f32.mrb[13].mxu1  ;;  %v1788_v13 = vmax.f32 %v1724_v61, 0.0  ;;  %v1028_v15 = vadd.f32 %v3546_v19, %v1027_v5  ;;  %v3078_v4 = vld [vmem:[%s3539_s23 + $0x28] sm:$0xff]  }
 0x133   : > { %3122 = vst [vmem:[%s3570_s9 + $0x90] sm:$0xff] %v2847_v2   ;;  %v1757_v14 = vadd.f32 %v3560_v39, %v1686_v3  ;;  %v902_v16 = vpop.f32.mrb[14].mxu0  ;;  %v1030_v17 = vpop.f32.mrb[14].mxu1  ;;  %v1820_v27 = vmax.f32 %v1756_v1, 0.0  ;;  %v3094_v9 = vld [vmem:[%s3539_s23 + $0xa8] sm:$0xff]  }
 0x134   : > { %v1789_v18 = vmax.f32 %v1725_v7, 0.0  ;;  %v1264_v20 = vadd.f32 %v2640_v0, %v900_v8  ;;  %v903_v21 = vadd.f32 %v3546_v19, %v902_v16  ;;  %v1031_v22 = vadd.f32 %v3546_v19, %v1030_v17  ;;  %v904_v23 = vpop.f32.mrb[15].mxu0  ;;  %v1032_v24 = vpop.f32.mrb[15].mxu1 }
 0x135   : > { %v1821_v28 = vmax.f32 %v1757_v14, 0.0  ;;  %v1296_v29 = vadd.f32 %v2704_v6, %v1028_v15  ;;  %v2648_v15 = vunpack.c.l.bf16 %v3078_v4 }
 0x136   : > { %v2927_v31 = vpack.c.bf16 %v1789_v18, %v1788_v13  ;;  %v1655_v32 = vmul.f32 %v3553_v30, %v1264_v20  ;;  %v1265_v33 = vadd.f32 %v2641_v11, %v903_v21  ;;  %v1297_v34 = vadd.f32 %v2705_v12, %v1031_v22 }
 0x137   : > { %v3007_v35 = vpack.c.bf16 %v1821_v28, %v1820_v27  ;;  %v1687_v36 = vmul.f32 %v3553_v30, %v1296_v29  ;;  %v2712_v22 = vunpack.c.l.bf16 %v3094_v9  ;;  %v2649_v27 = vunpack.c.h.bf16 %v3078_v4 }
 0x138   : > { %3137 = vst [vmem:[%s3590_s12 + $0x10] sm:$0xff] %v2927_v31   ;;  %v1726_v40 = vadd.f32 %v3560_v39, %v1655_v32  ;;  %v2772_v41 = vpack.c.bf16 %v1265_v33, %v1264_v20  ;;  %v1656_v42 = vmul.f32 %v3553_v30, %v1265_v33  ;;  %v2852_v43 = vpack.c.bf16 %v1297_v34, %v1296_v29 }
 0x139   : > { %3153 = vst [vmem:[%s3590_s12 + $0x90] sm:$0xff] %v3007_v35   ;;  %v1758_v44 = vadd.f32 %v3560_v39, %v1687_v36  ;;  %v1688_v45 = vmul.f32 %v3553_v30, %v1297_v34  ;;  %v907_v46 = vpop.f32.mrb[16].mxu0  ;;  %v1035_v47 = vpop.f32.mrb[16].mxu1  ;;  %v2713_v28 = vunpack.c.h.bf16 %v3094_v9 }
 0x13a   : > { %3107 = vst [vmem:[%s3570_s9 + $0x18] sm:$0xff] %v2772_v41   ;;  %v1727_v48 = vadd.f32 %v3560_v39, %v1656_v42  ;;  %3123 = vst [vmem:[%s3570_s9 + $0x98] sm:$0xff] %v2852_v43   ;;  %v908_v49 = vadd.f32 %v3546_v19, %v907_v46  ;;  %v1036_v50 = vadd.f32 %v3546_v19, %v1035_v47  ;;  %v909_v51 = vpop.f32.mrb[17].mxu0  ;;  %v1037_v52 = vpop.f32.mrb[17].mxu1  ;;  %v1790_v54 = vmax.f32 %v1726_v40, 0.0  ;;  %v3079_v42 = vld [vmem:[%s3539_s23 + $0x30] sm:$0xff]  }
 0x13b   : > { %v1759_v55 = vadd.f32 %v3560_v39, %v1688_v45  ;;  %v910_v56 = vpop.f32.mrb[18].mxu0  ;;  %v1038_v57 = vpop.f32.mrb[18].mxu1  ;;  %v1822_v1 = vmax.f32 %v1758_v44, 0.0  ;;  %v3095_v43 = vld [vmem:[%s3539_s23 + $0xb0] sm:$0xff]   ;;  %v2653_v4 = vunpack.c.h.bf16 %v3079_v42 }
 0x13c   : > { %v1791_v59 = vmax.f32 %v1727_v48, 0.0  ;;  %v1266_v60 = vadd.f32 %v2644_v37, %v908_v49  ;;  %v1298_v61 = vadd.f32 %v2708_v38, %v1036_v50  ;;  %v911_v62 = vadd.f32 %v3546_v19, %v910_v56  ;;  %v912_v63 = vpop.f32.mrb[19].mxu0  ;;  %v1040_v0 = vpop.f32.mrb[19].mxu1 }
 0x13d   : > { %v1823_v2 = vmax.f32 %v1759_v55, 0.0  ;;  %v1039_v3 = vadd.f32 %v3546_v19, %v1038_v57  ;;  %v2717_v9 = vunpack.c.h.bf16 %v3095_v43 }
 0x13e   : > { %v2932_v5 = vpack.c.bf16 %v1791_v59, %v1790_v54  ;;  %v1657_v6 = vmul.f32 %v3553_v30, %v1266_v60  ;;  %v1689_v7 = vmul.f32 %v3553_v30, %v1298_v61  ;;  %v1267_v8 = vadd.f32 %v2645_v53, %v911_v62 }
 0x13f   : > { %v3012_v10 = vpack.c.bf16 %v1823_v2, %v1822_v1  ;;  %v1299_v11 = vadd.f32 %v2709_v58, %v1039_v3  ;;  %v2652_v53 = vunpack.c.l.bf16 %v3079_v42  ;;  %v2716_v54 = vunpack.c.l.bf16 %v3095_v43 }
 0x140   : > { %3138 = vst [vmem:[%s3590_s12 + $0x18] sm:$0xff] %v2932_v5   ;;  %v1728_v12 = vadd.f32 %v3560_v39, %v1657_v6  ;;  %v2777_v13 = vpack.c.bf16 %v1267_v8, %v1266_v60  ;;  %v1658_v14 = vmul.f32 %v3553_v30, %v1267_v8  ;;  %v1760_v16 = vadd.f32 %v3560_v39, %v1689_v7 }
 0x141   : > { %3154 = vst [vmem:[%s3590_s12 + $0x98] sm:$0xff] %v3012_v10   ;;  %v2857_v17 = vpack.c.bf16 %v1299_v11, %v1298_v61  ;;  %v1690_v18 = vmul.f32 %v3553_v30, %v1299_v11  ;;  %v915_v20 = vpop.f32.mrb[20].mxu0  ;;  %v1043_v21 = vpop.f32.mrb[20].mxu1 }
 0x142   : > { %3108 = vst [vmem:[%s3570_s9 + $0x20] sm:$0xff] %v2777_v13   ;;  %v1729_v23 = vadd.f32 %v3560_v39, %v1658_v14  ;;  %v916_v24 = vadd.f32 %v3546_v19, %v915_v20  ;;  %v917_v25 = vpop.f32.mrb[21].mxu0  ;;  %v1045_v26 = vpop.f32.mrb[21].mxu1  ;;  %v1792_v29 = vmax.f32 %v1728_v12, 0.0  ;;  %v1044_v32 = vadd.f32 %v3546_v19, %v1043_v21  ;;  %v3080_v20 = vld [vmem:[%s3539_s23 + $0x38] sm:$0xff]  }
 0x143   : > { %3124 = vst [vmem:[%s3570_s9 + $0xa0] sm:$0xff] %v2857_v17   ;;  %v1761_v31 = vadd.f32 %v3560_v39, %v1690_v18  ;;  %v918_v33 = vpop.f32.mrb[22].mxu0  ;;  %v1046_v34 = vpop.f32.mrb[22].mxu1  ;;  %v1824_v44 = vmax.f32 %v1760_v16, 0.0  ;;  %v3096_v25 = vld [vmem:[%s3539_s23 + $0xb8] sm:$0xff]  }
 0x144   : > { %v1793_v35 = vmax.f32 %v1729_v23, 0.0  ;;  %v1268_v36 = vadd.f32 %v2648_v15, %v916_v24  ;;  %v919_v37 = vadd.f32 %v3546_v19, %v918_v33  ;;  %v1047_v38 = vadd.f32 %v3546_v19, %v1046_v34  ;;  %v920_v40 = vpop.f32.mrb[23].mxu0  ;;  %v1048_v41 = vpop.f32.mrb[23].mxu1 }
 0x145   : > { %v1825_v45 = vmax.f32 %v1761_v31, 0.0  ;;  %v1300_v46 = vadd.f32 %v2712_v22, %v1044_v32  ;;  %v2656_v32 = vunpack.c.l.bf16 %v3080_v20 }
 0x146   : > { %v2937_v47 = vpack.c.bf16 %v1793_v35, %v1792_v29  ;;  %v1659_v48 = vmul.f32 %v3553_v30, %v1268_v36  ;;  %v1269_v49 = vadd.f32 %v2649_v27, %v919_v37  ;;  %v1301_v50 = vadd.f32 %v2713_v28, %v1047_v38 }
 0x147   : > { %v3017_v51 = vpack.c.bf16 %v1825_v45, %v1824_v44  ;;  %v1691_v52 = vmul.f32 %v3553_v30, %v1300_v46  ;;  %v2720_v38 = vunpack.c.l.bf16 %v3096_v25  ;;  %v2657_v44 = vunpack.c.h.bf16 %v3080_v20 }
 0x148   : > { %3139 = vst [vmem:[%s3590_s12 + $0x20] sm:$0xff] %v2937_v47   ;;  %v1730_v55 = vadd.f32 %v3560_v39, %v1659_v48  ;;  %v2782_v56 = vpack.c.bf16 %v1269_v49, %v1268_v36  ;;  %v1660_v57 = vmul.f32 %v3553_v30, %v1269_v49  ;;  %v2862_v58 = vpack.c.bf16 %v1301_v50, %v1300_v46 }
 0x149   : > { %3155 = vst [vmem:[%s3590_s12 + $0xa0] sm:$0xff] %v3017_v51   ;;  %v1762_v59 = vadd.f32 %v3560_v39, %v1691_v52  ;;  %v1692_v60 = vmul.f32 %v3553_v30, %v1301_v50  ;;  %v923_v61 = vpop.f32.mrb[24].mxu0  ;;  %v1051_v62 = vpop.f32.mrb[24].mxu1  ;;  %v2721_v45 = vunpack.c.h.bf16 %v3096_v25 }
 0x14a   : > { %3109 = vst [vmem:[%s3570_s9 + $0x28] sm:$0xff] %v2782_v56   ;;  %v1731_v63 = vadd.f32 %v3560_v39, %v1660_v57  ;;  %3125 = vst [vmem:[%s3570_s9 + $0xa8] sm:$0xff] %v2862_v58   ;;  %v924_v0 = vadd.f32 %v3546_v19, %v923_v61  ;;  %v1052_v1 = vadd.f32 %v3546_v19, %v1051_v62  ;;  %v925_v2 = vpop.f32.mrb[25].mxu0  ;;  %v1053_v3 = vpop.f32.mrb[25].mxu1  ;;  %v1794_v5 = vmax.f32 %v1730_v55, 0.0  ;;  %v3081_v57 = vld [vmem:[%s3539_s23 + $0x40] sm:$0xff]  }
 0x14b   : > { %v1763_v6 = vadd.f32 %v3560_v39, %v1692_v60  ;;  %v926_v7 = vpop.f32.mrb[26].mxu0  ;;  %v1054_v8 = vpop.f32.mrb[26].mxu1  ;;  %v1826_v16 = vmax.f32 %v1762_v59, 0.0  ;;  %v3097_v58 = vld [vmem:[%s3539_s23 + $0xc0] sm:$0xff]   ;;  %v2661_v20 = vunpack.c.h.bf16 %v3081_v57 }
 0x14c   : > { %v1795_v10 = vmax.f32 %v1731_v63, 0.0  ;;  %v1270_v11 = vadd.f32 %v2652_v53, %v924_v0  ;;  %v1302_v12 = vadd.f32 %v2716_v54, %v1052_v1  ;;  %v927_v13 = vadd.f32 %v3546_v19, %v926_v7  ;;  %v928_v14 = vpop.f32.mrb[27].mxu0  ;;  %v1056_v15 = vpop.f32.mrb[27].mxu1 }
 0x14d   : > { %v1827_v17 = vmax.f32 %v1763_v6, 0.0  ;;  %v1055_v18 = vadd.f32 %v3546_v19, %v1054_v8  ;;  %v2725_v25 = vunpack.c.h.bf16 %v3097_v58 }
 0x14e   : > { %v2942_v21 = vpack.c.bf16 %v1795_v10, %v1794_v5  ;;  %v1661_v22 = vmul.f32 %v3553_v30, %v1270_v11  ;;  %v1693_v23 = vmul.f32 %v3553_v30, %v1302_v12  ;;  %v1271_v24 = vadd.f32 %v2653_v4, %v927_v13 }
 0x14f   : > { %v3022_v26 = vpack.c.bf16 %v1827_v17, %v1826_v16  ;;  %v1303_v27 = vadd.f32 %v2717_v9, %v1055_v18  ;;  %v2660_v4 = vunpack.c.l.bf16 %v3081_v57  ;;  %v2724_v5 = vunpack.c.l.bf16 %v3097_v58 }
 0x150   : > { %3140 = vst [vmem:[%s3590_s12 + $0x28] sm:$0xff] %v2942_v21   ;;  %v1732_v28 = vadd.f32 %v3560_v39, %v1661_v22  ;;  %v2787_v29 = vpack.c.bf16 %v1271_v24, %v1270_v11  ;;  %v1662_v31 = vmul.f32 %v3553_v30, %v1271_v24  ;;  %v1764_v33 = vadd.f32 %v3560_v39, %v1693_v23 }
 0x151   : > { %3156 = vst [vmem:[%s3590_s12 + $0xa8] sm:$0xff] %v3022_v26   ;;  %v2867_v34 = vpack.c.bf16 %v1303_v27, %v1302_v12  ;;  %v1694_v35 = vmul.f32 %v3553_v30, %v1303_v27  ;;  %v931_v36 = vpop.f32.mrb[28].mxu0  ;;  %v1059_v37 = vpop.f32.mrb[28].mxu1 }
 0x152   : > { %3110 = vst [vmem:[%s3570_s9 + $0x30] sm:$0xff] %v2787_v29   ;;  %v1733_v40 = vadd.f32 %v3560_v39, %v1662_v31  ;;  %v932_v41 = vadd.f32 %v3546_v19, %v931_v36  ;;  %v933_v42 = vpop.f32.mrb[29].mxu0  ;;  %v1061_v43 = vpop.f32.mrb[29].mxu1  ;;  %v1796_v46 = vmax.f32 %v1732_v28, 0.0  ;;  %v1060_v48 = vadd.f32 %v3546_v19, %v1059_v37  ;;  %v3082_v36 = vld [vmem:[%s3539_s23 + $0x48] sm:$0xff]  }
 0x153   : > { %3126 = vst [vmem:[%s3570_s9 + $0xb0] sm:$0xff] %v2867_v34   ;;  %v1765_v47 = vadd.f32 %v3560_v39, %v1694_v35  ;;  %v934_v49 = vpop.f32.mrb[30].mxu0  ;;  %v1062_v50 = vpop.f32.mrb[30].mxu1  ;;  %v1828_v59 = vmax.f32 %v1764_v33, 0.0  ;;  %v3098_v42 = vld [vmem:[%s3539_s23 + $0xc8] sm:$0xff]  }
 0x154   : > { %v1797_v51 = vmax.f32 %v1733_v40, 0.0  ;;  %v1272_v52 = vadd.f32 %v2656_v32, %v932_v41  ;;  %v935_v53 = vadd.f32 %v3546_v19, %v934_v49  ;;  %v1063_v54 = vadd.f32 %v3546_v19, %v1062_v50  ;;  %v936_v55 = vpop.f32.mrb[31].mxu0  ;;  %v1064_v56 = vpop.f32.mrb[31].mxu1 }
 0x155   : > { %v1829_v60 = vmax.f32 %v1765_v47, 0.0  ;;  %v1304_v61 = vadd.f32 %v2720_v38, %v1060_v48  ;;  %v2664_v48 = vunpack.c.l.bf16 %v3082_v36 }
 0x156   : > { %v2947_v62 = vpack.c.bf16 %v1797_v51, %v1796_v46  ;;  %v1663_v63 = vmul.f32 %v3553_v30, %v1272_v52  ;;  %v1273_v0 = vadd.f32 %v2657_v44, %v935_v53  ;;  %v1305_v1 = vadd.f32 %v2721_v45, %v1063_v54 }
 0x157   : > { %v3027_v2 = vpack.c.bf16 %v1829_v60, %v1828_v59  ;;  %v1695_v3 = vmul.f32 %v3553_v30, %v1304_v61  ;;  %v2728_v54 = vunpack.c.l.bf16 %v3098_v42  ;;  %v2665_v59 = vunpack.c.h.bf16 %v3082_v36 }
 0x158   : > { %3141 = vst [vmem:[%s3590_s12 + $0x30] sm:$0xff] %v2947_v62   ;;  %v1734_v6 = vadd.f32 %v3560_v39, %v1663_v63  ;;  %v2792_v7 = vpack.c.bf16 %v1273_v0, %v1272_v52  ;;  %v1664_v8 = vmul.f32 %v3553_v30, %v1273_v0  ;;  %v2872_v9 = vpack.c.bf16 %v1305_v1, %v1304_v61 }
 0x159   : > { %3157 = vst [vmem:[%s3590_s12 + $0xb0] sm:$0xff] %v3027_v2   ;;  %v1766_v10 = vadd.f32 %v3560_v39, %v1695_v3  ;;  %v1696_v11 = vmul.f32 %v3553_v30, %v1305_v1  ;;  %v939_v12 = vpop.f32.mrb[32].mxu0  ;;  %v1067_v13 = vpop.f32.mrb[32].mxu1  ;;  %v2729_v60 = vunpack.c.h.bf16 %v3098_v42 }
 0x15a   : > { %3111 = vst [vmem:[%s3570_s9 + $0x38] sm:$0xff] %v2792_v7   ;;  %v1735_v14 = vadd.f32 %v3560_v39, %v1664_v8  ;;  %3127 = vst [vmem:[%s3570_s9 + $0xb8] sm:$0xff] %v2872_v9   ;;  %v940_v15 = vadd.f32 %v3546_v19, %v939_v12  ;;  %v1068_v16 = vadd.f32 %v3546_v19, %v1067_v13  ;;  %v941_v17 = vpop.f32.mrb[33].mxu0  ;;  %v1069_v18 = vpop.f32.mrb[33].mxu1  ;;  %v1798_v21 = vmax.f32 %v1734_v6, 0.0  ;;  %v3083_v8 = vld [vmem:[%s3539_s23 + $0x50] sm:$0xff]  }
 0x15b   : > { %v1767_v22 = vadd.f32 %v3560_v39, %v1696_v11  ;;  %v942_v23 = vpop.f32.mrb[34].mxu0  ;;  %v1070_v24 = vpop.f32.mrb[34].mxu1  ;;  %v1830_v33 = vmax.f32 %v1766_v10, 0.0  ;;  %v3099_v9 = vld [vmem:[%s3539_s23 + $0xd0] sm:$0xff]   ;;  %v2669_v36 = vunpack.c.h.bf16 %v3083_v8 }
 0x15c   : > { %v1799_v26 = vmax.f32 %v1735_v14, 0.0  ;;  %v1274_v27 = vadd.f32 %v2660_v4, %v940_v15  ;;  %v1306_v28 = vadd.f32 %v2724_v5, %v1068_v16  ;;  %v943_v29 = vadd.f32 %v3546_v19, %v942_v23  ;;  %v944_v31 = vpop.f32.mrb[35].mxu0  ;;  %v1072_v32 = vpop.f32.mrb[35].mxu1 }
 0x15d   : > { %v1831_v34 = vmax.f32 %v1767_v22, 0.0  ;;  %v1071_v35 = vadd.f32 %v3546_v19, %v1070_v24  ;;  %v2733_v42 = vunpack.c.h.bf16 %v3099_v9 }
 0x15e   : > { %v2952_v37 = vpack.c.bf16 %v1799_v26, %v1798_v21  ;;  %v1665_v38 = vmul.f32 %v3553_v30, %v1274_v27  ;;  %v1697_v40 = vmul.f32 %v3553_v30, %v1306_v28  ;;  %v1275_v41 = vadd.f32 %v2661_v20, %v943_v29 }
 0x15f   : > { %v3032_v43 = vpack.c.bf16 %v1831_v34, %v1830_v33  ;;  %v1307_v44 = vadd.f32 %v2725_v25, %v1071_v35  ;;  %v2668_v20 = vunpack.c.l.bf16 %v3083_v8  ;;  %v2732_v21 = vunpack.c.l.bf16 %v3099_v9 }
 0x160   : > { %3142 = vst [vmem:[%s3590_s12 + $0x38] sm:$0xff] %v2952_v37   ;;  %v1736_v45 = vadd.f32 %v3560_v39, %v1665_v38  ;;  %v2797_v46 = vpack.c.bf16 %v1275_v41, %v1274_v27  ;;  %v1666_v47 = vmul.f32 %v3553_v30, %v1275_v41  ;;  %v1768_v49 = vadd.f32 %v3560_v39, %v1697_v40 }
 0x161   : > { %3158 = vst [vmem:[%s3590_s12 + $0xb8] sm:$0xff] %v3032_v43   ;;  %v2877_v50 = vpack.c.bf16 %v1307_v44, %v1306_v28  ;;  %v1698_v51 = vmul.f32 %v3553_v30, %v1307_v44  ;;  %v947_v52 = vpop.f32.mrb[36].mxu0  ;;  %v1075_v53 = vpop.f32.mrb[36].mxu1 }
 0x162   : > { %3112 = vst [vmem:[%s3570_s9 + $0x40] sm:$0xff] %v2797_v46   ;;  %v1737_v55 = vadd.f32 %v3560_v39, %v1666_v47  ;;  %v948_v56 = vadd.f32 %v3546_v19, %v947_v52  ;;  %v949_v57 = vpop.f32.mrb[37].mxu0  ;;  %v1077_v58 = vpop.f32.mrb[37].mxu1  ;;  %v1800_v61 = vmax.f32 %v1736_v45, 0.0  ;;  %v1076_v63 = vadd.f32 %v3546_v19, %v1075_v53  ;;  %v3084_v52 = vld [vmem:[%s3539_s23 + $0x58] sm:$0xff]  }
 0x163   : > { %3128 = vst [vmem:[%s3570_s9 + $0xc0] sm:$0xff] %v2877_v50   ;;  %v1769_v62 = vadd.f32 %v3560_v39, %v1698_v51  ;;  %v950_v0 = vpop.f32.mrb[38].mxu0  ;;  %v1078_v1 = vpop.f32.mrb[38].mxu1  ;;  %v1832_v10 = vmax.f32 %v1768_v49, 0.0  ;;  %v3100_v57 = vld [vmem:[%s3539_s23 + $0xd8] sm:$0xff]  }
 0x164   : > { %v1801_v2 = vmax.f32 %v1737_v55, 0.0  ;;  %v1276_v3 = vadd.f32 %v2664_v48, %v948_v56  ;;  %v951_v4 = vadd.f32 %v3546_v19, %v950_v0  ;;  %v1079_v5 = vadd.f32 %v3546_v19, %v1078_v1  ;;  %v952_v6 = vpop.f32.mrb[39].mxu0  ;;  %v1080_v7 = vpop.f32.mrb[39].mxu1 }
 0x165   : > { %v1833_v11 = vmax.f32 %v1769_v62, 0.0  ;;  %v1308_v12 = vadd.f32 %v2728_v54, %v1076_v63  ;;  %v2672_v63 = vunpack.c.l.bf16 %v3084_v52 }
 0x166   : > { %v2957_v13 = vpack.c.bf16 %v1801_v2, %v1800_v61  ;;  %v1667_v14 = vmul.f32 %v3553_v30, %v1276_v3  ;;  %v1277_v15 = vadd.f32 %v2665_v59, %v951_v4  ;;  %v1309_v16 = vadd.f32 %v2729_v60, %v1079_v5 }
 0x167   : > { %v3037_v17 = vpack.c.bf16 %v1833_v11, %v1832_v10  ;;  %v1699_v18 = vmul.f32 %v3553_v30, %v1308_v12  ;;  %v2736_v5 = vunpack.c.l.bf16 %v3100_v57  ;;  %v2673_v10 = vunpack.c.h.bf16 %v3084_v52 }
 0x168   : > { %3143 = vst [vmem:[%s3590_s12 + $0x40] sm:$0xff] %v2957_v13   ;;  %v1738_v22 = vadd.f32 %v3560_v39, %v1667_v14  ;;  %v2802_v23 = vpack.c.bf16 %v1277_v15, %v1276_v3  ;;  %v1668_v24 = vmul.f32 %v3553_v30, %v1277_v15  ;;  %v2882_v25 = vpack.c.bf16 %v1309_v16, %v1308_v12 }
 0x169   : > { %3159 = vst [vmem:[%s3590_s12 + $0xc0] sm:$0xff] %v3037_v17   ;;  %v1770_v26 = vadd.f32 %v3560_v39, %v1699_v18  ;;  %v1700_v27 = vmul.f32 %v3553_v30, %v1309_v16  ;;  %v955_v28 = vpop.f32.mrb[40].mxu0  ;;  %v1083_v29 = vpop.f32.mrb[40].mxu1  ;;  %v2737_v11 = vunpack.c.h.bf16 %v3100_v57 }
 0x16a   : > { %3113 = vst [vmem:[%s3570_s9 + $0x48] sm:$0xff] %v2802_v23   ;;  %v1739_v31 = vadd.f32 %v3560_v39, %v1668_v24  ;;  %3129 = vst [vmem:[%s3570_s9 + $0xc8] sm:$0xff] %v2882_v25   ;;  %v956_v32 = vadd.f32 %v3546_v19, %v955_v28  ;;  %v1084_v33 = vadd.f32 %v3546_v19, %v1083_v29  ;;  %v957_v34 = vpop.f32.mrb[41].mxu0  ;;  %v1085_v35 = vpop.f32.mrb[41].mxu1  ;;  %v1802_v37 = vmax.f32 %v1738_v22, 0.0  ;;  %v3085_v24 = vld [vmem:[%s3539_s23 + $0x60] sm:$0xff]  }
 0x16b   : > { %v1771_v38 = vadd.f32 %v3560_v39, %v1700_v27  ;;  %v958_v40 = vpop.f32.mrb[42].mxu0  ;;  %v1086_v41 = vpop.f32.mrb[42].mxu1  ;;  %v1834_v49 = vmax.f32 %v1770_v26, 0.0  ;;  %v3101_v25 = vld [vmem:[%s3539_s23 + $0xe0] sm:$0xff]   ;;  %v2677_v52 = vunpack.c.h.bf16 %v3085_v24 }
 0x16c   : > { %v1803_v43 = vmax.f32 %v1739_v31, 0.0  ;;  %v1278_v44 = vadd.f32 %v2668_v20, %v956_v32  ;;  %v1310_v45 = vadd.f32 %v2732_v21, %v1084_v33  ;;  %v959_v46 = vadd.f32 %v3546_v19, %v958_v40  ;;  %v960_v47 = vpop.f32.mrb[43].mxu0  ;;  %v1088_v48 = vpop.f32.mrb[43].mxu1 }
 0x16d   : > { %v1835_v50 = vmax.f32 %v1771_v38, 0.0  ;;  %v1087_v51 = vadd.f32 %v3546_v19, %v1086_v41 }
 0x16e   : > { %v2962_v53 = vpack.c.bf16 %v1803_v43, %v1802_v37  ;;  %v1669_v54 = vmul.f32 %v3553_v30, %v1278_v44  ;;  %v1701_v55 = vmul.f32 %v3553_v30, %v1310_v45  ;;  %v1279_v56 = vadd.f32 %v2669_v36, %v959_v46 }
 0x16f   : > { %v3042_v58 = vpack.c.bf16 %v1835_v50, %v1834_v49  ;;  %v1311_v59 = vadd.f32 %v2733_v42, %v1087_v51  ;;  %v2676_v36 = vunpack.c.l.bf16 %v3085_v24  ;;  %v2740_v37 = vunpack.c.l.bf16 %v3101_v25 }
 0x170   : > { %3144 = vst [vmem:[%s3590_s12 + $0x48] sm:$0xff] %v2962_v53   ;;  %v1740_v60 = vadd.f32 %v3560_v39, %v1669_v54  ;;  %v2807_v61 = vpack.c.bf16 %v1279_v56, %v1278_v44  ;;  %v1670_v62 = vmul.f32 %v3553_v30, %v1279_v56  ;;  %v1772_v0 = vadd.f32 %v3560_v39, %v1701_v55 }
 0x171   : > { %3160 = vst [vmem:[%s3590_s12 + $0xc8] sm:$0xff] %v3042_v58   ;;  %v2887_v1 = vpack.c.bf16 %v1311_v59, %v1310_v45  ;;  %v1702_v2 = vmul.f32 %v3553_v30, %v1311_v59  ;;  %v963_v3 = vpop.f32.mrb[44].mxu0  ;;  %v1091_v4 = vpop.f32.mrb[44].mxu1 }
 0x172   : > { %3114 = vst [vmem:[%s3570_s9 + $0x50] sm:$0xff] %v2807_v61   ;;  %v1741_v6 = vadd.f32 %v3560_v39, %v1670_v62  ;;  %v964_v7 = vadd.f32 %v3546_v19, %v963_v3  ;;  %v965_v8 = vpop.f32.mrb[45].mxu0  ;;  %v1093_v9 = vpop.f32.mrb[45].mxu1  ;;  %v1804_v12 = vmax.f32 %v1740_v60, 0.0  ;;  %v1092_v14 = vadd.f32 %v3546_v19, %v1091_v4  ;;  %v3789_v60 = vld [vmem:[%s3877_s3] ss:$0 sm:$0xff] }
 0x173   : > { %3130 = vst [vmem:[%s3570_s9 + $0xd0] sm:$0xff] %v2887_v1   ;;  %v1773_v13 = vadd.f32 %v3560_v39, %v1702_v2  ;;  %v966_v15 = vpop.f32.mrb[46].mxu0  ;;  %v1094_v16 = vpop.f32.mrb[46].mxu1  ;;  %v1836_v26 = vmax.f32 %v1772_v0, 0.0  ;;  %v3086_v1 = vld [vmem:[%s3539_s23 + $0x68] sm:$0xff]  }
 0x174   : > { %v1805_v17 = vmax.f32 %v1741_v6, 0.0  ;;  %v1280_v18 = vadd.f32 %v2672_v63, %v964_v7  ;;  %v967_v20 = vadd.f32 %v3546_v19, %v966_v15  ;;  %v1095_v21 = vadd.f32 %v3546_v19, %v1094_v16  ;;  %v968_v22 = vpop.f32.mrb[47].mxu0  ;;  %v1096_v23 = vpop.f32.mrb[47].mxu1  ;;  %v3797_v3 = vld [vmem:[%s3878_s4] ss:$0 sm:$0xff]  ;;  %v3102_v7 = vld [vmem:[%s3539_s23 + $0xe8] sm:$0xff]  }
 0x175   : > { %v1837_v27 = vmax.f32 %v1773_v13, 0.0  ;;  %v1312_v28 = vadd.f32 %v2736_v5, %v1092_v14  ;;  %v2680_v14 = vunpack.c.l.bf16 %v3086_v1 }
 0x176   : > { %v2967_v29 = vpack.c.bf16 %v1805_v17, %v1804_v12  ;;  %v1671_v31 = vmul.f32 %v3553_v30, %v1280_v18  ;;  %v1281_v32 = vadd.f32 %v2673_v10, %v967_v20  ;;  %v1313_v33 = vadd.f32 %v2737_v11, %v1095_v21  ;;  %v3806_v10 = vld [vmem:[%s3879_s5] ss:$0 sm:$0xff] }
 0x177   : > { %v3047_v34 = vpack.c.bf16 %v1837_v27, %v1836_v26  ;;  %v1703_v35 = vmul.f32 %v3553_v30, %v1312_v28  ;;  %v2744_v21 = vunpack.c.l.bf16 %v3102_v7  ;;  %v2681_v26 = vunpack.c.h.bf16 %v3086_v1 }
 0x178   : > { %3145 = vst [vmem:[%s3590_s12 + $0x50] sm:$0xff] %v2967_v29   ;;  %v1742_v38 = vadd.f32 %v3560_v39, %v1671_v31  ;;  %v2812_v40 = vpack.c.bf16 %v1281_v32, %v1280_v18  ;;  %v1672_v41 = vmul.f32 %v3553_v30, %v1281_v32  ;;  %v2892_v42 = vpack.c.bf16 %v1313_v33, %v1312_v28 }
 0x179   : > { %3161 = vst [vmem:[%s3590_s12 + $0xd0] sm:$0xff] %v3047_v34   ;;  %v1774_v43 = vadd.f32 %v3560_v39, %v1703_v35  ;;  %v1704_v44 = vmul.f32 %v3553_v30, %v1313_v33  ;;  %v971_v45 = vpop.f32.mrb[48].mxu0  ;;  %v1099_v46 = vpop.f32.mrb[48].mxu1  ;;  %v2741_v30 = vunpack.c.h.bf16 %v3101_v25  ;;  %v2745_v27 = vunpack.c.h.bf16 %v3102_v7 }
 0x17a   : > { %3115 = vst [vmem:[%s3570_s9 + $0x58] sm:$0xff] %v2812_v40   ;;  %v1743_v47 = vadd.f32 %v3560_v39, %v1672_v41  ;;  %3131 = vst [vmem:[%s3570_s9 + $0xd8] sm:$0xff] %v2892_v42   ;;  %v972_v48 = vadd.f32 %v3546_v19, %v971_v45  ;;  %v1100_v49 = vadd.f32 %v3546_v19, %v1099_v46  ;;  %v973_v50 = vpop.f32.mrb[49].mxu0  ;;  %v1101_v51 = vpop.f32.mrb[49].mxu1  ;;  %v1806_v53 = vmax.f32 %v1742_v38, 0.0  ;;  %v3087_v41 = vld [vmem:[%s3539_s23 + $0x70] sm:$0xff]  }
 0x17b   : > { %v1775_v54 = vadd.f32 %v3560_v39, %v1704_v44  ;;  %v974_v55 = vpop.f32.mrb[50].mxu0  ;;  %v1102_v56 = vpop.f32.mrb[50].mxu1  ;;  %v1838_v63 = vmax.f32 %v1774_v43, 0.0  ;;  %v3103_v42 = vld [vmem:[%s3539_s23 + $0xf0] sm:$0xff]   ;;  %v2685_v1 = vunpack.c.h.bf16 %v3087_v41 }
 0x17c   : > { %v1807_v57 = vmax.f32 %v1743_v47, 0.0  ;;  %v1282_v58 = vadd.f32 %v2676_v36, %v972_v48  ;;  %v1314_v59 = vadd.f32 %v2740_v37, %v1100_v49  ;;  %v975_v19 = vadd.f32 %v3789_v60, %v974_v55  ;;  %v976_v61 = vpop.f32.mrb[51].mxu0  ;;  %v1104_v62 = vpop.f32.mrb[51].mxu1 }
 0x17d   : > { %v1839_v0 = vmax.f32 %v1775_v54, 0.0  ;;  %v1103_v39 = vadd.f32 %v3789_v60, %v1102_v56  ;;  %v2749_v7 = vunpack.c.h.bf16 %v3103_v42 }
 0x17e   : > { %v2972_v2 = vpack.c.bf16 %v1807_v57, %v1806_v53  ;;  %v1673_v4 = vmul.f32 %v3797_v3, %v1282_v58  ;;  %v1705_v5 = vmul.f32 %v3797_v3, %v1314_v59  ;;  %v1283_v6 = vadd.f32 %v2677_v52, %v975_v19 }
 0x17f   : > { %v3052_v8 = vpack.c.bf16 %v1839_v0, %v1838_v63  ;;  %v1315_v9 = vadd.f32 %v2741_v30, %v1103_v39  ;;  %v2684_v52 = vunpack.c.l.bf16 %v3087_v41  ;;  %v2748_v53 = vunpack.c.l.bf16 %v3103_v42 }
 0x180   : > { %3146 = vst [vmem:[%s3590_s12 + $0x58] sm:$0xff] %v2972_v2   ;;  %v1744_v11 = vadd.f32 %v3806_v10, %v1673_v4  ;;  %v2817_v12 = vpack.c.bf16 %v1283_v6, %v1282_v58  ;;  %v1674_v13 = vmul.f32 %v3797_v3, %v1283_v6  ;;  %v1776_v15 = vadd.f32 %v3806_v10, %v1705_v5 }
 0x181   : > { %3162 = vst [vmem:[%s3590_s12 + $0xd8] sm:$0xff] %v3052_v8   ;;  %v2897_v16 = vpack.c.bf16 %v1315_v9, %v1314_v59  ;;  %v1706_v17 = vmul.f32 %v3797_v3, %v1315_v9  ;;  %v979_v18 = vpop.f32.mrb[52].mxu0  ;;  %v1107_v20 = vpop.f32.mrb[52].mxu1 }
 0x182   : > { %3116 = vst [vmem:[%s3570_s9 + $0x60] sm:$0xff] %v2817_v12   ;;  %v1745_v22 = vadd.f32 %v3806_v10, %v1674_v13  ;;  %v980_v23 = vadd.f32 %v3789_v60, %v979_v18  ;;  %v981_v24 = vpop.f32.mrb[53].mxu0  ;;  %v1109_v25 = vpop.f32.mrb[53].mxu1  ;;  %v1808_v28 = vmax.f32 %v1744_v11, 0.0  ;;  %v1108_v31 = vadd.f32 %v3789_v60, %v1107_v20  ;;  %v3088_v18 = vld [vmem:[%s3539_s23 + $0x78] sm:$0xff]  }
 0x183   : > { %3132 = vst [vmem:[%s3570_s9 + $0xe0] sm:$0xff] %v2897_v16   ;;  %v1777_v29 = vadd.f32 %v3806_v10, %v1706_v17  ;;  %v982_v32 = vpop.f32.mrb[54].mxu0  ;;  %v1110_v33 = vpop.f32.mrb[54].mxu1  ;;  %v1840_v43 = vmax.f32 %v1776_v15, 0.0  ;;  %v3104_v24 = vld [vmem:[%s3539_s23 + $0xf8] sm:$0xff]  }
 0x184   : > { %v1809_v34 = vmax.f32 %v1745_v22, 0.0  ;;  %v1284_v35 = vadd.f32 %v2680_v14, %v980_v23  ;;  %v983_v36 = vadd.f32 %v3789_v60, %v982_v32  ;;  %v1111_v37 = vadd.f32 %v3789_v60, %v1110_v33  ;;  %v984_v38 = vpop.f32.mrb[55].mxu0  ;;  %v1112_v40 = vpop.f32.mrb[55].mxu1 }
 0x185   : > { %v1841_v44 = vmax.f32 %v1777_v29, 0.0  ;;  %v1316_v45 = vadd.f32 %v2744_v21, %v1108_v31  ;;  %v2688_v31 = vunpack.c.l.bf16 %v3088_v18 }
 0x186   : > { %v2977_v46 = vpack.c.bf16 %v1809_v34, %v1808_v28  ;;  %v1675_v47 = vmul.f32 %v3797_v3, %v1284_v35  ;;  %v1285_v48 = vadd.f32 %v2681_v26, %v983_v36  ;;  %v1317_v49 = vadd.f32 %v2745_v27, %v1111_v37 }
 0x187   : > { %v3057_v50 = vpack.c.bf16 %v1841_v44, %v1840_v43  ;;  %v1707_v51 = vmul.f32 %v3797_v3, %v1316_v45  ;;  %v2752_v37 = vunpack.c.l.bf16 %v3104_v24  ;;  %v2689_v43 = vunpack.c.h.bf16 %v3088_v18 }
 0x188   : > { %3147 = vst [vmem:[%s3590_s12 + $0x60] sm:$0xff] %v2977_v46   ;;  %v1746_v54 = vadd.f32 %v3806_v10, %v1675_v47  ;;  %v2822_v55 = vpack.c.bf16 %v1285_v48, %v1284_v35  ;;  %v1676_v56 = vmul.f32 %v3797_v3, %v1285_v48  ;;  %v2902_v30 = vpack.c.bf16 %v1317_v49, %v1316_v45 }
 0x189   : > { %3163 = vst [vmem:[%s3590_s12 + $0xe0] sm:$0xff] %v3057_v50   ;;  %v1778_v57 = vadd.f32 %v3806_v10, %v1707_v51  ;;  %v1708_v58 = vmul.f32 %v3797_v3, %v1317_v49  ;;  %v987_v59 = vpop.f32.mrb[56].mxu0  ;;  %v1115_v19 = vpop.f32.mrb[56].mxu1  ;;  %v2753_v44 = vunpack.c.h.bf16 %v3104_v24 }
 0x18a   : > { %3117 = vst [vmem:[%s3570_s9 + $0x68] sm:$0xff] %v2822_v55   ;;  %v1747_v61 = vadd.f32 %v3806_v10, %v1676_v56  ;;  %3133 = vst [vmem:[%s3570_s9 + $0xe8] sm:$0xff] %v2902_v30   ;;  %v988_v62 = vadd.f32 %v3789_v60, %v987_v59  ;;  %v1116_v63 = vadd.f32 %v3789_v60, %v1115_v19  ;;  %v989_v0 = vpop.f32.mrb[57].mxu0  ;;  %v1117_v39 = vpop.f32.mrb[57].mxu1  ;;  %v1810_v2 = vmax.f32 %v1746_v54, 0.0 }
 0x18b   : > { %v1779_v4 = vadd.f32 %v3806_v10, %v1708_v58  ;;  %v990_v5 = vpop.f32.mrb[58].mxu0  ;;  %v1118_v6 = vpop.f32.mrb[58].mxu1  ;;  %v1842_v15 = vmax.f32 %v1778_v57, 0.0 }
 0x18c   : > { %v1811_v8 = vmax.f32 %v1747_v61, 0.0  ;;  %v1286_v9 = vadd.f32 %v2684_v52, %v988_v62  ;;  %v1318_v11 = vadd.f32 %v2748_v53, %v1116_v63  ;;  %v991_v12 = vadd.f32 %v3789_v60, %v990_v5  ;;  %v992_v13 = vpop.f32.mrb[59].mxu0  ;;  %v1120_v14 = vpop.f32.mrb[59].mxu1 }
 0x18d   : > { %v1843_v16 = vmax.f32 %v1779_v4, 0.0  ;;  %v1119_v17 = vadd.f32 %v3789_v60, %v1118_v6 }
 0x18e   : > { %v2982_v20 = vpack.c.bf16 %v1811_v8, %v1810_v2  ;;  %v1677_v21 = vmul.f32 %v3797_v3, %v1286_v9  ;;  %v1709_v22 = vmul.f32 %v3797_v3, %v1318_v11  ;;  %v1287_v23 = vadd.f32 %v2685_v1, %v991_v12 }
 0x18f   : > { %v3062_v25 = vpack.c.bf16 %v1843_v16, %v1842_v15  ;;  %v1319_v26 = vadd.f32 %v2749_v7, %v1119_v17 }
 0x190   : > { %3148 = vst [vmem:[%s3590_s12 + $0x68] sm:$0xff] %v2982_v20   ;;  %v1748_v27 = vadd.f32 %v3806_v10, %v1677_v21  ;;  %v2827_v28 = vpack.c.bf16 %v1287_v23, %v1286_v9  ;;  %v1678_v29 = vmul.f32 %v3797_v3, %v1287_v23  ;;  %v1780_v32 = vadd.f32 %v3806_v10, %v1709_v22 }
 0x191   : > { %3164 = vst [vmem:[%s3590_s12 + $0xe8] sm:$0xff] %v3062_v25   ;;  %v2907_v33 = vpack.c.bf16 %v1319_v26, %v1318_v11  ;;  %v1710_v34 = vmul.f32 %v3797_v3, %v1319_v26  ;;  %v995_v35 = vpop.f32.mrb[60].mxu0  ;;  %v1123_v36 = vpop.f32.mrb[60].mxu1 }
 0x192   : > { %3118 = vst [vmem:[%s3570_s9 + $0x70] sm:$0xff] %v2827_v28   ;;  %v1749_v38 = vadd.f32 %v3806_v10, %v1678_v29  ;;  %v996_v40 = vadd.f32 %v3789_v60, %v995_v35  ;;  %v997_v41 = vpop.f32.mrb[61].mxu0  ;;  %v1125_v42 = vpop.f32.mrb[61].mxu1  ;;  %v1812_v45 = vmax.f32 %v1748_v27, 0.0  ;;  %v1124_v47 = vadd.f32 %v3789_v60, %v1123_v36 }
 0x193   : > { %3134 = vst [vmem:[%s3570_s9 + $0xf0] sm:$0xff] %v2907_v33   ;;  %v1781_v46 = vadd.f32 %v3806_v10, %v1710_v34  ;;  %v998_v48 = vpop.f32.mrb[62].mxu0  ;;  %v1126_v49 = vpop.f32.mrb[62].mxu1  ;;  %v1844_v56 = vmax.f32 %v1780_v32, 0.0 }
 0x194   : > { %v1813_v50 = vmax.f32 %v1749_v38, 0.0  ;;  %v1288_v51 = vadd.f32 %v2688_v31, %v996_v40  ;;  %v999_v52 = vadd.f32 %v3789_v60, %v998_v48  ;;  %v1127_v53 = vadd.f32 %v3789_v60, %v1126_v49  ;;  %v1000_v54 = vpop.f32.mrb[63].mxu0  ;;  %v1128_v55 = vpop.f32.mrb[63].mxu1 }
 0x195   : > { %v1845_v30 = vmax.f32 %v1781_v46, 0.0  ;;  %v1320_v57 = vadd.f32 %v2752_v37, %v1124_v47 }
 0x196   : > { %v2987_v58 = vpack.c.bf16 %v1813_v50, %v1812_v45  ;;  %v1679_v59 = vmul.f32 %v3797_v3, %v1288_v51  ;;  %v1289_v19 = vadd.f32 %v2689_v43, %v999_v52  ;;  %v1321_v61 = vadd.f32 %v2753_v44, %v1127_v53 }
 0x197   : > { %v3067_v62 = vpack.c.bf16 %v1845_v30, %v1844_v56  ;;  %v1711_v63 = vmul.f32 %v3797_v3, %v1320_v57 }
 0x198   : > { %3149 = vst [vmem:[%s3590_s12 + $0x70] sm:$0xff] %v2987_v58   ;;  %v1750_v0 = vadd.f32 %v3806_v10, %v1679_v59  ;;  %v2832_v60 = vpack.c.bf16 %v1289_v19, %v1288_v51  ;;  %v1680_v39 = vmul.f32 %v3797_v3, %v1289_v19  ;;  %v2912_v1 = vpack.c.bf16 %v1321_v61, %v1320_v57 }
 0x199   : > { %3165 = vst [vmem:[%s3590_s12 + $0xf0] sm:$0xff] %v3067_v62   ;;  %v1782_v2 = vadd.f32 %v3806_v10, %v1711_v63  ;;  %v1712_v4 = vmul.f32 %v3797_v3, %v1321_v61 }
 0x19a   : > { %3119 = vst [vmem:[%s3570_s9 + $0x78] sm:$0xff] %v2832_v60   ;;  %v1751_v5 = vadd.f32 %v3806_v10, %v1680_v39  ;;  %3135 = vst [vmem:[%s3570_s9 + $0xf8] sm:$0xff] %v2912_v1   ;;  %v1814_v7 = vmax.f32 %v1750_v0, 0.0 }
 0x19b   : > { %v1783_v6 = vadd.f32 %v3806_v10, %v1712_v4  ;;  %v1846_v9 = vmax.f32 %v1782_v2, 0.0 }
 0x19c   : > { %v1815_v8 = vmax.f32 %v1751_v5, 0.0 }
 0x19d   : > { %v1847_v11 = vmax.f32 %v1783_v6, 0.0 }
 0x19e   : > { %v2992_v12 = vpack.c.bf16 %v1815_v8, %v1814_v7 }
 0x19f   : > { %v3072_v13 = vpack.c.bf16 %v1847_v11, %v1846_v9 }
 0x1a0   : > { %3150 = vst [vmem:[%s3590_s12 + $0x78] sm:$0xff] %v2992_v12  }
 0x1a1   : > { %3166 = vst [vmem:[%s3590_s12 + $0xf8] sm:$0xff] %v3072_v13  }
 0x1a2 PF: > { %s18_s24 = sadd.s32 1, %s3329_s24  }
 0x1a3   : > { %p15_p4 = scmp.ge.s32.totalorder %s18_s24, 6  }
 0x1a5   :  { %17 = sbr.rel (!%p15_p4) target bundleno = 1 (0x1), region = 89 }

// kernel: wide_resnet_forward.12
= control target key start
LH: loop header
LB: loop body
LE: loop exit
PB: predicated region body
PF: predicated region fallthrough
CT: control target
= control target key end

     0   :  { %s2380_s21 = smov 0   ;;  %s2713_s0 = inlined_call_operand.vmem [shape: bf16[512,384], index: 0, kind: input, shape index: {}]   ;;  %s2714_s1 = inlined_call_operand.vmem [shape: bf16[384,128], index: 1, kind: input, shape index: {}]   ;;  %s2715_s2 = inlined_call_operand.vmem [shape: f32[1,128], index: 2, kind: input, shape index: {}]   ;;  %s2716_s3 = inlined_call_operand.vmem [shape: f32[1,128], index: 3, kind: input, shape index: {}]   ;;  %s2717_s4 = inlined_call_operand.vmem [shape: f32[1,128], index: 4, kind: input, shape index: {}]   ;;  %s2718_s5 = inlined_call_operand.vmem [shape: bf16[512,128], index: 5, kind: output, shape index: {0}]   ;;  %s2719_s6 = inlined_call_operand.vmem [shape: bf16[512,128], index: 6, kind: output, shape index: {1}]  }
   0x1 LB: > { %s1634_s22 = sadd.s32 4294967295, %s2343_s21   ;;  %p1638_p0 = scmp.ge.s32.totalorder %s2343_s21, 1  ;;  %s2343_s21 = sphi %s2380_s21, %s17_s21  }
   0x2   : > { %p217_p1 = scmp.lt.s32.totalorder %s2343_s21, 3 }
   0x4   : > { %p218_p2 = pnand %p1638_p0, %p217_p1 }
   0x5   : > { %v2249_v0 = vld [vmem:[%s2714_s1 + $0x40] sm:$0xff] (!%p218_p2)   ;;  %s1639_s25 = sshll.u32 (!%p218_p2), %s1634_s22, 5  ;;  %v2251_v2 = vld [vmem:[%s2714_s1 + $0x48] sm:$0xff] (!%p218_p2)   ;;  %v2253_v4 = vld [vmem:[%s2714_s1 + $0x50] sm:$0xff] (!%p218_p2)  }
   0x6   : > { %221 = sbr.rel (%p218_p2) target bundleno = 357 (0x165), region = 40  ;;  %v2250_v1 = vld [vmem:[%s2714_s1] sm:$0xff] (!%p218_p2)   ;;  %2040 = vmatprep.subr.bf16.mxu0 (!%p218_p2), %v2249_v0  ;;  %2224 = vmatprep.subr.bf16.mxu1 (!%p218_p2), %v2249_v0  ;;  %p254_p3 = scmp.lt.s32.totalorder (!%p218_p2), %s1639_s25, 63  ;;  %v2252_v3 = vld [vmem:[%s2714_s1 + $0x8] sm:$0xff] (!%p218_p2)   ;;  %v2254_v5 = vld [vmem:[%s2714_s1 + $0x10] sm:$0xff] (!%p218_p2)  }
   0x7   : > { %2041 = vmatpush3.bf16.msra.mxu0 (!%p218_p2), %v2250_v1  ;;  %2232 = vmatpush3.bf16.msra.mxu1 (!%p218_p2), %v2250_v1  ;;  %v2255_v6 = vld [vmem:[%s2714_s1 + $0x58] sm:$0xff] (!%p218_p2)   ;;  %v2257_v8 = vld [vmem:[%s2714_s1 + $0x60] sm:$0xff] (!%p218_p2)   ;;  %v2259_v10 = vld [vmem:[%s2714_s1 + $0x68] sm:$0xff] (!%p218_p2)  }
   0x8   : > { %2042 = vmatprep.subr.bf16.mxu0 (!%p218_p2), %v2251_v2  ;;  %2225 = vmatprep.subr.bf16.mxu1 (!%p218_p2), %v2251_v2  ;;  %v2256_v7 = vld [vmem:[%s2714_s1 + $0x18] sm:$0xff] (!%p218_p2)   ;;  %v2258_v9 = vld [vmem:[%s2714_s1 + $0x20] sm:$0xff] (!%p218_p2)   ;;  %v2260_v13 = vld [vmem:[%s2714_s1 + $0x28] sm:$0xff] (!%p218_p2)  }
   0x9   : > { %v2261_v14 = vld [vmem:[%s2714_s1 + $0x70] sm:$0xff] (!%p218_p2)   ;;  %v2263_v16 = vld [vmem:[%s2714_s1 + $0x78] sm:$0xff] (!%p218_p2)   ;;  %v2271_v18 = vld [vmem:[%s2714_s1 + $0x80] sm:$0xff] (!%p218_p2)  }
   0xa   : > { %v2262_v15 = vld [vmem:[%s2714_s1 + $0x30] sm:$0xff] (!%p218_p2)   ;;  %v2264_v17 = vld [vmem:[%s2714_s1 + $0x38] sm:$0xff] (!%p218_p2)   ;;  %v2272_v22 = vld [vmem:[%s2714_s1 + $0x88] sm:$0xff] (!%p218_p2)  }
   0xb   : > { %2043 = vmatpush3.bf16.msra.mxu0 (!%p218_p2), %v2252_v3  ;;  %2233 = vmatpush3.bf16.msra.mxu1 (!%p218_p2), %v2252_v3  ;;  %v2279_v25 = vld [vmem:[%s2714_s1 + $0x90] sm:$0xff] (!%p218_p2)   ;;  %v2280_v27 = vld [vmem:[%s2714_s1 + $0x98] sm:$0xff] (!%p218_p2)   ;;  %v2287_v30 = vld [vmem:[%s2714_s1 + $0xa0] sm:$0xff] (!%p218_p2)  }
   0xc   : > { %2044 = vmatprep.subr.bf16.mxu0 (!%p218_p2), %v2253_v4  ;;  %2226 = vmatprep.subr.bf16.mxu1 (!%p218_p2), %v2253_v4  ;;  %v2288_v33 = vld [vmem:[%s2714_s1 + $0xa8] sm:$0xff] (!%p218_p2)   ;;  %v2295_v36 = vld [vmem:[%s2714_s1 + $0xb0] sm:$0xff] (!%p218_p2)   ;;  %v2296_v40 = vld [vmem:[%s2714_s1 + $0xb8] sm:$0xff] (!%p218_p2)  }
   0xd   : > { %s2721_s25 = smov (!%p254_p3, %s1639_s25), 63 }
   0xe   : > { %s2240_s14 = smul.u32 12, %s2721_s25  ;;  %s1642_s12 = sshll.u32 %s2721_s25, 2 }
   0xf   : > { %2045 = vmatpush3.bf16.msra.mxu0 %v2254_v5  ;;  %2234 = vmatpush3.bf16.msra.mxu1 %v2254_v5  ;;  %s2561_s17 = scalar_lea.vmem %s2718_s5, %s1642_s12  ;;  %s2580_s20 = scalar_lea.vmem %s2719_s6, %s1642_s12 }
  0x10   : > { %2046 = vmatprep.subr.bf16.mxu0 %v2255_v6  ;;  %2227 = vmatprep.subr.bf16.mxu1 %v2255_v6  ;;  %s2421_s22 = scalar_lea.vmem %s2713_s0, %s2240_s14 }
  0x11   : > { %v2267_v11 = vld [vmem:[%s2421_s22 + $0x4] ss:$12 sps:$4 sm:$0xff]   ;;  %v2265_v19 = vld [vmem:[%s2421_s22] ss:$12 sps:$4 sm:$0xff]   ;;  %v2273_v21 = vld [vmem:[%s2421_s22 + $0x1c] ss:$12 sps:$4 sm:$0xff]  }
  0x12   : > { %v2270_v12 = vld [vmem:[%s2421_s22 + $0x124] ss:$12 sps:$4 sm:$0xff]   ;;  %824 = vmatprep.mubr.bf16.mxu0 %v2267_v11  ;;  %v2268_v20 = vld [vmem:[%s2421_s22 + $0x120] ss:$12 sps:$4 sm:$0xff]   ;;  %v2275_v23 = vld [vmem:[%s2421_s22 + $0x13c] ss:$12 sps:$4 sm:$0xff]  }
  0x13   : > { %2047 = vmatpush3.bf16.msra.mxu0 %v2256_v7  ;;  %2235 = vmatpush3.bf16.msra.mxu1 %v2256_v7  ;;  %v2277_v24 = vld [vmem:[%s2421_s22 + $0x18] ss:$12 sps:$4 sm:$0xff]   ;;  %v2281_v28 = vld [vmem:[%s2421_s22 + $0x34] ss:$12 sps:$4 sm:$0xff]   ;;  %v2285_v31 = vld [vmem:[%s2421_s22 + $0x30] ss:$12 sps:$4 sm:$0xff]  }
  0x14   : > { %2048 = vmatprep.subr.bf16.mxu0 %v2257_v8  ;;  %2228 = vmatprep.subr.bf16.mxu1 %v2257_v8  ;;  %v2278_v26 = vld [vmem:[%s2421_s22 + $0x138] ss:$12 sps:$4 sm:$0xff]   ;;  %v2283_v29 = vld [vmem:[%s2421_s22 + $0x154] ss:$12 sps:$4 sm:$0xff]   ;;  %v2286_v32 = vld [vmem:[%s2421_s22 + $0x150] ss:$12 sps:$4 sm:$0xff]  }
  0x15   : > { %920 = vmatprep.mubr.bf16.mxu1 %v2270_v12  ;;  %v2289_v34 = vld [vmem:[%s2421_s22 + $0x4c] ss:$12 sps:$4 sm:$0xff]   ;;  %v2293_v37 = vld [vmem:[%s2421_s22 + $0x48] ss:$12 sps:$4 sm:$0xff]   ;;  %v2297_v39 = vld [vmem:[%s2421_s22 + $0x64] ss:$12 sps:$4 sm:$0xff]  }
  0x16   : > { %v2291_v35 = vld [vmem:[%s2421_s22 + $0x16c] ss:$12 sps:$4 sm:$0xff]   ;;  %v2294_v38 = vld [vmem:[%s2421_s22 + $0x168] ss:$12 sps:$4 sm:$0xff]   ;;  %v2306_v47 = vld [vmem:[%s2421_s22 + $0x50] ss:$12 sps:$4 sm:$0xff]  }
  0x17   : > { %2049 = vmatpush3.bf16.msra.mxu0 %v2258_v9  ;;  %2236 = vmatpush3.bf16.msra.mxu1 %v2258_v9  ;;  %v2299_v41 = vld [vmem:[%s2421_s22 + $0x8] ss:$12 sps:$4 sm:$0xff]   ;;  %v2300_v42 = vld [vmem:[%s2421_s22 + $0x60] ss:$12 sps:$4 sm:$0xff]   ;;  %v2304_v45 = vld [vmem:[%s2421_s22 + $0x38] ss:$12 sps:$4 sm:$0xff]  }
  0x18   : > { %2050 = vmatprep.subr.bf16.mxu0 %v2259_v10  ;;  %2229 = vmatprep.subr.bf16.mxu1 %v2259_v10  ;;  %v2301_v43 = vld [vmem:[%s2421_s22 + $0x20] ss:$12 sps:$4 sm:$0xff]   ;;  %v2302_v44 = vld [vmem:[%s2421_s22 + $0x7c] ss:$12 sps:$4 sm:$0xff]   ;;  %v2305_v46 = vld [vmem:[%s2421_s22 + $0x78] ss:$12 sps:$4 sm:$0xff]  }
  0x19   : > { %v2307_v48 = vld [vmem:[%s2421_s22 + $0x94] ss:$12 sps:$4 sm:$0xff]   ;;  %v2310_v50 = vld [vmem:[%s2421_s22 + $0x90] ss:$12 sps:$4 sm:$0xff]   ;;  %v2312_v52 = vld [vmem:[%s2421_s22 + $0xac] ss:$12 sps:$4 sm:$0xff]  }
  0x1a   : > { %v2309_v49 = vld [vmem:[%s2421_s22 + $0x68] ss:$12 sps:$4 sm:$0xff]   ;;  %v2311_v51 = vld [vmem:[%s2421_s22 + $0x80] ss:$12 sps:$4 sm:$0xff]   ;;  %v2314_v53 = vld [vmem:[%s2421_s22 + $0x98] ss:$12 sps:$4 sm:$0xff]  }
  0x1b   : > { %2051 = vmatpush3.bf16.msra.mxu0 %v2260_v13  ;;  %2237 = vmatpush3.bf16.msra.mxu1 %v2260_v13  ;;  %v2315_v54 = vld [vmem:[%s2421_s22 + $0xa8] ss:$12 sps:$4 sm:$0xff]   ;;  %v2316_v55 = vld [vmem:[%s2421_s22 + $0xb0] ss:$12 sps:$4 sm:$0xff]   ;;  %v2320_v58 = vld [vmem:[%s2421_s22 + $0xc0] ss:$12 sps:$4 sm:$0xff]  }
  0x1c   : > { %2052 = vmatprep.subr.bf16.mxu0 %v2261_v14  ;;  %2230 = vmatprep.subr.bf16.mxu1 %v2261_v14  ;;  %v2317_v56 = vld [vmem:[%s2421_s22 + $0xc4] ss:$12 sps:$4 sm:$0xff]   ;;  %v2319_v57 = vld [vmem:[%s2421_s22 + $0xc8] ss:$12 sps:$4 sm:$0xff]   ;;  %v2321_v59 = vld [vmem:[%s2421_s22 + $0xe0] ss:$12 sps:$4 sm:$0xff]  }
  0x1d   : > { %v2322_v60 = vld [vmem:[%s2421_s22 + $0xdc] ss:$12 sps:$4 sm:$0xff]   ;;  %v2324_v61 = vld [vmem:[%s2421_s22 + $0xf8] ss:$12 sps:$4 sm:$0xff]   ;;  %v2327_v0 = vld [vmem:[%s2421_s22 + $0xf4] ss:$12 sps:$4 sm:$0xff]  }
  0x1e   : > { %v2325_v62 = vld [vmem:[%s2421_s22 + $0xd8] ss:$12 sps:$4 sm:$0xff]   ;;  %v2326_v63 = vld [vmem:[%s2421_s22 + $0x110] ss:$12 sps:$4 sm:$0xff]   ;;  %v2329_v1 = vld [vmem:[%s2421_s22 + $0x128] ss:$12 sps:$4 sm:$0xff]  }
  0x1f   : > { %2053 = vmatpush3.bf16.msra.mxu0 %v2262_v15  ;;  %2238 = vmatpush3.bf16.msra.mxu1 %v2262_v15  ;;  %v2330_v2 = vld [vmem:[%s2421_s22 + $0xf0] ss:$12 sps:$4 sm:$0xff]   ;;  %v2331_v3 = vld [vmem:[%s2421_s22 + $0x140] ss:$12 sps:$4 sm:$0xff]   ;;  %v2334_v5 = vld [vmem:[%s2421_s22 + $0x158] ss:$12 sps:$4 sm:$0xff]  }
  0x20   : > { %2054 = vmatprep.subr.bf16.mxu0 %v2263_v16  ;;  %2231 = vmatprep.subr.bf16.mxu1 %v2263_v16  ;;  %v2332_v4 = vld [vmem:[%s2421_s22 + $0x10c] ss:$12 sps:$4 sm:$0xff]   ;;  %v2335_v6 = vld [vmem:[%s2421_s22 + $0x108] ss:$12 sps:$4 sm:$0xff]   ;;  %v2336_v7 = vld [vmem:[%s2421_s22 + $0x170] ss:$12 sps:$4 sm:$0xff]  }
  0x23   : > { %2055 = vmatpush3.bf16.msra.mxu0 %v2264_v17  ;;  %2239 = vmatpush3.bf16.msra.mxu1 %v2264_v17 }
  0x24   : > { %2176 = vmatprep.subr.bf16.mxu1 %v2271_v18 }
  0x26   : > { %825 = vmatmul.mubr.bf16.vlgmr.msra.gmra.mrb[0].mxu0 %v2265_v19  ;;  %921 = vmatmul.mubr.bf16.vlgmr.msra.gmra.mrb[0].mxu1 %v2268_v20 }
  0x27   : > { %2177 = vmatpush3.bf16.msra.mxu1 %v2271_v18  ;;  %832 = vmatprep.mubr.bf16.mxu0 %v2273_v21 }
  0x28   : > { %2178 = vmatprep.subr.bf16.mxu1 %v2272_v22  ;;  %928 = vmatprep.mubr.bf16.mxu1 %v2275_v23 }
  0x2b   : > { %2179 = vmatpush3.bf16.msra.mxu1 %v2272_v22 }
  0x2c   : > { %2180 = vmatprep.subr.bf16.mxu1 %v2279_v25 }
  0x2e   : > { %833 = vmatmul.mubr.bf16.gmra.mrb[4].mxu0 %v2277_v24  ;;  %929 = vmatmul.mubr.bf16.gmra.mrb[4].mxu1 %v2278_v26 }
  0x2f   : > { %2181 = vmatpush3.bf16.msra.mxu1 %v2279_v25  ;;  %840 = vmatprep.mubr.bf16.mxu0 %v2281_v28 }
  0x30   : > { %2182 = vmatprep.subr.bf16.mxu1 %v2280_v27  ;;  %936 = vmatprep.mubr.bf16.mxu1 %v2283_v29 }
  0x33   : > { %2183 = vmatpush3.bf16.msra.mxu1 %v2280_v27 }
  0x34   : > { %2184 = vmatprep.subr.bf16.mxu1 %v2287_v30 }
  0x36   : > { %841 = vmatmul.mubr.bf16.gmra.mrb[8].mxu0 %v2285_v31  ;;  %937 = vmatmul.mubr.bf16.gmra.mrb[8].mxu1 %v2286_v32 }
  0x37   : > { %2185 = vmatpush3.bf16.msra.mxu1 %v2287_v30  ;;  %848 = vmatprep.mubr.bf16.mxu0 %v2289_v34 }
  0x38   : > { %2186 = vmatprep.subr.bf16.mxu1 %v2288_v33  ;;  %944 = vmatprep.mubr.bf16.mxu1 %v2291_v35 }
  0x3b   : > { %2187 = vmatpush3.bf16.msra.mxu1 %v2288_v33 }
  0x3c   : > { %2188 = vmatprep.subr.bf16.mxu1 %v2295_v36 }
  0x3e   : > { %849 = vmatmul.mubr.bf16.gmra.mrb[12].mxu0 %v2293_v37  ;;  %945 = vmatmul.mubr.bf16.gmra.mrb[12].mxu1 %v2294_v38 }
  0x3f   : > { %2189 = vmatpush3.bf16.msra.mxu1 %v2295_v36  ;;  %856 = vmatprep.mubr.bf16.mxu0 %v2297_v39 }
  0x40   : > { %2190 = vmatprep.subr.bf16.mxu1 %v2296_v40  ;;  %2192 = vmatprep.mubr.bf16.mxu1 %v2299_v41 }
  0x43   : > { %2191 = vmatpush3.bf16.msra.mxu1 %v2296_v40 }
  0x46   : > { %857 = vmatmul.mubr.bf16.gmra.mrb[16].mxu0 %v2300_v42  ;;  %2193 = vmatmul.mubr.bf16.vlgmr.msra.gmra.mrb[16].mxu1 %v2301_v43 }
  0x47   : > { %864 = vmatprep.mubr.bf16.mxu0 %v2302_v44  ;;  %2196 = vmatprep.mubr.bf16.mxu1 %v2304_v45 }
  0x4e   : > { %865 = vmatmul.mubr.bf16.gmra.mrb[20].mxu0 %v2305_v46  ;;  %2197 = vmatmul.mubr.bf16.gmra.mrb[20].mxu1 %v2306_v47 }
  0x4f   : > { %872 = vmatprep.mubr.bf16.mxu0 %v2307_v48  ;;  %2200 = vmatprep.mubr.bf16.mxu1 %v2309_v49 }
  0x56   : > { %873 = vmatmul.mubr.bf16.gmra.mrb[24].mxu0 %v2310_v50  ;;  %2201 = vmatmul.mubr.bf16.gmra.mrb[24].mxu1 %v2311_v51 }
  0x57   : > { %880 = vmatprep.mubr.bf16.mxu0 %v2312_v52  ;;  %2204 = vmatprep.mubr.bf16.mxu1 %v2314_v53 }
  0x5e   : > { %881 = vmatmul.mubr.bf16.gmra.mrb[28].mxu0 %v2315_v54  ;;  %2205 = vmatmul.mubr.bf16.gmra.mrb[28].mxu1 %v2316_v55 }
  0x5f   : > { %888 = vmatprep.mubr.bf16.mxu0 %v2317_v56  ;;  %2208 = vmatprep.mubr.bf16.mxu1 %v2319_v57  ;;  %v2535_v56 = vld [vmem:[%s2715_s2] ss:$0 sm:$0xff] }
  0x66   : > { %889 = vmatmul.mubr.bf16.gmra.mrb[32].mxu0 %v2320_v58  ;;  %2209 = vmatmul.mubr.bf16.gmra.mrb[32].mxu1 %v2321_v59 }
  0x67   : > { %896 = vmatprep.mubr.bf16.mxu0 %v2322_v60  ;;  %2212 = vmatprep.mubr.bf16.mxu1 %v2324_v61  ;;  %v2541_v60 = vld [vmem:[%s2716_s3] ss:$0 sm:$0xff] }
  0x6e   : > { %897 = vmatmul.mubr.bf16.gmra.mrb[36].mxu0 %v2325_v62  ;;  %2213 = vmatmul.mubr.bf16.gmra.mrb[36].mxu1 %v2326_v63 }
  0x6f   : > { %904 = vmatprep.mubr.bf16.mxu0 %v2327_v0  ;;  %2216 = vmatprep.mubr.bf16.mxu1 %v2329_v1 }
  0x76   : > { %905 = vmatmul.mubr.bf16.gmra.mrb[40].mxu0 %v2330_v2  ;;  %2217 = vmatmul.mubr.bf16.gmra.mrb[40].mxu1 %v2331_v3  ;;  %v2549_v2 = vld [vmem:[%s2717_s4] ss:$0 sm:$0xff] }
  0x77   : > { %912 = vmatprep.mubr.bf16.mxu0 %v2332_v4  ;;  %2220 = vmatprep.mubr.bf16.mxu1 %v2334_v5 }
  0x7e   : > { %913 = vmatmul.mubr.bf16.gmra.mrb[44].mxu0 %v2335_v6  ;;  %2221 = vmatmul.mubr.bf16.gmra.mrb[44].mxu1 %v2336_v7 }
  0xf9   : > { %v2056_v8 = vpop.f32.mrb[0].mxu0  ;;  %v2128_v9 = vpop.f32.mrb[0].mxu1 }
  0xfa   : > { %v2057_v10 = vpop.f32.mrb[1].mxu0  ;;  %v2129_v11 = vpop.f32.mrb[1].mxu1 }
  0xfb   : > { %v2058_v12 = vadd.f32 %v2057_v10, %v2056_v8  ;;  %v2059_v13 = vpop.f32.mrb[2].mxu0  ;;  %v2516_v14 = vadd.f32 %v2129_v11, %v2128_v9  ;;  %v2131_v15 = vpop.f32.mrb[2].mxu1 }
  0xfc   : > { %v2060_v16 = vpop.f32.mrb[3].mxu0  ;;  %v2132_v17 = vpop.f32.mrb[3].mxu1 }
  0xfd   : > { %v2061_v18 = vadd.f32 %v2060_v16, %v2059_v13  ;;  %v2518_v19 = vadd.f32 %v2132_v17, %v2131_v15  ;;  %v827_v61 = vadd.f32 %v2058_v12, %v2535_v56 }
  0xff   : > { %v830_v7 = vadd.f32 %v2061_v18, %v2535_v56 }
 0x101   : > { %v2062_v20 = vpop.f32.mrb[4].mxu0  ;;  %v2134_v21 = vpop.f32.mrb[4].mxu1 }
 0x102   : > { %v2063_v22 = vpop.f32.mrb[5].mxu0  ;;  %v2135_v23 = vpop.f32.mrb[5].mxu1 }
 0x103   : > { %v2064_v24 = vadd.f32 %v2063_v22, %v2062_v20  ;;  %v2065_v25 = vpop.f32.mrb[6].mxu0  ;;  %v2520_v26 = vadd.f32 %v2135_v23, %v2134_v21  ;;  %v2137_v27 = vpop.f32.mrb[6].mxu1 }
 0x104   : > { %v2066_v28 = vpop.f32.mrb[7].mxu0  ;;  %v2138_v29 = vpop.f32.mrb[7].mxu1 }
 0x105   : > { %v2067_v30 = vadd.f32 %v2066_v28, %v2065_v25  ;;  %v2522_v31 = vadd.f32 %v2138_v29, %v2137_v27  ;;  %v835_v57 = vadd.f32 %v2064_v24, %v2535_v56 }
 0x107   : > { %v838_v1 = vadd.f32 %v2067_v30, %v2535_v56 }
 0x109   : > { %v2068_v32 = vpop.f32.mrb[8].mxu0  ;;  %v2140_v33 = vpop.f32.mrb[8].mxu1 }
 0x10a   : > { %v2069_v34 = vpop.f32.mrb[9].mxu0  ;;  %v2141_v35 = vpop.f32.mrb[9].mxu1 }
 0x10b   : > { %v2070_v36 = vadd.f32 %v2069_v34, %v2068_v32  ;;  %v2071_v37 = vpop.f32.mrb[10].mxu0  ;;  %v2524_v38 = vadd.f32 %v2141_v35, %v2140_v33  ;;  %v2143_v39 = vpop.f32.mrb[10].mxu1 }
 0x10c   : > { %v2072_v40 = vpop.f32.mrb[11].mxu0  ;;  %v2144_v41 = vpop.f32.mrb[11].mxu1 }
 0x10d   : > { %v2073_v42 = vadd.f32 %v2072_v40, %v2071_v37  ;;  %v2526_v43 = vadd.f32 %v2144_v41, %v2143_v39  ;;  %v843_v29 = vadd.f32 %v2070_v36, %v2535_v56 }
 0x10f   : > { %v846_v30 = vadd.f32 %v2073_v42, %v2535_v56 }
 0x111   : > { %v2074_v44 = vpop.f32.mrb[12].mxu0  ;;  %v2146_v45 = vpop.f32.mrb[12].mxu1 }
 0x112   : > { %v2075_v46 = vpop.f32.mrb[13].mxu0  ;;  %v2147_v47 = vpop.f32.mrb[13].mxu1 }
 0x113   : > { %v2076_v48 = vadd.f32 %v2075_v46, %v2074_v44  ;;  %v2077_v49 = vpop.f32.mrb[14].mxu0  ;;  %v2528_v50 = vadd.f32 %v2147_v47, %v2146_v45  ;;  %v2149_v51 = vpop.f32.mrb[14].mxu1 }
 0x114   : > { %v2078_v52 = vpop.f32.mrb[15].mxu0  ;;  %v2150_v53 = vpop.f32.mrb[15].mxu1 }
 0x115   : > { %v2079_v54 = vadd.f32 %v2078_v52, %v2077_v49  ;;  %v2530_v55 = vadd.f32 %v2150_v53, %v2149_v51  ;;  %v851_v24 = vadd.f32 %v2076_v48, %v2535_v56 }
 0x117   : > { %v854_v39 = vadd.f32 %v2079_v54, %v2535_v56 }
 0x119   : > { %v2080_v58 = vpop.f32.mrb[16].mxu0  ;;  %v2194_v59 = vpop.f32.mrb[16].mxu1 }
 0x11a   : > { %v996_v62 = vadd.f32 %v2194_v59, %v835_v57  ;;  %v2081_v63 = vpop.f32.mrb[17].mxu0  ;;  %v987_v0 = vpop.f32.mrb[17].mxu1 }
 0x11b   : > { %v2551_v3 = vadd.f32 %v2081_v63, %v2080_v58  ;;  %v988_v4 = vadd.f32 %v987_v0, %v827_v61  ;;  %v2083_v5 = vpop.f32.mrb[18].mxu0  ;;  %v2195_v6 = vpop.f32.mrb[18].mxu1 }
 0x11c   : > { %v1283_v8 = vmul.f32 %v2541_v60, %v996_v62  ;;  %v999_v9 = vadd.f32 %v2195_v6, %v838_v1  ;;  %v2084_v10 = vpop.f32.mrb[19].mxu0  ;;  %v990_v11 = vpop.f32.mrb[19].mxu1 }
 0x11d   : > { %v1281_v12 = vmul.f32 %v2541_v60, %v988_v4  ;;  %v2085_v13 = vadd.f32 %v2084_v10, %v2083_v5  ;;  %v991_v15 = vadd.f32 %v990_v11, %v830_v7 }
 0x11e   : > { %v1322_v16 = vadd.f32 %v2549_v2, %v1283_v8  ;;  %v1858_v17 = vpack.c.bf16 %v999_v9, %v996_v62  ;;  %v1284_v18 = vmul.f32 %v2541_v60, %v999_v9  ;;  %v859_v8 = vadd.f32 %v2551_v3, %v2535_v56 }
 0x11f   : > { %v1320_v20 = vadd.f32 %v2549_v2, %v1281_v12  ;;  %v1853_v21 = vpack.c.bf16 %v991_v15, %v988_v4  ;;  %v1282_v22 = vmul.f32 %v2541_v60, %v991_v15  ;;  %v862_v9 = vadd.f32 %v2085_v13, %v2535_v56 }
 0x120   : > { %2010 = vst [vmem:[%s2561_s17 + $0x8] sm:$0xff] %v1858_v17   ;;  %v1323_v23 = vadd.f32 %v2549_v2, %v1284_v18  ;;  %v1354_v32 = vmax.f32 %v1322_v16, 0.0 }
 0x121   : > { %1854 = vst [vmem:[%s2561_s17] sm:$0xff] %v1853_v21   ;;  %v1321_v25 = vadd.f32 %v2549_v2, %v1282_v22  ;;  %v2086_v27 = vpop.f32.mrb[20].mxu0  ;;  %v2198_v28 = vpop.f32.mrb[20].mxu1  ;;  %v1352_v40 = vmax.f32 %v1320_v20, 0.0 }
 0x122   : > { %v1355_v33 = vmax.f32 %v1323_v23, 0.0  ;;  %v1012_v34 = vadd.f32 %v2198_v28, %v851_v24  ;;  %v2087_v35 = vpop.f32.mrb[21].mxu0  ;;  %v1003_v37 = vpop.f32.mrb[21].mxu1 }
 0x123   : > { %v1353_v41 = vmax.f32 %v1321_v25, 0.0  ;;  %v2088_v44 = vadd.f32 %v2087_v35, %v2086_v27  ;;  %v1004_v36 = vadd.f32 %v1003_v37, %v843_v29  ;;  %v2089_v42 = vpop.f32.mrb[22].mxu0  ;;  %v2199_v45 = vpop.f32.mrb[22].mxu1 }
 0x124   : > { %v1938_v46 = vpack.c.bf16 %v1355_v33, %v1354_v32  ;;  %v1287_v47 = vmul.f32 %v2541_v60, %v1012_v34  ;;  %v1015_v48 = vadd.f32 %v2199_v45, %v854_v39  ;;  %v2090_v49 = vpop.f32.mrb[23].mxu0  ;;  %v1006_v51 = vpop.f32.mrb[23].mxu1 }
 0x125   : > { %v1933_v52 = vpack.c.bf16 %v1353_v41, %v1352_v40  ;;  %v1285_v53 = vmul.f32 %v2541_v60, %v1004_v36  ;;  %v2091_v54 = vadd.f32 %v2090_v49, %v2089_v42  ;;  %v1007_v57 = vadd.f32 %v1006_v51, %v846_v30 }
 0x126   : > { %2025 = vst [vmem:[%s2580_s20 + $0x8] sm:$0xff] %v1938_v46   ;;  %v1326_v58 = vadd.f32 %v2549_v2, %v1287_v47  ;;  %v1868_v59 = vpack.c.bf16 %v1015_v48, %v1012_v34  ;;  %v1288_v61 = vmul.f32 %v2541_v60, %v1015_v48  ;;  %v867_v4 = vadd.f32 %v2088_v44, %v2535_v56 }
 0x127   : > { %1934 = vst [vmem:[%s2580_s20] sm:$0xff] %v1933_v52   ;;  %v1324_v62 = vadd.f32 %v2549_v2, %v1285_v53  ;;  %v1863_v63 = vpack.c.bf16 %v1007_v57, %v1004_v36  ;;  %v1286_v0 = vmul.f32 %v2541_v60, %v1007_v57  ;;  %v870_v17 = vadd.f32 %v2091_v54, %v2535_v56 }
 0x128   : > { %2012 = vst [vmem:[%s2561_s17 + $0x18] sm:$0xff] %v1868_v59   ;;  %v1327_v1 = vadd.f32 %v2549_v2, %v1288_v61  ;;  %v1358_v10 = vmax.f32 %v1326_v58, 0.0 }
 0x129   : > { %2011 = vst [vmem:[%s2561_s17 + $0x10] sm:$0xff] %v1863_v63   ;;  %v1325_v5 = vadd.f32 %v2549_v2, %v1286_v0  ;;  %v2092_v6 = vpop.f32.mrb[24].mxu0  ;;  %v2202_v7 = vpop.f32.mrb[24].mxu1  ;;  %v1356_v18 = vmax.f32 %v1324_v62, 0.0 }
 0x12a   : > { %v1359_v11 = vmax.f32 %v1327_v1, 0.0  ;;  %v1028_v12 = vadd.f32 %v2202_v7, %v867_v4  ;;  %v2093_v15 = vpop.f32.mrb[25].mxu0  ;;  %v1019_v16 = vpop.f32.mrb[25].mxu1 }
 0x12b   : > { %v1357_v20 = vmax.f32 %v1325_v5, 0.0  ;;  %v2094_v21 = vadd.f32 %v2093_v15, %v2092_v6  ;;  %v1020_v22 = vadd.f32 %v1019_v16, %v859_v8  ;;  %v2095_v23 = vpop.f32.mrb[26].mxu0  ;;  %v2203_v24 = vpop.f32.mrb[26].mxu1 }
 0x12c   : > { %v1948_v25 = vpack.c.bf16 %v1359_v11, %v1358_v10  ;;  %v1291_v3 = vmul.f32 %v2541_v60, %v1028_v12  ;;  %v1031_v13 = vadd.f32 %v2203_v24, %v870_v17  ;;  %v2096_v27 = vpop.f32.mrb[27].mxu0  ;;  %v1022_v28 = vpop.f32.mrb[27].mxu1 }
 0x12d   : > { %v1943_v29 = vpack.c.bf16 %v1357_v20, %v1356_v18  ;;  %v1289_v30 = vmul.f32 %v2541_v60, %v1020_v22  ;;  %v2097_v32 = vadd.f32 %v2096_v27, %v2095_v23  ;;  %v1023_v33 = vadd.f32 %v1022_v28, %v862_v9 }
 0x12e   : > { %2027 = vst [vmem:[%s2580_s20 + $0x18] sm:$0xff] %v1948_v25   ;;  %v1330_v34 = vadd.f32 %v2549_v2, %v1291_v3  ;;  %v1878_v35 = vpack.c.bf16 %v1031_v13, %v1028_v12  ;;  %v1292_v37 = vmul.f32 %v2541_v60, %v1031_v13  ;;  %v875_v46 = vadd.f32 %v2094_v21, %v2535_v56 }
 0x12f   : > { %2026 = vst [vmem:[%s2580_s20 + $0x10] sm:$0xff] %v1943_v29   ;;  %v1328_v39 = vadd.f32 %v2549_v2, %v1289_v30  ;;  %v1873_v40 = vpack.c.bf16 %v1023_v33, %v1020_v22  ;;  %v1290_v41 = vmul.f32 %v2541_v60, %v1023_v33  ;;  %v878_v63 = vadd.f32 %v2097_v32, %v2535_v56 }
 0x130   : > { %2014 = vst [vmem:[%s2561_s17 + $0x28] sm:$0xff] %v1878_v35   ;;  %v1331_v44 = vadd.f32 %v2549_v2, %v1292_v37  ;;  %v1362_v47 = vmax.f32 %v1330_v34, 0.0 }
 0x131   : > { %2013 = vst [vmem:[%s2561_s17 + $0x20] sm:$0xff] %v1873_v40   ;;  %v1329_v36 = vadd.f32 %v2549_v2, %v1290_v41  ;;  %v2098_v42 = vpop.f32.mrb[28].mxu0  ;;  %v2206_v45 = vpop.f32.mrb[28].mxu1  ;;  %v1360_v52 = vmax.f32 %v1328_v39, 0.0 }
 0x132   : > { %v1363_v48 = vmax.f32 %v1331_v44, 0.0  ;;  %v2099_v49 = vpop.f32.mrb[29].mxu0  ;;  %v1035_v51 = vpop.f32.mrb[29].mxu1 }
 0x133   : > { %v1361_v53 = vmax.f32 %v1329_v36, 0.0  ;;  %v2100_v54 = vadd.f32 %v2099_v49, %v2098_v42  ;;  %v1036_v57 = vadd.f32 %v1035_v51, %v875_v46  ;;  %v2101_v58 = vpop.f32.mrb[30].mxu0  ;;  %v2207_v59 = vpop.f32.mrb[30].mxu1 }
 0x134   : > { %v1958_v61 = vpack.c.bf16 %v1363_v48, %v1362_v47  ;;  %v2102_v62 = vpop.f32.mrb[31].mxu0  ;;  %v1038_v0 = vpop.f32.mrb[31].mxu1 }
 0x135   : > { %v1953_v1 = vpack.c.bf16 %v1361_v53, %v1360_v52  ;;  %v883_v4 = vadd.f32 %v2100_v54, %v2535_v56  ;;  %v1293_v5 = vmul.f32 %v2541_v60, %v1036_v57  ;;  %v2103_v6 = vadd.f32 %v2102_v62, %v2101_v58 }
 0x136   : > { %2029 = vst [vmem:[%s2580_s20 + $0x28] sm:$0xff] %v1958_v61   ;;  %v1039_v7 = vadd.f32 %v1038_v0, %v878_v63 }
 0x137   : > { %2028 = vst [vmem:[%s2580_s20 + $0x20] sm:$0xff] %v1953_v1   ;;  %v1044_v8 = vadd.f32 %v2206_v45, %v883_v4  ;;  %v886_v9 = vadd.f32 %v2103_v6, %v2535_v56  ;;  %v1332_v10 = vadd.f32 %v2549_v2, %v1293_v5 }
 0x138   : > { %v1883_v11 = vpack.c.bf16 %v1039_v7, %v1036_v57  ;;  %v1294_v12 = vmul.f32 %v2541_v60, %v1039_v7  ;;  %v931_v7 = vadd.f32 %v2520_v26, %v2535_v56  ;;  %v939_v26 = vadd.f32 %v2524_v38, %v2535_v56 }
 0x139   : > { %v1295_v15 = vmul.f32 %v2541_v60, %v1044_v8  ;;  %v1047_v16 = vadd.f32 %v2207_v59, %v886_v9  ;;  %v2104_v17 = vpop.f32.mrb[32].mxu0  ;;  %v2210_v18 = vpop.f32.mrb[32].mxu1  ;;  %v1364_v28 = vmax.f32 %v1332_v10, 0.0 }
 0x13a   : > { %2015 = vst [vmem:[%s2561_s17 + $0x30] sm:$0xff] %v1883_v11   ;;  %v1333_v20 = vadd.f32 %v2549_v2, %v1294_v12  ;;  %v2105_v21 = vpop.f32.mrb[33].mxu0  ;;  %v1051_v22 = vpop.f32.mrb[33].mxu1 }
 0x13b   : > { %v1334_v23 = vadd.f32 %v2549_v2, %v1295_v15  ;;  %v1888_v24 = vpack.c.bf16 %v1047_v16, %v1044_v8  ;;  %v1296_v25 = vmul.f32 %v2541_v60, %v1047_v16  ;;  %v2106_v3 = vadd.f32 %v2105_v21, %v2104_v17  ;;  %v2107_v13 = vpop.f32.mrb[34].mxu0  ;;  %v2211_v27 = vpop.f32.mrb[34].mxu1 }
 0x13c   : > { %v1365_v29 = vmax.f32 %v1333_v20, 0.0  ;;  %v2108_v30 = vpop.f32.mrb[35].mxu0  ;;  %v1054_v32 = vpop.f32.mrb[35].mxu1  ;;  %v923_v8 = vadd.f32 %v2516_v14, %v2535_v56  ;;  %v926_v16 = vadd.f32 %v2518_v19, %v2535_v56  ;;  %v934_v21 = vadd.f32 %v2522_v31, %v2535_v56 }
 0x13d   : > { %2016 = vst [vmem:[%s2561_s17 + $0x38] sm:$0xff] %v1888_v24   ;;  %v1335_v33 = vadd.f32 %v2549_v2, %v1296_v25  ;;  %v891_v34 = vadd.f32 %v2106_v3, %v2535_v56  ;;  %v2109_v35 = vadd.f32 %v2108_v30, %v2107_v13  ;;  %v1366_v39 = vmax.f32 %v1334_v23, 0.0 }
 0x13e   : > { %v1963_v37 = vpack.c.bf16 %v1365_v29, %v1364_v28  ;;  %v2655_v14 = vadd.f32 %v2526_v43, %v2535_v56  ;;  %v947_v29 = vadd.f32 %v2528_v50, %v2535_v56 }
 0x13f   : > { %v1367_v40 = vmax.f32 %v1335_v33, 0.0  ;;  %v1052_v41 = vadd.f32 %v1051_v22, %v891_v34  ;;  %v894_v44 = vadd.f32 %v2109_v35, %v2535_v56 }
 0x140   : > { %2030 = vst [vmem:[%s2580_s20 + $0x30] sm:$0xff] %v1963_v37  }
 0x141   : > { %v1968_v36 = vpack.c.bf16 %v1367_v40, %v1366_v39  ;;  %v1297_v42 = vmul.f32 %v2541_v60, %v1052_v41  ;;  %v1055_v45 = vadd.f32 %v1054_v32, %v894_v44  ;;  %v2110_v46 = vpop.f32.mrb[36].mxu0  ;;  %v2631_v47 = vpop.f32.mrb[36].mxu1 }
 0x142   : > { %v2111_v48 = vpop.f32.mrb[37].mxu0  ;;  %v1067_v49 = vpop.f32.mrb[37].mxu1 }
 0x143   : > { %2031 = vst [vmem:[%s2580_s20 + $0x38] sm:$0xff] %v1968_v36   ;;  %v1336_v51 = vadd.f32 %v2549_v2, %v1297_v42  ;;  %v1893_v52 = vpack.c.bf16 %v1055_v45, %v1052_v41  ;;  %v1298_v53 = vmul.f32 %v2541_v60, %v1055_v45  ;;  %v2112_v54 = vadd.f32 %v2111_v48, %v2110_v46  ;;  %v2113_v57 = vpop.f32.mrb[38].mxu0  ;;  %v2636_v58 = vpop.f32.mrb[38].mxu1 }
 0x144   : > { %v2114_v59 = vpop.f32.mrb[39].mxu0  ;;  %v1070_v61 = vpop.f32.mrb[39].mxu1  ;;  %v950_v46 = vadd.f32 %v2530_v55, %v2535_v56 }
 0x145   : > { %2017 = vst [vmem:[%s2561_s17 + $0x40] sm:$0xff] %v1893_v52   ;;  %v1337_v62 = vadd.f32 %v2549_v2, %v1298_v53  ;;  %v899_v63 = vadd.f32 %v2112_v54, %v2535_v56  ;;  %v2115_v0 = vadd.f32 %v2114_v59, %v2113_v57  ;;  %v1368_v1 = vmax.f32 %v1336_v51, 0.0 }
 0x147   : > { %v1369_v4 = vmax.f32 %v1337_v62, 0.0  ;;  %v1060_v5 = vadd.f32 %v2210_v18, %v899_v63  ;;  %v902_v6 = vadd.f32 %v2115_v0, %v2535_v56 }
 0x149   : > { %v1973_v9 = vpack.c.bf16 %v1369_v4, %v1368_v1  ;;  %v1299_v10 = vmul.f32 %v2541_v60, %v1060_v5  ;;  %v1063_v11 = vadd.f32 %v2211_v27, %v902_v6  ;;  %v2116_v12 = vpop.f32.mrb[40].mxu0  ;;  %v2218_v15 = vpop.f32.mrb[40].mxu1 }
 0x14a   : > { %v1092_v17 = vadd.f32 %v2218_v15, %v931_v7  ;;  %v2117_v18 = vpop.f32.mrb[41].mxu0  ;;  %v1083_v20 = vpop.f32.mrb[41].mxu1 }
 0x14b   : > { %2032 = vst [vmem:[%s2580_s20 + $0x40] sm:$0xff] %v1973_v9   ;;  %v1338_v22 = vadd.f32 %v2549_v2, %v1299_v10  ;;  %v1898_v23 = vpack.c.bf16 %v1063_v11, %v1060_v5  ;;  %v1300_v19 = vmul.f32 %v2541_v60, %v1063_v11  ;;  %v2118_v24 = vadd.f32 %v2117_v18, %v2116_v12  ;;  %v2119_v25 = vpop.f32.mrb[42].mxu0  ;;  %v2219_v3 = vpop.f32.mrb[42].mxu1 }
 0x14c   : > { %v1307_v13 = vmul.f32 %v2541_v60, %v1092_v17  ;;  %v1084_v31 = vadd.f32 %v1083_v20, %v923_v8  ;;  %v1095_v27 = vadd.f32 %v2219_v3, %v934_v21  ;;  %v2120_v28 = vpop.f32.mrb[43].mxu0  ;;  %v1086_v38 = vpop.f32.mrb[43].mxu1 }
 0x14d   : > { %v1370_v43 = vmax.f32 %v1338_v22, 0.0  ;;  %2018 = vst [vmem:[%s2561_s17 + $0x48] sm:$0xff] %v1898_v23   ;;  %v1339_v30 = vadd.f32 %v2549_v2, %v1300_v19  ;;  %v907_v32 = vadd.f32 %v2118_v24, %v2535_v56  ;;  %v2121_v33 = vadd.f32 %v2120_v28, %v2119_v25 }
 0x14e   : > { %v1346_v34 = vadd.f32 %v2549_v2, %v1307_v13  ;;  %v1305_v35 = vmul.f32 %v2541_v60, %v1084_v31  ;;  %v1918_v37 = vpack.c.bf16 %v1095_v27, %v1092_v17  ;;  %v1308_v39 = vmul.f32 %v2541_v60, %v1095_v27 }
 0x14f   : > { %v1371_v40 = vmax.f32 %v1339_v30, 0.0  ;;  %v1068_v41 = vadd.f32 %v1067_v49, %v907_v32  ;;  %v910_v44 = vadd.f32 %v2121_v33, %v2535_v56  ;;  %v1087_v50 = vadd.f32 %v1086_v38, %v926_v16 }
 0x150   : > { %v1378_v36 = vmax.f32 %v1346_v34, 0.0  ;;  %v1344_v42 = vadd.f32 %v2549_v2, %v1305_v35  ;;  %2022 = vst [vmem:[%s2561_s17 + $0x68] sm:$0xff] %v1918_v37   ;;  %v1347_v45 = vadd.f32 %v2549_v2, %v1308_v39 }
 0x151   : > { %v1978_v48 = vpack.c.bf16 %v1371_v40, %v1370_v43  ;;  %v1301_v51 = vmul.f32 %v2541_v60, %v1068_v41  ;;  %v1071_v52 = vadd.f32 %v1070_v61, %v910_v44  ;;  %v1913_v53 = vpack.c.bf16 %v1087_v50, %v1084_v31  ;;  %v2122_v49 = vpop.f32.mrb[44].mxu0  ;;  %v2222_v54 = vpop.f32.mrb[44].mxu1 }
 0x152   : > { %v1376_v57 = vmax.f32 %v1344_v42, 0.0  ;;  %v1379_v59 = vmax.f32 %v1347_v45, 0.0  ;;  %v1306_v62 = vmul.f32 %v2541_v60, %v1087_v50  ;;  %v1108_v63 = vadd.f32 %v2222_v54, %v947_v29  ;;  %v2123_v0 = vpop.f32.mrb[45].mxu0  ;;  %v1099_v1 = vpop.f32.mrb[45].mxu1 }
 0x153   : > { %2033 = vst [vmem:[%s2580_s20 + $0x48] sm:$0xff] %v1978_v48   ;;  %v1340_v4 = vadd.f32 %v2549_v2, %v1301_v51  ;;  %v1903_v55 = vpack.c.bf16 %v1071_v52, %v1068_v41  ;;  %v1302_v5 = vmul.f32 %v2541_v60, %v1071_v52  ;;  %2021 = vst [vmem:[%s2561_s17 + $0x60] sm:$0xff] %v1913_v53   ;;  %v2125_v6 = vpop.f32.mrb[46].mxu0  ;;  %v2223_v7 = vpop.f32.mrb[46].mxu1 }
 0x154   : > { %v2124_v61 = vadd.f32 %v2123_v0, %v2122_v49  ;;  %v1998_v8 = vpack.c.bf16 %v1379_v59, %v1378_v36  ;;  %v1345_v9 = vadd.f32 %v2549_v2, %v1306_v62  ;;  %v1311_v10 = vmul.f32 %v2541_v60, %v1108_v63  ;;  %v2126_v12 = vpop.f32.mrb[47].mxu0  ;;  %v1102_v15 = vpop.f32.mrb[47].mxu1 }
 0x155   : > { %v1100_v11 = vadd.f32 %v1099_v1, %v939_v26  ;;  %v1372_v16 = vmax.f32 %v1340_v4, 0.0  ;;  %2019 = vst [vmem:[%s2561_s17 + $0x50] sm:$0xff] %v1903_v55   ;;  %v1341_v17 = vadd.f32 %v2549_v2, %v1302_v5  ;;  %v1111_v20 = vadd.f32 %v2223_v7, %v950_v46 }
 0x156   : > { %v915_v18 = vadd.f32 %v2124_v61, %v2535_v56  ;;  %2037 = vst [vmem:[%s2580_s20 + $0x68] sm:$0xff] %v1998_v8   ;;  %v1377_v21 = vmax.f32 %v1345_v9, 0.0  ;;  %v1350_v22 = vadd.f32 %v2549_v2, %v1311_v10  ;;  %v2127_v19 = vadd.f32 %v2126_v12, %v2125_v6 }
 0x157   : > { %v1309_v23 = vmul.f32 %v2541_v60, %v1100_v11  ;;  %v1373_v26 = vmax.f32 %v1341_v17, 0.0  ;;  %v1928_v25 = vpack.c.bf16 %v1111_v20, %v1108_v63  ;;  %v1312_v3 = vmul.f32 %v2541_v60, %v1111_v20 }
 0x158   : > { %v1076_v24 = vadd.f32 %v2631_v47, %v915_v18  ;;  %v1993_v13 = vpack.c.bf16 %v1377_v21, %v1376_v57  ;;  %v918_v31 = vadd.f32 %v2127_v19, %v2535_v56  ;;  %v1103_v29 = vadd.f32 %v1102_v15, %v2655_v14 }
 0x159   : > { %v1983_v27 = vpack.c.bf16 %v1373_v26, %v1372_v16  ;;  %2024 = vst [vmem:[%s2561_s17 + $0x78] sm:$0xff] %v1928_v25   ;;  %v1351_v38 = vadd.f32 %v2549_v2, %v1312_v3  ;;  %v1382_v43 = vmax.f32 %v1350_v22, 0.0  ;;  %v1348_v30 = vadd.f32 %v2549_v2, %v1309_v23 }
 0x15a   : > { %v1303_v28 = vmul.f32 %v2541_v60, %v1076_v24  ;;  %2036 = vst [vmem:[%s2580_s20 + $0x60] sm:$0xff] %v1993_v13   ;;  %v1079_v47 = vadd.f32 %v2636_v58, %v918_v31  ;;  %v1923_v56 = vpack.c.bf16 %v1103_v29, %v1100_v11  ;;  %v1310_v33 = vmul.f32 %v2541_v60, %v1103_v29 }
 0x15b   : > { %2034 = vst [vmem:[%s2580_s20 + $0x50] sm:$0xff] %v1983_v27   ;;  %v1383_v32 = vmax.f32 %v1351_v38, 0.0  ;;  %v1380_v40 = vmax.f32 %v1348_v30, 0.0 }
 0x15c   : > { %v1342_v34 = vadd.f32 %v2549_v2, %v1303_v28  ;;  %v1908_v35 = vpack.c.bf16 %v1079_v47, %v1076_v24  ;;  %v1304_v37 = vmul.f32 %v2541_v60, %v1079_v47  ;;  %2023 = vst [vmem:[%s2561_s17 + $0x70] sm:$0xff] %v1923_v56   ;;  %v1349_v39 = vadd.f32 %v2549_v2, %v1310_v33 }
 0x15d   : > { %v2008_v14 = vpack.c.bf16 %v1383_v32, %v1382_v43 }
 0x15e   : > { %2020 = vst [vmem:[%s2561_s17 + $0x58] sm:$0xff] %v1908_v35   ;;  %v1343_v58 = vadd.f32 %v2549_v2, %v1304_v37  ;;  %v1381_v41 = vmax.f32 %v1349_v39, 0.0  ;;  %v1374_v44 = vmax.f32 %v1342_v34, 0.0 }
 0x15f   : > { %2039 = vst [vmem:[%s2580_s20 + $0x78] sm:$0xff] %v2008_v14  }
 0x160   : > { %v1375_v50 = vmax.f32 %v1343_v58, 0.0  ;;  %v2003_v36 = vpack.c.bf16 %v1381_v41, %v1380_v40 }
 0x162   : > { %v1988_v42 = vpack.c.bf16 %v1375_v50, %v1374_v44  ;;  %2038 = vst [vmem:[%s2580_s20 + $0x70] sm:$0xff] %v2003_v36  }
 0x164   : > { %2035 = vst [vmem:[%s2580_s20 + $0x58] sm:$0xff] %v1988_v42  }
 0x165 PF: > { %s17_s21 = sadd.s32 1, %s2343_s21  }
 0x166   : > { %p14_p4 = scmp.ge.s32.totalorder %s17_s21, 4  }
 0x168   :  { %16 = sbr.rel (!%p14_p4) target bundleno = 1 (0x1), region = 82 }

// kernel: wide_resnet_forward.13
= control target key start
LH: loop header
LB: loop body
LE: loop exit
PB: predicated region body
PF: predicated region fallthrough
CT: control target
= control target key end

     0   :  { %s1939_s15 = smov 0   ;;  %s2204_s0 = inlined_call_operand.vmem [shape: bf16[512,384], index: 0, kind: input, shape index: {}]   ;;  %s2205_s1 = inlined_call_operand.vmem [shape: bf16[384,128], index: 1, kind: input, shape index: {}]   ;;  %s2206_s2 = inlined_call_operand.vmem [shape: f32[1,128], index: 2, kind: input, shape index: {}]   ;;  %s2207_s3 = inlined_call_operand.vmem [shape: f32[1,128], index: 3, kind: input, shape index: {}]   ;;  %s2208_s4 = inlined_call_operand.vmem [shape: bf16[512,128], index: 4, kind: output, shape index: {}]  }
   0x1 LB: > { %s1365_s16 = sadd.s32 4294967295, %s1912_s15   ;;  %p1369_p0 = scmp.ge.s32.totalorder %s1912_s15, 1  ;;  %s1912_s15 = sphi %s1939_s15, %s14_s15  }
   0x2   : > { %p164_p1 = scmp.lt.s32.totalorder %s1912_s15, 3 }
   0x4   : > { %p165_p2 = pnand %p1369_p0, %p164_p1 }
   0x5   : > { %v1818_v0 = vld [vmem:[%s2205_s1 + $0x40] sm:$0xff] (!%p165_p2)   ;;  %s1370_s19 = sshll.u32 (!%p165_p2), %s1365_s16, 5  ;;  %v1820_v2 = vld [vmem:[%s2205_s1 + $0x48] sm:$0xff] (!%p165_p2)   ;;  %v1822_v4 = vld [vmem:[%s2205_s1 + $0x50] sm:$0xff] (!%p165_p2)  }
   0x6   : > { %168 = sbr.rel (%p165_p2) target bundleno = 354 (0x162), region = 36  ;;  %v1819_v1 = vld [vmem:[%s2205_s1] sm:$0xff] (!%p165_p2)   ;;  %1609 = vmatprep.subr.bf16.mxu0 (!%p165_p2), %v1818_v0  ;;  %1793 = vmatprep.subr.bf16.mxu1 (!%p165_p2), %v1818_v0  ;;  %p192_p3 = scmp.lt.s32.totalorder (!%p165_p2), %s1370_s19, 63  ;;  %v1821_v3 = vld [vmem:[%s2205_s1 + $0x8] sm:$0xff] (!%p165_p2)   ;;  %v1823_v5 = vld [vmem:[%s2205_s1 + $0x10] sm:$0xff] (!%p165_p2)  }
   0x7   : > { %1610 = vmatpush3.bf16.msra.mxu0 (!%p165_p2), %v1819_v1  ;;  %1801 = vmatpush3.bf16.msra.mxu1 (!%p165_p2), %v1819_v1  ;;  %v1824_v6 = vld [vmem:[%s2205_s1 + $0x58] sm:$0xff] (!%p165_p2)   ;;  %v1826_v8 = vld [vmem:[%s2205_s1 + $0x60] sm:$0xff] (!%p165_p2)   ;;  %v1828_v10 = vld [vmem:[%s2205_s1 + $0x68] sm:$0xff] (!%p165_p2)  }
   0x8   : > { %1611 = vmatprep.subr.bf16.mxu0 (!%p165_p2), %v1820_v2  ;;  %1794 = vmatprep.subr.bf16.mxu1 (!%p165_p2), %v1820_v2  ;;  %v1825_v7 = vld [vmem:[%s2205_s1 + $0x18] sm:$0xff] (!%p165_p2)   ;;  %v1827_v9 = vld [vmem:[%s2205_s1 + $0x20] sm:$0xff] (!%p165_p2)   ;;  %v1829_v13 = vld [vmem:[%s2205_s1 + $0x28] sm:$0xff] (!%p165_p2)  }
   0x9   : > { %v1830_v14 = vld [vmem:[%s2205_s1 + $0x70] sm:$0xff] (!%p165_p2)   ;;  %v1832_v16 = vld [vmem:[%s2205_s1 + $0x78] sm:$0xff] (!%p165_p2)   ;;  %v1840_v18 = vld [vmem:[%s2205_s1 + $0x80] sm:$0xff] (!%p165_p2)  }
   0xa   : > { %v1831_v15 = vld [vmem:[%s2205_s1 + $0x30] sm:$0xff] (!%p165_p2)   ;;  %v1833_v17 = vld [vmem:[%s2205_s1 + $0x38] sm:$0xff] (!%p165_p2)   ;;  %v1841_v22 = vld [vmem:[%s2205_s1 + $0x88] sm:$0xff] (!%p165_p2)  }
   0xb   : > { %1612 = vmatpush3.bf16.msra.mxu0 (!%p165_p2), %v1821_v3  ;;  %1802 = vmatpush3.bf16.msra.mxu1 (!%p165_p2), %v1821_v3  ;;  %v1848_v25 = vld [vmem:[%s2205_s1 + $0x90] sm:$0xff] (!%p165_p2)   ;;  %v1849_v27 = vld [vmem:[%s2205_s1 + $0x98] sm:$0xff] (!%p165_p2)   ;;  %v1856_v30 = vld [vmem:[%s2205_s1 + $0xa0] sm:$0xff] (!%p165_p2)  }
   0xc   : > { %1613 = vmatprep.subr.bf16.mxu0 (!%p165_p2), %v1822_v4  ;;  %1795 = vmatprep.subr.bf16.mxu1 (!%p165_p2), %v1822_v4  ;;  %v1857_v33 = vld [vmem:[%s2205_s1 + $0xa8] sm:$0xff] (!%p165_p2)   ;;  %v1864_v36 = vld [vmem:[%s2205_s1 + $0xb0] sm:$0xff] (!%p165_p2)   ;;  %v1865_v40 = vld [vmem:[%s2205_s1 + $0xb8] sm:$0xff] (!%p165_p2)  }
   0xd   : > { %s2210_s19 = smov (!%p192_p3, %s1370_s19), 63 }
   0xe   : > { %s1809_s6 = smul.u32 12, %s2210_s19  ;;  %s1373_s26 = sshll.u32 %s2210_s19, 2 }
   0xf   : > { %1614 = vmatpush3.bf16.msra.mxu0 %v1823_v5  ;;  %1803 = vmatpush3.bf16.msra.mxu1 %v1823_v5  ;;  %s2113_s29 = scalar_lea.vmem %s2208_s4, %s1373_s26 }
  0x10   : > { %1615 = vmatprep.subr.bf16.mxu0 %v1824_v6  ;;  %1796 = vmatprep.subr.bf16.mxu1 %v1824_v6  ;;  %s1980_s13 = scalar_lea.vmem %s2204_s0, %s1809_s6 }
  0x11   : > { %v1836_v11 = vld [vmem:[%s1980_s13 + $0x4] ss:$12 sps:$4 sm:$0xff]   ;;  %v1834_v19 = vld [vmem:[%s1980_s13] ss:$12 sps:$4 sm:$0xff]   ;;  %v1842_v21 = vld [vmem:[%s1980_s13 + $0x1c] ss:$12 sps:$4 sm:$0xff]  }
  0x12   : > { %v1839_v12 = vld [vmem:[%s1980_s13 + $0x124] ss:$12 sps:$4 sm:$0xff]   ;;  %749 = vmatprep.mubr.bf16.mxu0 %v1836_v11  ;;  %v1837_v20 = vld [vmem:[%s1980_s13 + $0x120] ss:$12 sps:$4 sm:$0xff]   ;;  %v1844_v23 = vld [vmem:[%s1980_s13 + $0x13c] ss:$12 sps:$4 sm:$0xff]  }
  0x13   : > { %1616 = vmatpush3.bf16.msra.mxu0 %v1825_v7  ;;  %1804 = vmatpush3.bf16.msra.mxu1 %v1825_v7  ;;  %v1846_v24 = vld [vmem:[%s1980_s13 + $0x18] ss:$12 sps:$4 sm:$0xff]   ;;  %v1850_v28 = vld [vmem:[%s1980_s13 + $0x34] ss:$12 sps:$4 sm:$0xff]   ;;  %v1854_v31 = vld [vmem:[%s1980_s13 + $0x30] ss:$12 sps:$4 sm:$0xff]  }
  0x14   : > { %1617 = vmatprep.subr.bf16.mxu0 %v1826_v8  ;;  %1797 = vmatprep.subr.bf16.mxu1 %v1826_v8  ;;  %v1847_v26 = vld [vmem:[%s1980_s13 + $0x138] ss:$12 sps:$4 sm:$0xff]   ;;  %v1852_v29 = vld [vmem:[%s1980_s13 + $0x154] ss:$12 sps:$4 sm:$0xff]   ;;  %v1855_v32 = vld [vmem:[%s1980_s13 + $0x150] ss:$12 sps:$4 sm:$0xff]  }
  0x15   : > { %845 = vmatprep.mubr.bf16.mxu1 %v1839_v12  ;;  %v1858_v34 = vld [vmem:[%s1980_s13 + $0x4c] ss:$12 sps:$4 sm:$0xff]   ;;  %v1862_v37 = vld [vmem:[%s1980_s13 + $0x48] ss:$12 sps:$4 sm:$0xff]   ;;  %v1866_v39 = vld [vmem:[%s1980_s13 + $0x64] ss:$12 sps:$4 sm:$0xff]  }
  0x16   : > { %v1860_v35 = vld [vmem:[%s1980_s13 + $0x16c] ss:$12 sps:$4 sm:$0xff]   ;;  %v1863_v38 = vld [vmem:[%s1980_s13 + $0x168] ss:$12 sps:$4 sm:$0xff]   ;;  %v1875_v47 = vld [vmem:[%s1980_s13 + $0x50] ss:$12 sps:$4 sm:$0xff]  }
  0x17   : > { %1618 = vmatpush3.bf16.msra.mxu0 %v1827_v9  ;;  %1805 = vmatpush3.bf16.msra.mxu1 %v1827_v9  ;;  %v1868_v41 = vld [vmem:[%s1980_s13 + $0x8] ss:$12 sps:$4 sm:$0xff]   ;;  %v1869_v42 = vld [vmem:[%s1980_s13 + $0x60] ss:$12 sps:$4 sm:$0xff]   ;;  %v1873_v45 = vld [vmem:[%s1980_s13 + $0x38] ss:$12 sps:$4 sm:$0xff]  }
  0x18   : > { %1619 = vmatprep.subr.bf16.mxu0 %v1828_v10  ;;  %1798 = vmatprep.subr.bf16.mxu1 %v1828_v10  ;;  %v1870_v43 = vld [vmem:[%s1980_s13 + $0x20] ss:$12 sps:$4 sm:$0xff]   ;;  %v1871_v44 = vld [vmem:[%s1980_s13 + $0x7c] ss:$12 sps:$4 sm:$0xff]   ;;  %v1874_v46 = vld [vmem:[%s1980_s13 + $0x78] ss:$12 sps:$4 sm:$0xff]  }
  0x19   : > { %v1876_v48 = vld [vmem:[%s1980_s13 + $0x94] ss:$12 sps:$4 sm:$0xff]   ;;  %v1879_v50 = vld [vmem:[%s1980_s13 + $0x90] ss:$12 sps:$4 sm:$0xff]   ;;  %v1881_v52 = vld [vmem:[%s1980_s13 + $0xac] ss:$12 sps:$4 sm:$0xff]  }
  0x1a   : > { %v1878_v49 = vld [vmem:[%s1980_s13 + $0x68] ss:$12 sps:$4 sm:$0xff]   ;;  %v1880_v51 = vld [vmem:[%s1980_s13 + $0x80] ss:$12 sps:$4 sm:$0xff]   ;;  %v1883_v53 = vld [vmem:[%s1980_s13 + $0x98] ss:$12 sps:$4 sm:$0xff]  }
  0x1b   : > { %1620 = vmatpush3.bf16.msra.mxu0 %v1829_v13  ;;  %1806 = vmatpush3.bf16.msra.mxu1 %v1829_v13  ;;  %v1884_v54 = vld [vmem:[%s1980_s13 + $0xa8] ss:$12 sps:$4 sm:$0xff]   ;;  %v1885_v55 = vld [vmem:[%s1980_s13 + $0xb0] ss:$12 sps:$4 sm:$0xff]   ;;  %v1889_v58 = vld [vmem:[%s1980_s13 + $0xc0] ss:$12 sps:$4 sm:$0xff]  }
  0x1c   : > { %1621 = vmatprep.subr.bf16.mxu0 %v1830_v14  ;;  %1799 = vmatprep.subr.bf16.mxu1 %v1830_v14  ;;  %v1886_v56 = vld [vmem:[%s1980_s13 + $0xc4] ss:$12 sps:$4 sm:$0xff]   ;;  %v1888_v57 = vld [vmem:[%s1980_s13 + $0xc8] ss:$12 sps:$4 sm:$0xff]   ;;  %v1890_v59 = vld [vmem:[%s1980_s13 + $0xe0] ss:$12 sps:$4 sm:$0xff]  }
  0x1d   : > { %v1891_v60 = vld [vmem:[%s1980_s13 + $0xdc] ss:$12 sps:$4 sm:$0xff]   ;;  %v1893_v61 = vld [vmem:[%s1980_s13 + $0xf8] ss:$12 sps:$4 sm:$0xff]   ;;  %v1896_v0 = vld [vmem:[%s1980_s13 + $0xf4] ss:$12 sps:$4 sm:$0xff]  }
  0x1e   : > { %v1894_v62 = vld [vmem:[%s1980_s13 + $0xd8] ss:$12 sps:$4 sm:$0xff]   ;;  %v1895_v63 = vld [vmem:[%s1980_s13 + $0x110] ss:$12 sps:$4 sm:$0xff]   ;;  %v1898_v1 = vld [vmem:[%s1980_s13 + $0x128] ss:$12 sps:$4 sm:$0xff]  }
  0x1f   : > { %1622 = vmatpush3.bf16.msra.mxu0 %v1831_v15  ;;  %1807 = vmatpush3.bf16.msra.mxu1 %v1831_v15  ;;  %v1899_v2 = vld [vmem:[%s1980_s13 + $0xf0] ss:$12 sps:$4 sm:$0xff]   ;;  %v1900_v3 = vld [vmem:[%s1980_s13 + $0x140] ss:$12 sps:$4 sm:$0xff]   ;;  %v1903_v5 = vld [vmem:[%s1980_s13 + $0x158] ss:$12 sps:$4 sm:$0xff]  }
  0x20   : > { %1623 = vmatprep.subr.bf16.mxu0 %v1832_v16  ;;  %1800 = vmatprep.subr.bf16.mxu1 %v1832_v16  ;;  %v1901_v4 = vld [vmem:[%s1980_s13 + $0x10c] ss:$12 sps:$4 sm:$0xff]   ;;  %v1904_v6 = vld [vmem:[%s1980_s13 + $0x108] ss:$12 sps:$4 sm:$0xff]   ;;  %v1905_v7 = vld [vmem:[%s1980_s13 + $0x170] ss:$12 sps:$4 sm:$0xff]  }
  0x23   : > { %1624 = vmatpush3.bf16.msra.mxu0 %v1833_v17  ;;  %1808 = vmatpush3.bf16.msra.mxu1 %v1833_v17 }
  0x24   : > { %1745 = vmatprep.subr.bf16.mxu1 %v1840_v18 }
  0x26   : > { %750 = vmatmul.mubr.bf16.vlgmr.msra.gmra.mrb[0].mxu0 %v1834_v19  ;;  %846 = vmatmul.mubr.bf16.vlgmr.msra.gmra.mrb[0].mxu1 %v1837_v20 }
  0x27   : > { %1746 = vmatpush3.bf16.msra.mxu1 %v1840_v18  ;;  %757 = vmatprep.mubr.bf16.mxu0 %v1842_v21 }
  0x28   : > { %1747 = vmatprep.subr.bf16.mxu1 %v1841_v22  ;;  %853 = vmatprep.mubr.bf16.mxu1 %v1844_v23 }
  0x2b   : > { %1748 = vmatpush3.bf16.msra.mxu1 %v1841_v22 }
  0x2c   : > { %1749 = vmatprep.subr.bf16.mxu1 %v1848_v25 }
  0x2e   : > { %758 = vmatmul.mubr.bf16.gmra.mrb[4].mxu0 %v1846_v24  ;;  %854 = vmatmul.mubr.bf16.gmra.mrb[4].mxu1 %v1847_v26 }
  0x2f   : > { %1750 = vmatpush3.bf16.msra.mxu1 %v1848_v25  ;;  %765 = vmatprep.mubr.bf16.mxu0 %v1850_v28 }
  0x30   : > { %1751 = vmatprep.subr.bf16.mxu1 %v1849_v27  ;;  %861 = vmatprep.mubr.bf16.mxu1 %v1852_v29 }
  0x33   : > { %1752 = vmatpush3.bf16.msra.mxu1 %v1849_v27 }
  0x34   : > { %1753 = vmatprep.subr.bf16.mxu1 %v1856_v30 }
  0x36   : > { %766 = vmatmul.mubr.bf16.gmra.mrb[8].mxu0 %v1854_v31  ;;  %862 = vmatmul.mubr.bf16.gmra.mrb[8].mxu1 %v1855_v32 }
  0x37   : > { %1754 = vmatpush3.bf16.msra.mxu1 %v1856_v30  ;;  %773 = vmatprep.mubr.bf16.mxu0 %v1858_v34 }
  0x38   : > { %1755 = vmatprep.subr.bf16.mxu1 %v1857_v33  ;;  %869 = vmatprep.mubr.bf16.mxu1 %v1860_v35 }
  0x3b   : > { %1756 = vmatpush3.bf16.msra.mxu1 %v1857_v33 }
  0x3c   : > { %1757 = vmatprep.subr.bf16.mxu1 %v1864_v36 }
  0x3e   : > { %774 = vmatmul.mubr.bf16.gmra.mrb[12].mxu0 %v1862_v37  ;;  %870 = vmatmul.mubr.bf16.gmra.mrb[12].mxu1 %v1863_v38 }
  0x3f   : > { %1758 = vmatpush3.bf16.msra.mxu1 %v1864_v36  ;;  %781 = vmatprep.mubr.bf16.mxu0 %v1866_v39 }
  0x40   : > { %1759 = vmatprep.subr.bf16.mxu1 %v1865_v40  ;;  %1761 = vmatprep.mubr.bf16.mxu1 %v1868_v41 }
  0x43   : > { %1760 = vmatpush3.bf16.msra.mxu1 %v1865_v40 }
  0x46   : > { %782 = vmatmul.mubr.bf16.gmra.mrb[16].mxu0 %v1869_v42  ;;  %1762 = vmatmul.mubr.bf16.vlgmr.msra.gmra.mrb[16].mxu1 %v1870_v43 }
  0x47   : > { %789 = vmatprep.mubr.bf16.mxu0 %v1871_v44  ;;  %1765 = vmatprep.mubr.bf16.mxu1 %v1873_v45 }
  0x4e   : > { %790 = vmatmul.mubr.bf16.gmra.mrb[20].mxu0 %v1874_v46  ;;  %1766 = vmatmul.mubr.bf16.gmra.mrb[20].mxu1 %v1875_v47 }
  0x4f   : > { %797 = vmatprep.mubr.bf16.mxu0 %v1876_v48  ;;  %1769 = vmatprep.mubr.bf16.mxu1 %v1878_v49 }
  0x56   : > { %798 = vmatmul.mubr.bf16.gmra.mrb[24].mxu0 %v1879_v50  ;;  %1770 = vmatmul.mubr.bf16.gmra.mrb[24].mxu1 %v1880_v51 }
  0x57   : > { %805 = vmatprep.mubr.bf16.mxu0 %v1881_v52  ;;  %1773 = vmatprep.mubr.bf16.mxu1 %v1883_v53 }
  0x5e   : > { %806 = vmatmul.mubr.bf16.gmra.mrb[28].mxu0 %v1884_v54  ;;  %1774 = vmatmul.mubr.bf16.gmra.mrb[28].mxu1 %v1885_v55 }
  0x5f   : > { %813 = vmatprep.mubr.bf16.mxu0 %v1886_v56  ;;  %1777 = vmatprep.mubr.bf16.mxu1 %v1888_v57 }
  0x66   : > { %814 = vmatmul.mubr.bf16.gmra.mrb[32].mxu0 %v1889_v58  ;;  %1778 = vmatmul.mubr.bf16.gmra.mrb[32].mxu1 %v1890_v59  ;;  %v2094_v58 = vld [vmem:[%s2206_s2] ss:$0 sm:$0xff] }
  0x67   : > { %821 = vmatprep.mubr.bf16.mxu0 %v1891_v60  ;;  %1781 = vmatprep.mubr.bf16.mxu1 %v1893_v61 }
  0x6e   : > { %822 = vmatmul.mubr.bf16.gmra.mrb[36].mxu0 %v1894_v62  ;;  %1782 = vmatmul.mubr.bf16.gmra.mrb[36].mxu1 %v1895_v63  ;;  %v2099_v62 = vld [vmem:[%s2207_s3] ss:$0 sm:$0xff] }
  0x6f   : > { %829 = vmatprep.mubr.bf16.mxu0 %v1896_v0  ;;  %1785 = vmatprep.mubr.bf16.mxu1 %v1898_v1 }
  0x76   : > { %830 = vmatmul.mubr.bf16.gmra.mrb[40].mxu0 %v1899_v2  ;;  %1786 = vmatmul.mubr.bf16.gmra.mrb[40].mxu1 %v1900_v3 }
  0x77   : > { %837 = vmatprep.mubr.bf16.mxu0 %v1901_v4  ;;  %1789 = vmatprep.mubr.bf16.mxu1 %v1903_v5 }
  0x7e   : > { %838 = vmatmul.mubr.bf16.gmra.mrb[44].mxu0 %v1904_v6  ;;  %1790 = vmatmul.mubr.bf16.gmra.mrb[44].mxu1 %v1905_v7 }
  0xf9   : > { %v1625_v8 = vpop.f32.mrb[0].mxu0  ;;  %v1697_v9 = vpop.f32.mrb[0].mxu1 }
  0xfa   : > { %v1626_v10 = vpop.f32.mrb[1].mxu0  ;;  %v1698_v11 = vpop.f32.mrb[1].mxu1 }
  0xfb   : > { %v1627_v12 = vadd.f32 %v1626_v10, %v1625_v8  ;;  %v2075_v13 = vadd.f32 %v1698_v11, %v1697_v9  ;;  %v1628_v14 = vpop.f32.mrb[2].mxu0  ;;  %v1700_v15 = vpop.f32.mrb[2].mxu1 }
  0xfc   : > { %v1629_v16 = vpop.f32.mrb[3].mxu0  ;;  %v1701_v17 = vpop.f32.mrb[3].mxu1 }
  0xfd   : > { %v1630_v18 = vadd.f32 %v1629_v16, %v1628_v14  ;;  %v2077_v19 = vadd.f32 %v1701_v17, %v1700_v15 }
 0x101   : > { %v1631_v20 = vpop.f32.mrb[4].mxu0  ;;  %v1703_v21 = vpop.f32.mrb[4].mxu1 }
 0x102   : > { %v1632_v22 = vpop.f32.mrb[5].mxu0  ;;  %v1704_v23 = vpop.f32.mrb[5].mxu1 }
 0x103   : > { %v1633_v24 = vadd.f32 %v1632_v22, %v1631_v20  ;;  %v2079_v25 = vadd.f32 %v1704_v23, %v1703_v21  ;;  %v1634_v26 = vpop.f32.mrb[6].mxu0  ;;  %v1706_v27 = vpop.f32.mrb[6].mxu1 }
 0x104   : > { %v1635_v28 = vpop.f32.mrb[7].mxu0  ;;  %v1707_v29 = vpop.f32.mrb[7].mxu1 }
 0x105   : > { %v1636_v30 = vadd.f32 %v1635_v28, %v1634_v26  ;;  %v2081_v31 = vadd.f32 %v1707_v29, %v1706_v27 }
 0x109   : > { %v1637_v32 = vpop.f32.mrb[8].mxu0  ;;  %v1709_v33 = vpop.f32.mrb[8].mxu1 }
 0x10a   : > { %v1638_v34 = vpop.f32.mrb[9].mxu0  ;;  %v1710_v35 = vpop.f32.mrb[9].mxu1 }
 0x10b   : > { %v1639_v36 = vadd.f32 %v1638_v34, %v1637_v32  ;;  %v2083_v37 = vadd.f32 %v1710_v35, %v1709_v33  ;;  %v1640_v38 = vpop.f32.mrb[10].mxu0  ;;  %v1712_v39 = vpop.f32.mrb[10].mxu1 }
 0x10c   : > { %v1641_v40 = vpop.f32.mrb[11].mxu0  ;;  %v1713_v41 = vpop.f32.mrb[11].mxu1 }
 0x10d   : > { %v1642_v42 = vadd.f32 %v1641_v40, %v1640_v38  ;;  %v2085_v43 = vadd.f32 %v1713_v41, %v1712_v39 }
 0x111   : > { %v1643_v44 = vpop.f32.mrb[12].mxu0  ;;  %v1715_v45 = vpop.f32.mrb[12].mxu1 }
 0x112   : > { %v1644_v46 = vpop.f32.mrb[13].mxu0  ;;  %v1716_v47 = vpop.f32.mrb[13].mxu1 }
 0x113   : > { %v1645_v48 = vadd.f32 %v1644_v46, %v1643_v44  ;;  %v2087_v49 = vadd.f32 %v1716_v47, %v1715_v45  ;;  %v1646_v50 = vpop.f32.mrb[14].mxu0  ;;  %v1718_v51 = vpop.f32.mrb[14].mxu1 }
 0x114   : > { %v1647_v52 = vpop.f32.mrb[15].mxu0  ;;  %v1719_v53 = vpop.f32.mrb[15].mxu1 }
 0x115   : > { %v1648_v54 = vadd.f32 %v1647_v52, %v1646_v50  ;;  %v2089_v55 = vadd.f32 %v1719_v53, %v1718_v51 }
 0x119   : > { %v1649_v56 = vpop.f32.mrb[16].mxu0  ;;  %v1763_v57 = vpop.f32.mrb[16].mxu1 }
 0x11a   : > { %v921_v59 = vadd.f32 %v1763_v57, %v1633_v24  ;;  %v1650_v60 = vpop.f32.mrb[17].mxu0  ;;  %v912_v61 = vpop.f32.mrb[17].mxu1 }
 0x11b   : > { %v1651_v63 = vadd.f32 %v1650_v60, %v1649_v56  ;;  %v913_v0 = vadd.f32 %v1627_v12, %v912_v61  ;;  %v1652_v1 = vpop.f32.mrb[18].mxu0  ;;  %v1764_v2 = vpop.f32.mrb[18].mxu1 }
 0x11c   : > { %v1048_v3 = vmul.f32 %v2094_v58, %v921_v59  ;;  %v924_v4 = vadd.f32 %v1764_v2, %v1636_v30  ;;  %v1653_v5 = vpop.f32.mrb[19].mxu0  ;;  %v915_v6 = vpop.f32.mrb[19].mxu1 }
 0x11d   : > { %v1046_v7 = vmul.f32 %v2094_v58, %v913_v0  ;;  %v1654_v8 = vadd.f32 %v1653_v5, %v1652_v1  ;;  %v916_v9 = vadd.f32 %v1630_v18, %v915_v6 }
 0x11e   : > { %v1087_v10 = vadd.f32 %v2099_v62, %v1048_v3  ;;  %v1049_v11 = vmul.f32 %v2094_v58, %v924_v4 }
 0x11f   : > { %v1085_v14 = vadd.f32 %v2099_v62, %v1046_v7  ;;  %v1047_v15 = vmul.f32 %v2094_v58, %v916_v9 }
 0x120   : > { %v1088_v12 = vadd.f32 %v2099_v62, %v1049_v11  ;;  %v1119_v21 = vmax.f32 %v1087_v10, 0.0 }
 0x121   : > { %v1086_v16 = vadd.f32 %v2099_v62, %v1047_v15  ;;  %v1655_v17 = vpop.f32.mrb[20].mxu0  ;;  %v1767_v20 = vpop.f32.mrb[20].mxu1  ;;  %v1117_v26 = vmax.f32 %v1085_v14, 0.0 }
 0x122   : > { %v1120_v22 = vmax.f32 %v1088_v12, 0.0  ;;  %v937_v23 = vadd.f32 %v1767_v20, %v1645_v48  ;;  %v1656_v24 = vpop.f32.mrb[21].mxu0  ;;  %v928_v18 = vpop.f32.mrb[21].mxu1 }
 0x123   : > { %v1118_v27 = vmax.f32 %v1086_v16, 0.0  ;;  %v1657_v28 = vadd.f32 %v1656_v24, %v1655_v17  ;;  %v929_v29 = vadd.f32 %v1639_v36, %v928_v18  ;;  %v1658_v30 = vpop.f32.mrb[22].mxu0  ;;  %v1768_v32 = vpop.f32.mrb[22].mxu1 }
 0x124   : > { %v1522_v33 = vpack.c.bf16 %v1120_v22, %v1119_v21  ;;  %v1052_v34 = vmul.f32 %v2094_v58, %v937_v23  ;;  %v940_v35 = vadd.f32 %v1768_v32, %v1648_v54  ;;  %v1659_v38 = vpop.f32.mrb[23].mxu0  ;;  %v931_v39 = vpop.f32.mrb[23].mxu1 }
 0x125   : > { %v1517_v40 = vpack.c.bf16 %v1118_v27, %v1117_v26  ;;  %v1050_v41 = vmul.f32 %v2094_v58, %v929_v29  ;;  %v1660_v44 = vadd.f32 %v1659_v38, %v1658_v30  ;;  %v932_v45 = vadd.f32 %v1642_v42, %v931_v39 }
 0x126   : > { %1594 = vst [vmem:[%s2113_s29 + $0x8] sm:$0xff] %v1522_v33   ;;  %v1091_v46 = vadd.f32 %v2099_v62, %v1052_v34  ;;  %v1053_v47 = vmul.f32 %v2094_v58, %v940_v35 }
 0x127   : > { %1518 = vst [vmem:[%s2113_s29] sm:$0xff] %v1517_v40   ;;  %v1089_v36 = vadd.f32 %v2099_v62, %v1050_v41  ;;  %v1051_v48 = vmul.f32 %v2094_v58, %v932_v45 }
 0x128   : > { %v1092_v50 = vadd.f32 %v2099_v62, %v1053_v47  ;;  %v1123_v54 = vmax.f32 %v1091_v46, 0.0 }
 0x129   : > { %v1090_v51 = vadd.f32 %v2099_v62, %v1051_v48  ;;  %v1661_v52 = vpop.f32.mrb[24].mxu0  ;;  %v1771_v53 = vpop.f32.mrb[24].mxu1  ;;  %v1121_v60 = vmax.f32 %v1089_v36, 0.0 }
 0x12a   : > { %v1124_v56 = vmax.f32 %v1092_v50, 0.0  ;;  %v953_v57 = vadd.f32 %v1771_v53, %v1657_v28  ;;  %v1662_v42 = vpop.f32.mrb[25].mxu0  ;;  %v944_v59 = vpop.f32.mrb[25].mxu1 }
 0x12b   : > { %v1122_v61 = vmax.f32 %v1090_v51, 0.0  ;;  %v1663_v0 = vadd.f32 %v1662_v42, %v1661_v52  ;;  %v945_v1 = vadd.f32 %v1651_v63, %v944_v59  ;;  %v1664_v2 = vpop.f32.mrb[26].mxu0  ;;  %v1772_v3 = vpop.f32.mrb[26].mxu1 }
 0x12c   : > { %v1532_v4 = vpack.c.bf16 %v1124_v56, %v1123_v54  ;;  %v1056_v5 = vmul.f32 %v2094_v58, %v953_v57  ;;  %v956_v6 = vadd.f32 %v1772_v3, %v1660_v44  ;;  %v1665_v7 = vpop.f32.mrb[27].mxu0  ;;  %v947_v9 = vpop.f32.mrb[27].mxu1 }
 0x12d   : > { %v1527_v10 = vpack.c.bf16 %v1122_v61, %v1121_v60  ;;  %v1054_v11 = vmul.f32 %v2094_v58, %v945_v1  ;;  %v1666_v14 = vadd.f32 %v1665_v7, %v1664_v2  ;;  %v948_v15 = vadd.f32 %v1654_v8, %v947_v9 }
 0x12e   : > { %1596 = vst [vmem:[%s2113_s29 + $0x18] sm:$0xff] %v1532_v4   ;;  %v1095_v12 = vadd.f32 %v2099_v62, %v1056_v5  ;;  %v1057_v16 = vmul.f32 %v2094_v58, %v956_v6 }
 0x12f   : > { %1595 = vst [vmem:[%s2113_s29 + $0x10] sm:$0xff] %v1527_v10   ;;  %v1093_v63 = vadd.f32 %v2099_v62, %v1054_v11  ;;  %v1055_v17 = vmul.f32 %v2094_v58, %v948_v15 }
 0x130   : > { %v1096_v20 = vadd.f32 %v2099_v62, %v1057_v16  ;;  %v1127_v24 = vmax.f32 %v1095_v12, 0.0 }
 0x131   : > { %v1094_v21 = vadd.f32 %v2099_v62, %v1055_v17  ;;  %v1667_v22 = vpop.f32.mrb[28].mxu0  ;;  %v1775_v23 = vpop.f32.mrb[28].mxu1  ;;  %v1125_v27 = vmax.f32 %v1093_v63, 0.0 }
 0x132   : > { %v1128_v18 = vmax.f32 %v1096_v20, 0.0  ;;  %v1668_v8 = vpop.f32.mrb[29].mxu0  ;;  %v960_v26 = vpop.f32.mrb[29].mxu1 }
 0x133   : > { %v1126_v28 = vmax.f32 %v1094_v21, 0.0  ;;  %v1669_v29 = vadd.f32 %v1668_v8, %v1667_v22  ;;  %v961_v30 = vadd.f32 %v1663_v0, %v960_v26  ;;  %v1670_v32 = vpop.f32.mrb[30].mxu0  ;;  %v1776_v33 = vpop.f32.mrb[30].mxu1 }
 0x134   : > { %v1542_v34 = vpack.c.bf16 %v1128_v18, %v1127_v24  ;;  %v1671_v35 = vpop.f32.mrb[31].mxu0  ;;  %v963_v38 = vpop.f32.mrb[31].mxu1 }
 0x135   : > { %v1537_v39 = vpack.c.bf16 %v1126_v28, %v1125_v27  ;;  %v969_v40 = vadd.f32 %v1775_v23, %v1669_v29  ;;  %v1058_v41 = vmul.f32 %v2094_v58, %v961_v30  ;;  %v1672_v44 = vadd.f32 %v1671_v35, %v1670_v32 }
 0x136   : > { %1598 = vst [vmem:[%s2113_s29 + $0x28] sm:$0xff] %v1542_v34   ;;  %v964_v45 = vadd.f32 %v1666_v14, %v963_v38 }
 0x137   : > { %1597 = vst [vmem:[%s2113_s29 + $0x20] sm:$0xff] %v1537_v39   ;;  %v1060_v46 = vmul.f32 %v2094_v58, %v969_v40  ;;  %v972_v47 = vadd.f32 %v1776_v33, %v1672_v44  ;;  %v1097_v36 = vadd.f32 %v2099_v62, %v1058_v41 }
 0x138   : > { %v1059_v48 = vmul.f32 %v2094_v58, %v964_v45 }
 0x139   : > { %v1099_v50 = vadd.f32 %v2099_v62, %v1060_v46  ;;  %v1061_v51 = vmul.f32 %v2094_v58, %v972_v47  ;;  %v1673_v52 = vpop.f32.mrb[32].mxu0  ;;  %v1779_v53 = vpop.f32.mrb[32].mxu1  ;;  %v1129_v0 = vmax.f32 %v1097_v36, 0.0 }
 0x13a   : > { %v1098_v54 = vadd.f32 %v2099_v62, %v1059_v48  ;;  %v1674_v56 = vpop.f32.mrb[33].mxu0  ;;  %v976_v57 = vpop.f32.mrb[33].mxu1 }
 0x13b   : > { %v1100_v42 = vadd.f32 %v2099_v62, %v1061_v51  ;;  %v1675_v59 = vadd.f32 %v1674_v56, %v1673_v52  ;;  %v1676_v60 = vpop.f32.mrb[34].mxu0  ;;  %v1780_v61 = vpop.f32.mrb[34].mxu1  ;;  %v1131_v4 = vmax.f32 %v1099_v50, 0.0 }
 0x13c   : > { %v1130_v1 = vmax.f32 %v1098_v54, 0.0  ;;  %v1677_v2 = vpop.f32.mrb[35].mxu0  ;;  %v979_v3 = vpop.f32.mrb[35].mxu1 }
 0x13d   : > { %v1132_v5 = vmax.f32 %v1100_v42, 0.0  ;;  %v977_v6 = vadd.f32 %v1675_v59, %v976_v57  ;;  %v1678_v7 = vadd.f32 %v1677_v2, %v1676_v60 }
 0x13e   : > { %v1547_v9 = vpack.c.bf16 %v1130_v1, %v1129_v0 }
 0x13f   : > { %v1552_v10 = vpack.c.bf16 %v1132_v5, %v1131_v4  ;;  %v1062_v11 = vmul.f32 %v2094_v58, %v977_v6  ;;  %v980_v14 = vadd.f32 %v1678_v7, %v979_v3 }
 0x140   : > { %1599 = vst [vmem:[%s2113_s29 + $0x30] sm:$0xff] %v1547_v9  }
 0x141   : > { %1600 = vst [vmem:[%s2113_s29 + $0x38] sm:$0xff] %v1552_v10   ;;  %v1101_v15 = vadd.f32 %v2099_v62, %v1062_v11  ;;  %v1063_v12 = vmul.f32 %v2094_v58, %v980_v14  ;;  %v1679_v16 = vpop.f32.mrb[36].mxu0  ;;  %v2150_v63 = vpop.f32.mrb[36].mxu1 }
 0x142   : > { %v1680_v17 = vpop.f32.mrb[37].mxu0  ;;  %v992_v20 = vpop.f32.mrb[37].mxu1 }
 0x143   : > { %v1102_v21 = vadd.f32 %v2099_v62, %v1063_v12  ;;  %v1681_v22 = vadd.f32 %v1680_v17, %v1679_v16  ;;  %v1682_v23 = vpop.f32.mrb[38].mxu0  ;;  %v2153_v24 = vpop.f32.mrb[38].mxu1  ;;  %v1133_v26 = vmax.f32 %v1101_v15, 0.0 }
 0x144   : > { %v1683_v18 = vpop.f32.mrb[39].mxu0  ;;  %v995_v8 = vpop.f32.mrb[39].mxu1 }
 0x145   : > { %v1134_v27 = vmax.f32 %v1102_v21, 0.0  ;;  %v985_v28 = vadd.f32 %v1779_v53, %v1681_v22  ;;  %v1684_v29 = vadd.f32 %v1683_v18, %v1682_v23 }
 0x147   : > { %v1557_v30 = vpack.c.bf16 %v1134_v27, %v1133_v26  ;;  %v1064_v32 = vmul.f32 %v2094_v58, %v985_v28  ;;  %v988_v33 = vadd.f32 %v1780_v61, %v1684_v29 }
 0x149   : > { %1601 = vst [vmem:[%s2113_s29 + $0x40] sm:$0xff] %v1557_v30   ;;  %v1103_v34 = vadd.f32 %v2099_v62, %v1064_v32  ;;  %v1065_v35 = vmul.f32 %v2094_v58, %v988_v33  ;;  %v1685_v38 = vpop.f32.mrb[40].mxu0  ;;  %v1787_v39 = vpop.f32.mrb[40].mxu1 }
 0x14a   : > { %v1017_v40 = vadd.f32 %v1787_v39, %v2079_v25  ;;  %v1686_v41 = vpop.f32.mrb[41].mxu0  ;;  %v1008_v44 = vpop.f32.mrb[41].mxu1 }
 0x14b   : > { %v1104_v45 = vadd.f32 %v2099_v62, %v1065_v35  ;;  %v1687_v46 = vadd.f32 %v1686_v41, %v1685_v38  ;;  %v1009_v47 = vadd.f32 %v2075_v13, %v1008_v44  ;;  %v1688_v36 = vpop.f32.mrb[42].mxu0  ;;  %v1788_v48 = vpop.f32.mrb[42].mxu1  ;;  %v1135_v50 = vmax.f32 %v1103_v34, 0.0 }
 0x14c   : > { %v1072_v51 = vmul.f32 %v2094_v58, %v1017_v40  ;;  %v1020_v52 = vadd.f32 %v1788_v48, %v2081_v31  ;;  %v1689_v53 = vpop.f32.mrb[43].mxu0  ;;  %v1011_v54 = vpop.f32.mrb[43].mxu1 }
 0x14d   : > { %v1136_v56 = vmax.f32 %v1104_v45, 0.0  ;;  %v993_v57 = vadd.f32 %v1687_v46, %v992_v20  ;;  %v1070_v25 = vmul.f32 %v2094_v58, %v1009_v47  ;;  %v1690_v42 = vadd.f32 %v1689_v53, %v1688_v36 }
 0x14e   : > { %v1111_v59 = vadd.f32 %v2099_v62, %v1072_v51  ;;  %v1073_v60 = vmul.f32 %v2094_v58, %v1020_v52  ;;  %v1012_v13 = vadd.f32 %v2077_v19, %v1011_v54 }
 0x14f   : > { %v1562_v61 = vpack.c.bf16 %v1136_v56, %v1135_v50  ;;  %v1066_v0 = vmul.f32 %v2094_v58, %v993_v57  ;;  %v1109_v1 = vadd.f32 %v2099_v62, %v1070_v25  ;;  %v996_v31 = vadd.f32 %v1690_v42, %v995_v8 }
 0x150   : > { %v1112_v2 = vadd.f32 %v2099_v62, %v1073_v60  ;;  %v1071_v3 = vmul.f32 %v2094_v58, %v1012_v13  ;;  %v1143_v4 = vmax.f32 %v1111_v59, 0.0 }
 0x151   : > { %1602 = vst [vmem:[%s2113_s29 + $0x48] sm:$0xff] %v1562_v61   ;;  %v1105_v5 = vadd.f32 %v2099_v62, %v1066_v0  ;;  %v1067_v6 = vmul.f32 %v2094_v58, %v996_v31  ;;  %v1691_v7 = vpop.f32.mrb[44].mxu0  ;;  %v1791_v9 = vpop.f32.mrb[44].mxu1  ;;  %v1141_v10 = vmax.f32 %v1109_v1, 0.0 }
 0x152   : > { %v1144_v19 = vmax.f32 %v1112_v2, 0.0  ;;  %v1110_v11 = vadd.f32 %v2099_v62, %v1071_v3  ;;  %v1033_v14 = vadd.f32 %v1791_v9, %v2087_v49  ;;  %v1692_v15 = vpop.f32.mrb[45].mxu0  ;;  %v1024_v12 = vpop.f32.mrb[45].mxu1 }
 0x153   : > { %v1137_v16 = vmax.f32 %v1105_v5, 0.0  ;;  %v1106_v17 = vadd.f32 %v2099_v62, %v1067_v6  ;;  %v1693_v20 = vadd.f32 %v1692_v15, %v1691_v7  ;;  %v1025_v21 = vadd.f32 %v2083_v37, %v1024_v12  ;;  %v1694_v22 = vpop.f32.mrb[46].mxu0  ;;  %v1792_v23 = vpop.f32.mrb[46].mxu1 }
 0x154   : > { %v1582_v18 = vpack.c.bf16 %v1144_v19, %v1143_v4  ;;  %v1142_v8 = vmax.f32 %v1110_v11, 0.0  ;;  %v1076_v26 = vmul.f32 %v2094_v58, %v1033_v14  ;;  %v1036_v27 = vadd.f32 %v1792_v23, %v2089_v55  ;;  %v1695_v28 = vpop.f32.mrb[47].mxu0  ;;  %v1027_v49 = vpop.f32.mrb[47].mxu1 }
 0x155   : > { %v1138_v29 = vmax.f32 %v1106_v17, 0.0  ;;  %v1001_v30 = vadd.f32 %v2150_v63, %v1693_v20  ;;  %v1074_v32 = vmul.f32 %v2094_v58, %v1025_v21  ;;  %v1696_v33 = vadd.f32 %v1695_v28, %v1694_v22 }
 0x156   : > { %1606 = vst [vmem:[%s2113_s29 + $0x68] sm:$0xff] %v1582_v18   ;;  %v1577_v37 = vpack.c.bf16 %v1142_v8, %v1141_v10  ;;  %v1115_v34 = vadd.f32 %v2099_v62, %v1076_v26  ;;  %v1077_v35 = vmul.f32 %v2094_v58, %v1036_v27  ;;  %v1028_v38 = vadd.f32 %v2085_v43, %v1027_v49 }
 0x157   : > { %v1567_v39 = vpack.c.bf16 %v1138_v29, %v1137_v16  ;;  %v1068_v55 = vmul.f32 %v2094_v58, %v1001_v30  ;;  %v1004_v40 = vadd.f32 %v2153_v24, %v1696_v33  ;;  %v1113_v63 = vadd.f32 %v2099_v62, %v1074_v32 }
 0x158   : > { %1605 = vst [vmem:[%s2113_s29 + $0x60] sm:$0xff] %v1577_v37   ;;  %v1116_v41 = vadd.f32 %v2099_v62, %v1077_v35  ;;  %v1075_v44 = vmul.f32 %v2094_v58, %v1028_v38  ;;  %v1147_v46 = vmax.f32 %v1115_v34, 0.0 }
 0x159   : > { %1603 = vst [vmem:[%s2113_s29 + $0x50] sm:$0xff] %v1567_v39   ;;  %v1107_v45 = vadd.f32 %v2099_v62, %v1068_v55  ;;  %v1069_v43 = vmul.f32 %v2094_v58, %v1004_v40  ;;  %v1145_v48 = vmax.f32 %v1113_v63, 0.0 }
 0x15a   : > { %v1148_v47 = vmax.f32 %v1116_v41, 0.0  ;;  %v1114_v36 = vadd.f32 %v2099_v62, %v1075_v44 }
 0x15b   : > { %v1108_v24 = vadd.f32 %v2099_v62, %v1069_v43  ;;  %v1139_v52 = vmax.f32 %v1107_v45, 0.0 }
 0x15c   : > { %v1592_v50 = vpack.c.bf16 %v1148_v47, %v1147_v46  ;;  %v1146_v51 = vmax.f32 %v1114_v36, 0.0 }
 0x15d   : > { %v1140_v53 = vmax.f32 %v1108_v24, 0.0 }
 0x15e   : > { %1608 = vst [vmem:[%s2113_s29 + $0x78] sm:$0xff] %v1592_v50   ;;  %v1587_v54 = vpack.c.bf16 %v1146_v51, %v1145_v48 }
 0x15f   : > { %v1572_v56 = vpack.c.bf16 %v1140_v53, %v1139_v52 }
 0x160   : > { %1607 = vst [vmem:[%s2113_s29 + $0x70] sm:$0xff] %v1587_v54  }
 0x161   : > { %1604 = vst [vmem:[%s2113_s29 + $0x58] sm:$0xff] %v1572_v56  }
 0x162 PF: > { %s14_s15 = sadd.s32 1, %s1912_s15  }
 0x163   : > { %p11_p4 = scmp.ge.s32.totalorder %s14_s15, 4  }
 0x165   :  { %13 = sbr.rel (!%p11_p4) target bundleno = 1 (0x1), region = 66 }

// kernel: wide_resnet_forward.15
= control target key start
LH: loop header
LB: loop body
LE: loop exit
PB: predicated region body
PF: predicated region fallthrough
CT: control target
= control target key end

     0   :  { %v449_v1 = vmov 0.0|0.0   ;;  %vm450_vm0 = vmmov 0   ;;  %v451_v2 = vmov 0.0   ;;  %s584_s0 = inlined_call_operand.vmem [shape: f32[2,128], index: 0, kind: input, shape index: {}]   ;;  %s585_s1 = inlined_call_operand.vmem [shape: bf16[128,128], index: 1, kind: input, shape index: {}]   ;;  %s586_s2 = inlined_call_operand.vmem [shape: f32[128,128], index: 2, kind: input, shape index: {}]   ;;  %s587_s3 = inlined_call_operand.vmem [shape: f32[1,128], index: 3, kind: input, shape index: {}]   ;;  %s588_s4 = inlined_call_operand.hbm [shape: f32[2,128], index: 4, kind: output, shape index: {}]  }
   0x1   :  { %v231_v0 = vld [vmem:[%s585_s1] sm:$0xff]   ;;  %373 = vmatprep.subr.bf16.mxu0 %v449_v1  ;;  %335 = vmatprep.mubr.msk.f32.mxu0 %vm450_vm0, %v451_v2  ;;  %v262_v3 = vld [vmem:[%s585_s1 + $0x8] sm:$0xff]   ;;  %v123_v6 = vld [vmem:[%s586_s2 + $0x10] sm:$0xff] }
   0x2   :  { %375 = vmatpush3.bf16.msra.mxu0 %v231_v0  ;;  %397 = vmatprep.subr.bf16.mxu1 %v449_v1  ;;  %v121_v4 = vld [vmem:[%s586_s2] sm:$0xff]  ;;  %v122_v5 = vld [vmem:[%s586_s2 + $0x8] sm:$0xff]  ;;  %v124_v8 = vld [vmem:[%s586_s2 + $0x18] sm:$0xff] }
   0x3   :  { %376 = vmatprep.subr.bf16.mxu0 %v449_v1  ;;  %370 = vmatprep.mubr.msk.f32.mxu1 %vm450_vm0, %v451_v2  ;;  %v398_v7 = vpack.c.bf16 %v122_v5, %v121_v4  ;;  %v401_v9 = vpack.c.bf16 %v124_v8, %v123_v6  ;;  %v263_v10 = vld [vmem:[%s585_s1 + $0x10] sm:$0xff]   ;;  %v125_v11 = vld [vmem:[%s586_s2 + $0x20] sm:$0xff]  ;;  %v126_v12 = vld [vmem:[%s586_s2 + $0x28] sm:$0xff] }
   0x5   :  { %399 = vmatpush3.bf16.msra.mxu1 %v398_v7 }
   0x6   :  { %378 = vmatpush3.bf16.msra.mxu0 %v262_v3  ;;  %400 = vmatprep.subr.bf16.mxu1 %v449_v1 }
   0x7   :  { %379 = vmatprep.subr.bf16.mxu0 %v449_v1 }
   0x8   :  { %9 = vsyncpa [#allocation3], 0  ;;  %v404_v13 = vpack.c.bf16 %v126_v12, %v125_v11  ;;  %v264_v14 = vld [vmem:[%s585_s1 + $0x18] sm:$0xff]   ;;  %v127_v15 = vld [vmem:[%s586_s2 + $0x30] sm:$0xff]  ;;  %s452_s14 = smov [#allocation2]  }
   0x9   :  { %402 = vmatpush3.bf16.msra.mxu1 %v401_v9  ;;  %v128_v16 = vld [vmem:[%s586_s2 + $0x38] sm:$0xff]  ;;  %v265_v18 = vld [vmem:[%s585_s1 + $0x20] sm:$0xff]   ;;  %v130_v20 = vld [vmem:[%s586_s2 + $0x48] sm:$0xff] }
   0xa   :  { %381 = vmatpush3.bf16.msra.mxu0 %v263_v10  ;;  %403 = vmatprep.subr.bf16.mxu1 %v449_v1  ;;  %v407_v17 = vpack.c.bf16 %v128_v16, %v127_v15  ;;  %v129_v19 = vld [vmem:[%s586_s2 + $0x40] sm:$0xff]  ;;  %v266_v22 = vld [vmem:[%s585_s1 + $0x28] sm:$0xff]   ;;  %v131_v23 = vld [vmem:[%s586_s2 + $0x50] sm:$0xff] }
   0xb   :  { %382 = vmatprep.subr.bf16.mxu0 %v449_v1  ;;  %v410_v21 = vpack.c.bf16 %v130_v20, %v129_v19  ;;  %v132_v24 = vld [vmem:[%s586_s2 + $0x58] sm:$0xff]  ;;  %v267_v26 = vld [vmem:[%s585_s1 + $0x30] sm:$0xff]   ;;  %v133_v27 = vld [vmem:[%s586_s2 + $0x60] sm:$0xff] }
   0xc   :  { %v413_v25 = vpack.c.bf16 %v132_v24, %v131_v23  ;;  %v134_v28 = vld [vmem:[%s586_s2 + $0x68] sm:$0xff]  ;;  %v268_v30 = vld [vmem:[%s585_s1 + $0x38] sm:$0xff]   ;;  %v135_v31 = vld [vmem:[%s586_s2 + $0x70] sm:$0xff] }
   0xd   :  { %405 = vmatpush3.bf16.msra.mxu1 %v404_v13  ;;  %v416_v29 = vpack.c.bf16 %v134_v28, %v133_v27  ;;  %v136_v32 = vld [vmem:[%s586_s2 + $0x78] sm:$0xff]  ;;  %v50_v33 = vld [vmem:[%s584_s0] sm:$0x3]  ;;  %s221_s2 = sshll.u32 %s452_s14, 4  ;;  %s222_s2 = int_to_ptr.vmem [resolvable:$true] %s221_s2 }
   0xe   :  { %384 = vmatpush3.bf16.msra.mxu0 %v264_v14  ;;  %406 = vmatprep.subr.bf16.mxu1 %v449_v1  ;;  %v419_v34 = vpack.c.bf16 %v136_v32, %v135_v31  ;;  %v229_v37 = vld [vmem:[%s587_s3] ss:$0 sm:$0xff]  ;;  %s425_s0 = scalar_lea.vmem %s222_s2, 32  ;;  %p430_p1 = scmp.lt.s32.totalorder %s222_s2, %s222_s2 }
   0xf   :  { %385 = vmatprep.subr.bf16.mxu0 %v449_v1  ;;  %p426_p0 = scmp.ne.s32.totalorder %s222_s2, %s425_s0  ;;  %p431_p2 = scmp.lt.s32.totalorder %s425_s0, %s425_s0 }
  0x11   :  { %408 = vmatpush3.bf16.msra.mxu1 %v407_v17  ;;  %p432_p3 = por %p431_p2, %p430_p1 }
  0x12   :  { %387 = vmatpush3.bf16.msra.mxu0 %v265_v18  ;;  %409 = vmatprep.subr.bf16.mxu1 %v449_v1 }
  0x13   :  { %388 = vmatprep.subr.bf16.mxu0 %v449_v1  ;;  %p433_p4 = pnand %p432_p3, %p426_p0 }
  0x15   :  { %411 = vmatpush3.bf16.msra.mxu1 %v410_v21 }
  0x16   :  { %390 = vmatpush3.bf16.msra.mxu0 %v266_v22  ;;  %412 = vmatprep.subr.bf16.mxu1 %v449_v1 }
  0x17   :  { %391 = vmatprep.subr.bf16.mxu0 %v449_v1 }
  0x19   :  { %414 = vmatpush3.bf16.msra.mxu1 %v413_v25 }
  0x1a   :  { %393 = vmatpush3.bf16.msra.mxu0 %v267_v26  ;;  %415 = vmatprep.subr.bf16.mxu1 %v449_v1 }
  0x1b   :  { %394 = vmatprep.subr.bf16.mxu0 %v449_v1 }
  0x1d   :  { %417 = vmatpush3.bf16.msra.mxu1 %v416_v29 }
  0x1e   :  { %396 = vmatpush3.bf16.msra.mxu0 %v268_v30  ;;  %418 = vmatprep.subr.bf16.mxu1 %v449_v1 }
  0x21   :  { %336 = vmatmul.mubr.f32.vlgmr.msra.gmra.mrb[0].mxu0 %v50_v33  ;;  %420 = vmatpush3.bf16.msra.mxu1 %v419_v34 }
  0xf4   :  { %v117_v35 = vpop.f32.mrb[0].mxu0 }
  0xf5   :  { %v337_v36 = vpop.f32.mrb[1].mxu0  ;;  %371 = vmatmul.mubr.f32.vlgmr.msra.gmra.mrb[0].mxu1 %v117_v35 }
 0x1c8   :  { %v210_v38 = vpop.f32.mrb[0].mxu1 }
 0x1c9   :  { %v211_v39 = vadd.f32 %v229_v37, %v210_v38  ;;  %v372_v40 = vpop.f32.mrb[1].mxu1 }
 0x1cb   :  { %214 = vst [vmem:[#allocation2] sm:$0x3] %v211_v39 }
 0x1cc   :  { %436 = shalt.err (!%p433_p4)
}
 0x1cd   :  { %s437_s17 = scalar_lea.hbm %s588_s4, 32 }
 0x1ce   :  { %p438_p5 = scmp.ne.s32.totalorder %s588_s4, %s437_s17  ;;  %p441_p6 = scmp.lt.u32.totalorder %s437_s17, %s588_s4 }
 0x1d0   :  { %p443_p7 = pnand %p441_p6, %p438_p5 }
 0x1d2   :  { %446 = shalt.err (!%p443_p7)
}
 0x1d3   :  { %224 = dma.vmem_to_hbm [thread:$0]  %s222_s2, 32, %s588_s4, [#allocation3]  }
 0x1d4   :  { %447 = dma.done.wait [#allocation3], 32  }
 0x1d5   :  { %448 = vsyncadd [#allocation3], 4294967264 }
 0x1d6   :  { %228 = vsyncpa [#allocation3], 1 }

// kernel: wide_resnet_forward.14
= control target key start
LH: loop header
LB: loop body
LE: loop exit
PB: predicated region body
PF: predicated region fallthrough
CT: control target
= control target key end

     0   :  { %12 = vsyncpa [#allocation3], 0  ;;  %s1922_s0 = inlined_call_operand.vmem [shape: bf16[128,640], index: 0, kind: input, shape index: {}]   ;;  %s1923_s1 = inlined_call_operand.vmem [shape: bf16[640,128], index: 1, kind: input, shape index: {}]   ;;  %s1924_s2 = inlined_call_operand.vmem [shape: f32[1,128], index: 2, kind: input, shape index: {}]   ;;  %s1925_s3 = inlined_call_operand.vmem [shape: f32[1,128], index: 3, kind: input, shape index: {}]   ;;  %s1926_s4 = inlined_call_operand.vmem [shape: f32[1,128], index: 4, kind: input, shape index: {}]   ;;  %s1927_s5 = inlined_call_operand.hbm [shape: bf16[128,128], index: 5, kind: output, shape index: {0}]   ;;  %s1928_s6 = inlined_call_operand.vmem [shape: bf16[128,128], index: 6, kind: output, shape index: {1}]  }
   0x1   :  { %14 = vsyncpa [#allocation3 + $0x1], 0  ;;  %s1649_s21 = smov 0   ;;  %s1651_s22 = smov 0  }
   0x2   :  { %s1653_s23 = smov 0   ;;  %s1655_s24 = smov 0  }
   0x3 LB: > { %s1670_s25 = sadd.s32 4294967295, %s1609_s24   ;;  %s1149_s26 = sadd.s32 4294967294, %s1609_s24   ;;  %s1609_s24 = sphi %s1655_s24, %s1934_s24   ;;  %s1605_s23 = sphi %s1653_s23, %s1933_s23   ;;  %s1601_s22 = sphi %s1651_s22, %s1932_s22   ;;  %s1597_s21 = sphi %s1649_s21, %s1931_s21  }
   0x4   : > { %s1674_s27 = sadd.s32 1, %s1609_s24   ;;  %s137_s28 = sadd.s32 1, %s1605_s23 }
   0x5   : > { %s134_s29 = ssub.s32 %s1609_s24, %s1674_s27  ;;  %p147_p0 = scmp.ne.s32.totalorder %s1605_s23, %s1601_s22 }
   0x6   : > { %p135_p1 = scmp.eq.s32.totalorder %s134_s29, 0  ;;  %p148_p2 = scmp.eq.s32.totalorder %s1670_s25, 1 }
   0x7   : > { %p153_p3 = scmp.ne.s32.totalorder %s1601_s22, %s1597_s21  ;;  %p154_p4 = scmp.eq.s32.totalorder %s1149_s26, 1 }
   0x8   : > { %s1685_s30 = scalar_select %p135_p1, %s1605_s23, %s137_s28  }
   0x9   : > { %p1687_p5 = por %p148_p2, %p147_p0  ;;  %p1691_p6 = por %p154_p4, %p153_p3 }
   0xa   : > { %p1152_p7 = scmp.ge.s32.totalorder %s1609_s24, 1  ;;  %p220_p8 = scmp.lt.s32.totalorder %s1609_s24, 3 }
   0xc   : > { %p221_p9 = pnand %p1152_p7, %p220_p8 }
   0xd   : > { %v1479_v0 = vld [vmem:[%s1923_s1 + $0x40] sm:$0xff] (!%p221_p9)   ;;  %v1483_v4 = vld [vmem:[%s1923_s1 + $0x48] sm:$0xff] (!%p221_p9)   ;;  %v1487_v8 = vld [vmem:[%s1923_s1 + $0x50] sm:$0xff] (!%p221_p9)   ;;  %s1154_s9 = sshll.u32 (!%p221_p9), %s1670_s25, 3 }
   0xe   : > { %224 = sbr.rel (%p221_p9) target bundleno = 323 (0x143), region = 40  ;;  %v1480_v1 = vld [vmem:[%s1923_s1 + $0xc0] sm:$0xff] (!%p221_p9)   ;;  %1305 = vmatprep.subr.bf16.mxu0 (!%p221_p9), %v1479_v0  ;;  %v1484_v5 = vld [vmem:[%s1923_s1 + $0xc8] sm:$0xff] (!%p221_p9)   ;;  %v1488_v9 = vld [vmem:[%s1923_s1 + $0xd0] sm:$0xff] (!%p221_p9)   ;;  %p257_p10 = scmp.lt.s32.totalorder (!%p221_p9), %s1154_s9, 15 }
   0xf   : > { %v1481_v2 = vld [vmem:[%s1923_s1] sm:$0xff] (!%p221_p9)   ;;  %1345 = vmatprep.subr.bf16.mxu1 (!%p221_p9), %v1480_v1  ;;  %v1485_v6 = vld [vmem:[%s1923_s1 + $0x8] sm:$0xff] (!%p221_p9)   ;;  %v1489_v10 = vld [vmem:[%s1923_s1 + $0x10] sm:$0xff] (!%p221_p9)  }
  0x10   : > { %v1482_v3 = vld [vmem:[%s1923_s1 + $0x80] sm:$0xff] (!%p221_p9)   ;;  %1306 = vmatpush3.bf16.msra.mxu0 (!%p221_p9), %v1481_v2  ;;  %v1486_v7 = vld [vmem:[%s1923_s1 + $0x88] sm:$0xff] (!%p221_p9)   ;;  %v1490_v11 = vld [vmem:[%s1923_s1 + $0x90] sm:$0xff] (!%p221_p9)  }
  0x11   : > { %1346 = vmatpush3.bf16.msra.mxu1 (!%p221_p9), %v1482_v3  ;;  %1307 = vmatprep.subr.bf16.mxu0 (!%p221_p9), %v1483_v4  ;;  %v1491_v12 = vld [vmem:[%s1923_s1 + $0x58] sm:$0xff] (!%p221_p9)   ;;  %v1495_v16 = vld [vmem:[%s1923_s1 + $0x60] sm:$0xff] (!%p221_p9)   ;;  %v1499_v20 = vld [vmem:[%s1923_s1 + $0x68] sm:$0xff] (!%p221_p9)  }
  0x12   : > { %1347 = vmatprep.subr.bf16.mxu1 (!%p221_p9), %v1484_v5  ;;  %v1492_v13 = vld [vmem:[%s1923_s1 + $0xd8] sm:$0xff] (!%p221_p9)   ;;  %v1496_v17 = vld [vmem:[%s1923_s1 + $0xe0] sm:$0xff] (!%p221_p9)   ;;  %v1500_v21 = vld [vmem:[%s1923_s1 + $0xe8] sm:$0xff] (!%p221_p9)  }
  0x13   : > { %v1493_v14 = vld [vmem:[%s1923_s1 + $0x18] sm:$0xff] (!%p221_p9)   ;;  %v1497_v18 = vld [vmem:[%s1923_s1 + $0x20] sm:$0xff] (!%p221_p9)   ;;  %v1501_v22 = vld [vmem:[%s1923_s1 + $0x28] sm:$0xff] (!%p221_p9)  }
  0x14   : > { %1308 = vmatpush3.bf16.msra.mxu0 (!%p221_p9), %v1485_v6  ;;  %v1494_v15 = vld [vmem:[%s1923_s1 + $0x98] sm:$0xff] (!%p221_p9)   ;;  %v1498_v19 = vld [vmem:[%s1923_s1 + $0xa0] sm:$0xff] (!%p221_p9)   ;;  %v1502_v23 = vld [vmem:[%s1923_s1 + $0xa8] sm:$0xff] (!%p221_p9)  }
  0x15   : > { %1348 = vmatpush3.bf16.msra.mxu1 %v1486_v7  ;;  %1309 = vmatprep.subr.bf16.mxu0 %v1487_v8  ;;  %s1936_s9 = smov (!%p257_p10, %s1154_s9), 15  ;;  %v1503_v24 = vld [vmem:[%s1923_s1 + $0x70] sm:$0xff]   ;;  %v1507_v28 = vld [vmem:[%s1923_s1 + $0x78] sm:$0xff]   ;;  %v1517_v36 = vld [vmem:[%s1923_s1 + $0x100] sm:$0xff]  }
  0x16   : > { %1349 = vmatprep.subr.bf16.mxu1 %v1488_v9  ;;  %v1504_v25 = vld [vmem:[%s1923_s1 + $0xf0] sm:$0xff]   ;;  %s1437_s18 = smul.u32 20, %s1936_s9  ;;  %v1508_v29 = vld [vmem:[%s1923_s1 + $0xf8] sm:$0xff]   ;;  %v1518_v37 = vld [vmem:[%s1923_s1 + $0x108] sm:$0xff]   ;;  %s1157_s17 = sshll.u32 %s1936_s9, 2 }
  0x17   : > { %v1505_v26 = vld [vmem:[%s1923_s1 + $0x30] sm:$0xff]   ;;  %v1509_v30 = vld [vmem:[%s1923_s1 + $0x38] sm:$0xff]   ;;  %v1533_v46 = vld [vmem:[%s1923_s1 + $0x120] sm:$0xff]   ;;  %s1866_s29 = scalar_lea.vmem %s1928_s6, %s1157_s17 }
  0x18   : > { %1310 = vmatpush3.bf16.msra.mxu0 %v1489_v10  ;;  %v1506_v27 = vld [vmem:[%s1923_s1 + $0xb0] sm:$0xff]   ;;  %s1794_s15 = scalar_lea.vmem %s1922_s0, %s1437_s18  ;;  %v1510_v31 = vld [vmem:[%s1923_s1 + $0xb8] sm:$0xff]   ;;  %v1534_v51 = vld [vmem:[%s1923_s1 + $0x128] sm:$0xff]   ;;  %s1258_s18 = sshll.u32 %s1670_s25, 9 }
  0x19   : > { %1350 = vmatpush3.bf16.msra.mxu1 %v1490_v11  ;;  %1311 = vmatprep.subr.bf16.mxu0 %v1491_v12  ;;  %v1511_v32 = vld [vmem:[%s1794_s15] ss:$20 sps:$4 sm:$0xff]   ;;  %v1513_v33 = vld [vmem:[%s1794_s15 + $0x4] ss:$20 sps:$4 sm:$0xff]   ;;  %v1514_v34 = vld [vmem:[%s1794_s15 + $0x8] ss:$20 sps:$4 sm:$0xff]   ;;  %s1873_s10 = scalar_lea.hbm %s1927_s5, %s1258_s18 }
  0x1a   : > { %1351 = vmatprep.subr.bf16.mxu1 %v1492_v13  ;;  %v1516_v35 = vld [vmem:[%s1794_s15 + $0xc] ss:$20 sps:$4 sm:$0xff]   ;;  %758 = vmatprep.mubr.bf16.mxu0 %v1513_v33  ;;  %v1521_v39 = vld [vmem:[%s1794_s15 + $0x34] ss:$20 sps:$4 sm:$0xff]   ;;  %v1524_v42 = vld [vmem:[%s1794_s15 + $0x30] ss:$20 sps:$4 sm:$0xff]  }
  0x1b   : > { %823 = vmatprep.mubr.bf16.mxu1 %v1516_v35  ;;  %v1519_v38 = vld [vmem:[%s1794_s15 + $0x2c] ss:$20 sps:$4 sm:$0xff]   ;;  %v1523_v40 = vld [vmem:[%s1794_s15 + $0x28] ss:$20 sps:$4 sm:$0xff]   ;;  %v1525_v41 = vld [vmem:[%s1923_s1 + $0x110] sm:$0xff]  }
  0x1c   : > { %1312 = vmatpush3.bf16.msra.mxu0 %v1493_v14  ;;  %v1527_v43 = vld [vmem:[%s1794_s15 + $0x54] ss:$20 sps:$4 sm:$0xff]   ;;  %v1526_v44 = vld [vmem:[%s1923_s1 + $0x118] sm:$0xff]   ;;  %v1531_v47 = vld [vmem:[%s1794_s15 + $0x50] ss:$20 sps:$4 sm:$0xff]  }
  0x1d   : > { %1352 = vmatpush3.bf16.msra.mxu1 %v1494_v15  ;;  %1313 = vmatprep.subr.bf16.mxu0 %v1495_v16  ;;  %v1529_v45 = vld [vmem:[%s1794_s15 + $0x5c] ss:$20 sps:$4 sm:$0xff]   ;;  %v1532_v48 = vld [vmem:[%s1794_s15 + $0x58] ss:$20 sps:$4 sm:$0xff]   ;;  %v1540_v54 = vld [vmem:[%s1794_s15 + $0x80] ss:$20 sps:$4 sm:$0xff]  }
  0x1e   : > { %1353 = vmatprep.subr.bf16.mxu1 %v1496_v17  ;;  %v1535_v49 = vld [vmem:[%s1794_s15 + $0x7c] ss:$20 sps:$4 sm:$0xff]   ;;  %v1537_v50 = vld [vmem:[%s1794_s15 + $0x84] ss:$20 sps:$4 sm:$0xff]   ;;  %v1544_v56 = vld [vmem:[%s1794_s15 + $0x60] ss:$20 sps:$4 sm:$0xff]  }
  0x1f   : > { %v1541_v52 = vld [vmem:[%s1923_s1 + $0x130] sm:$0xff]   ;;  %v1539_v53 = vld [vmem:[%s1794_s15 + $0x78] ss:$20 sps:$4 sm:$0xff]   ;;  %v1546_v59 = vld [vmem:[%s1794_s15 + $0x88] ss:$20 sps:$4 sm:$0xff]  }
  0x20   : > { %1314 = vmatpush3.bf16.msra.mxu0 %v1497_v18  ;;  %v1543_v55 = vld [vmem:[%s1794_s15 + $0x10] ss:$20 sps:$4 sm:$0xff]   ;;  %v1542_v57 = vld [vmem:[%s1923_s1 + $0x138] sm:$0xff]   ;;  %v1158_v62 = vld [vmem:[%s1924_s2] ss:$0 sm:$0xff] }
  0x21   : > { %1354 = vmatpush3.bf16.msra.mxu1 %v1498_v19  ;;  %1315 = vmatprep.subr.bf16.mxu0 %v1499_v20  ;;  %v1545_v58 = vld [vmem:[%s1794_s15 + $0x38] ss:$20 sps:$4 sm:$0xff]   ;;  %s246_s15 = sand.u32 1, %s1601_s22  }
  0x22   : > { %1355 = vmatprep.subr.bf16.mxu1 %v1500_v21  ;;  %s1153_s13 = sshll.u32 %s246_s15, 5  ;;  %s1879_s11 = scalar_lea.sflag [#allocation3], %s246_s15 }
  0x23   : > { %s248_s19 = scalar_lea.vmem [#allocation2], %s1153_s13  ;;  %s1611_s13 = smov [#allocation2]  }
  0x24   : > { %1316 = vmatpush3.bf16.msra.mxu0 %v1501_v22  ;;  %s1058_s20 = sshll.u32 %s248_s19, 4  ;;  %s1551_s14 = sshll.u32 %s1611_s13, 4  ;;  %s1868_s20 = int_to_ptr.vmem [resolvable:$true] %s1058_s20  ;;  %s1552_s14 = int_to_ptr.vmem [resolvable:$false] %s1551_s14 }
  0x25   : > { %1356 = vmatpush3.bf16.msra.mxu1 %v1502_v23  ;;  %1317 = vmatprep.subr.bf16.mxu0 %v1503_v24  ;;  %s1547_s12 = scalar_lea.vmem %s1868_s20, 512  ;;  %s1553_s16 = scalar_lea.vmem %s1552_s14, 1024 }
  0x26   : > { %1357 = vmatprep.subr.bf16.mxu1 %v1504_v25  ;;  %p1548_p11 = scmp.ne.s32.totalorder %s1868_s20, %s1547_s12  ;;  %p1554_p0 = scmp.lt.s32.totalorder %s1868_s20, %s1552_s14 }
  0x27   : > { %p1555_p1 = scmp.lt.s32.totalorder %s1553_s16, %s1547_s12 }
  0x28   : > { %1318 = vmatpush3.bf16.msra.mxu0 %v1505_v26  ;;  %p1549_p12 = pnand %p1548_p11, %p1687_p5 }
  0x29   : > { %1358 = vmatpush3.bf16.msra.mxu1 %v1506_v27  ;;  %1319 = vmatprep.subr.bf16.mxu0 %v1507_v28  ;;  %p1556_p2 = por %p1555_p1, %p1554_p0 }
  0x2a   : > { %1359 = vmatprep.subr.bf16.mxu1 %v1508_v29  ;;  %p1550_p13 = pneg %p1549_p12 }
  0x2c   : > { %1320 = vmatpush3.bf16.msra.mxu0 %v1509_v30  ;;  %p1557_p3 = pnand %p1556_p2, %p1550_p13 }
  0x2d   : > { %1360 = vmatpush3.bf16.msra.mxu1 %v1510_v31  ;;  %1397 = vmatprep.subr.bf16.mxu0 %v1517_v36 }
  0x2e   : > { %1421 = vmatprep.subr.bf16.mxu1 %v1517_v36 }
  0x2f   : > { %759 = vmatmul.mubr.bf16.vlgmr.msra.gmra.mrb[0].mxu0 %v1511_v32 }
  0x30   : > { %824 = vmatmul.mubr.bf16.vlgmr.msra.gmra.mrb[0].mxu1 %v1514_v34  ;;  %1398 = vmatpush3.bf16.msra.mxu0 %v1517_v36 }
  0x31   : > { %1429 = vmatpush3.bf16.msra.mxu1 %v1517_v36  ;;  %1399 = vmatprep.subr.bf16.mxu0 %v1518_v37 }
  0x32   : > { %1422 = vmatprep.subr.bf16.mxu1 %v1518_v37  ;;  %766 = vmatprep.mubr.bf16.mxu0 %v1519_v38 }
  0x33   : > { %831 = vmatprep.mubr.bf16.mxu1 %v1521_v39 }
  0x34   : > { %1400 = vmatpush3.bf16.msra.mxu0 %v1518_v37 }
  0x35   : > { %1430 = vmatpush3.bf16.msra.mxu1 %v1518_v37  ;;  %1401 = vmatprep.subr.bf16.mxu0 %v1525_v41 }
  0x36   : > { %1423 = vmatprep.subr.bf16.mxu1 %v1525_v41 }
  0x37   : > { %767 = vmatmul.mubr.bf16.gmra.mrb[4].mxu0 %v1523_v40 }
  0x38   : > { %832 = vmatmul.mubr.bf16.gmra.mrb[4].mxu1 %v1524_v42  ;;  %774 = vmatprep.mubr.bf16.mxu0 %v1527_v43 }
  0x39   : > { %1402 = vmatpush3.bf16.msra.mxu0 %v1525_v41  ;;  %839 = vmatprep.mubr.bf16.mxu1 %v1529_v45 }
  0x3a   : > { %1431 = vmatpush3.bf16.msra.mxu1 %v1525_v41  ;;  %1403 = vmatprep.subr.bf16.mxu0 %v1526_v44 }
  0x3b   : > { %1424 = vmatprep.subr.bf16.mxu1 %v1526_v44 }
  0x3d   : > { %1404 = vmatpush3.bf16.msra.mxu0 %v1526_v44 }
  0x3e   : > { %1432 = vmatpush3.bf16.msra.mxu1 %v1526_v44  ;;  %1405 = vmatprep.subr.bf16.mxu0 %v1533_v46 }
  0x3f   : > { %775 = vmatmul.mubr.bf16.gmra.mrb[8].mxu0 %v1531_v47  ;;  %1425 = vmatprep.subr.bf16.mxu1 %v1533_v46 }
  0x40   : > { %840 = vmatmul.mubr.bf16.gmra.mrb[8].mxu1 %v1532_v48  ;;  %782 = vmatprep.mubr.bf16.mxu0 %v1535_v49 }
  0x41   : > { %1406 = vmatpush3.bf16.msra.mxu0 %v1533_v46  ;;  %847 = vmatprep.mubr.bf16.mxu1 %v1537_v50 }
  0x42   : > { %1433 = vmatpush3.bf16.msra.mxu1 %v1533_v46  ;;  %1407 = vmatprep.subr.bf16.mxu0 %v1534_v51 }
  0x43   : > { %1426 = vmatprep.subr.bf16.mxu1 %v1534_v51 }
  0x45   : > { %1408 = vmatpush3.bf16.msra.mxu0 %v1534_v51 }
  0x46   : > { %1434 = vmatpush3.bf16.msra.mxu1 %v1534_v51  ;;  %1409 = vmatprep.subr.bf16.mxu0 %v1541_v52 }
  0x47   : > { %783 = vmatmul.mubr.bf16.gmra.mrb[12].mxu0 %v1539_v53  ;;  %1427 = vmatprep.subr.bf16.mxu1 %v1541_v52 }
  0x48   : > { %848 = vmatmul.mubr.bf16.gmra.mrb[12].mxu1 %v1540_v54  ;;  %1413 = vmatprep.mubr.bf16.mxu0 %v1543_v55 }
  0x49   : > { %1410 = vmatpush3.bf16.msra.mxu0 %v1541_v52  ;;  %1417 = vmatprep.mubr.bf16.mxu1 %v1544_v56 }
  0x4a   : > { %1435 = vmatpush3.bf16.msra.mxu1 %v1541_v52  ;;  %1411 = vmatprep.subr.bf16.mxu0 %v1542_v57 }
  0x4b   : > { %1428 = vmatprep.subr.bf16.mxu1 %v1542_v57 }
  0x4d   : > { %1412 = vmatpush3.bf16.msra.mxu0 %v1542_v57 }
  0x4e   : > { %1436 = vmatpush3.bf16.msra.mxu1 %v1542_v57 }
  0x50   : > { %1414 = vmatmul.mubr.bf16.vlgmr.msra.gmra.mrb[16].mxu0 %v1545_v58 }
  0x51   : > { %1418 = vmatmul.mubr.bf16.vlgmr.msra.gmra.mrb[16].mxu1 %v1546_v59 }
 0x102   : > { %v1321_v60 = vpop.f32.mrb[0].mxu0 }
 0x103   : > { %v1361_v61 = vpop.f32.mrb[0].mxu1  ;;  %v1322_v63 = vpop.f32.mrb[1].mxu0 }
 0x104   : > { %v1323_v0 = vadd.f32 %v1322_v63, %v1321_v60  ;;  %v1362_v1 = vpop.f32.mrb[1].mxu1  ;;  %v1324_v2 = vpop.f32.mrb[2].mxu0  ;;  %v1227_v63 = vld [vmem:[%s1925_s3] ss:$0 sm:$0xff] }
 0x105   : > { %v1363_v3 = vadd.f32 %v1362_v1, %v1361_v61  ;;  %v1364_v4 = vpop.f32.mrb[2].mxu1  ;;  %v1325_v5 = vpop.f32.mrb[3].mxu0 }
 0x106   : > { %v761_v6 = vadd.f32 %v1323_v0, %v1158_v62  ;;  %v1326_v7 = vadd.f32 %v1325_v5, %v1324_v2  ;;  %v1365_v8 = vpop.f32.mrb[3].mxu1 }
 0x107   : > { %v1366_v9 = vadd.f32 %v1365_v8, %v1364_v4 }
 0x108   : > { %v764_v10 = vadd.f32 %v1326_v7, %v1158_v62  ;;  %v826_v11 = vadd.f32 %v1363_v3, %v761_v6  ;;  %v1228_v3 = vld [vmem:[%s1926_s4] ss:$0 sm:$0xff] }
 0x10a   : > { %v1327_v12 = vpop.f32.mrb[4].mxu0  ;;  %v1849_v13 = vadd.f32 %v1366_v9, %v764_v10 }
 0x10b   : > { %v1367_v14 = vpop.f32.mrb[4].mxu1  ;;  %v1328_v15 = vpop.f32.mrb[5].mxu0 }
 0x10c   : > { %v1329_v16 = vadd.f32 %v1328_v15, %v1327_v12  ;;  %v1368_v17 = vpop.f32.mrb[5].mxu1  ;;  %v1330_v18 = vpop.f32.mrb[6].mxu0 }
 0x10d   : > { %v1369_v19 = vadd.f32 %v1368_v17, %v1367_v14  ;;  %v1370_v20 = vpop.f32.mrb[6].mxu1  ;;  %v1331_v21 = vpop.f32.mrb[7].mxu0 }
 0x10e   : > { %v769_v22 = vadd.f32 %v1329_v16, %v1158_v62  ;;  %v1332_v23 = vadd.f32 %v1331_v21, %v1330_v18  ;;  %v1371_v24 = vpop.f32.mrb[7].mxu1 }
 0x10f   : > { %v1372_v25 = vadd.f32 %v1371_v24, %v1370_v20 }
 0x110   : > { %v772_v26 = vadd.f32 %v1332_v23, %v1158_v62  ;;  %v834_v27 = vadd.f32 %v1369_v19, %v769_v22 }
 0x112   : > { %v1333_v28 = vpop.f32.mrb[8].mxu0  ;;  %v837_v29 = vadd.f32 %v1372_v25, %v772_v26 }
 0x113   : > { %v1373_v30 = vpop.f32.mrb[8].mxu1  ;;  %v1334_v31 = vpop.f32.mrb[9].mxu0 }
 0x114   : > { %v1335_v32 = vadd.f32 %v1334_v31, %v1333_v28  ;;  %v1374_v33 = vpop.f32.mrb[9].mxu1  ;;  %v1336_v34 = vpop.f32.mrb[10].mxu0 }
 0x115   : > { %v1375_v35 = vadd.f32 %v1374_v33, %v1373_v30  ;;  %v1376_v36 = vpop.f32.mrb[10].mxu1  ;;  %v1337_v37 = vpop.f32.mrb[11].mxu0 }
 0x116   : > { %v777_v38 = vadd.f32 %v1335_v32, %v1158_v62  ;;  %v1338_v39 = vadd.f32 %v1337_v37, %v1336_v34  ;;  %v1377_v40 = vpop.f32.mrb[11].mxu1 }
 0x117   : > { %v1378_v41 = vadd.f32 %v1377_v40, %v1376_v36 }
 0x118   : > { %v780_v42 = vadd.f32 %v1338_v39, %v1158_v62  ;;  %v842_v43 = vadd.f32 %v1375_v35, %v777_v38 }
 0x11a   : > { %v1339_v44 = vpop.f32.mrb[12].mxu0  ;;  %v845_v45 = vadd.f32 %v1378_v41, %v780_v42 }
 0x11b   : > { %v1379_v46 = vpop.f32.mrb[12].mxu1  ;;  %v1340_v47 = vpop.f32.mrb[13].mxu0 }
 0x11c   : > { %v1341_v48 = vadd.f32 %v1340_v47, %v1339_v44  ;;  %v1380_v49 = vpop.f32.mrb[13].mxu1  ;;  %v1342_v50 = vpop.f32.mrb[14].mxu0 }
 0x11d   : > { %v1381_v51 = vadd.f32 %v1380_v49, %v1379_v46  ;;  %v1382_v52 = vpop.f32.mrb[14].mxu1  ;;  %v1343_v53 = vpop.f32.mrb[15].mxu0 }
 0x11e   : > { %v785_v54 = vadd.f32 %v1341_v48, %v1158_v62  ;;  %v1344_v55 = vadd.f32 %v1343_v53, %v1342_v50  ;;  %v1383_v56 = vpop.f32.mrb[15].mxu1 }
 0x11f   : > { %v1384_v57 = vadd.f32 %v1383_v56, %v1382_v52 }
 0x120   : > { %v788_v58 = vadd.f32 %v1344_v55, %v1158_v62  ;;  %v850_v59 = vadd.f32 %v1381_v51, %v785_v54 }
 0x122   : > { %v853_v60 = vadd.f32 %v1384_v57, %v788_v58 }
 0x123   : > { %v1415_v61 = vpop.f32.mrb[16].mxu0 }
 0x124   : > { %v899_v0 = vadd.f32 %v1415_v61, %v834_v27  ;;  %v1419_v1 = vpop.f32.mrb[16].mxu1  ;;  %v890_v2 = vpop.f32.mrb[17].mxu0 }
 0x125   : > { %v915_v4 = vadd.f32 %v1419_v1, %v850_v59  ;;  %v891_v5 = vadd.f32 %v890_v2, %v826_v11  ;;  %v906_v62 = vpop.f32.mrb[17].mxu1  ;;  %v1416_v6 = vpop.f32.mrb[18].mxu0 }
 0x126   : > { %v970_v7 = vmul.f32 %v1227_v63, %v899_v0  ;;  %v907_v8 = vadd.f32 %v906_v62, %v842_v43  ;;  %v902_v9 = vadd.f32 %v1416_v6, %v837_v29  ;;  %v1420_v10 = vpop.f32.mrb[18].mxu1  ;;  %v893_v12 = vpop.f32.mrb[19].mxu0 }
 0x127   : > { %v974_v14 = vmul.f32 %v1227_v63, %v915_v4  ;;  %v968_v15 = vmul.f32 %v1227_v63, %v891_v5  ;;  %v918_v16 = vadd.f32 %v1420_v10, %v853_v60  ;;  %v894_v17 = vadd.f32 %v893_v12, %v1849_v13  ;;  %v909_v18 = vpop.f32.mrb[19].mxu1 }
 0x128   : > { %v985_v19 = vadd.f32 %v1228_v3, %v970_v7  ;;  %v1267_v20 = vpack.c.bf16 %v902_v9, %v899_v0  ;;  %v971_v21 = vmul.f32 %v1227_v63, %v902_v9  ;;  %v972_v24 = vmul.f32 %v1227_v63, %v907_v8 }
 0x129   : > { %v989_v22 = vadd.f32 %v1228_v3, %v974_v14  ;;  %v1277_v11 = vpack.c.bf16 %v918_v16, %v915_v4  ;;  %v975_v23 = vmul.f32 %v1227_v63, %v918_v16  ;;  %v1262_v26 = vpack.c.bf16 %v894_v17, %v891_v5 }
 0x12a   : > { %1299 = vst [vmem:[%s248_s19 + $0x8] sm:$0xff] %v1267_v20   ;;  %v986_v25 = vadd.f32 %v1228_v3, %v971_v21  ;;  %v983_v27 = vadd.f32 %v1228_v3, %v968_v15  ;;  %v969_v29 = vmul.f32 %v1227_v63, %v894_v17  ;;  %v993_v13 = vmax.f32 %v985_v19, 0.0 }
 0x12b   : > { %1301 = vst [vmem:[%s248_s19 + $0x18] sm:$0xff] %v1277_v11   ;;  %v990_v28 = vadd.f32 %v1228_v3, %v975_v23  ;;  %1263 = vst [vmem:[%s248_s19] sm:$0xff] %v1262_v26   ;;  %v910_v31 = vadd.f32 %v909_v18, %v845_v45  ;;  %v997_v32 = vmax.f32 %v989_v22, 0.0  ;;  %v987_v35 = vadd.f32 %v1228_v3, %v972_v24 }
 0x12c   : > { %v994_v30 = vmax.f32 %v986_v25, 0.0  ;;  %v984_v34 = vadd.f32 %v1228_v3, %v969_v29  ;;  %v991_v39 = vmax.f32 %v983_v27, 0.0 }
 0x12d   : > { %v998_v33 = vmax.f32 %v990_v28, 0.0  ;;  %v1272_v37 = vpack.c.bf16 %v910_v31, %v907_v8  ;;  %v973_v38 = vmul.f32 %v1227_v63, %v910_v31 }
 0x12e   : > { %v1287_v36 = vpack.c.bf16 %v994_v30, %v993_v13  ;;  %v992_v41 = vmax.f32 %v984_v34, 0.0 }
 0x12f   : > { %v1297_v40 = vpack.c.bf16 %v998_v33, %v997_v32  ;;  %1300 = vst [vmem:[%s248_s19 + $0x10] sm:$0xff] %v1272_v37   ;;  %v988_v42 = vadd.f32 %v1228_v3, %v973_v38 }
 0x130   : > { %1302 = vst [vmem:[%s1866_s29 + $0x8] sm:$0xff] %v1287_v36   ;;  %v1282_v43 = vpack.c.bf16 %v992_v41, %v991_v39 }
 0x131   : > { %1304 = vst [vmem:[%s1866_s29 + $0x18] sm:$0xff] %v1297_v40  }
 0x132   : > { %1560 = shalt.err (!%p1557_p3)
}
 0x133   : > { %s1561_s15 = scalar_lea.hbm %s1873_s10, 512  ;;  %s1565_s18 = scalar_lea.hbm %s1927_s5, 1024 }
 0x134   : > { %p1562_p4 = scmp.ne.s32.totalorder %s1873_s10, %s1561_s15  ;;  %p1566_p9 = scmp.lt.u32.totalorder %s1873_s10, %s1927_s5 }
 0x135   : > { %p1567_p10 = scmp.lt.u32.totalorder %s1565_s18, %s1561_s15  ;;  %p1569_p12 = scmp.lt.u32.totalorder %s1561_s15, %s1873_s10 }
 0x136   : > { %p1563_p7 = pnand %p1562_p4, %p1687_p5 }
 0x137   : > { %p1568_p11 = por %p1567_p10, %p1566_p9 }
 0x138   : > { %p1564_p8 = pneg %p1563_p7 }
 0x139   : > { %p1570_p13 = por %p1569_p12, %p1568_p11 }
 0x13b   : > { %p1571_p0 = pnand %p1570_p13, %p1564_p8 }
 0x13d   : > { %1574 = shalt.err (!%p1571_p0)
}
 0x13e   : > { %s1612_s25 = smov 64   ;;  %s1613_s9 = smov 4   ;;  %v995_v44 = vmax.f32 %v987_v35, 0.0  ;;  %v996_v45 = vmax.f32 %v988_v42, 0.0  ;;  %1283 = vst [vmem:[%s1866_s29] sm:$0xff] %v1282_v43  }
 0x13f   : > { %1438 = dma.vmem_to_hbm [thread:$0]  (%p1687_p5), %s1868_s20, 512, %s1873_s10, %s1879_s11, %s1612_s25, %s1612_s25, %s1613_s9  }
 0x140   : > { %v1292_v46 = vpack.c.bf16 %v996_v45, %v995_v44 }
 0x142   : > { %1303 = vst [vmem:[%s1866_s29 + $0x10] sm:$0xff] %v1292_v46  }
 0x143 PF: > { %p1444_p1 = scmp.ge.s32.totalorder %s1609_s24, 2  ;;  %s1077_s12 = sand.u32 1, %s1597_s21  }
 0x144   : > { %s1078_s13 = scalar_lea.sflag [#allocation3], %s1077_s12 }
 0x145   : > { %p1441_p2 = pnand %p1444_p1, %p1691_p6 }
 0x147   : > { %1592 = dma.done.wait (!%p1441_p2), %s1078_s13, 512  }
 0x148   : > { %1594 = vsyncadd (!%p1441_p2), %s1078_s13, 4294966784  ;;  %p17_p5 = scmp.ge.s32.totalorder %s1674_s27, 4   ;;  %s1931_s21 = smov %s1601_s22 }
 0x149   : > { %s1932_s22 = smov %s1605_s23  ;;  %s1933_s23 = smov %s1685_s30 }
 0x14a   : > { %s1934_s24 = smov %s1674_s27  ;;  %19 = sbr.rel (!%p17_p5) target bundleno = 3 (0x3), region = 87 }
 0x151   :  { %1091 = vsyncpa [#allocation3], 1 }
 0x152   :  { %1093 = vsyncpa [#allocation3 + $0x1], 1 }

</bundles_post_ra>
